<compile_context>
chip_gen: v7x
topology: tpu7x:2x2x1
jax: 0.10.0
libtpu: 0.0.40
codegen_flags: <defaults>
</compile_context>

<pallas_src>
import jax
import jax.numpy as jnp
from jax import lax
from jax.experimental import pallas as pl
from jax.experimental.pallas import tpu as pltpu

LEAKY_SLOPE = 0.01                       # nn.LeakyReLU() default negative_slope
BN_EPS = 1e-5                            # nn.BatchNorm2d default eps
_CHANNELS = [(1, 8), (8, 8), (8, 16), (16, 16)]   # conv_block (in, out) channels
_IMG = 32                                # spatial size implied by fc in-features 16*2*2
_MAX_K = 9 * 16                          # padded rows of packed conv-weight operand
_MAX_C = 16                              # padded cols of packed conv-weight / gamma-beta


# --------------------------------------------------------------------------- #
# Fused Pallas kernel: conv1..conv4 (+BN+LeakyReLU) + FC + tanh
# --------------------------------------------------------------------------- #
def _encoder_kernel(p1_ref, w_ref, gb_ref, wfc_ref, bfc_ref, o_ref):
    batch = o_ref.shape[0]
    w_all = w_ref[...]                   # (4, 144, 16) packed im2col conv weights
    gb_all = gb_ref[...]                 # (4, 2, 16)   packed (gamma, beta)

    def bn_lrelu(y, layer, cout):
        """Training-mode BatchNorm (biased var, single-pass stats) + LeakyReLU."""
        m = y.shape[0]
        s1 = jnp.sum(y, axis=0, keepdims=True)
        s2 = jnp.sum(y * y, axis=0, keepdims=True)
        mean = s1 * (1.0 / m)
        var = jnp.maximum(s2 * (1.0 / m) - mean * mean, 0.0)
        gamma = gb_all[layer, 0:1, :cout]
        beta = gb_all[layer, 1:2, :cout]
        yb = (y - mean) * (lax.rsqrt(var + BN_EPS) * gamma) + beta
        return jnp.where(yb > 0, yb, LEAKY_SLOPE * yb)

    def conv3x3_s2(x, layer, cin, cout):
        """3x3/stride-2/pad-1 conv as 9 accumulated matmuls over parity phases."""
        b, h, w, _ = x.shape
        ho, wo = h // 2, w // 2
        x6 = x.reshape(b, ho, 2, wo, 2, cin)
        # phase[p][q][b, i, j, c] = x[b, 2i+p, 2j+q, c]
        phase = {(0, 0): x6[:, :, 0, :, 0, :],
                 (0, 1): x6[:, :, 0, :, 1, :],
                 (1, 0): x6[:, :, 1, :, 0, :],
                 (1, 1): x6[:, :, 1, :, 1, :]}
        wl = w_all[layer, :9 * cin, :cout]
        acc = jnp.zeros((b * ho * wo, cout), jnp.float32)
        for ky in range(3):
            for kx in range(3):
                # padded input row 2*ho+ky  <=>  unpadded row 2*ho+ky-1
                t = phase[(0 if ky == 1 else 1, 0 if kx == 1 else 1)]
                if ky == 0:   # needs phase row index ho-1: shift down, zero row on top
                    t = jnp.concatenate(
                        [jnp.zeros_like(t[:, :1]), t[:, :-1]], axis=1)
                if kx == 0:   # needs phase col index wo-1: shift right, zero col at left
                    t = jnp.concatenate(
                        [jnp.zeros_like(t[:, :, :1]), t[:, :, :-1]], axis=2)
                wt = wl[(ky * 3 + kx) * cin:(ky * 3 + kx + 1) * cin, :]
                acc = acc + jnp.dot(t.reshape(b * ho * wo, cin), wt,
                                    preferred_element_type=jnp.float32)
        return acc

    # ---- layer 1: patches built outside (they come straight from the HBM input)
    y = jnp.dot(p1_ref[...], w_all[0, :9, :8], preferred_element_type=jnp.float32)
    x = bn_lrelu(y, 0, 8).reshape(batch, 16, 16, 8)
    # ---- layers 2..4: fully resident in VMEM / vregs
    x = bn_lrelu(conv3x3_s2(x, 1, 8, 8), 1, 8).reshape(batch, 8, 8, 8)
    x = bn_lrelu(conv3x3_s2(x, 2, 8, 16), 2, 16).reshape(batch, 4, 4, 16)
    y4 = bn_lrelu(conv3x3_s2(x, 3, 16, 16), 3, 16)           # (batch*4, 16)
    # ---- FC + tanh.  The NCHW flatten ('b c w h -> b (c w h)') is folded into a
    #      host-side permutation of the FC weight: contract over (s = h*2+w, c).
    y4 = y4.reshape(batch, 4, 16)
    wfc = wfc_ref[...]                                       # (4, 16, latent)
    latent = wfc.shape[2]
    acc = jnp.zeros((batch, latent), jnp.float32)
    for s in range(4):
        acc = acc + jnp.dot(y4[:, s, :], wfc[s],
                            preferred_element_type=jnp.float32)
    o_ref[...] = jnp.tanh(acc + bfc_ref[...])


# --------------------------------------------------------------------------- #
# Wrapper (XLA glue: first-layer im2col + single pallas_call)
# --------------------------------------------------------------------------- #
def _im2col_first(x_nchw):
    """First-layer im2col on the raw (B,1,32,32) input -> (B*16*16, 9)."""
    b = x_nchw.shape[0]
    x = x_nchw.reshape(b, _IMG, _IMG).astype(jnp.float32)    # C == 1
    xp = jnp.pad(x, ((0, 0), (1, 1), (1, 1)))
    ho = _IMG // 2
    cols = [xp[:, ky:ky + 2 * ho - 1:2, kx:kx + 2 * ho - 1:2]
            for ky in range(3) for kx in range(3)]
    return jnp.stack(cols, axis=-1).reshape(b * ho * ho, 9)


def encoder_forward(packed, x_nchw):
    """Forward pass equivalent to Encoder.forward.  x_nchw: (B, 1, 32, 32)."""
    b = x_nchw.shape[0]
    latent = packed["bfc"].shape[1]
    patches1 = _im2col_first(x_nchw)
    return pl.pallas_call(
        _encoder_kernel,
        out_shape=jax.ShapeDtypeStruct((b, latent), jnp.float32),
        grid=(1,),
        in_specs=[
            pl.BlockSpec(patches1.shape, lambda i: (0, 0)),
            pl.BlockSpec(packed["w"].shape, lambda i: (0, 0, 0)),
            pl.BlockSpec(packed["gb"].shape, lambda i: (0, 0, 0)),
            pl.BlockSpec(packed["wfc"].shape, lambda i: (0, 0, 0)),
            pl.BlockSpec(packed["bfc"].shape, lambda i: (0, 0)),
        ],
        out_specs=pl.BlockSpec((b, latent), lambda i: (0, 0)),
        compiler_params=pltpu.CompilerParams(
            dimension_semantics=("arbitrary",)),
    )(patches1, packed["w"], packed["gb"], packed["wfc"], packed["bfc"])


# --------------------------------------------------------------------------- #
# Parameter setup (conv bias omitted: exactly cancelled by train-mode BN mean)
# --------------------------------------------------------------------------- #
def _pack_params(raw, latent_width):
    w_all = jnp.zeros((4, _MAX_K, _MAX_C), jnp.float32)
    gb_all = jnp.zeros((4, 2, _MAX_C), jnp.float32)
    for l, ((cin, cout), layer) in enumerate(zip(_CHANNELS, raw["conv"])):
        w_mat = layer["w"].reshape(9 * cin, cout)            # rows ordered (ky, kx, ci)
        w_all = w_all.at[l, :9 * cin, :cout].set(w_mat)
        gb_all = gb_all.at[l, 0, :cout].set(layer["gamma"])
        gb_all = gb_all.at[l, 1, :cout].set(layer["beta"])
    # Fold NCHW flatten into FC weight: flat index k = c*4 + s, s = h*2 + w.
    wfc = raw["fc"]["w"].reshape(16, 4, latent_width).transpose(1, 0, 2)  # (s, c, L)
    bfc = raw["fc"]["b"].reshape(1, latent_width)
    return {"w": w_all, "gb": gb_all, "wfc": wfc, "bfc": bfc}


def init_encoder_params(key, latent_width=64):
    """Deterministic synthetic parameters matching the module's shapes."""
    keys = jax.random.split(key, 4 * 3 + 2)
    raw = {"conv": [], "fc": None}
    ki = 0
    for cin, cout in _CHANNELS:
        bound = (cin * 9) ** -0.5
        w = jax.random.uniform(keys[ki], (3, 3, cin, cout), jnp.float32,
                               -bound, bound)                # (ky, kx, ci, co)
        gamma = jax.random.uniform(keys[ki + 1], (cout,), jnp.float32, 0.5, 1.5)
        beta = jax.random.uniform(keys[ki + 2], (cout,), jnp.float32, -0.5, 0.5)
        ki += 3
        raw["conv"].append({"w": w, "gamma": gamma, "beta": beta})
    fan_in = 16 * 2 * 2
    bound = fan_in ** -0.5
    w_fc = jax.random.uniform(keys[ki], (fan_in, latent_width), jnp.float32,
                              -bound, bound)
    b_fc = jax.random.uniform(keys[ki + 1], (latent_width,), jnp.float32,
                              -bound, bound)
    raw["fc"] = {"w": w_fc, "b": b_fc}
    return {"raw": raw, "packed": _pack_params(raw, latent_width)}


# --------------------------------------------------------------------------- #
# Pure-XLA reference (same math as the PyTorch module in training mode)
# --------------------------------------------------------------------------- #
def encoder_reference(raw, x_nchw):
    x = jnp.transpose(x_nchw, (0, 2, 3, 1)).astype(jnp.float32)   # NCHW -> NHWC
    for layer in raw["conv"]:
        y = lax.conv_general_dilated(
            x, layer["w"], window_strides=(2, 2), padding=((1, 1), (1, 1)),
            dimension_numbers=("NHWC", "HWIO", "NHWC"),
            precision=lax.Precision.HIGHEST)
        mean = jnp.mean(y, axis=(0, 1, 2), keepdims=True)
        var = jnp.mean(jnp.square(y - mean), axis=(0, 1, 2), keepdims=True)
        y = (y - mean) * lax.rsqrt(var + BN_EPS) * layer["gamma"] + layer["beta"]
        x = jnp.where(y > 0, y, LEAKY_SLOPE * y)
    flat = jnp.transpose(x, (0, 3, 1, 2)).reshape(x.shape[0], -1)  # 'b c w h -> b (c w h)'
    return jnp.tanh(jnp.dot(flat, raw["fc"]["w"],
                            precision=lax.Precision.HIGHEST) + raw["fc"]["b"])


# --------------------------------------------------------------------------- #
if __name__ == "__main__":
    key = jax.random.PRNGKey(0)
    k_param, k_data = jax.random.split(key)

    batch = 2
    x = jax.random.normal(k_data, (batch, 1, _IMG, _IMG), jnp.float32)   # NCHW

    params = init_encoder_params(k_param, latent_width=64)
    fwd = jax.jit(encoder_forward)
    out = jax.block_until_ready(fwd(params["packed"], x))

    assert out.shape == (batch, 64), out.shape
    assert bool(jnp.all(jnp.isfinite(out)))
    ref = encoder_reference(params["raw"], x)
    max_err = float(jnp.max(jnp.abs(out - ref)))
    assert max_err < 2e-3, f"mismatch vs XLA reference: max abs err = {max_err}"
    print("KERNEL_OK")
</pallas_src>

<mosaic_0001>
module attributes {stable_mosaic.version = 11 : i64} {
  func.func @_encoder_kernel(%arg0: i32, %arg1: memref<512x9xf32, #tpu.memory_space<vmem>>, %arg2: memref<4x144x16xf32, #tpu.memory_space<vmem>>, %arg3: memref<4x2x16xf32, #tpu.memory_space<vmem>>, %arg4: memref<4x16x64xf32, #tpu.memory_space<vmem>>, %arg5: memref<1x64xf32, #tpu.memory_space<vmem>>, %arg6: memref<2x64xf32, #tpu.memory_space<vmem>>) attributes {dimension_semantics = [#tpu.dimension_semantics<arbitrary>], iteration_bounds = array<i64: 1>, scalar_prefetch = 0 : i64, scratch_operands = 0 : i64, tpu.core_type = #tpu.core_type<tc>, window_params = [{pipeline_mode = #tpu.pipeline_mode<synchronous>, transform_indices = @transform_0, window_bounds = array<i64: 512, 9>}, {pipeline_mode = #tpu.pipeline_mode<synchronous>, transform_indices = @transform_1, window_bounds = array<i64: 4, 144, 16>}, {pipeline_mode = #tpu.pipeline_mode<synchronous>, transform_indices = @transform_2, window_bounds = array<i64: 4, 2, 16>}, {pipeline_mode = #tpu.pipeline_mode<synchronous>, transform_indices = @transform_3, window_bounds = array<i64: 4, 16, 64>}, {pipeline_mode = #tpu.pipeline_mode<synchronous>, transform_indices = @transform_4, window_bounds = array<i64: 1, 64>}, {pipeline_mode = #tpu.pipeline_mode<synchronous>, transform_indices = @transform_5, window_bounds = array<i64: 2, 64>}]} {
    %c0 = arith.constant 0 : index
    %c0_0 = arith.constant 0 : index
    %c0_1 = arith.constant 0 : index
    %0 = vector.load %arg2[%c0, %c0_0, %c0_1] : memref<4x144x16xf32, #tpu.memory_space<vmem>>, vector<4x144x16xf32>
    %c0_2 = arith.constant 0 : index
    %c0_3 = arith.constant 0 : index
    %c0_4 = arith.constant 0 : index
    %1 = vector.load %arg3[%c0_2, %c0_3, %c0_4] : memref<4x2x16xf32, #tpu.memory_space<vmem>>, vector<4x2x16xf32>
    %c0_5 = arith.constant 0 : index
    %c0_6 = arith.constant 0 : index
    %2 = vector.load %arg1[%c0_5, %c0_6] : memref<512x9xf32, #tpu.memory_space<vmem>>, vector<512x9xf32>
    %3 = vector.extract_strided_slice %0 {offsets = [0, 0, 0], sizes = [1, 9, 8], strides = [1, 1, 1]} : vector<4x144x16xf32> to vector<1x9x8xf32>
    %4 = vector.shape_cast %3 : vector<1x9x8xf32> to vector<9x8xf32>
    %cst = arith.constant dense<0.000000e+00> : vector<512x8xf32>
    %5 = tpu.matmul %2, %4, %cst {dimension_numbers = #tpu.dot_dimension_numbers<[1], [0], [0], [1], [0, 0, 1, 1], [], []>} : vector<512x9xf32>, vector<9x8xf32>, vector<512x8xf32> -> vector<512x8xf32>
    %cst_7 = arith.constant dense<0.000000e+00> : vector<8xf32>
    %6 = vector.multi_reduction <add>, %5, %cst_7 [0] : vector<512x8xf32> to vector<8xf32>
    %7 = vector.shape_cast %6 : vector<8xf32> to vector<1x8xf32>
    %8 = arith.mulf %5, %5 : vector<512x8xf32>
    %cst_8 = arith.constant dense<0.000000e+00> : vector<8xf32>
    %9 = vector.multi_reduction <add>, %8, %cst_8 [0] : vector<512x8xf32> to vector<8xf32>
    %10 = vector.shape_cast %9 : vector<8xf32> to vector<1x8xf32>
    %cst_9 = arith.constant 0.001953125 : f32
    %11 = vector.broadcast %cst_9 : f32 to vector<1x8xf32>
    %12 = arith.mulf %7, %11 : vector<1x8xf32>
    %cst_10 = arith.constant 0.001953125 : f32
    %13 = vector.broadcast %cst_10 : f32 to vector<1x8xf32>
    %14 = arith.mulf %10, %13 : vector<1x8xf32>
    %15 = arith.mulf %12, %12 : vector<1x8xf32>
    %16 = arith.subf %14, %15 : vector<1x8xf32>
    %cst_11 = arith.constant 0.000000e+00 : f32
    %17 = vector.broadcast %cst_11 : f32 to vector<1x8xf32>
    %18 = arith.maximumf %16, %17 : vector<1x8xf32>
    %19 = vector.extract_strided_slice %1 {offsets = [0, 0, 0], sizes = [1, 1, 8], strides = [1, 1, 1]} : vector<4x2x16xf32> to vector<1x1x8xf32>
    %20 = vector.shape_cast %19 : vector<1x1x8xf32> to vector<1x8xf32>
    %21 = vector.extract_strided_slice %1 {offsets = [0, 1, 0], sizes = [1, 1, 8], strides = [1, 1, 1]} : vector<4x2x16xf32> to vector<1x1x8xf32>
    %22 = vector.shape_cast %21 : vector<1x1x8xf32> to vector<1x8xf32>
    %23 = vector.broadcast %12 : vector<1x8xf32> to vector<512x8xf32>
    %24 = arith.subf %5, %23 : vector<512x8xf32>
    %cst_12 = arith.constant 9.99999974E-6 : f32
    %25 = vector.broadcast %cst_12 : f32 to vector<1x8xf32>
    %26 = arith.addf %18, %25 : vector<1x8xf32>
    %27 = math.rsqrt %26 : vector<1x8xf32>
    %28 = arith.mulf %27, %20 : vector<1x8xf32>
    %29 = vector.broadcast %28 : vector<1x8xf32> to vector<512x8xf32>
    %30 = arith.mulf %24, %29 : vector<512x8xf32>
    %31 = vector.broadcast %22 : vector<1x8xf32> to vector<512x8xf32>
    %32 = arith.addf %30, %31 : vector<512x8xf32>
    %cst_13 = arith.constant 0.000000e+00 : f32
    %33 = vector.broadcast %cst_13 : f32 to vector<512x8xf32>
    %34 = arith.cmpf ogt, %32, %33 : vector<512x8xf32>
    %cst_14 = arith.constant 0.00999999977 : f32
    %35 = vector.broadcast %cst_14 : f32 to vector<512x8xf32>
    %36 = arith.mulf %35, %32 : vector<512x8xf32>
    %37 = arith.select %34, %32, %36 : vector<512x8xi1>, vector<512x8xf32>
    %38 = vector.shape_cast %37 : vector<512x8xf32> to vector<2x16x16x8xf32>
    %39 = vector.shape_cast %38 : vector<2x16x16x8xf32> to vector<2x8x2x8x2x8xf32>
    %40 = vector.extract_strided_slice %39 {offsets = [0, 0, 0, 0, 0, 0], sizes = [2, 8, 1, 8, 1, 8], strides = [1, 1, 1, 1, 1, 1]} : vector<2x8x2x8x2x8xf32> to vector<2x8x1x8x1x8xf32>
    %41 = vector.shape_cast %40 : vector<2x8x1x8x1x8xf32> to vector<2x8x8x8xf32>
    %42 = vector.extract_strided_slice %39 {offsets = [0, 0, 0, 0, 1, 0], sizes = [2, 8, 1, 8, 1, 8], strides = [1, 1, 1, 1, 1, 1]} : vector<2x8x2x8x2x8xf32> to vector<2x8x1x8x1x8xf32>
    %43 = vector.shape_cast %42 : vector<2x8x1x8x1x8xf32> to vector<2x8x8x8xf32>
    %44 = vector.extract_strided_slice %39 {offsets = [0, 0, 1, 0, 0, 0], sizes = [2, 8, 1, 8, 1, 8], strides = [1, 1, 1, 1, 1, 1]} : vector<2x8x2x8x2x8xf32> to vector<2x8x1x8x1x8xf32>
    %45 = vector.shape_cast %44 : vector<2x8x1x8x1x8xf32> to vector<2x8x8x8xf32>
    %46 = vector.extract_strided_slice %39 {offsets = [0, 0, 1, 0, 1, 0], sizes = [2, 8, 1, 8, 1, 8], strides = [1, 1, 1, 1, 1, 1]} : vector<2x8x2x8x2x8xf32> to vector<2x8x1x8x1x8xf32>
    %47 = vector.shape_cast %46 : vector<2x8x1x8x1x8xf32> to vector<2x8x8x8xf32>
    %48 = vector.extract_strided_slice %0 {offsets = [1, 0, 0], sizes = [1, 72, 8], strides = [1, 1, 1]} : vector<4x144x16xf32> to vector<1x72x8xf32>
    %49 = vector.shape_cast %48 : vector<1x72x8xf32> to vector<72x8xf32>
    %cst_15 = arith.constant 0.000000e+00 : f32
    %50 = vector.broadcast %cst_15 : f32 to vector<128x8xf32>
    %cst_16 = arith.constant 0.000000e+00 : f32
    %51 = vector.broadcast %cst_16 : f32 to vector<2x1x8x8xf32>
    %52 = vector.extract_strided_slice %47 {offsets = [0, 0, 0, 0], sizes = [2, 7, 8, 8], strides = [1, 1, 1, 1]} : vector<2x8x8x8xf32> to vector<2x7x8x8xf32>
    %53 = tpu.concatenate %51, %52 in 1 : vector<2x1x8x8xf32>, vector<2x7x8x8xf32> -> vector<2x8x8x8xf32>
    %cst_17 = arith.constant 0.000000e+00 : f32
    %54 = vector.broadcast %cst_17 : f32 to vector<2x8x1x8xf32>
    %55 = vector.extract_strided_slice %53 {offsets = [0, 0, 0, 0], sizes = [2, 8, 7, 8], strides = [1, 1, 1, 1]} : vector<2x8x8x8xf32> to vector<2x8x7x8xf32>
    %56 = tpu.concatenate %54, %55 in 2 : vector<2x8x1x8xf32>, vector<2x8x7x8xf32> -> vector<2x8x8x8xf32>
    %57 = vector.extract_strided_slice %49 {offsets = [0, 0], sizes = [8, 8], strides = [1, 1]} : vector<72x8xf32> to vector<8x8xf32>
    %58 = vector.shape_cast %56 : vector<2x8x8x8xf32> to vector<128x8xf32>
    %cst_18 = arith.constant dense<0.000000e+00> : vector<128x8xf32>
    %59 = tpu.matmul %58, %57, %cst_18 {dimension_numbers = #tpu.dot_dimension_numbers<[1], [0], [0], [1], [0, 0, 1, 1], [], []>} : vector<128x8xf32>, vector<8x8xf32>, vector<128x8xf32> -> vector<128x8xf32>
    %60 = arith.addf %50, %59 : vector<128x8xf32>
    %cst_19 = arith.constant 0.000000e+00 : f32
    %61 = vector.broadcast %cst_19 : f32 to vector<2x1x8x8xf32>
    %62 = vector.extract_strided_slice %45 {offsets = [0, 0, 0, 0], sizes = [2, 7, 8, 8], strides = [1, 1, 1, 1]} : vector<2x8x8x8xf32> to vector<2x7x8x8xf32>
    %63 = tpu.concatenate %61, %62 in 1 : vector<2x1x8x8xf32>, vector<2x7x8x8xf32> -> vector<2x8x8x8xf32>
    %64 = vector.extract_strided_slice %49 {offsets = [8, 0], sizes = [8, 8], strides = [1, 1]} : vector<72x8xf32> to vector<8x8xf32>
    %65 = vector.shape_cast %63 : vector<2x8x8x8xf32> to vector<128x8xf32>
    %cst_20 = arith.constant dense<0.000000e+00> : vector<128x8xf32>
    %66 = tpu.matmul %65, %64, %cst_20 {dimension_numbers = #tpu.dot_dimension_numbers<[1], [0], [0], [1], [0, 0, 1, 1], [], []>} : vector<128x8xf32>, vector<8x8xf32>, vector<128x8xf32> -> vector<128x8xf32>
    %67 = arith.addf %60, %66 : vector<128x8xf32>
    %cst_21 = arith.constant 0.000000e+00 : f32
    %68 = vector.broadcast %cst_21 : f32 to vector<2x1x8x8xf32>
    %69 = vector.extract_strided_slice %47 {offsets = [0, 0, 0, 0], sizes = [2, 7, 8, 8], strides = [1, 1, 1, 1]} : vector<2x8x8x8xf32> to vector<2x7x8x8xf32>
    %70 = tpu.concatenate %68, %69 in 1 : vector<2x1x8x8xf32>, vector<2x7x8x8xf32> -> vector<2x8x8x8xf32>
    %71 = vector.extract_strided_slice %49 {offsets = [16, 0], sizes = [8, 8], strides = [1, 1]} : vector<72x8xf32> to vector<8x8xf32>
    %72 = vector.shape_cast %70 : vector<2x8x8x8xf32> to vector<128x8xf32>
    %cst_22 = arith.constant dense<0.000000e+00> : vector<128x8xf32>
    %73 = tpu.matmul %72, %71, %cst_22 {dimension_numbers = #tpu.dot_dimension_numbers<[1], [0], [0], [1], [0, 0, 1, 1], [], []>} : vector<128x8xf32>, vector<8x8xf32>, vector<128x8xf32> -> vector<128x8xf32>
    %74 = arith.addf %67, %73 : vector<128x8xf32>
    %cst_23 = arith.constant 0.000000e+00 : f32
    %75 = vector.broadcast %cst_23 : f32 to vector<2x8x1x8xf32>
    %76 = vector.extract_strided_slice %43 {offsets = [0, 0, 0, 0], sizes = [2, 8, 7, 8], strides = [1, 1, 1, 1]} : vector<2x8x8x8xf32> to vector<2x8x7x8xf32>
    %77 = tpu.concatenate %75, %76 in 2 : vector<2x8x1x8xf32>, vector<2x8x7x8xf32> -> vector<2x8x8x8xf32>
    %78 = vector.extract_strided_slice %49 {offsets = [24, 0], sizes = [8, 8], strides = [1, 1]} : vector<72x8xf32> to vector<8x8xf32>
    %79 = vector.shape_cast %77 : vector<2x8x8x8xf32> to vector<128x8xf32>
    %cst_24 = arith.constant dense<0.000000e+00> : vector<128x8xf32>
    %80 = tpu.matmul %79, %78, %cst_24 {dimension_numbers = #tpu.dot_dimension_numbers<[1], [0], [0], [1], [0, 0, 1, 1], [], []>} : vector<128x8xf32>, vector<8x8xf32>, vector<128x8xf32> -> vector<128x8xf32>
    %81 = arith.addf %74, %80 : vector<128x8xf32>
    %82 = vector.extract_strided_slice %49 {offsets = [32, 0], sizes = [8, 8], strides = [1, 1]} : vector<72x8xf32> to vector<8x8xf32>
    %83 = vector.shape_cast %41 : vector<2x8x8x8xf32> to vector<128x8xf32>
    %cst_25 = arith.constant dense<0.000000e+00> : vector<128x8xf32>
    %84 = tpu.matmul %83, %82, %cst_25 {dimension_numbers = #tpu.dot_dimension_numbers<[1], [0], [0], [1], [0, 0, 1, 1], [], []>} : vector<128x8xf32>, vector<8x8xf32>, vector<128x8xf32> -> vector<128x8xf32>
    %85 = arith.addf %81, %84 : vector<128x8xf32>
    %86 = vector.extract_strided_slice %49 {offsets = [40, 0], sizes = [8, 8], strides = [1, 1]} : vector<72x8xf32> to vector<8x8xf32>
    %87 = vector.shape_cast %43 : vector<2x8x8x8xf32> to vector<128x8xf32>
    %cst_26 = arith.constant dense<0.000000e+00> : vector<128x8xf32>
    %88 = tpu.matmul %87, %86, %cst_26 {dimension_numbers = #tpu.dot_dimension_numbers<[1], [0], [0], [1], [0, 0, 1, 1], [], []>} : vector<128x8xf32>, vector<8x8xf32>, vector<128x8xf32> -> vector<128x8xf32>
    %89 = arith.addf %85, %88 : vector<128x8xf32>
    %cst_27 = arith.constant 0.000000e+00 : f32
    %90 = vector.broadcast %cst_27 : f32 to vector<2x8x1x8xf32>
    %91 = vector.extract_strided_slice %47 {offsets = [0, 0, 0, 0], sizes = [2, 8, 7, 8], strides = [1, 1, 1, 1]} : vector<2x8x8x8xf32> to vector<2x8x7x8xf32>
    %92 = tpu.concatenate %90, %91 in 2 : vector<2x8x1x8xf32>, vector<2x8x7x8xf32> -> vector<2x8x8x8xf32>
    %93 = vector.extract_strided_slice %49 {offsets = [48, 0], sizes = [8, 8], strides = [1, 1]} : vector<72x8xf32> to vector<8x8xf32>
    %94 = vector.shape_cast %92 : vector<2x8x8x8xf32> to vector<128x8xf32>
    %cst_28 = arith.constant dense<0.000000e+00> : vector<128x8xf32>
    %95 = tpu.matmul %94, %93, %cst_28 {dimension_numbers = #tpu.dot_dimension_numbers<[1], [0], [0], [1], [0, 0, 1, 1], [], []>} : vector<128x8xf32>, vector<8x8xf32>, vector<128x8xf32> -> vector<128x8xf32>
    %96 = arith.addf %89, %95 : vector<128x8xf32>
    %97 = vector.extract_strided_slice %49 {offsets = [56, 0], sizes = [8, 8], strides = [1, 1]} : vector<72x8xf32> to vector<8x8xf32>
    %98 = vector.shape_cast %45 : vector<2x8x8x8xf32> to vector<128x8xf32>
    %cst_29 = arith.constant dense<0.000000e+00> : vector<128x8xf32>
    %99 = tpu.matmul %98, %97, %cst_29 {dimension_numbers = #tpu.dot_dimension_numbers<[1], [0], [0], [1], [0, 0, 1, 1], [], []>} : vector<128x8xf32>, vector<8x8xf32>, vector<128x8xf32> -> vector<128x8xf32>
    %100 = arith.addf %96, %99 : vector<128x8xf32>
    %101 = vector.extract_strided_slice %49 {offsets = [64, 0], sizes = [8, 8], strides = [1, 1]} : vector<72x8xf32> to vector<8x8xf32>
    %102 = vector.shape_cast %47 : vector<2x8x8x8xf32> to vector<128x8xf32>
    %cst_30 = arith.constant dense<0.000000e+00> : vector<128x8xf32>
    %103 = tpu.matmul %102, %101, %cst_30 {dimension_numbers = #tpu.dot_dimension_numbers<[1], [0], [0], [1], [0, 0, 1, 1], [], []>} : vector<128x8xf32>, vector<8x8xf32>, vector<128x8xf32> -> vector<128x8xf32>
    %104 = arith.addf %100, %103 : vector<128x8xf32>
    %cst_31 = arith.constant dense<0.000000e+00> : vector<8xf32>
    %105 = vector.multi_reduction <add>, %104, %cst_31 [0] : vector<128x8xf32> to vector<8xf32>
    %106 = vector.shape_cast %105 : vector<8xf32> to vector<1x8xf32>
    %107 = arith.mulf %104, %104 : vector<128x8xf32>
    %cst_32 = arith.constant dense<0.000000e+00> : vector<8xf32>
    %108 = vector.multi_reduction <add>, %107, %cst_32 [0] : vector<128x8xf32> to vector<8xf32>
    %109 = vector.shape_cast %108 : vector<8xf32> to vector<1x8xf32>
    %cst_33 = arith.constant 7.812500e-03 : f32
    %110 = vector.broadcast %cst_33 : f32 to vector<1x8xf32>
    %111 = arith.mulf %106, %110 : vector<1x8xf32>
    %cst_34 = arith.constant 7.812500e-03 : f32
    %112 = vector.broadcast %cst_34 : f32 to vector<1x8xf32>
    %113 = arith.mulf %109, %112 : vector<1x8xf32>
    %114 = arith.mulf %111, %111 : vector<1x8xf32>
    %115 = arith.subf %113, %114 : vector<1x8xf32>
    %cst_35 = arith.constant 0.000000e+00 : f32
    %116 = vector.broadcast %cst_35 : f32 to vector<1x8xf32>
    %117 = arith.maximumf %115, %116 : vector<1x8xf32>
    %118 = vector.extract_strided_slice %1 {offsets = [1, 0, 0], sizes = [1, 1, 8], strides = [1, 1, 1]} : vector<4x2x16xf32> to vector<1x1x8xf32>
    %119 = vector.shape_cast %118 : vector<1x1x8xf32> to vector<1x8xf32>
    %120 = vector.extract_strided_slice %1 {offsets = [1, 1, 0], sizes = [1, 1, 8], strides = [1, 1, 1]} : vector<4x2x16xf32> to vector<1x1x8xf32>
    %121 = vector.shape_cast %120 : vector<1x1x8xf32> to vector<1x8xf32>
    %122 = vector.broadcast %111 : vector<1x8xf32> to vector<128x8xf32>
    %123 = arith.subf %104, %122 : vector<128x8xf32>
    %cst_36 = arith.constant 9.99999974E-6 : f32
    %124 = vector.broadcast %cst_36 : f32 to vector<1x8xf32>
    %125 = arith.addf %117, %124 : vector<1x8xf32>
    %126 = math.rsqrt %125 : vector<1x8xf32>
    %127 = arith.mulf %126, %119 : vector<1x8xf32>
    %128 = vector.broadcast %127 : vector<1x8xf32> to vector<128x8xf32>
    %129 = arith.mulf %123, %128 : vector<128x8xf32>
    %130 = vector.broadcast %121 : vector<1x8xf32> to vector<128x8xf32>
    %131 = arith.addf %129, %130 : vector<128x8xf32>
    %cst_37 = arith.constant 0.000000e+00 : f32
    %132 = vector.broadcast %cst_37 : f32 to vector<128x8xf32>
    %133 = arith.cmpf ogt, %131, %132 : vector<128x8xf32>
    %cst_38 = arith.constant 0.00999999977 : f32
    %134 = vector.broadcast %cst_38 : f32 to vector<128x8xf32>
    %135 = arith.mulf %134, %131 : vector<128x8xf32>
    %136 = arith.select %133, %131, %135 : vector<128x8xi1>, vector<128x8xf32>
    %137 = vector.shape_cast %136 : vector<128x8xf32> to vector<2x8x8x8xf32>
    %138 = vector.shape_cast %137 : vector<2x8x8x8xf32> to vector<2x4x2x4x2x8xf32>
    %139 = vector.extract_strided_slice %138 {offsets = [0, 0, 0, 0, 0, 0], sizes = [2, 4, 1, 4, 1, 8], strides = [1, 1, 1, 1, 1, 1]} : vector<2x4x2x4x2x8xf32> to vector<2x4x1x4x1x8xf32>
    %140 = vector.shape_cast %139 : vector<2x4x1x4x1x8xf32> to vector<2x4x4x8xf32>
    %141 = vector.extract_strided_slice %138 {offsets = [0, 0, 0, 0, 1, 0], sizes = [2, 4, 1, 4, 1, 8], strides = [1, 1, 1, 1, 1, 1]} : vector<2x4x2x4x2x8xf32> to vector<2x4x1x4x1x8xf32>
    %142 = vector.shape_cast %141 : vector<2x4x1x4x1x8xf32> to vector<2x4x4x8xf32>
    %143 = vector.extract_strided_slice %138 {offsets = [0, 0, 1, 0, 0, 0], sizes = [2, 4, 1, 4, 1, 8], strides = [1, 1, 1, 1, 1, 1]} : vector<2x4x2x4x2x8xf32> to vector<2x4x1x4x1x8xf32>
    %144 = vector.shape_cast %143 : vector<2x4x1x4x1x8xf32> to vector<2x4x4x8xf32>
    %145 = vector.extract_strided_slice %138 {offsets = [0, 0, 1, 0, 1, 0], sizes = [2, 4, 1, 4, 1, 8], strides = [1, 1, 1, 1, 1, 1]} : vector<2x4x2x4x2x8xf32> to vector<2x4x1x4x1x8xf32>
    %146 = vector.shape_cast %145 : vector<2x4x1x4x1x8xf32> to vector<2x4x4x8xf32>
    %147 = vector.extract_strided_slice %0 {offsets = [2, 0, 0], sizes = [1, 72, 16], strides = [1, 1, 1]} : vector<4x144x16xf32> to vector<1x72x16xf32>
    %148 = vector.shape_cast %147 : vector<1x72x16xf32> to vector<72x16xf32>
    %cst_39 = arith.constant 0.000000e+00 : f32
    %149 = vector.broadcast %cst_39 : f32 to vector<32x16xf32>
    %cst_40 = arith.constant 0.000000e+00 : f32
    %150 = vector.broadcast %cst_40 : f32 to vector<2x1x4x8xf32>
    %151 = vector.extract_strided_slice %146 {offsets = [0, 0, 0, 0], sizes = [2, 3, 4, 8], strides = [1, 1, 1, 1]} : vector<2x4x4x8xf32> to vector<2x3x4x8xf32>
    %152 = tpu.concatenate %150, %151 in 1 : vector<2x1x4x8xf32>, vector<2x3x4x8xf32> -> vector<2x4x4x8xf32>
    %cst_41 = arith.constant 0.000000e+00 : f32
    %153 = vector.broadcast %cst_41 : f32 to vector<2x4x1x8xf32>
    %154 = vector.extract_strided_slice %152 {offsets = [0, 0, 0, 0], sizes = [2, 4, 3, 8], strides = [1, 1, 1, 1]} : vector<2x4x4x8xf32> to vector<2x4x3x8xf32>
    %155 = tpu.concatenate %153, %154 in 2 : vector<2x4x1x8xf32>, vector<2x4x3x8xf32> -> vector<2x4x4x8xf32>
    %156 = vector.extract_strided_slice %148 {offsets = [0, 0], sizes = [8, 16], strides = [1, 1]} : vector<72x16xf32> to vector<8x16xf32>
    %157 = vector.shape_cast %155 : vector<2x4x4x8xf32> to vector<32x8xf32>
    %cst_42 = arith.constant dense<0.000000e+00> : vector<32x16xf32>
    %158 = tpu.matmul %157, %156, %cst_42 {dimension_numbers = #tpu.dot_dimension_numbers<[1], [0], [0], [1], [0, 0, 1, 1], [], []>} : vector<32x8xf32>, vector<8x16xf32>, vector<32x16xf32> -> vector<32x16xf32>
    %159 = arith.addf %149, %158 : vector<32x16xf32>
    %cst_43 = arith.constant 0.000000e+00 : f32
    %160 = vector.broadcast %cst_43 : f32 to vector<2x1x4x8xf32>
    %161 = vector.extract_strided_slice %144 {offsets = [0, 0, 0, 0], sizes = [2, 3, 4, 8], strides = [1, 1, 1, 1]} : vector<2x4x4x8xf32> to vector<2x3x4x8xf32>
    %162 = tpu.concatenate %160, %161 in 1 : vector<2x1x4x8xf32>, vector<2x3x4x8xf32> -> vector<2x4x4x8xf32>
    %163 = vector.extract_strided_slice %148 {offsets = [8, 0], sizes = [8, 16], strides = [1, 1]} : vector<72x16xf32> to vector<8x16xf32>
    %164 = vector.shape_cast %162 : vector<2x4x4x8xf32> to vector<32x8xf32>
    %cst_44 = arith.constant dense<0.000000e+00> : vector<32x16xf32>
    %165 = tpu.matmul %164, %163, %cst_44 {dimension_numbers = #tpu.dot_dimension_numbers<[1], [0], [0], [1], [0, 0, 1, 1], [], []>} : vector<32x8xf32>, vector<8x16xf32>, vector<32x16xf32> -> vector<32x16xf32>
    %166 = arith.addf %159, %165 : vector<32x16xf32>
    %cst_45 = arith.constant 0.000000e+00 : f32
    %167 = vector.broadcast %cst_45 : f32 to vector<2x1x4x8xf32>
    %168 = vector.extract_strided_slice %146 {offsets = [0, 0, 0, 0], sizes = [2, 3, 4, 8], strides = [1, 1, 1, 1]} : vector<2x4x4x8xf32> to vector<2x3x4x8xf32>
    %169 = tpu.concatenate %167, %168 in 1 : vector<2x1x4x8xf32>, vector<2x3x4x8xf32> -> vector<2x4x4x8xf32>
    %170 = vector.extract_strided_slice %148 {offsets = [16, 0], sizes = [8, 16], strides = [1, 1]} : vector<72x16xf32> to vector<8x16xf32>
    %171 = vector.shape_cast %169 : vector<2x4x4x8xf32> to vector<32x8xf32>
    %cst_46 = arith.constant dense<0.000000e+00> : vector<32x16xf32>
    %172 = tpu.matmul %171, %170, %cst_46 {dimension_numbers = #tpu.dot_dimension_numbers<[1], [0], [0], [1], [0, 0, 1, 1], [], []>} : vector<32x8xf32>, vector<8x16xf32>, vector<32x16xf32> -> vector<32x16xf32>
    %173 = arith.addf %166, %172 : vector<32x16xf32>
    %cst_47 = arith.constant 0.000000e+00 : f32
    %174 = vector.broadcast %cst_47 : f32 to vector<2x4x1x8xf32>
    %175 = vector.extract_strided_slice %142 {offsets = [0, 0, 0, 0], sizes = [2, 4, 3, 8], strides = [1, 1, 1, 1]} : vector<2x4x4x8xf32> to vector<2x4x3x8xf32>
    %176 = tpu.concatenate %174, %175 in 2 : vector<2x4x1x8xf32>, vector<2x4x3x8xf32> -> vector<2x4x4x8xf32>
    %177 = vector.extract_strided_slice %148 {offsets = [24, 0], sizes = [8, 16], strides = [1, 1]} : vector<72x16xf32> to vector<8x16xf32>
    %178 = vector.shape_cast %176 : vector<2x4x4x8xf32> to vector<32x8xf32>
    %cst_48 = arith.constant dense<0.000000e+00> : vector<32x16xf32>
    %179 = tpu.matmul %178, %177, %cst_48 {dimension_numbers = #tpu.dot_dimension_numbers<[1], [0], [0], [1], [0, 0, 1, 1], [], []>} : vector<32x8xf32>, vector<8x16xf32>, vector<32x16xf32> -> vector<32x16xf32>
    %180 = arith.addf %173, %179 : vector<32x16xf32>
    %181 = vector.extract_strided_slice %148 {offsets = [32, 0], sizes = [8, 16], strides = [1, 1]} : vector<72x16xf32> to vector<8x16xf32>
    %182 = vector.shape_cast %140 : vector<2x4x4x8xf32> to vector<32x8xf32>
    %cst_49 = arith.constant dense<0.000000e+00> : vector<32x16xf32>
    %183 = tpu.matmul %182, %181, %cst_49 {dimension_numbers = #tpu.dot_dimension_numbers<[1], [0], [0], [1], [0, 0, 1, 1], [], []>} : vector<32x8xf32>, vector<8x16xf32>, vector<32x16xf32> -> vector<32x16xf32>
    %184 = arith.addf %180, %183 : vector<32x16xf32>
    %185 = vector.extract_strided_slice %148 {offsets = [40, 0], sizes = [8, 16], strides = [1, 1]} : vector<72x16xf32> to vector<8x16xf32>
    %186 = vector.shape_cast %142 : vector<2x4x4x8xf32> to vector<32x8xf32>
    %cst_50 = arith.constant dense<0.000000e+00> : vector<32x16xf32>
    %187 = tpu.matmul %186, %185, %cst_50 {dimension_numbers = #tpu.dot_dimension_numbers<[1], [0], [0], [1], [0, 0, 1, 1], [], []>} : vector<32x8xf32>, vector<8x16xf32>, vector<32x16xf32> -> vector<32x16xf32>
    %188 = arith.addf %184, %187 : vector<32x16xf32>
    %cst_51 = arith.constant 0.000000e+00 : f32
    %189 = vector.broadcast %cst_51 : f32 to vector<2x4x1x8xf32>
    %190 = vector.extract_strided_slice %146 {offsets = [0, 0, 0, 0], sizes = [2, 4, 3, 8], strides = [1, 1, 1, 1]} : vector<2x4x4x8xf32> to vector<2x4x3x8xf32>
    %191 = tpu.concatenate %189, %190 in 2 : vector<2x4x1x8xf32>, vector<2x4x3x8xf32> -> vector<2x4x4x8xf32>
    %192 = vector.extract_strided_slice %148 {offsets = [48, 0], sizes = [8, 16], strides = [1, 1]} : vector<72x16xf32> to vector<8x16xf32>
    %193 = vector.shape_cast %191 : vector<2x4x4x8xf32> to vector<32x8xf32>
    %cst_52 = arith.constant dense<0.000000e+00> : vector<32x16xf32>
    %194 = tpu.matmul %193, %192, %cst_52 {dimension_numbers = #tpu.dot_dimension_numbers<[1], [0], [0], [1], [0, 0, 1, 1], [], []>} : vector<32x8xf32>, vector<8x16xf32>, vector<32x16xf32> -> vector<32x16xf32>
    %195 = arith.addf %188, %194 : vector<32x16xf32>
    %196 = vector.extract_strided_slice %148 {offsets = [56, 0], sizes = [8, 16], strides = [1, 1]} : vector<72x16xf32> to vector<8x16xf32>
    %197 = vector.shape_cast %144 : vector<2x4x4x8xf32> to vector<32x8xf32>
    %cst_53 = arith.constant dense<0.000000e+00> : vector<32x16xf32>
    %198 = tpu.matmul %197, %196, %cst_53 {dimension_numbers = #tpu.dot_dimension_numbers<[1], [0], [0], [1], [0, 0, 1, 1], [], []>} : vector<32x8xf32>, vector<8x16xf32>, vector<32x16xf32> -> vector<32x16xf32>
    %199 = arith.addf %195, %198 : vector<32x16xf32>
    %200 = vector.extract_strided_slice %148 {offsets = [64, 0], sizes = [8, 16], strides = [1, 1]} : vector<72x16xf32> to vector<8x16xf32>
    %201 = vector.shape_cast %146 : vector<2x4x4x8xf32> to vector<32x8xf32>
    %cst_54 = arith.constant dense<0.000000e+00> : vector<32x16xf32>
    %202 = tpu.matmul %201, %200, %cst_54 {dimension_numbers = #tpu.dot_dimension_numbers<[1], [0], [0], [1], [0, 0, 1, 1], [], []>} : vector<32x8xf32>, vector<8x16xf32>, vector<32x16xf32> -> vector<32x16xf32>
    %203 = arith.addf %199, %202 : vector<32x16xf32>
    %cst_55 = arith.constant dense<0.000000e+00> : vector<16xf32>
    %204 = vector.multi_reduction <add>, %203, %cst_55 [0] : vector<32x16xf32> to vector<16xf32>
    %205 = vector.shape_cast %204 : vector<16xf32> to vector<1x16xf32>
    %206 = arith.mulf %203, %203 : vector<32x16xf32>
    %cst_56 = arith.constant dense<0.000000e+00> : vector<16xf32>
    %207 = vector.multi_reduction <add>, %206, %cst_56 [0] : vector<32x16xf32> to vector<16xf32>
    %208 = vector.shape_cast %207 : vector<16xf32> to vector<1x16xf32>
    %cst_57 = arith.constant 3.125000e-02 : f32
    %209 = vector.broadcast %cst_57 : f32 to vector<1x16xf32>
    %210 = arith.mulf %205, %209 : vector<1x16xf32>
    %cst_58 = arith.constant 3.125000e-02 : f32
    %211 = vector.broadcast %cst_58 : f32 to vector<1x16xf32>
    %212 = arith.mulf %208, %211 : vector<1x16xf32>
    %213 = arith.mulf %210, %210 : vector<1x16xf32>
    %214 = arith.subf %212, %213 : vector<1x16xf32>
    %cst_59 = arith.constant 0.000000e+00 : f32
    %215 = vector.broadcast %cst_59 : f32 to vector<1x16xf32>
    %216 = arith.maximumf %214, %215 : vector<1x16xf32>
    %217 = vector.extract_strided_slice %1 {offsets = [2, 0, 0], sizes = [1, 1, 16], strides = [1, 1, 1]} : vector<4x2x16xf32> to vector<1x1x16xf32>
    %218 = vector.shape_cast %217 : vector<1x1x16xf32> to vector<1x16xf32>
    %219 = vector.extract_strided_slice %1 {offsets = [2, 1, 0], sizes = [1, 1, 16], strides = [1, 1, 1]} : vector<4x2x16xf32> to vector<1x1x16xf32>
    %220 = vector.shape_cast %219 : vector<1x1x16xf32> to vector<1x16xf32>
    %221 = vector.broadcast %210 : vector<1x16xf32> to vector<32x16xf32>
    %222 = arith.subf %203, %221 : vector<32x16xf32>
    %cst_60 = arith.constant 9.99999974E-6 : f32
    %223 = vector.broadcast %cst_60 : f32 to vector<1x16xf32>
    %224 = arith.addf %216, %223 : vector<1x16xf32>
    %225 = math.rsqrt %224 : vector<1x16xf32>
    %226 = arith.mulf %225, %218 : vector<1x16xf32>
    %227 = vector.broadcast %226 : vector<1x16xf32> to vector<32x16xf32>
    %228 = arith.mulf %222, %227 : vector<32x16xf32>
    %229 = vector.broadcast %220 : vector<1x16xf32> to vector<32x16xf32>
    %230 = arith.addf %228, %229 : vector<32x16xf32>
    %cst_61 = arith.constant 0.000000e+00 : f32
    %231 = vector.broadcast %cst_61 : f32 to vector<32x16xf32>
    %232 = arith.cmpf ogt, %230, %231 : vector<32x16xf32>
    %cst_62 = arith.constant 0.00999999977 : f32
    %233 = vector.broadcast %cst_62 : f32 to vector<32x16xf32>
    %234 = arith.mulf %233, %230 : vector<32x16xf32>
    %235 = arith.select %232, %230, %234 : vector<32x16xi1>, vector<32x16xf32>
    %236 = vector.shape_cast %235 : vector<32x16xf32> to vector<2x4x4x16xf32>
    %237 = vector.shape_cast %236 : vector<2x4x4x16xf32> to vector<2x2x2x2x2x16xf32>
    %238 = vector.extract_strided_slice %237 {offsets = [0, 0, 0, 0, 0, 0], sizes = [2, 2, 1, 2, 1, 16], strides = [1, 1, 1, 1, 1, 1]} : vector<2x2x2x2x2x16xf32> to vector<2x2x1x2x1x16xf32>
    %239 = vector.shape_cast %238 : vector<2x2x1x2x1x16xf32> to vector<2x2x2x16xf32>
    %240 = vector.extract_strided_slice %237 {offsets = [0, 0, 0, 0, 1, 0], sizes = [2, 2, 1, 2, 1, 16], strides = [1, 1, 1, 1, 1, 1]} : vector<2x2x2x2x2x16xf32> to vector<2x2x1x2x1x16xf32>
    %241 = vector.shape_cast %240 : vector<2x2x1x2x1x16xf32> to vector<2x2x2x16xf32>
    %242 = vector.extract_strided_slice %237 {offsets = [0, 0, 1, 0, 0, 0], sizes = [2, 2, 1, 2, 1, 16], strides = [1, 1, 1, 1, 1, 1]} : vector<2x2x2x2x2x16xf32> to vector<2x2x1x2x1x16xf32>
    %243 = vector.shape_cast %242 : vector<2x2x1x2x1x16xf32> to vector<2x2x2x16xf32>
    %244 = vector.extract_strided_slice %237 {offsets = [0, 0, 1, 0, 1, 0], sizes = [2, 2, 1, 2, 1, 16], strides = [1, 1, 1, 1, 1, 1]} : vector<2x2x2x2x2x16xf32> to vector<2x2x1x2x1x16xf32>
    %245 = vector.shape_cast %244 : vector<2x2x1x2x1x16xf32> to vector<2x2x2x16xf32>
    %246 = vector.extract_strided_slice %0 {offsets = [3, 0, 0], sizes = [1, 144, 16], strides = [1, 1, 1]} : vector<4x144x16xf32> to vector<1x144x16xf32>
    %247 = vector.shape_cast %246 : vector<1x144x16xf32> to vector<144x16xf32>
    %cst_63 = arith.constant 0.000000e+00 : f32
    %248 = vector.broadcast %cst_63 : f32 to vector<8x16xf32>
    %cst_64 = arith.constant 0.000000e+00 : f32
    %249 = vector.broadcast %cst_64 : f32 to vector<2x1x2x16xf32>
    %250 = vector.extract_strided_slice %245 {offsets = [0, 0, 0, 0], sizes = [2, 1, 2, 16], strides = [1, 1, 1, 1]} : vector<2x2x2x16xf32> to vector<2x1x2x16xf32>
    %251 = tpu.concatenate %249, %250 in 1 : vector<2x1x2x16xf32>, vector<2x1x2x16xf32> -> vector<2x2x2x16xf32>
    %cst_65 = arith.constant 0.000000e+00 : f32
    %252 = vector.broadcast %cst_65 : f32 to vector<2x2x1x16xf32>
    %253 = vector.extract_strided_slice %251 {offsets = [0, 0, 0, 0], sizes = [2, 2, 1, 16], strides = [1, 1, 1, 1]} : vector<2x2x2x16xf32> to vector<2x2x1x16xf32>
    %254 = tpu.concatenate %252, %253 in 2 : vector<2x2x1x16xf32>, vector<2x2x1x16xf32> -> vector<2x2x2x16xf32>
    %255 = vector.extract_strided_slice %247 {offsets = [0, 0], sizes = [16, 16], strides = [1, 1]} : vector<144x16xf32> to vector<16x16xf32>
    %256 = vector.shape_cast %254 : vector<2x2x2x16xf32> to vector<8x16xf32>
    %cst_66 = arith.constant dense<0.000000e+00> : vector<8x16xf32>
    %257 = tpu.matmul %256, %255, %cst_66 {dimension_numbers = #tpu.dot_dimension_numbers<[1], [0], [0], [1], [0, 0, 1, 1], [], []>} : vector<8x16xf32>, vector<16x16xf32>, vector<8x16xf32> -> vector<8x16xf32>
    %258 = arith.addf %248, %257 : vector<8x16xf32>
    %cst_67 = arith.constant 0.000000e+00 : f32
    %259 = vector.broadcast %cst_67 : f32 to vector<2x1x2x16xf32>
    %260 = vector.extract_strided_slice %243 {offsets = [0, 0, 0, 0], sizes = [2, 1, 2, 16], strides = [1, 1, 1, 1]} : vector<2x2x2x16xf32> to vector<2x1x2x16xf32>
    %261 = tpu.concatenate %259, %260 in 1 : vector<2x1x2x16xf32>, vector<2x1x2x16xf32> -> vector<2x2x2x16xf32>
    %262 = vector.extract_strided_slice %247 {offsets = [16, 0], sizes = [16, 16], strides = [1, 1]} : vector<144x16xf32> to vector<16x16xf32>
    %263 = vector.shape_cast %261 : vector<2x2x2x16xf32> to vector<8x16xf32>
    %cst_68 = arith.constant dense<0.000000e+00> : vector<8x16xf32>
    %264 = tpu.matmul %263, %262, %cst_68 {dimension_numbers = #tpu.dot_dimension_numbers<[1], [0], [0], [1], [0, 0, 1, 1], [], []>} : vector<8x16xf32>, vector<16x16xf32>, vector<8x16xf32> -> vector<8x16xf32>
    %265 = arith.addf %258, %264 : vector<8x16xf32>
    %cst_69 = arith.constant 0.000000e+00 : f32
    %266 = vector.broadcast %cst_69 : f32 to vector<2x1x2x16xf32>
    %267 = vector.extract_strided_slice %245 {offsets = [0, 0, 0, 0], sizes = [2, 1, 2, 16], strides = [1, 1, 1, 1]} : vector<2x2x2x16xf32> to vector<2x1x2x16xf32>
    %268 = tpu.concatenate %266, %267 in 1 : vector<2x1x2x16xf32>, vector<2x1x2x16xf32> -> vector<2x2x2x16xf32>
    %269 = vector.extract_strided_slice %247 {offsets = [32, 0], sizes = [16, 16], strides = [1, 1]} : vector<144x16xf32> to vector<16x16xf32>
    %270 = vector.shape_cast %268 : vector<2x2x2x16xf32> to vector<8x16xf32>
    %cst_70 = arith.constant dense<0.000000e+00> : vector<8x16xf32>
    %271 = tpu.matmul %270, %269, %cst_70 {dimension_numbers = #tpu.dot_dimension_numbers<[1], [0], [0], [1], [0, 0, 1, 1], [], []>} : vector<8x16xf32>, vector<16x16xf32>, vector<8x16xf32> -> vector<8x16xf32>
    %272 = arith.addf %265, %271 : vector<8x16xf32>
    %cst_71 = arith.constant 0.000000e+00 : f32
    %273 = vector.broadcast %cst_71 : f32 to vector<2x2x1x16xf32>
    %274 = vector.extract_strided_slice %241 {offsets = [0, 0, 0, 0], sizes = [2, 2, 1, 16], strides = [1, 1, 1, 1]} : vector<2x2x2x16xf32> to vector<2x2x1x16xf32>
    %275 = tpu.concatenate %273, %274 in 2 : vector<2x2x1x16xf32>, vector<2x2x1x16xf32> -> vector<2x2x2x16xf32>
    %276 = vector.extract_strided_slice %247 {offsets = [48, 0], sizes = [16, 16], strides = [1, 1]} : vector<144x16xf32> to vector<16x16xf32>
    %277 = vector.shape_cast %275 : vector<2x2x2x16xf32> to vector<8x16xf32>
    %cst_72 = arith.constant dense<0.000000e+00> : vector<8x16xf32>
    %278 = tpu.matmul %277, %276, %cst_72 {dimension_numbers = #tpu.dot_dimension_numbers<[1], [0], [0], [1], [0, 0, 1, 1], [], []>} : vector<8x16xf32>, vector<16x16xf32>, vector<8x16xf32> -> vector<8x16xf32>
    %279 = arith.addf %272, %278 : vector<8x16xf32>
    %280 = vector.extract_strided_slice %247 {offsets = [64, 0], sizes = [16, 16], strides = [1, 1]} : vector<144x16xf32> to vector<16x16xf32>
    %281 = vector.shape_cast %239 : vector<2x2x2x16xf32> to vector<8x16xf32>
    %cst_73 = arith.constant dense<0.000000e+00> : vector<8x16xf32>
    %282 = tpu.matmul %281, %280, %cst_73 {dimension_numbers = #tpu.dot_dimension_numbers<[1], [0], [0], [1], [0, 0, 1, 1], [], []>} : vector<8x16xf32>, vector<16x16xf32>, vector<8x16xf32> -> vector<8x16xf32>
    %283 = arith.addf %279, %282 : vector<8x16xf32>
    %284 = vector.extract_strided_slice %247 {offsets = [80, 0], sizes = [16, 16], strides = [1, 1]} : vector<144x16xf32> to vector<16x16xf32>
    %285 = vector.shape_cast %241 : vector<2x2x2x16xf32> to vector<8x16xf32>
    %cst_74 = arith.constant dense<0.000000e+00> : vector<8x16xf32>
    %286 = tpu.matmul %285, %284, %cst_74 {dimension_numbers = #tpu.dot_dimension_numbers<[1], [0], [0], [1], [0, 0, 1, 1], [], []>} : vector<8x16xf32>, vector<16x16xf32>, vector<8x16xf32> -> vector<8x16xf32>
    %287 = arith.addf %283, %286 : vector<8x16xf32>
    %cst_75 = arith.constant 0.000000e+00 : f32
    %288 = vector.broadcast %cst_75 : f32 to vector<2x2x1x16xf32>
    %289 = vector.extract_strided_slice %245 {offsets = [0, 0, 0, 0], sizes = [2, 2, 1, 16], strides = [1, 1, 1, 1]} : vector<2x2x2x16xf32> to vector<2x2x1x16xf32>
    %290 = tpu.concatenate %288, %289 in 2 : vector<2x2x1x16xf32>, vector<2x2x1x16xf32> -> vector<2x2x2x16xf32>
    %291 = vector.extract_strided_slice %247 {offsets = [96, 0], sizes = [16, 16], strides = [1, 1]} : vector<144x16xf32> to vector<16x16xf32>
    %292 = vector.shape_cast %290 : vector<2x2x2x16xf32> to vector<8x16xf32>
    %cst_76 = arith.constant dense<0.000000e+00> : vector<8x16xf32>
    %293 = tpu.matmul %292, %291, %cst_76 {dimension_numbers = #tpu.dot_dimension_numbers<[1], [0], [0], [1], [0, 0, 1, 1], [], []>} : vector<8x16xf32>, vector<16x16xf32>, vector<8x16xf32> -> vector<8x16xf32>
    %294 = arith.addf %287, %293 : vector<8x16xf32>
    %295 = vector.extract_strided_slice %247 {offsets = [112, 0], sizes = [16, 16], strides = [1, 1]} : vector<144x16xf32> to vector<16x16xf32>
    %296 = vector.shape_cast %243 : vector<2x2x2x16xf32> to vector<8x16xf32>
    %cst_77 = arith.constant dense<0.000000e+00> : vector<8x16xf32>
    %297 = tpu.matmul %296, %295, %cst_77 {dimension_numbers = #tpu.dot_dimension_numbers<[1], [0], [0], [1], [0, 0, 1, 1], [], []>} : vector<8x16xf32>, vector<16x16xf32>, vector<8x16xf32> -> vector<8x16xf32>
    %298 = arith.addf %294, %297 : vector<8x16xf32>
    %299 = vector.extract_strided_slice %247 {offsets = [128, 0], sizes = [16, 16], strides = [1, 1]} : vector<144x16xf32> to vector<16x16xf32>
    %300 = vector.shape_cast %245 : vector<2x2x2x16xf32> to vector<8x16xf32>
    %cst_78 = arith.constant dense<0.000000e+00> : vector<8x16xf32>
    %301 = tpu.matmul %300, %299, %cst_78 {dimension_numbers = #tpu.dot_dimension_numbers<[1], [0], [0], [1], [0, 0, 1, 1], [], []>} : vector<8x16xf32>, vector<16x16xf32>, vector<8x16xf32> -> vector<8x16xf32>
    %302 = arith.addf %298, %301 : vector<8x16xf32>
    %cst_79 = arith.constant dense<0.000000e+00> : vector<16xf32>
    %303 = vector.multi_reduction <add>, %302, %cst_79 [0] : vector<8x16xf32> to vector<16xf32>
    %304 = vector.shape_cast %303 : vector<16xf32> to vector<1x16xf32>
    %305 = arith.mulf %302, %302 : vector<8x16xf32>
    %cst_80 = arith.constant dense<0.000000e+00> : vector<16xf32>
    %306 = vector.multi_reduction <add>, %305, %cst_80 [0] : vector<8x16xf32> to vector<16xf32>
    %307 = vector.shape_cast %306 : vector<16xf32> to vector<1x16xf32>
    %cst_81 = arith.constant 1.250000e-01 : f32
    %308 = vector.broadcast %cst_81 : f32 to vector<1x16xf32>
    %309 = arith.mulf %304, %308 : vector<1x16xf32>
    %cst_82 = arith.constant 1.250000e-01 : f32
    %310 = vector.broadcast %cst_82 : f32 to vector<1x16xf32>
    %311 = arith.mulf %307, %310 : vector<1x16xf32>
    %312 = arith.mulf %309, %309 : vector<1x16xf32>
    %313 = arith.subf %311, %312 : vector<1x16xf32>
    %cst_83 = arith.constant 0.000000e+00 : f32
    %314 = vector.broadcast %cst_83 : f32 to vector<1x16xf32>
    %315 = arith.maximumf %313, %314 : vector<1x16xf32>
    %316 = vector.extract_strided_slice %1 {offsets = [3, 0, 0], sizes = [1, 1, 16], strides = [1, 1, 1]} : vector<4x2x16xf32> to vector<1x1x16xf32>
    %317 = vector.shape_cast %316 : vector<1x1x16xf32> to vector<1x16xf32>
    %318 = vector.extract_strided_slice %1 {offsets = [3, 1, 0], sizes = [1, 1, 16], strides = [1, 1, 1]} : vector<4x2x16xf32> to vector<1x1x16xf32>
    %319 = vector.shape_cast %318 : vector<1x1x16xf32> to vector<1x16xf32>
    %320 = vector.broadcast %309 : vector<1x16xf32> to vector<8x16xf32>
    %321 = arith.subf %302, %320 : vector<8x16xf32>
    %cst_84 = arith.constant 9.99999974E-6 : f32
    %322 = vector.broadcast %cst_84 : f32 to vector<1x16xf32>
    %323 = arith.addf %315, %322 : vector<1x16xf32>
    %324 = math.rsqrt %323 : vector<1x16xf32>
    %325 = arith.mulf %324, %317 : vector<1x16xf32>
    %326 = vector.broadcast %325 : vector<1x16xf32> to vector<8x16xf32>
    %327 = arith.mulf %321, %326 : vector<8x16xf32>
    %328 = vector.broadcast %319 : vector<1x16xf32> to vector<8x16xf32>
    %329 = arith.addf %327, %328 : vector<8x16xf32>
    %cst_85 = arith.constant 0.000000e+00 : f32
    %330 = vector.broadcast %cst_85 : f32 to vector<8x16xf32>
    %331 = arith.cmpf ogt, %329, %330 : vector<8x16xf32>
    %cst_86 = arith.constant 0.00999999977 : f32
    %332 = vector.broadcast %cst_86 : f32 to vector<8x16xf32>
    %333 = arith.mulf %332, %329 : vector<8x16xf32>
    %334 = arith.select %331, %329, %333 : vector<8x16xi1>, vector<8x16xf32>
    %335 = vector.shape_cast %334 : vector<8x16xf32> to vector<2x4x16xf32>
    %c0_87 = arith.constant 0 : index
    %c0_88 = arith.constant 0 : index
    %c0_89 = arith.constant 0 : index
    %336 = vector.load %arg4[%c0_87, %c0_88, %c0_89] : memref<4x16x64xf32, #tpu.memory_space<vmem>>, vector<4x16x64xf32>
    %cst_90 = arith.constant 0.000000e+00 : f32
    %337 = vector.broadcast %cst_90 : f32 to vector<2x64xf32>
    %338 = vector.extract_strided_slice %335 {offsets = [0, 0, 0], sizes = [2, 1, 16], strides = [1, 1, 1]} : vector<2x4x16xf32> to vector<2x1x16xf32>
    %339 = vector.shape_cast %338 : vector<2x1x16xf32> to vector<2x16xf32>
    %340 = vector.extract_strided_slice %336 {offsets = [0, 0, 0], sizes = [1, 16, 64], strides = [1, 1, 1]} : vector<4x16x64xf32> to vector<1x16x64xf32>
    %341 = vector.shape_cast %340 : vector<1x16x64xf32> to vector<16x64xf32>
    %cst_91 = arith.constant dense<0.000000e+00> : vector<2x64xf32>
    %342 = tpu.matmul %339, %341, %cst_91 {dimension_numbers = #tpu.dot_dimension_numbers<[1], [0], [0], [1], [0, 0, 1, 1], [], []>} : vector<2x16xf32>, vector<16x64xf32>, vector<2x64xf32> -> vector<2x64xf32>
    %343 = arith.addf %337, %342 : vector<2x64xf32>
    %344 = vector.extract_strided_slice %335 {offsets = [0, 1, 0], sizes = [2, 1, 16], strides = [1, 1, 1]} : vector<2x4x16xf32> to vector<2x1x16xf32>
    %345 = vector.shape_cast %344 : vector<2x1x16xf32> to vector<2x16xf32>
    %346 = vector.extract_strided_slice %336 {offsets = [1, 0, 0], sizes = [1, 16, 64], strides = [1, 1, 1]} : vector<4x16x64xf32> to vector<1x16x64xf32>
    %347 = vector.shape_cast %346 : vector<1x16x64xf32> to vector<16x64xf32>
    %cst_92 = arith.constant dense<0.000000e+00> : vector<2x64xf32>
    %348 = tpu.matmul %345, %347, %cst_92 {dimension_numbers = #tpu.dot_dimension_numbers<[1], [0], [0], [1], [0, 0, 1, 1], [], []>} : vector<2x16xf32>, vector<16x64xf32>, vector<2x64xf32> -> vector<2x64xf32>
    %349 = arith.addf %343, %348 : vector<2x64xf32>
    %350 = vector.extract_strided_slice %335 {offsets = [0, 2, 0], sizes = [2, 1, 16], strides = [1, 1, 1]} : vector<2x4x16xf32> to vector<2x1x16xf32>
    %351 = vector.shape_cast %350 : vector<2x1x16xf32> to vector<2x16xf32>
    %352 = vector.extract_strided_slice %336 {offsets = [2, 0, 0], sizes = [1, 16, 64], strides = [1, 1, 1]} : vector<4x16x64xf32> to vector<1x16x64xf32>
    %353 = vector.shape_cast %352 : vector<1x16x64xf32> to vector<16x64xf32>
    %cst_93 = arith.constant dense<0.000000e+00> : vector<2x64xf32>
    %354 = tpu.matmul %351, %353, %cst_93 {dimension_numbers = #tpu.dot_dimension_numbers<[1], [0], [0], [1], [0, 0, 1, 1], [], []>} : vector<2x16xf32>, vector<16x64xf32>, vector<2x64xf32> -> vector<2x64xf32>
    %355 = arith.addf %349, %354 : vector<2x64xf32>
    %356 = vector.extract_strided_slice %335 {offsets = [0, 3, 0], sizes = [2, 1, 16], strides = [1, 1, 1]} : vector<2x4x16xf32> to vector<2x1x16xf32>
    %357 = vector.shape_cast %356 : vector<2x1x16xf32> to vector<2x16xf32>
    %358 = vector.extract_strided_slice %336 {offsets = [3, 0, 0], sizes = [1, 16, 64], strides = [1, 1, 1]} : vector<4x16x64xf32> to vector<1x16x64xf32>
    %359 = vector.shape_cast %358 : vector<1x16x64xf32> to vector<16x64xf32>
    %cst_94 = arith.constant dense<0.000000e+00> : vector<2x64xf32>
    %360 = tpu.matmul %357, %359, %cst_94 {dimension_numbers = #tpu.dot_dimension_numbers<[1], [0], [0], [1], [0, 0, 1, 1], [], []>} : vector<2x16xf32>, vector<16x64xf32>, vector<2x64xf32> -> vector<2x64xf32>
    %361 = arith.addf %355, %360 : vector<2x64xf32>
    %c0_95 = arith.constant 0 : index
    %c0_96 = arith.constant 0 : index
    %362 = vector.load %arg5[%c0_95, %c0_96] : memref<1x64xf32, #tpu.memory_space<vmem>>, vector<1x64xf32>
    %363 = vector.broadcast %362 : vector<1x64xf32> to vector<2x64xf32>
    %364 = arith.addf %361, %363 : vector<2x64xf32>
    %365 = math.tanh %364 : vector<2x64xf32>
    %c0_97 = arith.constant 0 : index
    %c0_98 = arith.constant 0 : index
    %366 = vector.load %arg6[%c0_97, %c0_98] : memref<2x64xf32, #tpu.memory_space<vmem>>, vector<2x64xf32>
    tpu.vector_store %arg6[%c0_97, %c0_98], %365 {strides = array<i32>} : memref<2x64xf32, #tpu.memory_space<vmem>>, vector<2x64xf32>,
    return
  }
  func.func @transform_0(%arg0: i32) -> (i32, i32) {
    %c0_i32 = arith.constant 0 : i32
    %c0_i32_0 = arith.constant 0 : i32
    %c0_i32_1 = arith.constant 0 : i32
    return %c0_i32, %c0_i32_0 : i32, i32
  }
  func.func @transform_1(%arg0: i32) -> (i32, i32, i32) {
    %c0_i32 = arith.constant 0 : i32
    %c0_i32_0 = arith.constant 0 : i32
    %c0_i32_1 = arith.constant 0 : i32
    %c0_i32_2 = arith.constant 0 : i32
    return %c0_i32, %c0_i32_0, %c0_i32_1 : i32, i32, i32
  }
  func.func @transform_2(%arg0: i32) -> (i32, i32, i32) {
    %c0_i32 = arith.constant 0 : i32
    %c0_i32_0 = arith.constant 0 : i32
    %c0_i32_1 = arith.constant 0 : i32
    %c0_i32_2 = arith.constant 0 : i32
    return %c0_i32, %c0_i32_0, %c0_i32_1 : i32, i32, i32
  }
  func.func @transform_3(%arg0: i32) -> (i32, i32, i32) {
    %c0_i32 = arith.constant 0 : i32
    %c0_i32_0 = arith.constant 0 : i32
    %c0_i32_1 = arith.constant 0 : i32
    %c0_i32_2 = arith.constant 0 : i32
    return %c0_i32, %c0_i32_0, %c0_i32_1 : i32, i32, i32
  }
  func.func @transform_4(%arg0: i32) -> (i32, i32) {
    %c0_i32 = arith.constant 0 : i32
    %c0_i32_0 = arith.constant 0 : i32
    %c0_i32_1 = arith.constant 0 : i32
    return %c0_i32, %c0_i32_0 : i32, i32
  }
  func.func @transform_5(%arg0: i32) -> (i32, i32) {
    %c0_i32 = arith.constant 0 : i32
    %c0_i32_0 = arith.constant 0 : i32
    %c0_i32_1 = arith.constant 0 : i32
    return %c0_i32, %c0_i32_0 : i32, i32
  }
}

</mosaic_0001>

<bundles_post_ra>
// kernel: encoder_forward.1
= control target key start
LH: loop header
LB: loop body
LE: loop exit
PB: predicated region body
PF: predicated region fallthrough
CT: control target
= control target key end

     0   :  { %vm19864_vm0 = vcmask 1040384   ;;  %vm127_vm1 = vcmask 72704   ;;  %vm11990_vm2 = vmmov 1   ;;  %s19776_s0 = inlined_call_operand.vmem [shape: f32[512,9], index: 0, kind: input, shape index: {}]   ;;  %s19777_s1 = inlined_call_operand.vmem [shape: f32[4,144,16], index: 1, kind: input, shape index: {}]   ;;  %s19778_s2 = inlined_call_operand.vmem [shape: f32[4,2,16], index: 2, kind: input, shape index: {}]   ;;  %s19779_s3 = inlined_call_operand.vmem [shape: f32[4,16,64], index: 3, kind: input, shape index: {}]   ;;  %s19780_s4 = inlined_call_operand.vmem [shape: f32[1,64], index: 4, kind: input, shape index: {}]   ;;  %s19781_s5 = inlined_call_operand.hbm [shape: f32[2,64], index: 5, kind: output, shape index: {}]  }
   0x1   :  { %v21_v0 = vld [vmem:[%s19777_s1] sm:$0xff]  ;;  %v22_v1 = vld [vmem:[%s19777_s1 + $0x8] sm:$0xff]  ;;  %vm11727_vm3 = vmpackc.low %vm19864_vm0, %vm11990_vm2 }
   0x2   :  { %v63_v2 = vld [vmem:[%s19776_s0] sm:$0xff]  ;;  %v11726_v3 = vpack.c.bf16 %v22_v1, %v21_v0  ;;  %v64_v4 = vld [vmem:[%s19776_s0 + $0x8] sm:$0xff]  ;;  %v65_v5 = vld [vmem:[%s19776_s0 + $0x10] sm:$0xff] }
   0x3   :  { %11233 = vmatprep.mubr.msk.f32.mxu0 %vm127_vm1, %v63_v2  ;;  %v66_v6 = vld [vmem:[%s19776_s0 + $0x18] sm:$0xff]  ;;  %v67_v7 = vld [vmem:[%s19776_s0 + $0x20] sm:$0xff]  ;;  %v68_v8 = vld [vmem:[%s19776_s0 + $0x28] sm:$0xff] }
   0x4   :  { %11728 = vmatprep.subr.msk.bf16.mxu0 %vm11727_vm3, %v11726_v3  ;;  %v69_v9 = vld [vmem:[%s19776_s0 + $0x30] sm:$0xff]  ;;  %v70_v10 = vld [vmem:[%s19776_s0 + $0x38] sm:$0xff]  ;;  %v71_v11 = vld [vmem:[%s19776_s0 + $0x40] sm:$0xff] }
   0x5   :  { %11731 = vmatpush3.bf16.msk.msra.mxu0 %vm11727_vm3, %v11726_v3  ;;  %v72_v12 = vld [vmem:[%s19776_s0 + $0x48] sm:$0xff]  ;;  %v73_v13 = vld [vmem:[%s19776_s0 + $0x50] sm:$0xff] }
   0x8   :  { %11234 = vmatmul.mubr.msk.f32.vlgmr.msra.gmra.mrb[0].mxu0 %vm127_vm1, %v64_v4 }
   0x9   :  { %11236 = vmatprep.mubr.msk.f32.mxu0 %vm127_vm1, %v65_v5 }
   0xc   :  { %11237 = vmatmul.mubr.msk.f32.gmra.mrb[2].mxu0 %vm127_vm1, %v66_v6 }
   0xd   :  { %11239 = vmatprep.mubr.msk.f32.mxu0 %vm127_vm1, %v67_v7 }
  0x10   :  { %11240 = vmatmul.mubr.msk.f32.gmra.mrb[4].mxu0 %vm127_vm1, %v68_v8 }
  0x11   :  { %11242 = vmatprep.mubr.msk.f32.mxu0 %vm127_vm1, %v69_v9 }
  0x14   :  { %11243 = vmatmul.mubr.msk.f32.gmra.mrb[6].mxu0 %vm127_vm1, %v70_v10 }
  0x15   :  { %11245 = vmatprep.mubr.msk.f32.mxu0 %vm127_vm1, %v71_v11 }
  0x16   :  { %10 = vsyncpa [#allocation3], 0  ;;  %v74_v14 = vld [vmem:[%s19776_s0 + $0x58] sm:$0xff]  ;;  %v75_v15 = vld [vmem:[%s19776_s0 + $0x60] sm:$0xff]  ;;  %vm19866_vm4 = vcmask 64512   ;;  %s11995_s18 = smov [#allocation2]  }
  0x17   :  { %v76_v16 = vld [vmem:[%s19776_s0 + $0x68] sm:$0xff]  ;;  %v77_v17 = vld [vmem:[%s19776_s0 + $0x70] sm:$0xff]  ;;  %v78_v18 = vld [vmem:[%s19776_s0 + $0x78] sm:$0xff]  ;;  %s10663_s19 = sshll.u32 %s11995_s18, 4  ;;  %s10664_s19 = int_to_ptr.vmem [resolvable:$true] %s10663_s19 }
  0x18   :  { %11246 = vmatmul.mubr.msk.f32.gmra.mrb[8].mxu0 %vm127_vm1, %v72_v12  ;;  %v79_v19 = vld [vmem:[%s19776_s0 + $0x80] sm:$0xff]  ;;  %v80_v20 = vld [vmem:[%s19776_s0 + $0x88] sm:$0xff]  ;;  %v81_v21 = vld [vmem:[%s19776_s0 + $0x90] sm:$0xff]  ;;  %s11966_s20 = scalar_lea.vmem %s10664_s19, 32  ;;  %p11971_p1 = scmp.lt.s32.totalorder %s10664_s19, %s10664_s19 }
  0x19   :  { %11248 = vmatprep.mubr.msk.f32.mxu0 %vm127_vm1, %v73_v13  ;;  %v82_v22 = vld [vmem:[%s19776_s0 + $0x98] sm:$0xff]  ;;  %v83_v23 = vld [vmem:[%s19776_s0 + $0xa0] sm:$0xff]  ;;  %v84_v24 = vld [vmem:[%s19776_s0 + $0xa8] sm:$0xff]  ;;  %p11967_p0 = scmp.ne.s32.totalorder %s10664_s19, %s11966_s20  ;;  %p11972_p2 = scmp.lt.s32.totalorder %s11966_s20, %s11966_s20 }
  0x1a   :  { %v85_v25 = vld [vmem:[%s19776_s0 + $0xb0] sm:$0xff]  ;;  %v86_v26 = vld [vmem:[%s19776_s0 + $0xb8] sm:$0xff]  ;;  %v87_v27 = vld [vmem:[%s19776_s0 + $0xc0] sm:$0xff] }
  0x1b   :  { %v88_v28 = vld [vmem:[%s19776_s0 + $0xc8] sm:$0xff]  ;;  %v89_v29 = vld [vmem:[%s19776_s0 + $0xd0] sm:$0xff]  ;;  %v90_v30 = vld [vmem:[%s19776_s0 + $0xd8] sm:$0xff]  ;;  %p11973_p3 = por %p11972_p2, %p11971_p1 }
  0x1c   :  { %11249 = vmatmul.mubr.msk.f32.gmra.mrb[10].mxu0 %vm127_vm1, %v74_v14  ;;  %v91_v31 = vld [vmem:[%s19776_s0 + $0xe0] sm:$0xff]  ;;  %v92_v32 = vld [vmem:[%s19776_s0 + $0xe8] sm:$0xff]  ;;  %v93_v33 = vld [vmem:[%s19776_s0 + $0xf0] sm:$0xff] }
  0x1d   :  { %11251 = vmatprep.mubr.msk.f32.mxu0 %vm127_vm1, %v75_v15  ;;  %v94_v34 = vld [vmem:[%s19776_s0 + $0xf8] sm:$0xff]  ;;  %v95_v35 = vld [vmem:[%s19776_s0 + $0x100] sm:$0xff]  ;;  %v96_v36 = vld [vmem:[%s19776_s0 + $0x108] sm:$0xff]  ;;  %p11974_p4 = pnand %p11973_p3, %p11967_p0 }
  0x1e   :  { %v97_v37 = vld [vmem:[%s19776_s0 + $0x110] sm:$0xff]  ;;  %v98_v38 = vld [vmem:[%s19776_s0 + $0x118] sm:$0xff]  ;;  %v99_v39 = vld [vmem:[%s19776_s0 + $0x120] sm:$0xff] }
  0x1f   :  { %v100_v40 = vld [vmem:[%s19776_s0 + $0x128] sm:$0xff]  ;;  %v101_v41 = vld [vmem:[%s19776_s0 + $0x130] sm:$0xff]  ;;  %v102_v42 = vld [vmem:[%s19776_s0 + $0x138] sm:$0xff] }
  0x20   :  { %11252 = vmatmul.mubr.msk.f32.gmra.mrb[12].mxu0 %vm127_vm1, %v76_v16  ;;  %v103_v43 = vld [vmem:[%s19776_s0 + $0x140] sm:$0xff]  ;;  %v104_v44 = vld [vmem:[%s19776_s0 + $0x148] sm:$0xff]  ;;  %v105_v45 = vld [vmem:[%s19776_s0 + $0x150] sm:$0xff] }
  0x21   :  { %11254 = vmatprep.mubr.msk.f32.mxu0 %vm127_vm1, %v77_v17  ;;  %v106_v46 = vld [vmem:[%s19776_s0 + $0x158] sm:$0xff]  ;;  %v107_v47 = vld [vmem:[%s19776_s0 + $0x160] sm:$0xff]  ;;  %v108_v48 = vld [vmem:[%s19776_s0 + $0x168] sm:$0xff] }
  0x22   :  { %v109_v49 = vld [vmem:[%s19776_s0 + $0x170] sm:$0xff]  ;;  %v110_v50 = vld [vmem:[%s19776_s0 + $0x178] sm:$0xff]  ;;  %v111_v51 = vld [vmem:[%s19776_s0 + $0x180] sm:$0xff] }
  0x23   :  { %v112_v52 = vld [vmem:[%s19776_s0 + $0x188] sm:$0xff]  ;;  %v113_v53 = vld [vmem:[%s19776_s0 + $0x190] sm:$0xff]  ;;  %v114_v54 = vld [vmem:[%s19776_s0 + $0x198] sm:$0xff] }
  0x24   :  { %11255 = vmatmul.mubr.msk.f32.gmra.mrb[14].mxu0 %vm127_vm1, %v78_v18  ;;  %v115_v55 = vld [vmem:[%s19776_s0 + $0x1a0] sm:$0xff]  ;;  %v116_v56 = vld [vmem:[%s19776_s0 + $0x1a8] sm:$0xff]  ;;  %v117_v57 = vld [vmem:[%s19776_s0 + $0x1b0] sm:$0xff] }
  0x25   :  { %11257 = vmatprep.mubr.msk.f32.mxu0 %vm127_vm1, %v79_v19  ;;  %v118_v58 = vld [vmem:[%s19776_s0 + $0x1b8] sm:$0xff]  ;;  %v119_v59 = vld [vmem:[%s19776_s0 + $0x1c0] sm:$0xff]  ;;  %v120_v60 = vld [vmem:[%s19776_s0 + $0x1c8] sm:$0xff] }
  0x26   :  { %v121_v61 = vld [vmem:[%s19776_s0 + $0x1d0] sm:$0xff]  ;;  %v122_v62 = vld [vmem:[%s19776_s0 + $0x1d8] sm:$0xff]  ;;  %v123_v63 = vld [vmem:[%s19776_s0 + $0x1e0] sm:$0xff] }
  0x27   :  { %v124_v0 = vld [vmem:[%s19776_s0 + $0x1e8] sm:$0xff]  ;;  %v125_v1 = vld [vmem:[%s19776_s0 + $0x1f0] sm:$0xff]  ;;  %v126_v2 = vld [vmem:[%s19776_s0 + $0x1f8] sm:$0xff] }
  0x28   :  { %11258 = vmatmul.mubr.msk.f32.gmra.mrb[16].mxu0 %vm127_vm1, %v80_v20 }
  0x29   :  { %11260 = vmatprep.mubr.msk.f32.mxu0 %vm127_vm1, %v81_v21 }
  0x2c   :  { %11261 = vmatmul.mubr.msk.f32.gmra.mrb[18].mxu0 %vm127_vm1, %v82_v22 }
  0x2d   :  { %11263 = vmatprep.mubr.msk.f32.mxu0 %vm127_vm1, %v83_v23 }
  0x30   :  { %11264 = vmatmul.mubr.msk.f32.gmra.mrb[20].mxu0 %vm127_vm1, %v84_v24 }
  0x31   :  { %11266 = vmatprep.mubr.msk.f32.mxu0 %vm127_vm1, %v85_v25 }
  0x34   :  { %11267 = vmatmul.mubr.msk.f32.gmra.mrb[22].mxu0 %vm127_vm1, %v86_v26 }
  0x35   :  { %11269 = vmatprep.mubr.msk.f32.mxu0 %vm127_vm1, %v87_v27 }
  0x38   :  { %11270 = vmatmul.mubr.msk.f32.gmra.mrb[24].mxu0 %vm127_vm1, %v88_v28 }
  0x39   :  { %11272 = vmatprep.mubr.msk.f32.mxu0 %vm127_vm1, %v89_v29 }
  0x3c   :  { %11273 = vmatmul.mubr.msk.f32.gmra.mrb[26].mxu0 %vm127_vm1, %v90_v30 }
  0x3d   :  { %11275 = vmatprep.mubr.msk.f32.mxu0 %vm127_vm1, %v91_v31 }
  0x40   :  { %11276 = vmatmul.mubr.msk.f32.gmra.mrb[28].mxu0 %vm127_vm1, %v92_v32 }
  0x41   :  { %11278 = vmatprep.mubr.msk.f32.mxu0 %vm127_vm1, %v93_v33 }
  0x44   :  { %11279 = vmatmul.mubr.msk.f32.gmra.mrb[30].mxu0 %vm127_vm1, %v94_v34 }
  0x45   :  { %11281 = vmatprep.mubr.msk.f32.mxu0 %vm127_vm1, %v95_v35 }
  0x48   :  { %11282 = vmatmul.mubr.msk.f32.gmra.mrb[32].mxu0 %vm127_vm1, %v96_v36 }
  0x49   :  { %11284 = vmatprep.mubr.msk.f32.mxu0 %vm127_vm1, %v97_v37 }
  0x4c   :  { %11285 = vmatmul.mubr.msk.f32.gmra.mrb[34].mxu0 %vm127_vm1, %v98_v38 }
  0x4d   :  { %11287 = vmatprep.mubr.msk.f32.mxu0 %vm127_vm1, %v99_v39 }
  0x50   :  { %11288 = vmatmul.mubr.msk.f32.gmra.mrb[36].mxu0 %vm127_vm1, %v100_v40 }
  0x51   :  { %11290 = vmatprep.mubr.msk.f32.mxu0 %vm127_vm1, %v101_v41 }
  0x54   :  { %11291 = vmatmul.mubr.msk.f32.gmra.mrb[38].mxu0 %vm127_vm1, %v102_v42 }
  0x55   :  { %11293 = vmatprep.mubr.msk.f32.mxu0 %vm127_vm1, %v103_v43 }
  0x58   :  { %11294 = vmatmul.mubr.msk.f32.gmra.mrb[40].mxu0 %vm127_vm1, %v104_v44 }
  0x59   :  { %11296 = vmatprep.mubr.msk.f32.mxu0 %vm127_vm1, %v105_v45 }
  0x5c   :  { %11297 = vmatmul.mubr.msk.f32.gmra.mrb[42].mxu0 %vm127_vm1, %v106_v46 }
  0x5d   :  { %11299 = vmatprep.mubr.msk.f32.mxu0 %vm127_vm1, %v107_v47 }
  0x60   :  { %11300 = vmatmul.mubr.msk.f32.gmra.mrb[44].mxu0 %vm127_vm1, %v108_v48 }
  0x61   :  { %11302 = vmatprep.mubr.msk.f32.mxu0 %vm127_vm1, %v109_v49 }
  0x64   :  { %11303 = vmatmul.mubr.msk.f32.gmra.mrb[46].mxu0 %vm127_vm1, %v110_v50 }
  0x65   :  { %11305 = vmatprep.mubr.msk.f32.mxu0 %vm127_vm1, %v111_v51 }
  0x68   :  { %11306 = vmatmul.mubr.msk.f32.gmra.mrb[48].mxu0 %vm127_vm1, %v112_v52 }
  0x69   :  { %11308 = vmatprep.mubr.msk.f32.mxu0 %vm127_vm1, %v113_v53 }
  0x6c   :  { %11309 = vmatmul.mubr.msk.f32.gmra.mrb[50].mxu0 %vm127_vm1, %v114_v54 }
  0x6d   :  { %11311 = vmatprep.mubr.msk.f32.mxu0 %vm127_vm1, %v115_v55 }
  0x70   :  { %11312 = vmatmul.mubr.msk.f32.gmra.mrb[52].mxu0 %vm127_vm1, %v116_v56 }
  0x71   :  { %11314 = vmatprep.mubr.msk.f32.mxu0 %vm127_vm1, %v117_v57 }
  0x74   :  { %11315 = vmatmul.mubr.msk.f32.gmra.mrb[54].mxu0 %vm127_vm1, %v118_v58 }
  0x75   :  { %11317 = vmatprep.mubr.msk.f32.mxu0 %vm127_vm1, %v119_v59 }
  0x78   :  { %11318 = vmatmul.mubr.msk.f32.gmra.mrb[56].mxu0 %vm127_vm1, %v120_v60 }
  0x79   :  { %11320 = vmatprep.mubr.msk.f32.mxu0 %vm127_vm1, %v121_v61 }
  0x7c   :  { %11321 = vmatmul.mubr.msk.f32.gmra.mrb[58].mxu0 %vm127_vm1, %v122_v62 }
  0x7d   :  { %11323 = vmatprep.mubr.msk.f32.mxu0 %vm127_vm1, %v123_v63 }
  0x80   :  { %11324 = vmatmul.mubr.msk.f32.gmra.mrb[60].mxu0 %vm127_vm1, %v124_v0 }
  0x81   :  { %11326 = vmatprep.mubr.msk.f32.mxu0 %vm127_vm1, %v125_v1 }
  0x84   :  { %11327 = vmatmul.mubr.msk.f32.gmra.mrb[62].mxu0 %vm127_vm1, %v126_v2 }
  0xdb   :  { %v12289_v3 = vpop.f32.mrb[0].mxu0 }
  0xdc   :  { %v711_v4 = vsel %vm19866_vm4, %v12289_v3, 0.0  ;;  %v844_v5 = vmul.f32 %v12289_v3, %v12289_v3  ;;  %v12295_v6 = vpop.f32.mrb[1].mxu0 }
  0xdd   :  { %v710_v7 = vsel %vm19866_vm4, %v12295_v6, 0.0  ;;  %v843_v8 = vmul.f32 %v12295_v6, %v12295_v6 }
  0xde   :  { %v908_v9 = vsel %vm19866_vm4, %v844_v5, 0.0  ;;  %v712_v10 = vadd.f32 %v711_v4, %v710_v7 }
  0xdf   :  { %v907_v11 = vsel %vm19866_vm4, %v843_v8, 0.0  ;;  %v12303_v12 = vpop.f32.mrb[2].mxu0 }
  0xe0   :  { %v909_v13 = vadd.f32 %v908_v9, %v907_v11  ;;  %v12305_v14 = vpop.f32.mrb[3].mxu0  ;;  %v846_v15 = vmul.f32 %v12303_v12, %v12303_v12  ;;  %v715_v19 = vsel %vm19866_vm4, %v12303_v12, 0.0 }
  0xe1   :  { %v713_v16 = vsel %vm19866_vm4, %v12305_v14, 0.0  ;;  %v845_v17 = vmul.f32 %v12305_v14, %v12305_v14 }
  0xe2   :  { %v714_v18 = vadd.f32 %v713_v16, %v712_v10  ;;  %v912_v25 = vsel %vm19866_vm4, %v846_v15, 0.0 }
  0xe3   :  { %v910_v20 = vsel %vm19866_vm4, %v845_v17, 0.0  ;;  %v12316_v21 = vpop.f32.mrb[4].mxu0 }
  0xe4   :  { %v716_v22 = vadd.f32 %v715_v19, %v714_v18  ;;  %v911_v23 = vadd.f32 %v910_v20, %v909_v13  ;;  %v12318_v24 = vpop.f32.mrb[5].mxu0  ;;  %v848_v26 = vmul.f32 %v12316_v21, %v12316_v21  ;;  %v719_v31 = vsel %vm19866_vm4, %v12316_v21, 0.0 }
  0xe5   :  { %v717_v27 = vsel %vm19866_vm4, %v12318_v24, 0.0  ;;  %v847_v28 = vmul.f32 %v12318_v24, %v12318_v24 }
  0xe6   :  { %v913_v29 = vadd.f32 %v912_v25, %v911_v23  ;;  %v718_v30 = vadd.f32 %v717_v27, %v716_v22  ;;  %v916_v37 = vsel %vm19866_vm4, %v848_v26, 0.0 }
  0xe7   :  { %v914_v32 = vsel %vm19866_vm4, %v847_v28, 0.0  ;;  %v12330_v33 = vpop.f32.mrb[6].mxu0 }
  0xe8   :  { %v915_v34 = vadd.f32 %v914_v32, %v913_v29  ;;  %v12332_v35 = vpop.f32.mrb[7].mxu0  ;;  %v720_v36 = vadd.f32 %v719_v31, %v718_v30  ;;  %v850_v38 = vmul.f32 %v12330_v33, %v12330_v33  ;;  %v723_v43 = vsel %vm19866_vm4, %v12330_v33, 0.0 }
  0xe9   :  { %v721_v39 = vsel %vm19866_vm4, %v12332_v35, 0.0  ;;  %v849_v40 = vmul.f32 %v12332_v35, %v12332_v35 }
  0xea   :  { %v722_v41 = vadd.f32 %v721_v39, %v720_v36  ;;  %v917_v42 = vadd.f32 %v916_v37, %v915_v34  ;;  %v920_v49 = vsel %vm19866_vm4, %v850_v38, 0.0 }
  0xeb   :  { %v918_v44 = vsel %vm19866_vm4, %v849_v40, 0.0  ;;  %v12344_v45 = vpop.f32.mrb[8].mxu0 }
  0xec   :  { %v919_v46 = vadd.f32 %v918_v44, %v917_v42  ;;  %v12346_v47 = vpop.f32.mrb[9].mxu0  ;;  %v724_v48 = vadd.f32 %v723_v43, %v722_v41  ;;  %v852_v50 = vmul.f32 %v12344_v45, %v12344_v45  ;;  %v727_v55 = vsel %vm19866_vm4, %v12344_v45, 0.0 }
  0xed   :  { %v725_v51 = vsel %vm19866_vm4, %v12346_v47, 0.0  ;;  %v851_v52 = vmul.f32 %v12346_v47, %v12346_v47 }
  0xee   :  { %v726_v53 = vadd.f32 %v725_v51, %v724_v48  ;;  %v921_v54 = vadd.f32 %v920_v49, %v919_v46  ;;  %v924_v61 = vsel %vm19866_vm4, %v852_v50, 0.0 }
  0xef   :  { %v922_v56 = vsel %vm19866_vm4, %v851_v52, 0.0  ;;  %v12358_v57 = vpop.f32.mrb[10].mxu0 }
  0xf0   :  { %v923_v58 = vadd.f32 %v922_v56, %v921_v54  ;;  %v12360_v59 = vpop.f32.mrb[11].mxu0  ;;  %v728_v60 = vadd.f32 %v727_v55, %v726_v53  ;;  %v854_v62 = vmul.f32 %v12358_v57, %v12358_v57  ;;  %v731_v4 = vsel %vm19866_vm4, %v12358_v57, 0.0 }
  0xf1   :  { %v729_v63 = vsel %vm19866_vm4, %v12360_v59, 0.0  ;;  %v853_v0 = vmul.f32 %v12360_v59, %v12360_v59 }
  0xf2   :  { %v730_v1 = vadd.f32 %v729_v63, %v728_v60  ;;  %v925_v2 = vadd.f32 %v924_v61, %v923_v58  ;;  %v928_v11 = vsel %vm19866_vm4, %v854_v62, 0.0 }
  0xf3   :  { %v926_v5 = vsel %vm19866_vm4, %v853_v0, 0.0  ;;  %v12372_v7 = vpop.f32.mrb[12].mxu0 }
  0xf4   :  { %v927_v8 = vadd.f32 %v926_v5, %v925_v2  ;;  %v12374_v9 = vpop.f32.mrb[13].mxu0  ;;  %v732_v10 = vadd.f32 %v731_v4, %v730_v1  ;;  %v856_v13 = vmul.f32 %v12372_v7, %v12372_v7  ;;  %v735_v19 = vsel %vm19866_vm4, %v12372_v7, 0.0 }
  0xf5   :  { %v733_v15 = vsel %vm19866_vm4, %v12374_v9, 0.0  ;;  %v855_v16 = vmul.f32 %v12374_v9, %v12374_v9 }
  0xf6   :  { %v734_v17 = vadd.f32 %v733_v15, %v732_v10  ;;  %v929_v18 = vadd.f32 %v928_v11, %v927_v8  ;;  %v932_v27 = vsel %vm19866_vm4, %v856_v13, 0.0 }
  0xf7   :  { %v930_v20 = vsel %vm19866_vm4, %v855_v16, 0.0  ;;  %v12386_v22 = vpop.f32.mrb[14].mxu0 }
  0xf8   :  { %v931_v23 = vadd.f32 %v930_v20, %v929_v18  ;;  %v12388_v25 = vpop.f32.mrb[15].mxu0  ;;  %v736_v26 = vadd.f32 %v735_v19, %v734_v17  ;;  %v858_v28 = vmul.f32 %v12386_v22, %v12386_v22  ;;  %v739_v34 = vsel %vm19866_vm4, %v12386_v22, 0.0 }
  0xf9   :  { %v737_v29 = vsel %vm19866_vm4, %v12388_v25, 0.0  ;;  %v857_v30 = vmul.f32 %v12388_v25, %v12388_v25 }
  0xfa   :  { %v738_v31 = vadd.f32 %v737_v29, %v736_v26  ;;  %v933_v32 = vadd.f32 %v932_v27, %v931_v23  ;;  %v936_v41 = vsel %vm19866_vm4, %v858_v28, 0.0 }
  0xfb   :  { %v934_v36 = vsel %vm19866_vm4, %v857_v30, 0.0  ;;  %v12400_v37 = vpop.f32.mrb[16].mxu0 }
  0xfc   :  { %v935_v38 = vadd.f32 %v934_v36, %v933_v32  ;;  %v12402_v39 = vpop.f32.mrb[17].mxu0  ;;  %v740_v40 = vadd.f32 %v739_v34, %v738_v31  ;;  %v860_v42 = vmul.f32 %v12400_v37, %v12400_v37  ;;  %v743_v49 = vsel %vm19866_vm4, %v12400_v37, 0.0 }
  0xfd   :  { %v741_v43 = vsel %vm19866_vm4, %v12402_v39, 0.0  ;;  %v859_v44 = vmul.f32 %v12402_v39, %v12402_v39 }
  0xfe   :  { %v742_v46 = vadd.f32 %v741_v43, %v740_v40  ;;  %v937_v48 = vadd.f32 %v936_v41, %v935_v38  ;;  %v940_v55 = vsel %vm19866_vm4, %v860_v42, 0.0 }
  0xff   :  { %v938_v50 = vsel %vm19866_vm4, %v859_v44, 0.0  ;;  %v12414_v51 = vpop.f32.mrb[18].mxu0 }
 0x100   :  { %v939_v52 = vadd.f32 %v938_v50, %v937_v48  ;;  %v12416_v53 = vpop.f32.mrb[19].mxu0  ;;  %v744_v54 = vadd.f32 %v743_v49, %v742_v46  ;;  %v862_v56 = vmul.f32 %v12414_v51, %v12414_v51  ;;  %v747_v63 = vsel %vm19866_vm4, %v12414_v51, 0.0 }
 0x101   :  { %v745_v58 = vsel %vm19866_vm4, %v12416_v53, 0.0  ;;  %v861_v60 = vmul.f32 %v12416_v53, %v12416_v53 }
 0x102   :  { %v746_v61 = vadd.f32 %v745_v58, %v744_v54  ;;  %v941_v62 = vadd.f32 %v940_v55, %v939_v52  ;;  %v944_v8 = vsel %vm19866_vm4, %v862_v56, 0.0  ;;  %v24_v52 = vld [vmem:[%s19777_s1 + $0x98] sm:$0xff] }
 0x103   :  { %v942_v0 = vsel %vm19866_vm4, %v861_v60, 0.0  ;;  %v12428_v1 = vpop.f32.mrb[20].mxu0  ;;  %11771 = vmatprep.subr.mxu1 %v24_v52  ;;  %11329 = vmatprep.subr.mxu0 %v24_v52 }
 0x104   :  { %v943_v2 = vadd.f32 %v942_v0, %v941_v62  ;;  %v12430_v4 = vpop.f32.mrb[21].mxu0  ;;  %v748_v5 = vadd.f32 %v747_v63, %v746_v61  ;;  %v864_v10 = vmul.f32 %v12428_v1, %v12428_v1  ;;  %v751_v17 = vsel %vm19866_vm4, %v12428_v1, 0.0  ;;  %11772 = vmatpush3.msra.mxu1 %v24_v52  ;;  %11330 = vmatpush3.msra.mxu0 %v24_v52 }
 0x105   :  { %v749_v11 = vsel %vm19866_vm4, %v12430_v4, 0.0  ;;  %v863_v13 = vmul.f32 %v12430_v4, %v12430_v4 }
 0x106   :  { %v750_v15 = vadd.f32 %v749_v11, %v748_v5  ;;  %v945_v16 = vadd.f32 %v944_v8, %v943_v2  ;;  %v948_v27 = vsel %vm19866_vm4, %v864_v10, 0.0 }
 0x107   :  { %v946_v18 = vsel %vm19866_vm4, %v863_v13, 0.0  ;;  %v12442_v19 = vpop.f32.mrb[22].mxu0 }
 0x108   :  { %v947_v20 = vadd.f32 %v946_v18, %v945_v16  ;;  %v12444_v23 = vpop.f32.mrb[23].mxu0  ;;  %v752_v26 = vadd.f32 %v751_v17, %v750_v15  ;;  %v866_v28 = vmul.f32 %v12442_v19, %v12442_v19  ;;  %v755_v34 = vsel %vm19866_vm4, %v12442_v19, 0.0 }
 0x109   :  { %v753_v29 = vsel %vm19866_vm4, %v12444_v23, 0.0  ;;  %v865_v30 = vmul.f32 %v12444_v23, %v12444_v23 }
 0x10a   :  { %v754_v31 = vadd.f32 %v753_v29, %v752_v26  ;;  %v949_v32 = vadd.f32 %v948_v27, %v947_v20  ;;  %v952_v43 = vsel %vm19866_vm4, %v866_v28, 0.0 }
 0x10b   :  { %v950_v36 = vsel %vm19866_vm4, %v865_v30, 0.0  ;;  %v12456_v38 = vpop.f32.mrb[24].mxu0 }
 0x10c   :  { %v951_v40 = vadd.f32 %v950_v36, %v949_v32  ;;  %v12458_v41 = vpop.f32.mrb[25].mxu0  ;;  %v756_v42 = vadd.f32 %v755_v34, %v754_v31  ;;  %v868_v44 = vmul.f32 %v12456_v38, %v12456_v38  ;;  %v759_v54 = vsel %vm19866_vm4, %v12456_v38, 0.0 }
 0x10d   :  { %v757_v46 = vsel %vm19866_vm4, %v12458_v41, 0.0  ;;  %v867_v48 = vmul.f32 %v12458_v41, %v12458_v41 }
 0x10e   :  { %v758_v49 = vadd.f32 %v757_v46, %v756_v42  ;;  %v953_v50 = vadd.f32 %v952_v43, %v951_v40  ;;  %v956_v62 = vsel %vm19866_vm4, %v868_v44, 0.0 }
 0x10f   :  { %v954_v55 = vsel %vm19866_vm4, %v867_v48, 0.0  ;;  %v12473_v56 = vpop.f32.mrb[26].mxu0 }
 0x110   :  { %v955_v58 = vadd.f32 %v954_v55, %v953_v50  ;;  %v12475_v60 = vpop.f32.mrb[27].mxu0  ;;  %v760_v61 = vadd.f32 %v759_v54, %v758_v49  ;;  %v870_v63 = vmul.f32 %v12473_v56, %v12473_v56  ;;  %v763_v10 = vsel %vm19866_vm4, %v12473_v56, 0.0 }
 0x111   :  { %v761_v0 = vsel %vm19866_vm4, %v12475_v60, 0.0  ;;  %v869_v2 = vmul.f32 %v12475_v60, %v12475_v60 }
 0x112   :  { %v762_v5 = vadd.f32 %v761_v0, %v760_v61  ;;  %v957_v8 = vadd.f32 %v956_v62, %v955_v58  ;;  %v960_v18 = vsel %vm19866_vm4, %v870_v63, 0.0 }
 0x113   :  { %v958_v11 = vsel %vm19866_vm4, %v869_v2, 0.0  ;;  %v12487_v13 = vpop.f32.mrb[28].mxu0 }
 0x114   :  { %v959_v15 = vadd.f32 %v958_v11, %v957_v8  ;;  %v12489_v16 = vpop.f32.mrb[29].mxu0  ;;  %v764_v17 = vadd.f32 %v763_v10, %v762_v5  ;;  %v872_v20 = vmul.f32 %v12487_v13, %v12487_v13  ;;  %v767_v30 = vsel %vm19866_vm4, %v12487_v13, 0.0 }
 0x115   :  { %v765_v26 = vsel %vm19866_vm4, %v12489_v16, 0.0  ;;  %v871_v27 = vmul.f32 %v12489_v16, %v12489_v16 }
 0x116   :  { %v766_v28 = vadd.f32 %v765_v26, %v764_v17  ;;  %v961_v29 = vadd.f32 %v960_v18, %v959_v15  ;;  %v964_v42 = vsel %vm19866_vm4, %v872_v20, 0.0 }
 0x117   :  { %v962_v31 = vsel %vm19866_vm4, %v871_v27, 0.0  ;;  %v12501_v32 = vpop.f32.mrb[30].mxu0 }
 0x118   :  { %v963_v34 = vadd.f32 %v962_v31, %v961_v29  ;;  %v12503_v36 = vpop.f32.mrb[31].mxu0  ;;  %v768_v40 = vadd.f32 %v767_v30, %v766_v28  ;;  %v874_v43 = vmul.f32 %v12501_v32, %v12501_v32  ;;  %v771_v50 = vsel %vm19866_vm4, %v12501_v32, 0.0 }
 0x119   :  { %v769_v44 = vsel %vm19866_vm4, %v12503_v36, 0.0  ;;  %v873_v46 = vmul.f32 %v12503_v36, %v12503_v36 }
 0x11a   :  { %v770_v48 = vadd.f32 %v769_v44, %v768_v40  ;;  %v965_v49 = vadd.f32 %v964_v42, %v963_v34  ;;  %v968_v62 = vsel %vm19866_vm4, %v874_v43, 0.0 }
 0x11b   :  { %v966_v52 = vsel %vm19866_vm4, %v873_v46, 0.0  ;;  %v12515_v54 = vpop.f32.mrb[32].mxu0 }
 0x11c   :  { %v967_v55 = vadd.f32 %v966_v52, %v965_v49  ;;  %v12517_v58 = vpop.f32.mrb[33].mxu0  ;;  %v772_v61 = vadd.f32 %v771_v50, %v770_v48  ;;  %v876_v63 = vmul.f32 %v12515_v54, %v12515_v54  ;;  %v775_v10 = vsel %vm19866_vm4, %v12515_v54, 0.0 }
 0x11d   :  { %v773_v0 = vsel %vm19866_vm4, %v12517_v58, 0.0  ;;  %v875_v2 = vmul.f32 %v12517_v58, %v12517_v58 }
 0x11e   :  { %v774_v5 = vadd.f32 %v773_v0, %v772_v61  ;;  %v969_v8 = vadd.f32 %v968_v62, %v967_v55  ;;  %v972_v26 = vsel %vm19866_vm4, %v876_v63, 0.0 }
 0x11f   :  { %v970_v11 = vsel %vm19866_vm4, %v875_v2, 0.0  ;;  %v12529_v15 = vpop.f32.mrb[34].mxu0 }
 0x120   :  { %v971_v17 = vadd.f32 %v970_v11, %v969_v8  ;;  %v12531_v18 = vpop.f32.mrb[35].mxu0  ;;  %v776_v20 = vadd.f32 %v775_v10, %v774_v5  ;;  %v878_v27 = vmul.f32 %v12529_v15, %v12529_v15  ;;  %v779_v34 = vsel %vm19866_vm4, %v12529_v15, 0.0 }
 0x121   :  { %v777_v28 = vsel %vm19866_vm4, %v12531_v18, 0.0  ;;  %v877_v29 = vmul.f32 %v12531_v18, %v12531_v18 }
 0x122   :  { %v778_v30 = vadd.f32 %v777_v28, %v776_v20  ;;  %v973_v31 = vadd.f32 %v972_v26, %v971_v17  ;;  %v976_v48 = vsel %vm19866_vm4, %v878_v27, 0.0 }
 0x123   :  { %v974_v40 = vsel %vm19866_vm4, %v877_v29, 0.0  ;;  %v12543_v42 = vpop.f32.mrb[36].mxu0 }
 0x124   :  { %v975_v43 = vadd.f32 %v974_v40, %v973_v31  ;;  %v12545_v44 = vpop.f32.mrb[37].mxu0  ;;  %v780_v46 = vadd.f32 %v779_v34, %v778_v30  ;;  %v880_v49 = vmul.f32 %v12543_v42, %v12543_v42  ;;  %v783_v62 = vsel %vm19866_vm4, %v12543_v42, 0.0 }
 0x125   :  { %v781_v50 = vsel %vm19866_vm4, %v12545_v44, 0.0  ;;  %v879_v52 = vmul.f32 %v12545_v44, %v12545_v44 }
 0x126   :  { %v782_v55 = vadd.f32 %v781_v50, %v780_v46  ;;  %v977_v61 = vadd.f32 %v976_v48, %v975_v43  ;;  %v980_v10 = vsel %vm19866_vm4, %v880_v49, 0.0 }
 0x127   :  { %v978_v63 = vsel %vm19866_vm4, %v879_v52, 0.0  ;;  %v12557_v0 = vpop.f32.mrb[38].mxu0 }
 0x128   :  { %20485 = vst [vmem:[#allocation5_spill] sm:$0xff] %v12557_v0  ;;  %v979_v2 = vadd.f32 %v978_v63, %v977_v61  ;;  %v12559_v5 = vpop.f32.mrb[39].mxu0  ;;  %v784_v8 = vadd.f32 %v783_v62, %v782_v55  ;;  %v882_v11 = vmul.f32 %v12557_v0, %v12557_v0  ;;  %v787_v28 = vsel %vm19866_vm4, %v12557_v0, 0.0 }
 0x129   :  { %v785_v17 = vsel %vm19866_vm4, %v12559_v5, 0.0  ;;  %v881_v20 = vmul.f32 %v12559_v5, %v12559_v5 }
 0x12a   :  { %v786_v26 = vadd.f32 %v785_v17, %v784_v8  ;;  %v981_v27 = vadd.f32 %v980_v10, %v979_v2  ;;  %v984_v43 = vsel %vm19866_vm4, %v882_v11, 0.0 }
 0x12b   :  { %v982_v29 = vsel %vm19866_vm4, %v881_v20, 0.0  ;;  %v12571_v30 = vpop.f32.mrb[40].mxu0 }
 0x12c   :  { %20486 = vst [vmem:[#allocation6_spill] sm:$0xff] %v12571_v30  ;;  %v983_v31 = vadd.f32 %v982_v29, %v981_v27  ;;  %v12573_v34 = vpop.f32.mrb[41].mxu0  ;;  %v788_v40 = vadd.f32 %v787_v28, %v786_v26  ;;  %v884_v46 = vmul.f32 %v12571_v30, %v12571_v30  ;;  %v791_v55 = vsel %vm19866_vm4, %v12571_v30, 0.0 }
 0x12d   :  { %20487 = vst [vmem:[#allocation7_spill] sm:$0xff] %v12573_v34  ;;  %v789_v48 = vsel %vm19866_vm4, %v12573_v34, 0.0  ;;  %v883_v49 = vmul.f32 %v12573_v34, %v12573_v34 }
 0x12e   :  { %v790_v50 = vadd.f32 %v789_v48, %v788_v40  ;;  %v985_v52 = vadd.f32 %v984_v43, %v983_v31  ;;  %v988_v10 = vsel %vm19866_vm4, %v884_v46, 0.0 }
 0x12f   :  { %v986_v61 = vsel %vm19866_vm4, %v883_v49, 0.0  ;;  %v12585_v62 = vpop.f32.mrb[42].mxu0 }
 0x130   :  { %20488 = vst [vmem:[#allocation8_spill] sm:$0xff] %v12585_v62  ;;  %v987_v63 = vadd.f32 %v986_v61, %v985_v52  ;;  %v12587_v2 = vpop.f32.mrb[43].mxu0  ;;  %v792_v8 = vadd.f32 %v791_v55, %v790_v50  ;;  %v886_v11 = vmul.f32 %v12585_v62, %v12585_v62  ;;  %v795_v28 = vsel %vm19866_vm4, %v12585_v62, 0.0 }
 0x131   :  { %20489 = vst [vmem:[#allocation9_spill] sm:$0xff] %v12587_v2  ;;  %v793_v17 = vsel %vm19866_vm4, %v12587_v2, 0.0  ;;  %v885_v20 = vmul.f32 %v12587_v2, %v12587_v2 }
 0x132   :  { %v794_v26 = vadd.f32 %v793_v17, %v792_v8  ;;  %v989_v27 = vadd.f32 %v988_v10, %v987_v63  ;;  %v992_v48 = vsel %vm19866_vm4, %v886_v11, 0.0 }
 0x133   :  { %v990_v29 = vsel %vm19866_vm4, %v885_v20, 0.0  ;;  %v12599_v31 = vpop.f32.mrb[44].mxu0 }
 0x134   :  { %20490 = vst [vmem:[#allocation10_spill] sm:$0xff] %v12599_v31  ;;  %v991_v40 = vadd.f32 %v990_v29, %v989_v27  ;;  %v12601_v43 = vpop.f32.mrb[45].mxu0  ;;  %v796_v46 = vadd.f32 %v795_v28, %v794_v26  ;;  %v888_v49 = vmul.f32 %v12599_v31, %v12599_v31  ;;  %v799_v63 = vsel %vm19866_vm4, %v12599_v31, 0.0 }
 0x135   :  { %20491 = vst [vmem:[#allocation11_spill] sm:$0xff] %v12601_v43  ;;  %v797_v50 = vsel %vm19866_vm4, %v12601_v43, 0.0  ;;  %v887_v52 = vmul.f32 %v12601_v43, %v12601_v43 }
 0x136   :  { %v798_v55 = vadd.f32 %v797_v50, %v796_v46  ;;  %v993_v61 = vadd.f32 %v992_v48, %v991_v40  ;;  %v996_v26 = vsel %vm19866_vm4, %v888_v49, 0.0 }
 0x137   :  { %v994_v8 = vsel %vm19866_vm4, %v887_v52, 0.0  ;;  %v12613_v10 = vpop.f32.mrb[46].mxu0 }
 0x138   :  { %20492 = vst [vmem:[#allocation12_spill] sm:$0xff] %v12613_v10  ;;  %v995_v17 = vadd.f32 %v994_v8, %v993_v61  ;;  %v12615_v11 = vpop.f32.mrb[47].mxu0  ;;  %v800_v20 = vadd.f32 %v799_v63, %v798_v55  ;;  %v890_v27 = vmul.f32 %v12613_v10, %v12613_v10  ;;  %v803_v48 = vsel %vm19866_vm4, %v12613_v10, 0.0 }
 0x139   :  { %20493 = vst [vmem:[#allocation13_spill] sm:$0xff] %v12615_v11  ;;  %v801_v28 = vsel %vm19866_vm4, %v12615_v11, 0.0  ;;  %v889_v29 = vmul.f32 %v12615_v11, %v12615_v11 }
 0x13a   :  { %v802_v40 = vadd.f32 %v801_v28, %v800_v20  ;;  %v997_v46 = vadd.f32 %v996_v26, %v995_v17  ;;  %v1000_v63 = vsel %vm19866_vm4, %v890_v27, 0.0 }
 0x13b   :  { %v998_v50 = vsel %vm19866_vm4, %v889_v29, 0.0  ;;  %v12627_v52 = vpop.f32.mrb[48].mxu0 }
 0x13c   :  { %20494 = vst [vmem:[#allocation14_spill] sm:$0xff] %v12627_v52  ;;  %v999_v55 = vadd.f32 %v998_v50, %v997_v46  ;;  %v12629_v49 = vpop.f32.mrb[49].mxu0  ;;  %v804_v61 = vadd.f32 %v803_v48, %v802_v40  ;;  %v892_v8 = vmul.f32 %v12627_v52, %v12627_v52  ;;  %v807_v29 = vsel %vm19866_vm4, %v12627_v52, 0.0 }
 0x13d   :  { %20495 = vst [vmem:[#allocation15_spill] sm:$0xff] %v12629_v49  ;;  %v805_v20 = vsel %vm19866_vm4, %v12629_v49, 0.0  ;;  %v891_v17 = vmul.f32 %v12629_v49, %v12629_v49 }
 0x13e   :  { %v806_v26 = vadd.f32 %v805_v20, %v804_v61  ;;  %v1001_v28 = vadd.f32 %v1000_v63, %v999_v55  ;;  %v1004_v10 = vsel %vm19866_vm4, %v892_v8, 0.0 }
 0x13f   :  { %v1002_v46 = vsel %vm19866_vm4, %v891_v17, 0.0  ;;  %v12641_v50 = vpop.f32.mrb[50].mxu0 }
 0x140   :  { %20496 = vst [vmem:[#allocation16_spill] sm:$0xff] %v12641_v50  ;;  %v1003_v40 = vadd.f32 %v1002_v46, %v1001_v28  ;;  %v12643_v27 = vpop.f32.mrb[51].mxu0  ;;  %v808_v48 = vadd.f32 %v807_v29, %v806_v26  ;;  %v894_v11 = vmul.f32 %v12641_v50, %v12641_v50  ;;  %v811_v17 = vsel %vm19866_vm4, %v12641_v50, 0.0 }
 0x141   :  { %20497 = vst [vmem:[#allocation17_spill] sm:$0xff] %v12643_v27  ;;  %v809_v61 = vsel %vm19866_vm4, %v12643_v27, 0.0  ;;  %v893_v55 = vmul.f32 %v12643_v27, %v12643_v27 }
 0x142   :  { %v810_v63 = vadd.f32 %v809_v61, %v808_v48  ;;  %v1005_v20 = vadd.f32 %v1004_v10, %v1003_v40  ;;  %v1008_v52 = vsel %vm19866_vm4, %v894_v11, 0.0 }
 0x143   :  { %v1006_v28 = vsel %vm19866_vm4, %v893_v55, 0.0  ;;  %v12655_v46 = vpop.f32.mrb[52].mxu0 }
 0x144   :  { %20498 = vst [vmem:[#allocation18_spill] sm:$0xff] %v12655_v46  ;;  %v1007_v26 = vadd.f32 %v1006_v28, %v1005_v20  ;;  %v12657_v8 = vpop.f32.mrb[53].mxu0  ;;  %v812_v29 = vadd.f32 %v811_v17, %v810_v63  ;;  %v896_v49 = vmul.f32 %v12655_v46, %v12655_v46  ;;  %v815_v55 = vsel %vm19866_vm4, %v12655_v46, 0.0 }
 0x145   :  { %20499 = vst [vmem:[#allocation19_spill] sm:$0xff] %v12657_v8  ;;  %v813_v48 = vsel %vm19866_vm4, %v12657_v8, 0.0  ;;  %v895_v10 = vmul.f32 %v12657_v8, %v12657_v8 }
 0x146   :  { %v814_v40 = vadd.f32 %v813_v48, %v812_v29  ;;  %v1009_v61 = vadd.f32 %v1008_v52, %v1007_v26  ;;  %v1012_v50 = vsel %vm19866_vm4, %v896_v49, 0.0 }
 0x147   :  { %v1010_v20 = vsel %vm19866_vm4, %v895_v10, 0.0  ;;  %v12669_v28 = vpop.f32.mrb[54].mxu0 }
 0x148   :  { %20500 = vst [vmem:[#allocation20_spill] sm:$0xff] %v12669_v28  ;;  %v1011_v63 = vadd.f32 %v1010_v20, %v1009_v61  ;;  %v12671_v11 = vpop.f32.mrb[55].mxu0  ;;  %v816_v17 = vadd.f32 %v815_v55, %v814_v40  ;;  %v898_v27 = vmul.f32 %v12669_v28, %v12669_v28  ;;  %v819_v10 = vsel %vm19866_vm4, %v12669_v28, 0.0 }
 0x149   :  { %20501 = vst [vmem:[#allocation21_spill] sm:$0xff] %v12671_v11  ;;  %v817_v29 = vsel %vm19866_vm4, %v12671_v11, 0.0  ;;  %v897_v52 = vmul.f32 %v12671_v11, %v12671_v11 }
 0x14a   :  { %v818_v26 = vadd.f32 %v817_v29, %v816_v17  ;;  %v1013_v48 = vadd.f32 %v1012_v50, %v1011_v63  ;;  %v1016_v46 = vsel %vm19866_vm4, %v898_v27, 0.0 }
 0x14b   :  { %v1014_v61 = vsel %vm19866_vm4, %v897_v52, 0.0  ;;  %v12683_v20 = vpop.f32.mrb[56].mxu0 }
 0x14c   :  { %20502 = vst [vmem:[#allocation22_spill] sm:$0xff] %v12683_v20  ;;  %v1015_v40 = vadd.f32 %v1014_v61, %v1013_v48  ;;  %v12685_v49 = vpop.f32.mrb[57].mxu0  ;;  %v820_v55 = vadd.f32 %v819_v10, %v818_v26  ;;  %v900_v8 = vmul.f32 %v12683_v20, %v12683_v20  ;;  %v823_v52 = vsel %vm19866_vm4, %v12683_v20, 0.0 }
 0x14d   :  { %20503 = vst [vmem:[#allocation23_spill] sm:$0xff] %v12685_v49  ;;  %v821_v17 = vsel %vm19866_vm4, %v12685_v49, 0.0  ;;  %v899_v50 = vmul.f32 %v12685_v49, %v12685_v49 }
 0x14e   :  { %v822_v63 = vadd.f32 %v821_v17, %v820_v55  ;;  %v1017_v29 = vadd.f32 %v1016_v46, %v1015_v40  ;;  %v1020_v28 = vsel %vm19866_vm4, %v900_v8, 0.0 }
 0x14f   :  { %v1018_v48 = vsel %vm19866_vm4, %v899_v50, 0.0  ;;  %v12697_v61 = vpop.f32.mrb[58].mxu0 }
 0x150   :  { %20504 = vst [vmem:[#allocation24_spill] sm:$0xff] %v12697_v61  ;;  %v1019_v26 = vadd.f32 %v1018_v48, %v1017_v29  ;;  %v12699_v27 = vpop.f32.mrb[59].mxu0  ;;  %v824_v10 = vadd.f32 %v823_v52, %v822_v63  ;;  %v902_v11 = vmul.f32 %v12697_v61, %v12697_v61  ;;  %v827_v50 = vsel %vm19866_vm4, %v12697_v61, 0.0 }
 0x151   :  { %20505 = vst [vmem:[#allocation25_spill] sm:$0xff] %v12699_v27  ;;  %v825_v55 = vsel %vm19866_vm4, %v12699_v27, 0.0  ;;  %v901_v46 = vmul.f32 %v12699_v27, %v12699_v27 }
 0x152   :  { %v826_v40 = vadd.f32 %v825_v55, %v824_v10  ;;  %v1021_v17 = vadd.f32 %v1020_v28, %v1019_v26  ;;  %v1024_v20 = vsel %vm19866_vm4, %v902_v11, 0.0 }
 0x153   :  { %v1022_v29 = vsel %vm19866_vm4, %v901_v46, 0.0  ;;  %v12711_v48 = vpop.f32.mrb[60].mxu0 }
 0x154   :  { %20506 = vst [vmem:[#allocation26_spill] sm:$0xff] %v12711_v48  ;;  %v1023_v63 = vadd.f32 %v1022_v29, %v1021_v17  ;;  %v12713_v8 = vpop.f32.mrb[61].mxu0  ;;  %v828_v52 = vadd.f32 %v827_v50, %v826_v40  ;;  %v904_v49 = vmul.f32 %v12711_v48, %v12711_v48  ;;  %v831_v46 = vsel %vm19866_vm4, %v12711_v48, 0.0 }
 0x155   :  { %20507 = vst [vmem:[#allocation27_spill] sm:$0xff] %v12713_v8  ;;  %v829_v10 = vsel %vm19866_vm4, %v12713_v8, 0.0  ;;  %v903_v28 = vmul.f32 %v12713_v8, %v12713_v8 }
 0x156   :  { %v830_v26 = vadd.f32 %v829_v10, %v828_v52  ;;  %v1025_v55 = vadd.f32 %v1024_v20, %v1023_v63  ;;  %v1028_v61 = vsel %vm19866_vm4, %v904_v49, 0.0 }
 0x157   :  { %v1026_v17 = vsel %vm19866_vm4, %v903_v28, 0.0  ;;  %v12725_v29 = vpop.f32.mrb[62].mxu0 }
 0x158   :  { %20508 = vst [vmem:[#allocation28_spill] sm:$0xff] %v12725_v29  ;;  %v1027_v40 = vadd.f32 %v1026_v17, %v1025_v55  ;;  %v12727_v11 = vpop.f32.mrb[63].mxu0  ;;  %v832_v50 = vadd.f32 %v831_v46, %v830_v26  ;;  %v906_v27 = vmul.f32 %v12725_v29, %v12725_v29  ;;  %v835_v28 = vsel %vm19866_vm4, %v12725_v29, 0.0 }
 0x159   :  { %v833_v52 = vsel %vm19866_vm4, %v12727_v11, 0.0  ;;  %v905_v20 = vmul.f32 %v12727_v11, %v12727_v11 }
 0x15a   :  { %v834_v63 = vadd.f32 %v833_v52, %v832_v50  ;;  %v1029_v10 = vadd.f32 %v1028_v61, %v1027_v40  ;;  %v1032_v49 = vsel %vm19866_vm4, %v906_v27, 0.0  ;;  %v1112_v61 = vlaneseq }
 0x15b   :  { %v1030_v55 = vsel %vm19866_vm4, %v905_v20, 0.0 }
 0x15c   :  { %v836_v17 = vadd.f32 %v835_v28, %v834_v63  ;;  %v1031_v26 = vadd.f32 %v1030_v55, %v1029_v10  ;;  %v12742_v20 = vshrl.u32 %v1112_v61, 7  ;;  %v20513_v61 = vld [vmem:[#allocation9_spill] sm:$0xff]  ;;  %v20530_v10 = vld [vmem:[#allocation24_spill] sm:$0xff] }
 0x15e   :  { %v837_v46 = vrot.slane %v836_v17, 4  ;;  %v1033_v48 = vadd.f32 %v1032_v49, %v1031_v26  ;;  %20509 = vst [vmem:[#allocation29_spill] sm:$0xff] %v12742_v20  ;;  %v12874_v26 = vsub.s32 0, %v12742_v20 }
 0x15f   :  { %v20535_v28 = vld [vmem:[#allocation28_spill] sm:$0xff] }
 0x160   :  { %v838_v8 = vadd.f32 %v837_v46, %v836_v17  ;;  %v1034_v31 = vrot.slane %v1033_v48, 4  ;;  %v20511_v46 = vld [vmem:[#allocation7_spill] sm:$0xff]  ;;  %v12877_v17 = vsub.s32 1, %v12742_v20 }
 0x162   :  { %v839_v43 = vrot.slane %v838_v8, 2  ;;  %v1035_v62 = vadd.f32 %v1034_v31, %v1033_v48  ;;  %20533 = vst [vmem:[#allocation7_spill] sm:$0xff] %v12877_v17 }
 0x164   :  { %v840_v2 = vadd.f32 %v839_v43, %v838_v8  ;;  %v1036_v30 = vrot.slane %v1035_v62, 2 }
 0x166   :  { %v841_v34 = vrot.slane %v840_v2, 1  ;;  %v1037_v50 = vadd.f32 %v1036_v30, %v1035_v62  ;;  %v20534_v62 = vld [vmem:[#allocation26_spill] sm:$0xff] }
 0x168   :  { %v842_v40 = vadd.f32 %v841_v34, %v840_v2  ;;  %v1038_v52 = vrot.slane %v1037_v50, 1  ;;  %v59_v34 = vld [vmem:[%s19778_s2] sm:$0x3] }
 0x169   :  { %v12887_v8 = vrot.slane %v59_v34, %v12877_v17 }
 0x16a   :  { %v1039_v29 = vadd.f32 %v1038_v52, %v1037_v50  ;;  %v12740_v0 = vmul.f32 0.001953125, %v842_v40  ;;  %v20512_v50 = vld [vmem:[#allocation6_spill] sm:$0xff]  ;;  %v20514_v40 = vld [vmem:[#allocation8_spill] sm:$0xff]  ;;  %v20515_v52 = vld [vmem:[#allocation11_spill] sm:$0xff] }
 0x16c   :  { %v1041_v63 = vmul.f32 0.001953125, %v1039_v29  ;;  %v1042_v27 = vmul.f32 %v12740_v0, %v12740_v0  ;;  %v20536_v48 = vsub.f32 %v12727_v11, %v12740_v0  ;;  %v20540_v11 = vsub.f32 %v12303_v12, %v12740_v0 }
 0x16e   :  { %v1043_v43 = vsub.f32 %v1041_v63, %v1042_v27  ;;  %v20516_v63 = vld [vmem:[#allocation10_spill] sm:$0xff]  ;;  %v20537_v27 = vsub.f32 %v12295_v6, %v12740_v0 }
 0x170   :  { %v1044_v49 = vmax.f32 %v1043_v43, 0.0 }
 0x172   :  { %v1109_v43 = vadd.f32 1e-05, %v1044_v49  ;;  %v20517_v49 = vld [vmem:[#allocation13_spill] sm:$0xff] }
 0x174   :  { %11955 = vrsqrt.f32 %v1109_v43  ;;  %v20510_v43 = vld [vmem:[#allocation5_spill] sm:$0xff] }
 0x175   :  { %20532 = vst [vmem:[#allocation5_spill] sm:$0xff] %v12874_v26 }
 0x17e   :  { %v11956_v55 = vpop.eup %11955 }
 0x17f   :  { %v1111_v29 = vmul.f32 %v11956_v55, %v59_v34  ;;  %v20538_v55 = vsub.f32 %v12289_v3, %v12740_v0  ;;  %v20539_v34 = vsub.f32 %v12305_v14, %v12740_v0  ;;  %v20543_v14 = vsub.f32 %v12332_v35, %v12740_v0 }
 0x180   :  { %v20546_v35 = vsub.f32 %v12344_v45, %v12740_v0  ;;  %v20550_v45 = vsub.f32 %v12372_v7, %v12740_v0  ;;  %v20554_v7 = vsub.f32 %v12400_v37, %v12740_v0  ;;  %v20558_v37 = vsub.f32 %v12428_v1, %v12740_v0 }
 0x181   :  { %v12884_v31 = vrot.slane %v1111_v29, %v12874_v26  ;;  %v20562_v1 = vsub.f32 %v12456_v38, %v12740_v0  ;;  %v20567_v38 = vsub.f32 %v12487_v13, %v12740_v0  ;;  %v20571_v13 = vsub.f32 %v12515_v54, %v12740_v0 }
 0x182   :  { %v20577_v54 = vsub.f32 %v12543_v42, %v12740_v0  ;;  %v20583_v42 = vsub.f32 %v20512_v50, %v12740_v0  ;;  %v20589_v50 = vsub.f32 %v20516_v63, %v12740_v0  ;;  %v20597_v63 = vld [vmem:[#allocation14_spill] sm:$0xff] }
 0x183   :  { %v1178_v20 = vmul.f32 %v12884_v31, %v20536_v48  ;;  %v12897_v2 = vmul.f32 %v12884_v31, %v20537_v27  ;;  %v12903_v29 = vmul.f32 %v12884_v31, %v20538_v55  ;;  %v12909_v30 = vmul.f32 %v12884_v31, %v20539_v34 }
 0x184   :  { %v12915_v6 = vmul.f32 %v12884_v31, %v20540_v11  ;;  %v20541_v48 = vsub.f32 %v12318_v24, %v12740_v0  ;;  %v20542_v27 = vsub.f32 %v12316_v21, %v12740_v0  ;;  %v12929_v34 = vmul.f32 %v12884_v31, %v20543_v14 }
 0x185   :  { %v12932_v12 = vadd.f32 %v12887_v8, %v1178_v20  ;;  %v20544_v11 = vsub.f32 %v12330_v33, %v12740_v0  ;;  %v20545_v21 = vsub.f32 %v12346_v47, %v12740_v0  ;;  %v20547_v20 = vsub.f32 %v12360_v59, %v12740_v0 }
 0x186   :  { %v1120_v3 = vmul.f32 %v12884_v31, %v20541_v48  ;;  %v1121_v55 = vmul.f32 %v12884_v31, %v20542_v27  ;;  %v1125_v27 = vmul.f32 %v12884_v31, %v20546_v35  ;;  %v20548_v33 = vsub.f32 %v12358_v57, %v12740_v0 }
 0x187   :  { %v12938_v24 = vmul.f32 %v12884_v31, %v20544_v11  ;;  %v1124_v48 = vmul.f32 %v12884_v31, %v20545_v21  ;;  %v12952_v14 = vmul.f32 %v12884_v31, %v20547_v20  ;;  %v20549_v47 = vsub.f32 %v12374_v9, %v12740_v0 }
 0x188   :  { %v12958_v11 = vmul.f32 %v12884_v31, %v20548_v33  ;;  %v1129_v35 = vmul.f32 %v12884_v31, %v20550_v45  ;;  %v20551_v59 = vsub.f32 %v12388_v25, %v12740_v0  ;;  %v20552_v57 = vsub.f32 %v12386_v22, %v12740_v0 }
 0x189   :  { %v1128_v21 = vmul.f32 %v12884_v31, %v20549_v47  ;;  %v20553_v9 = vsub.f32 %v12402_v39, %v12740_v0  ;;  %v1133_v45 = vmul.f32 %v12884_v31, %v20554_v7  ;;  %v20555_v25 = vsub.f32 %v12416_v53, %v12740_v0 }
 0x18a   :  { %v12972_v20 = vmul.f32 %v12884_v31, %v20551_v59  ;;  %v12978_v33 = vmul.f32 %v12884_v31, %v20552_v57  ;;  %v20556_v22 = vsub.f32 %v12414_v51, %v12740_v0  ;;  %v20557_v39 = vsub.f32 %v12430_v4, %v12740_v0 }
 0x18b   :  { %v1132_v47 = vmul.f32 %v12884_v31, %v20553_v9  ;;  %v12992_v59 = vmul.f32 %v12884_v31, %v20555_v25  ;;  %v1137_v7 = vmul.f32 %v12884_v31, %v20558_v37  ;;  %v20559_v53 = vsub.f32 %v12444_v23, %v12740_v0 }
 0x18c   :  { %v12998_v57 = vmul.f32 %v12884_v31, %v20556_v22  ;;  %v1136_v9 = vmul.f32 %v12884_v31, %v20557_v39  ;;  %v20560_v51 = vsub.f32 %v12442_v19, %v12740_v0  ;;  %v20561_v4 = vsub.f32 %v12458_v41, %v12740_v0 }
 0x18d   :  { %v13012_v25 = vmul.f32 %v12884_v31, %v20559_v53  ;;  %v1141_v37 = vmul.f32 %v12884_v31, %v20562_v1  ;;  %v20563_v23 = vsub.f32 %v12475_v60, %v12740_v0  ;;  %v20565_v19 = vsub.f32 %v12473_v56, %v12740_v0 }
 0x18e   :  { %v13018_v22 = vmul.f32 %v12884_v31, %v20560_v51  ;;  %v1140_v39 = vmul.f32 %v12884_v31, %v20561_v4  ;;  %v20566_v41 = vsub.f32 %v12489_v16, %v12740_v0  ;;  %v1145_v1 = vmul.f32 %v12884_v31, %v20567_v38 }
 0x18f   :  { %v13032_v53 = vmul.f32 %v12884_v31, %v20563_v23  ;;  %v1143_v51 = vmul.f32 %v12884_v31, %v20565_v19  ;;  %v20568_v60 = vsub.f32 %v12503_v36, %v12740_v0  ;;  %v20569_v56 = vsub.f32 %v12501_v32, %v12740_v0 }
 0x190   :  { %v1144_v4 = vmul.f32 %v12884_v31, %v20566_v41  ;;  %v20570_v16 = vsub.f32 %v12517_v58, %v12740_v0  ;;  %v1149_v38 = vmul.f32 %v12884_v31, %v20571_v13  ;;  %v20572_v36 = vsub.f32 %v12531_v18, %v12740_v0 }
 0x191   :  { %20564 = vst [vmem:[#allocation6_spill] sm:$0xff] %v13032_v53  ;;  %v1146_v23 = vmul.f32 %v12884_v31, %v20568_v60  ;;  %v1147_v19 = vmul.f32 %v12884_v31, %v20569_v56  ;;  %v20574_v32 = vsub.f32 %v12529_v15, %v12740_v0  ;;  %v20576_v58 = vsub.f32 %v12545_v44, %v12740_v0 }
 0x192   :  { %v1148_v41 = vmul.f32 %v12884_v31, %v20570_v16  ;;  %v13066_v60 = vmul.f32 %v12884_v31, %v20572_v36  ;;  %v1153_v13 = vmul.f32 %v12884_v31, %v20577_v54  ;;  %v20578_v18 = vsub.f32 %v12559_v5, %v12740_v0 }
 0x193   :  { %v13072_v56 = vmul.f32 %v12884_v31, %v20574_v32  ;;  %v1152_v16 = vmul.f32 %v12884_v31, %v20576_v58  ;;  %v20580_v15 = vsub.f32 %v20510_v43, %v12740_v0  ;;  %v20582_v44 = vsub.f32 %v20511_v46, %v12740_v0 }
 0x194   :  { %20573 = vst [vmem:[#allocation9_spill] sm:$0xff] %v13066_v60  ;;  %v13086_v36 = vmul.f32 %v12884_v31, %v20578_v18  ;;  %v1157_v54 = vmul.f32 %v12884_v31, %v20583_v42  ;;  %v20584_v5 = vsub.f32 %v20513_v61, %v12740_v0  ;;  %v20586_v43 = vsub.f32 %v20514_v40, %v12740_v0  ;;  %v20592_v40 = vld [vmem:[#allocation12_spill] sm:$0xff] }
 0x195   :  { %20575 = vst [vmem:[#allocation8_spill] sm:$0xff] %v13072_v56  ;;  %v13092_v32 = vmul.f32 %v12884_v31, %v20580_v15  ;;  %v1156_v58 = vmul.f32 %v12884_v31, %v20582_v44  ;;  %v20588_v46 = vsub.f32 %v20515_v52, %v12740_v0  ;;  %v1161_v42 = vmul.f32 %v12884_v31, %v20589_v50  ;;  %v20595_v52 = vld [vmem:[#allocation15_spill] sm:$0xff] }
 0x196   :  { %20579 = vst [vmem:[#allocation11_spill] sm:$0xff] %v13086_v36  ;;  %v13106_v18 = vmul.f32 %v12884_v31, %v20584_v5  ;;  %v13112_v15 = vmul.f32 %v12884_v31, %v20586_v43  ;;  %v20590_v61 = vsub.f32 %v20517_v49, %v12740_v0  ;;  %v20593_v43 = vsub.f32 %v20592_v40, %v12740_v0  ;;  %v20599_v49 = vld [vmem:[#allocation17_spill] sm:$0xff]  ;;  %v20602_v40 = vld [vmem:[#allocation16_spill] sm:$0xff] }
 0x197   :  { %20581 = vst [vmem:[#allocation10_spill] sm:$0xff] %v13092_v32  ;;  %v1160_v44 = vmul.f32 %v12884_v31, %v20588_v46  ;;  %v20596_v46 = vsub.f32 %v20595_v52, %v12740_v0  ;;  %v20598_v50 = vsub.f32 %v20597_v63, %v12740_v0  ;;  %v20605_v52 = vld [vmem:[#allocation19_spill] sm:$0xff]  ;;  %v20607_v63 = vld [vmem:[#allocation18_spill] sm:$0xff]  ;;  %vm1310_vm5 = vcmp.gt.f32.partialorder %v12932_v12, 0.0 }
 0x198   :  { %20585 = vst [vmem:[#allocation13_spill] sm:$0xff] %v13106_v18  ;;  %20587 = vst [vmem:[#allocation24_spill] sm:$0xff] %v13112_v15  ;;  %v13126_v5 = vmul.f32 %v12884_v31, %v20590_v61  ;;  %v13132_v15 = vmul.f32 %v12884_v31, %v20593_v43  ;;  %v20600_v61 = vsub.f32 %v20599_v49, %v12740_v0  ;;  %v20609_v49 = vld [vmem:[#allocation21_spill] sm:$0xff] }
 0x199   :  { %v1164_v18 = vmul.f32 %v12884_v31, %v20596_v46  ;;  %v1165_v32 = vmul.f32 %v12884_v31, %v20598_v50  ;;  %v20603_v43 = vsub.f32 %v20602_v40, %v12740_v0  ;;  %v20606_v46 = vsub.f32 %v20605_v52, %v12740_v0  ;;  %v20612_v40 = vld [vmem:[#allocation20_spill] sm:$0xff]  ;;  %v20615_v52 = vld [vmem:[#allocation23_spill] sm:$0xff] }
 0x19a   :  { %20591 = vst [vmem:[#allocation26_spill] sm:$0xff] %v13126_v5  ;;  %20594 = vst [vmem:[#allocation28_spill] sm:$0xff] %v13132_v15  ;;  %v13146_v5 = vmul.f32 %v12884_v31, %v20600_v61  ;;  %v20608_v50 = vsub.f32 %v20607_v63, %v12740_v0  ;;  %v20610_v61 = vsub.f32 %v20609_v49, %v12740_v0  ;;  %v20617_v63 = vld [vmem:[#allocation22_spill] sm:$0xff]  ;;  %v20619_v49 = vld [vmem:[#allocation25_spill] sm:$0xff] }
 0x19b   :  { %v13152_v15 = vmul.f32 %v12884_v31, %v20603_v43  ;;  %v1168_v36 = vmul.f32 %v12884_v31, %v20606_v46  ;;  %v20613_v43 = vsub.f32 %v20612_v40, %v12740_v0  ;;  %v20616_v46 = vsub.f32 %v20615_v52, %v12740_v0 }
 0x19c   :  { %20601 = vst [vmem:[#allocation12_spill] sm:$0xff] %v13146_v5  ;;  %v1169_v56 = vmul.f32 %v12884_v31, %v20608_v50  ;;  %v13166_v5 = vmul.f32 %v12884_v31, %v20610_v61  ;;  %v20618_v50 = vsub.f32 %v20617_v63, %v12740_v0  ;;  %v20620_v61 = vsub.f32 %v20619_v49, %v12740_v0 }
 0x19d   :  { %20604 = vst [vmem:[#allocation15_spill] sm:$0xff] %v13152_v15  ;;  %v13172_v15 = vmul.f32 %v12884_v31, %v20613_v43  ;;  %v1172_v60 = vmul.f32 %v12884_v31, %v20616_v46  ;;  %v20621_v40 = vsub.f32 %v20530_v10, %v12740_v0  ;;  %v20624_v63 = vsub.f32 %v20534_v62, %v12740_v0 }
 0x19e   :  { %20611 = vst [vmem:[#allocation14_spill] sm:$0xff] %v13166_v5  ;;  %v1173_v53 = vmul.f32 %v12884_v31, %v20618_v50  ;;  %v1174_v5 = vmul.f32 %v12884_v31, %v20620_v61  ;;  %v20625_v49 = vsub.f32 %v20535_v28, %v12740_v0  ;;  %v13204_v10 = vadd.f32 %v12887_v8, %v12897_v2  ;;  %v20650_v26 = vld [vmem:[#allocation10_spill] sm:$0xff] }
 0x19f   :  { %20614 = vst [vmem:[#allocation17_spill] sm:$0xff] %v13172_v15  ;;  %v1175_v43 = vmul.f32 %v12884_v31, %v20621_v40  ;;  %v20622_v15 = vld [vmem:[#allocation27_spill] sm:$0xff]  ;;  %v1177_v50 = vmul.f32 %v12884_v31, %v20624_v63  ;;  %v13208_v40 = vadd.f32 %v12887_v8, %v12903_v29  ;;  %v13214_v62 = vadd.f32 %v12887_v8, %v1121_v55 }
 0x1a0   :  { %v20623_v52 = vsub.f32 %v20622_v15, %v12740_v0  ;;  %v1179_v61 = vmul.f32 %v12884_v31, %v20625_v49  ;;  %v13211_v15 = vadd.f32 %v12887_v8, %v1120_v3  ;;  %v13217_v0 = vadd.f32 %v12887_v8, %v1124_v48 }
 0x1a1   :  { %v13223_v2 = vadd.f32 %v12887_v8, %v1128_v21  ;;  %v13226_v28 = vadd.f32 %v12887_v8, %v1129_v35  ;;  %v13229_v29 = vadd.f32 %v12887_v8, %v1132_v47  ;;  %v13232_v3 = vadd.f32 %v12887_v8, %v1133_v45 }
 0x1a2   :  { %v1176_v46 = vmul.f32 %v12884_v31, %v20623_v52  ;;  %v11991_v52 = vmov 1983009808   ;;  %v13220_v31 = vadd.f32 %v12887_v8, %v1125_v27  ;;  %v13235_v55 = vadd.f32 %v12887_v8, %v1136_v9 }
 0x1a3   :  { %v1506_v63 = vunpack.c.l.s4 %v11991_v52  ;;  %v13238_v48 = vadd.f32 %v12887_v8, %v1137_v7  ;;  %v13241_v49 = vadd.f32 %v12887_v8, %v1140_v39  ;;  %v13244_v21 = vadd.f32 %v12887_v8, %v1141_v37  ;;  %v20626_v52 = vld [vmem:[#allocation29_spill] sm:$0xff] }
 0x1a4   :  { %v13247_v35 = vadd.f32 %v12887_v8, %v1143_v51  ;;  %v13250_v47 = vadd.f32 %v12887_v8, %v1144_v4  ;;  %v13253_v45 = vadd.f32 %v12887_v8, %v1145_v1  ;;  %v13256_v9 = vadd.f32 %v12887_v8, %v1146_v23 }
 0x1a5   :  { %v1507_v27 = vunpack.c.0.s8 %v1506_v63  ;;  %v13259_v7 = vadd.f32 %v12887_v8, %v1147_v19  ;;  %v1374_v39 = vmul.f32 0.01, %v12932_v12  ;;  %v13263_v37 = vadd.f32 %v12887_v8, %v1148_v41 }
 0x1a6   :  { %v13266_v51 = vadd.f32 %v12887_v8, %v1149_v38  ;;  %v13270_v4 = vadd.f32 %v12887_v8, %v1152_v16  ;;  %v13273_v1 = vadd.f32 %v12887_v8, %v1153_v13  ;;  %v13276_v23 = vadd.f32 %v12887_v8, %v1156_v58 }
 0x1a7   :  { %v13279_v19 = vadd.f32 %v12887_v8, %v1157_v54  ;;  %v13282_v41 = vsub.s32 %v1507_v27, %v20626_v52  ;;  %v13285_v38 = vadd.f32 %v12887_v8, %v1160_v44  ;;  %v13288_v63 = vadd.f32 %v12887_v8, %v1161_v42 }
 0x1a8   :  { %v1438_v16 = vsel %vm1310_vm5, %v12932_v12, %v1374_v39  ;;  %v13292_v13 = vadd.f32 %v12887_v8, %v1164_v18  ;;  %v13295_v58 = vadd.f32 %v12887_v8, %v1165_v32  ;;  %v13298_v54 = vadd.f32 %v12887_v8, %v1168_v36 }
 0x1a9   :  { %20627 = vst [vmem:[#allocation16_spill] sm:$0xff] %v13282_v41  ;;  %20628 = vst [vmem:[#allocation19_spill] sm:$0xff] %v13285_v38  ;;  %v13301_v27 = vadd.f32 %v12887_v8, %v1169_v56  ;;  %v13304_v44 = vadd.f32 %v12887_v8, %v1172_v60  ;;  %v13307_v42 = vadd.f32 %v12887_v8, %v1173_v53  ;;  %vm1248_vm6 = vcmp.gt.f32.partialorder %v13204_v10, 0.0 }
 0x1aa   :  { %20629 = vst [vmem:[#allocation18_spill] sm:$0xff] %v13288_v63  ;;  %20630 = vst [vmem:[#allocation21_spill] sm:$0xff] %v13292_v13  ;;  %v13310_v12 = vadd.f32 %v12887_v8, %v1174_v5  ;;  %v13313_v18 = vadd.f32 %v12887_v8, %v1175_v43  ;;  %v13316_v32 = vrot.slane %v1438_v16, %v13282_v41  ;;  %vm1249_vm7 = vcmp.gt.f32.partialorder %v13208_v40, 0.0 }
 0x1ab   :  { %20631 = vst [vmem:[#allocation20_spill] sm:$0xff] %v13295_v58  ;;  %20632 = vst [vmem:[#allocation23_spill] sm:$0xff] %v13298_v54  ;;  %v13319_v36 = vadd.f32 %v12887_v8, %v1176_v46  ;;  %v13322_v56 = vadd.f32 %v12887_v8, %v1177_v50  ;;  %v13325_v60 = vadd.f32 %v12887_v8, %v1179_v61  ;;  %vm1252_vm10 = vcmp.gt.f32.partialorder %v13211_v15, 0.0 }
 0x1ac   :  { %20633 = vst [vmem:[#allocation22_spill] sm:$0xff] %v13301_v27  ;;  %20634 = vst [vmem:[#allocation25_spill] sm:$0xff] %v13304_v44  ;;  %v2558_v53 = vcombine.high %v1438_v16, %v1438_v16  ;;  %v13329_v5 = vcombine.high %v13316_v32, %v13316_v32  ;;  %v13336_v39 = vrot.slane %v13316_v32, %v12877_v17  ;;  %vm1253_vm11 = vcmp.gt.f32.partialorder %v13214_v62, 0.0 }
 0x1ad   :  { %20635 = vst [vmem:[#allocation27_spill] sm:$0xff] %v13307_v42  ;;  %20636 = vst [vmem:[#allocation30_spill] sm:$0xff] %v13310_v12  ;;  %v1186_v61 = vadd.f32 %v12887_v8, %v12909_v30  ;;  %v1187_v16 = vadd.f32 %v12887_v8, %v12915_v6  ;;  %v13354_v52 = vadd.f32 %v12887_v8, %v12938_v24  ;;  %v23_v24 = vld [vmem:[%s19777_s1 + $0x90] sm:$0xff]  ;;  %v20663_v12 = vld [vmem:[#allocation17_spill] sm:$0xff]  ;;  %vm1256_vm14 = vcmp.gt.f32.partialorder %v13217_v0, 0.0 }
 0x1ae   :  { %20637 = vst [vmem:[#allocation31_spill] sm:$0xff] %v13313_v18  ;;  %20638 = vst [vmem:[#allocation32_spill] sm:$0xff] %v13316_v32  ;;  %v13332_v43 = vrot.slane %v2558_v53, %v13282_v41  ;;  %v13340_v46 = vrot.slane %v13329_v5, %v12877_v17  ;;  %v13350_v53 = vadd.f32 %v12887_v8, %v12929_v34  ;;  %11355 = vmatprep.subr.mxu1 %v23_v24  ;;  %v20647_v32 = vld [vmem:[#allocation9_spill] sm:$0xff]  ;;  %v20652_v24 = vld [vmem:[#allocation24_spill] sm:$0xff] }
 0x1af   :  { %20639 = vst [vmem:[#allocation33_spill] sm:$0xff] %v13319_v36  ;;  %20640 = vst [vmem:[#allocation34_spill] sm:$0xff] %v13322_v56  ;;  %v13362_v50 = vadd.f32 %v12887_v8, %v12958_v11  ;;  %v13366_v30 = vadd.f32 %v12887_v8, %v12972_v20  ;;  %v13370_v6 = vadd.f32 %v12887_v8, %v12978_v33  ;;  %v20646_v33 = vld [vmem:[#allocation6_spill] sm:$0xff]  ;;  %v20651_v17 = vld [vmem:[#allocation13_spill] sm:$0xff]  ;;  %vm1250_vm8 = vcmp.gt.f32.partialorder %v1186_v61, 0.0 }
 0x1b0   :  { %20641 = vst [vmem:[#allocation35_spill] sm:$0xff] %v13325_v60  ;;  %20642 = vst [vmem:[#allocation36_spill] sm:$0xff] %v13329_v5  ;;  %v13374_v34 = vadd.f32 %v12887_v8, %v12992_v59  ;;  %v13385_v11 = vadd.f32 %v12887_v8, %v13012_v25  ;;  %v13389_v20 = vadd.f32 %v12887_v8, %v13018_v22  ;;  %v20649_v5 = vld [vmem:[#allocation11_spill] sm:$0xff]  ;;  %v20653_v41 = vld [vmem:[#allocation26_spill] sm:$0xff]  ;;  %vm1251_vm9 = vcmp.gt.f32.partialorder %v1187_v16, 0.0 }
 0x1b1   :  { %20643 = vst [vmem:[#allocation37_spill] sm:$0xff] %v13332_v43  ;;  %20644 = vst [vmem:[#allocation38_spill] sm:$0xff] %v13336_v39  ;;  %v13393_v59 = vadd.f32 %v12887_v8, %v20646_v33  ;;  %v13397_v39 = vadd.f32 %v12887_v8, %v20647_v32  ;;  %v20648_v43 = vld [vmem:[#allocation8_spill] sm:$0xff]  ;;  %v13405_v25 = vadd.f32 %v12887_v8, %v20649_v5  ;;  %v20659_v36 = vld [vmem:[#allocation15_spill] sm:$0xff]  ;;  %vm1254_vm12 = vcmp.gt.f32.partialorder %v13350_v53, 0.0 }
 0x1b2   :  { %20645 = vst [vmem:[#allocation39_spill] sm:$0xff] %v13340_v46  ;;  %v13358_v46 = vadd.f32 %v12887_v8, %v12952_v14  ;;  %v13381_v14 = vadd.f32 %v12887_v8, %v12998_v57  ;;  %v13401_v57 = vadd.f32 %v12887_v8, %v20648_v43  ;;  %v13409_v22 = vadd.f32 %v12887_v8, %v20650_v26  ;;  %v20655_v60 = vld [vmem:[#allocation28_spill] sm:$0xff]  ;;  %v20661_v18 = vld [vmem:[#allocation14_spill] sm:$0xff] }
 0x1b3   :  { %v13413_v33 = vadd.f32 %v12887_v8, %v20651_v17  ;;  %v13417_v32 = vadd.f32 %v12887_v8, %v20652_v24  ;;  %v13421_v43 = vadd.f32 %v12887_v8, %v20653_v41  ;;  %v13425_v5 = vadd.f32 %v12887_v8, %v20655_v60  ;;  %v20657_v56 = vld [vmem:[#allocation12_spill] sm:$0xff] }
 0x1b4   :  { %v13429_v26 = vadd.f32 %v12887_v8, %v20657_v56  ;;  %v13433_v17 = vadd.f32 %v12887_v8, %v20659_v36  ;;  %v13437_v24 = vadd.f32 %v12887_v8, %v20661_v18  ;;  %v13441_v41 = vadd.f32 %v12887_v8, %v20663_v12 }
 0x1b5   :  { %20654 = vst [vmem:[#allocation6_spill] sm:$0xff] %v13421_v43  ;;  %20656 = vst [vmem:[#allocation9_spill] sm:$0xff] %v13425_v5  ;;  %v1312_v36 = vmul.f32 0.01, %v13204_v10  ;;  %v1313_v56 = vmul.f32 0.01, %v13208_v40 }
 0x1b6   :  { %20658 = vst [vmem:[#allocation8_spill] sm:$0xff] %v13429_v26  ;;  %20660 = vst [vmem:[#allocation11_spill] sm:$0xff] %v13433_v17  ;;  %vm1255_vm13 = vcmp.gt.f32.partialorder %v13354_v52, 0.0  ;;  %v1314_v8 = vmul.f32 0.01, %v1186_v61  ;;  %vm1257_vm15 = vcmp.gt.f32.partialorder %v13220_v31, 0.0 }
 0x1b7   :  { %20662 = vst [vmem:[#allocation10_spill] sm:$0xff] %v13437_v24  ;;  %20664 = vst [vmem:[#allocation13_spill] sm:$0xff] %v13441_v41  ;;  %vm1258_vm1 = vcmp.gt.f32.partialorder %v13358_v46, 0.0  ;;  %v1315_v12 = vmul.f32 0.01, %v1187_v16  ;;  %vm1259_vm2 = vcmp.gt.f32.partialorder %v13362_v50, 0.0  ;;  %v13462_v41 = vsel %vm1248_vm6, %v13204_v10, %v1312_v36 }
 0x1b8   :  { %v1316_v18 = vmul.f32 0.01, %v13211_v15  ;;  %v1317_v60 = vmul.f32 0.01, %v13214_v62  ;;  %v1318_v42 = vmul.f32 0.01, %v13350_v53  ;;  %v13471_v17 = vsel %vm1249_vm7, %v13208_v40, %v1313_v56 }
 0x1b9   :  { %v1319_v44 = vmul.f32 0.01, %v13354_v52  ;;  %20665 = vst [vmem:[#allocation24_spill] sm:$0xff] %v13462_v41  ;;  %vm1260_vm3 = vcmp.gt.f32.partialorder %v13223_v2, 0.0  ;;  %v1320_v24 = vmul.f32 0.01, %v13217_v0  ;;  %v13482_v41 = vsel %vm1250_vm8, %v1186_v61, %v1314_v8 }
 0x1ba   :  { %v1321_v27 = vmul.f32 0.01, %v13220_v31  ;;  %v1322_v54 = vmul.f32 0.01, %v13358_v46  ;;  %20666 = vst [vmem:[#allocation26_spill] sm:$0xff] %v13471_v17  ;;  %vm1261_vm5 = vcmp.gt.f32.partialorder %v13226_v28, 0.0  ;;  %v13495_v17 = vsel %vm1251_vm9, %v1187_v16, %v1315_v12 }
 0x1bb   :  { %v1323_v26 = vmul.f32 0.01, %v13362_v50  ;;  %v13476_v10 = vmul.f32 0.01, %v13223_v2  ;;  %v13479_v36 = vmul.f32 0.01, %v13226_v28 }
 0x1bc   :  { %20667 = vst [vmem:[#allocation28_spill] sm:$0xff] %v13482_v41  ;;  %vm1262_vm6 = vcmp.gt.f32.partialorder %v13366_v30, 0.0  ;;  %v13486_v58 = vmul.f32 0.01, %v13366_v30  ;;  %v13489_v40 = vmul.f32 0.01, %v13370_v6  ;;  %v13510_v41 = vsel %vm1252_vm10, %v13211_v15, %v1316_v18 }
 0x1bd   :  { %v13492_v56 = vmul.f32 0.01, %v13229_v29  ;;  %20668 = vst [vmem:[#allocation12_spill] sm:$0xff] %v13495_v17  ;;  %vm1263_vm7 = vcmp.gt.f32.partialorder %v13370_v6, 0.0  ;;  %v13499_v13 = vmul.f32 0.01, %v13232_v3 }
 0x1be   :  { %v13502_v61 = vmul.f32 0.01, %v13374_v34  ;;  %v13505_v8 = vmul.f32 0.01, %v13381_v14  ;;  %20670 = vst [vmem:[#allocation14_spill] sm:$0xff] %v13510_v41  ;;  %vm1264_vm8 = vcmp.gt.f32.partialorder %v13229_v29, 0.0 }
 0x1bf   :  { %v13514_v16 = vmul.f32 0.01, %v13235_v55  ;;  %v13517_v12 = vmul.f32 0.01, %v13238_v48  ;;  %v13520_v17 = vmul.f32 0.01, %v13385_v11 }
 0x1c0   :  { %20669 = vst [vmem:[#allocation15_spill] sm:$0xff] %v13505_v8  ;;  %v13525_v8 = vsel %vm1253_vm11, %v13214_v62, %v1317_v60  ;;  %vm1265_vm9 = vcmp.gt.f32.partialorder %v13232_v3, 0.0  ;;  %v13529_v15 = vmul.f32 0.01, %v13389_v20  ;;  %v13532_v18 = vmul.f32 0.01, %v13241_v49 }
 0x1c1   :  { %20671 = vst [vmem:[#allocation17_spill] sm:$0xff] %v13520_v17  ;;  %20672 = vst [vmem:[#allocation40_spill] sm:$0xff] %v13525_v8  ;;  %v13535_v41 = vmul.f32 0.01, %v13244_v21  ;;  %v13540_v17 = vsel %vm1254_vm12, %v13350_v53, %v1318_v42  ;;  %vm1266_vm10 = vcmp.gt.f32.partialorder %v13374_v34, 0.0  ;;  %vm1267_vm11 = vcmp.gt.f32.partialorder %v13381_v14, 0.0 }
 0x1c2   :  { %20674 = vst [vmem:[#allocation42_spill] sm:$0xff] %v13540_v17  ;;  %v13544_v62 = vmul.f32 0.01, %v13393_v59  ;;  %v13547_v60 = vmul.f32 0.01, %v13247_v35  ;;  %vm20714_vm0 = vcmp.gt.f32.partialorder %v13235_v55, 0.0 }
 0x1c3   :  { %20673 = vst [vmem:[#allocation41_spill] sm:$0xff] %v13535_v41  ;;  %v13550_v8 = vmul.f32 0.01, %v13250_v47  ;;  %v13555_v41 = vsel %vm1255_vm13, %v13354_v52, %v1319_v44  ;;  %v13561_v42 = vmul.f32 0.01, %v13253_v45  ;;  %v13572_v52 = vsel %vm1256_vm14, %v13217_v0, %v1320_v24 }
 0x1c4   :  { %20675 = vst [vmem:[#allocation43_spill] sm:$0xff] %v13555_v41  ;;  %v13564_v53 = vmul.f32 0.01, %v13256_v9  ;;  %v13567_v17 = vmul.f32 0.01, %v13259_v7  ;;  %20677 = vst [vmem:[#allocation45_spill] sm:$0xff] %v13572_v52  ;;  %v13590_v0 = vsel %vm1257_vm15, %v13220_v31, %v1321_v27  ;;  %v13608_v31 = vsel %vm1258_vm1, %v13358_v46, %v1322_v54 }
 0x1c5   :  { %vm1270_vm13 = vcmp.gt.f32.partialorder %v13385_v11, 0.0  ;;  %v13579_v44 = vmul.f32 0.01, %v13263_v37  ;;  %v13582_v41 = vmul.f32 0.01, %v13266_v51  ;;  %20679 = vst [vmem:[#allocation47_spill] sm:$0xff] %v13590_v0  ;;  %v13626_v54 = vsel %vm1259_vm2, %v13362_v50, %v1323_v26 }
 0x1c6   :  { %20676 = vst [vmem:[#allocation44_spill] sm:$0xff] %v13567_v17  ;;  %v13585_v17 = vmul.f32 0.01, %v13397_v39  ;;  %vm1274_vm14 = vcmp.gt.f32.partialorder %v13393_v59, 0.0  ;;  %v13597_v24 = vmul.f32 0.01, %v13401_v57  ;;  %v13645_v50 = vsel %vm1260_vm3, %v13223_v2, %v13476_v10 }
 0x1c7   :  { %v13600_v52 = vmul.f32 0.01, %v13270_v4  ;;  %20681 = vst [vmem:[#allocation49_spill] sm:$0xff] %v13608_v31  ;;  %vm1278_vm15 = vcmp.gt.f32.partialorder %v13256_v9, 0.0  ;;  %v13615_v27 = vmul.f32 0.01, %v13405_v25  ;;  %v13664_v2 = vsel %vm1261_vm5, %v13226_v28, %v13479_v36 }
 0x1c8   :  { %20678 = vst [vmem:[#allocation46_spill] sm:$0xff] %v13585_v17  ;;  %v13603_v17 = vmul.f32 0.01, %v13273_v1  ;;  %v13618_v0 = vmul.f32 0.01, %v13409_v22  ;;  %20683 = vst [vmem:[#allocation51_spill] sm:$0xff] %v13626_v54  ;;  %v13683_v28 = vsel %vm1262_vm6, %v13366_v30, %v13486_v58  ;;  %v13696_v58 = vsel %vm1263_vm7, %v13370_v6, %v13489_v40 }
 0x1c9   :  { %vm1282_vm1 = vcmp.gt.f32.partialorder %v13397_v39, 0.0  ;;  %v13633_v46 = vmul.f32 0.01, %v13279_v19  ;;  %v13636_v31 = vmul.f32 0.01, %v13413_v33  ;;  %20685 = vst [vmem:[#allocation53_spill] sm:$0xff] %v13645_v50  ;;  %v13709_v6 = vsel %vm1264_vm8, %v13229_v29, %v13492_v56 }
 0x1ca   :  { %20680 = vst [vmem:[#allocation48_spill] sm:$0xff] %v13603_v17  ;;  %v13621_v17 = vmul.f32 0.01, %v13276_v23  ;;  %vm1286_vm2 = vcmp.gt.f32.partialorder %v13405_v25, 0.0  ;;  %v13652_v26 = vmul.f32 0.01, %v13285_v38  ;;  %v13722_v29 = vsel %vm1265_vm9, %v13232_v3, %v13499_v13 }
 0x1cb   :  { %v13655_v54 = vmul.f32 0.01, %v13288_v63  ;;  %20689 = vst [vmem:[#allocation57_spill] sm:$0xff] %v13664_v2  ;;  %vm1290_vm3 = vcmp.gt.f32.partialorder %v13413_v33, 0.0  ;;  %v13671_v10 = vmul.f32 0.01, %v13425_v5  ;;  %v13734_v38 = vsel %vm1266_vm10, %v13374_v34, %v13502_v61 }
 0x1cc   :  { %20682 = vst [vmem:[#allocation50_spill] sm:$0xff] %v13621_v17  ;;  %v13639_v17 = vmul.f32 0.01, %v13417_v32  ;;  %20686 = vst [vmem:[#allocation54_spill] sm:$0xff] %v13652_v26  ;;  %v20691_v50 = vld [vmem:[#allocation21_spill] sm:$0xff]  ;;  %vm1294_vm5 = vcmp.gt.f32.partialorder %v13421_v43, 0.0 }
 0x1cd   :  { %20687 = vst [vmem:[#allocation55_spill] sm:$0xff] %v13655_v54  ;;  %20690 = vst [vmem:[#allocation58_spill] sm:$0xff] %v13671_v10  ;;  %v13674_v54 = vmul.f32 0.01, %v20691_v50  ;;  %v20696_v36 = vld [vmem:[#allocation8_spill] sm:$0xff]  ;;  %v20698_v63 = vld [vmem:[#allocation23_spill] sm:$0xff] }
 0x1ce   :  { %20684 = vst [vmem:[#allocation52_spill] sm:$0xff] %v13639_v17  ;;  %v13658_v17 = vmul.f32 0.01, %v13421_v43  ;;  %20695 = vst [vmem:[#allocation61_spill] sm:$0xff] %v13683_v28  ;;  %v1362_v2 = vmul.f32 0.01, %v20696_v36 }
 0x1cf   :  { %20692 = vst [vmem:[#allocation59_spill] sm:$0xff] %v13674_v54  ;;  %v20697_v54 = vld [vmem:[#allocation11_spill] sm:$0xff]  ;;  %20699 = vst [vmem:[#allocation62_spill] sm:$0xff] %v13696_v58  ;;  %vm1298_vm6 = vcmp.gt.f32.partialorder %v20696_v36, 0.0  ;;  %v20700_v30 = vld [vmem:[#allocation22_spill] sm:$0xff]  ;;  %vm20715_vm10 = vcmp.gt.f32.partialorder %v13238_v48, 0.0 }
 0x1d0   :  { %20688 = vst [vmem:[#allocation56_spill] sm:$0xff] %v13658_v17  ;;  %v20693_v17 = vld [vmem:[#allocation20_spill] sm:$0xff]  ;;  %v1363_v10 = vmul.f32 0.01, %v20697_v54  ;;  %v1365_v28 = vmul.f32 0.01, %v20700_v30  ;;  %v13754_v34 = vsel %vm20715_vm10, %v13238_v48, %v13517_v12 }
 0x1d1   :  { %v13677_v26 = vmul.f32 0.01, %v20693_v17  ;;  %v20701_v17 = vld [vmem:[#allocation10_spill] sm:$0xff]  ;;  %v20702_v5 = vld [vmem:[#allocation13_spill] sm:$0xff]  ;;  %20703 = vst [vmem:[#allocation63_spill] sm:$0xff] %v13709_v6  ;;  %v20705_v58 = vld [vmem:[#allocation27_spill] sm:$0xff] }
 0x1d2   :  { %v1366_v50 = vmul.f32 0.01, %v20701_v17  ;;  %v1367_v43 = vmul.f32 0.01, %v20702_v5  ;;  %vm1302_vm7 = vcmp.gt.f32.partialorder %v20701_v17, 0.0  ;;  %v20704_v40 = vld [vmem:[#allocation25_spill] sm:$0xff] }
 0x1d3   :  { %20694 = vst [vmem:[#allocation60_spill] sm:$0xff] %v13677_v26  ;;  %v1364_v26 = vmul.f32 0.01, %v20698_v63  ;;  %vm1305_vm12 = vcmp.gt.f32.partialorder %v20705_v58, 0.0  ;;  %v1368_v30 = vmul.f32 0.01, %v20704_v40 }
 0x1d4   :  { %v1369_v63 = vmul.f32 0.01, %v20705_v58  ;;  %v20706_v54 = vld [vmem:[#allocation30_spill] sm:$0xff]  ;;  %20707 = vst [vmem:[#allocation64_spill] sm:$0xff] %v13722_v29  ;;  %v20708_v56 = vld [vmem:[#allocation31_spill] sm:$0xff]  ;;  %v20709_v6 = vld [vmem:[#allocation33_spill] sm:$0xff] }
 0x1d5   :  { %v1370_v36 = vmul.f32 0.01, %v20706_v54  ;;  %vm1306_vm8 = vcmp.gt.f32.partialorder %v20706_v54, 0.0  ;;  %vm1307_vm4 = vcmp.gt.f32.partialorder %v20708_v56, 0.0  ;;  %v1371_v5 = vmul.f32 0.01, %v20708_v56 }
 0x1d6   :  { %v1372_v40 = vmul.f32 0.01, %v20709_v6  ;;  %v20710_v17 = vld [vmem:[#allocation34_spill] sm:$0xff]  ;;  %v20711_v3 = vld [vmem:[#allocation35_spill] sm:$0xff]  ;;  %v13748_v6 = vsel %vm20714_vm0, %v13235_v55, %v13514_v16  ;;  %v20717_v61 = vld [vmem:[#allocation17_spill] sm:$0xff]  ;;  %vm20720_vm0 = vcmp.gt.f32.partialorder %v13241_v49, 0.0 }
 0x1d7   :  { %v1373_v58 = vmul.f32 0.01, %v20710_v17  ;;  %v1375_v13 = vmul.f32 0.01, %v20711_v3  ;;  %v20712_v29 = vld [vmem:[#allocation15_spill] sm:$0xff]  ;;  %20716 = vst [vmem:[#allocation34_spill] sm:$0xff] %v13754_v34  ;;  %v13773_v48 = vsel %vm20720_vm0, %v13241_v49, %v13532_v18 }
 0x1d8   :  { %v13742_v54 = vsel %vm1267_vm11, %v13381_v14, %v20712_v29  ;;  %vm1311_vm9 = vcmp.gt.f32.partialorder %v20711_v3, 0.0  ;;  %v13761_v14 = vsel %vm1270_vm13, %v13385_v11, %v20717_v61  ;;  %vm20718_vm11 = vcmp.gt.f32.partialorder %v13389_v20, 0.0  ;;  %v20721_v16 = vld [vmem:[#allocation41_spill] sm:$0xff] }
 0x1d9   :  { %20713 = vst [vmem:[#allocation31_spill] sm:$0xff] %v13742_v54  ;;  %v13767_v55 = vsel %vm20718_vm11, %v13389_v20, %v13529_v15  ;;  %vm20722_vm10 = vcmp.gt.f32.partialorder %v13244_v21, 0.0  ;;  %v13785_v11 = vsel %vm1274_vm14, %v13393_v59, %v13544_v62  ;;  %vm20724_vm13 = vcmp.gt.f32.partialorder %v13247_v35, 0.0 }
 0x1da   :  { %20719 = vst [vmem:[#allocation35_spill] sm:$0xff] %v13767_v55  ;;  %v13779_v12 = vsel %vm20722_vm10, %v13244_v21, %v20721_v16  ;;  %v13791_v20 = vsel %vm20724_vm13, %v13247_v35, %v13547_v60  ;;  %vm20726_vm11 = vcmp.gt.f32.partialorder %v13250_v47, 0.0  ;;  %vm20727_vm0 = vcmp.gt.f32.partialorder %v13253_v45, 0.0  ;;  %v20729_v35 = vld [vmem:[#allocation44_spill] sm:$0xff]  ;;  %v20752_v60 = vld [vmem:[#allocation19_spill] sm:$0xff] }
 0x1db   :  { %20723 = vst [vmem:[#allocation15_spill] sm:$0xff] %v13779_v12  ;;  %20725 = vst [vmem:[#allocation17_spill] sm:$0xff] %v13791_v20  ;;  %v13797_v49 = vsel %vm20726_vm11, %v13250_v47, %v13550_v8  ;;  %v13803_v21 = vsel %vm20727_vm0, %v13253_v45, %v13561_v42  ;;  %v13809_v59 = vsel %vm1278_vm15, %v13256_v9, %v13564_v53  ;;  %vm20730_vm14 = vcmp.gt.f32.partialorder %v13259_v7, 0.0  ;;  %v20735_v9 = vld [vmem:[#allocation46_spill] sm:$0xff]  ;;  %v20767_v61 = vld [vmem:[#allocation60_spill] sm:$0xff] }
 0x1dc   :  { %20728 = vst [vmem:[#allocation41_spill] sm:$0xff] %v13803_v21  ;;  %v13815_v15 = vsel %vm20730_vm14, %v13259_v7, %v20729_v35  ;;  %vm20732_vm10 = vcmp.gt.f32.partialorder %v13263_v37, 0.0  ;;  %vm20733_vm13 = vcmp.gt.f32.partialorder %v13266_v51, 0.0  ;;  %v13833_v8 = vsel %vm1282_vm1, %v13397_v39, %v20735_v9  ;;  %v20755_v53 = vld [vmem:[#allocation18_spill] sm:$0xff]  ;;  %v20768_v16 = vld [vmem:[#allocation20_spill] sm:$0xff] }
 0x1dd   :  { %20731 = vst [vmem:[#allocation44_spill] sm:$0xff] %v13815_v15  ;;  %v13821_v47 = vsel %vm20732_vm10, %v13263_v37, %v13579_v44  ;;  %v13827_v45 = vsel %vm20733_vm13, %v13266_v51, %v13582_v41  ;;  %vm20736_vm15 = vcmp.gt.f32.partialorder %v13401_v57, 0.0  ;;  %vm20738_vm11 = vcmp.gt.f32.partialorder %v13270_v4, 0.0  ;;  %v20739_v51 = vld [vmem:[#allocation48_spill] sm:$0xff]  ;;  %v20759_v44 = vld [vmem:[#allocation6_spill] sm:$0xff] }
 0x1de   :  { %20734 = vst [vmem:[#allocation65_spill] sm:$0xff] %v13827_v45  ;;  %v13839_v7 = vsel %vm20736_vm15, %v13401_v57, %v13597_v24  ;;  %v13845_v37 = vsel %vm20738_vm11, %v13270_v4, %v13600_v52  ;;  %vm20740_vm0 = vcmp.gt.f32.partialorder %v13273_v1, 0.0  ;;  %v13857_v39 = vsel %vm1286_vm2, %v13405_v25, %v13615_v27  ;;  %v20744_v4 = vld [vmem:[#allocation50_spill] sm:$0xff]  ;;  %v20761_v24 = vld [vmem:[#allocation9_spill] sm:$0xff]  ;;  %v20764_v27 = vld [vmem:[#allocation59_spill] sm:$0xff] }
 0x1df   :  { %20737 = vst [vmem:[#allocation46_spill] sm:$0xff] %v13839_v7  ;;  %v13851_v41 = vsel %vm20740_vm0, %v13273_v1, %v20739_v51  ;;  %vm20742_vm1 = vcmp.gt.f32.partialorder %v13409_v22, 0.0  ;;  %vm20745_vm14 = vcmp.gt.f32.partialorder %v13276_v23, 0.0  ;;  %vm20746_vm10 = vcmp.gt.f32.partialorder %v13279_v19, 0.0  ;;  %v20771_v9 = vld [vmem:[#allocation8_spill] sm:$0xff] }
 0x1e0   :  { %20741 = vst [vmem:[#allocation48_spill] sm:$0xff] %v13851_v41  ;;  %v13863_v57 = vsel %vm20742_vm1, %v13409_v22, %v13618_v0  ;;  %v13869_v18 = vsel %vm20745_vm14, %v13276_v23, %v20744_v4  ;;  %v13875_v1 = vsel %vm20746_vm10, %v13279_v19, %v13633_v46  ;;  %v13881_v25 = vsel %vm1290_vm3, %v13413_v33, %v13636_v31  ;;  %v20748_v22 = vld [vmem:[#allocation52_spill] sm:$0xff]  ;;  %v20751_v23 = vld [vmem:[#allocation54_spill] sm:$0xff]  ;;  %v20754_v19 = vld [vmem:[#allocation55_spill] sm:$0xff] }
 0x1e1   :  { %20743 = vst [vmem:[#allocation66_spill] sm:$0xff] %v13863_v57  ;;  %20747 = vst [vmem:[#allocation50_spill] sm:$0xff] %v13875_v1  ;;  %vm20749_vm2 = vcmp.gt.f32.partialorder %v13417_v32, 0.0  ;;  %vm20753_vm13 = vcmp.gt.f32.partialorder %v20752_v60, 0.0  ;;  %vm20756_vm15 = vcmp.gt.f32.partialorder %v20755_v53, 0.0  ;;  %v20758_v33 = vld [vmem:[#allocation56_spill] sm:$0xff]  ;;  %v13928_v51 = vsel %vm1298_vm6, %v20771_v9, %v1362_v2 }
 0x1e2   :  { %v13887_v62 = vsel %vm20749_vm2, %v13417_v32, %v20748_v22  ;;  %v13893_v42 = vsel %vm20753_vm13, %v20752_v60, %v20751_v23  ;;  %v13899_v52 = vsel %vm20756_vm15, %v20755_v53, %v20754_v19  ;;  %v13905_v0 = vsel %vm1294_vm5, %v20759_v44, %v20758_v33  ;;  %v20760_v32 = vld [vmem:[#allocation58_spill] sm:$0xff]  ;;  %v20765_v46 = vld [vmem:[#allocation21_spill] sm:$0xff]  ;;  %v20772_v4 = vld [vmem:[#allocation11_spill] sm:$0xff] }
 0x1e3   :  { %20750 = vst [vmem:[#allocation52_spill] sm:$0xff] %v13887_v62  ;;  %20757 = vst [vmem:[#allocation54_spill] sm:$0xff] %v13899_v52  ;;  %vm20762_vm3 = vcmp.gt.f32.partialorder %v20761_v24, 0.0  ;;  %vm20766_vm11 = vcmp.gt.f32.partialorder %v20765_v46, 0.0  ;;  %vm20769_vm0 = vcmp.gt.f32.partialorder %v20768_v16, 0.0  ;;  %vm20773_vm5 = vcmp.gt.f32.partialorder %v20772_v4, 0.0 }
 0x1e4   :  { %v13911_v31 = vsel %vm20762_vm3, %v20761_v24, %v20760_v32  ;;  %v13917_v29 = vsel %vm20766_vm11, %v20765_v46, %v20764_v27  ;;  %v13923_v35 = vsel %vm20769_vm0, %v20768_v16, %v20767_v61  ;;  %v13933_v22 = vsel %vm20773_vm5, %v20772_v4, %v1363_v10  ;;  %v20775_v23 = vld [vmem:[#allocation23_spill] sm:$0xff]  ;;  %v20777_v19 = vld [vmem:[#allocation22_spill] sm:$0xff]  ;;  %v20781_v44 = vld [vmem:[#allocation13_spill] sm:$0xff] }
 0x1e5   :  { %20763 = vst [vmem:[#allocation19_spill] sm:$0xff] %v13911_v31  ;;  %20770 = vst [vmem:[#allocation55_spill] sm:$0xff] %v13923_v35  ;;  %vm20776_vm1 = vcmp.gt.f32.partialorder %v20775_v23, 0.0  ;;  %vm20778_vm14 = vcmp.gt.f32.partialorder %v20777_v19, 0.0  ;;  %v20780_v33 = vld [vmem:[#allocation10_spill] sm:$0xff]  ;;  %vm20782_vm6 = vcmp.gt.f32.partialorder %v20781_v44, 0.0 }
 0x1e6   :  { %20774 = vst [vmem:[#allocation18_spill] sm:$0xff] %v13933_v22  ;;  %v13938_v60 = vsel %vm20776_vm1, %v20775_v23, %v1364_v26  ;;  %v13943_v53 = vsel %vm20778_vm14, %v20777_v19, %v1365_v28  ;;  %v13948_v2 = vsel %vm1302_vm7, %v20780_v33, %v1366_v50  ;;  %v13953_v10 = vsel %vm20782_vm6, %v20781_v44, %v1367_v43  ;;  %v20784_v32 = vld [vmem:[#allocation25_spill] sm:$0xff]  ;;  %v20786_v24 = vld [vmem:[#allocation27_spill] sm:$0xff]  ;;  %v20788_v27 = vld [vmem:[#allocation30_spill] sm:$0xff] }
 0x1e7   :  { %20779 = vst [vmem:[#allocation56_spill] sm:$0xff] %v13943_v53  ;;  %20783 = vst [vmem:[#allocation6_spill] sm:$0xff] %v13953_v10  ;;  %vm20785_vm10 = vcmp.gt.f32.partialorder %v20784_v32, 0.0  ;;  %v13963_v28 = vsel %vm1305_vm12, %v20786_v24, %v1369_v63  ;;  %v13968_v50 = vsel %vm1306_vm8, %v20788_v27, %v1370_v36  ;;  %v13973_v43 = vsel %vm1307_vm4, %v20708_v56, %v1371_v5  ;;  %v20790_v46 = vld [vmem:[#allocation33_spill] sm:$0xff]  ;;  %v20792_v61 = vld [vmem:[#allocation24_spill] sm:$0xff] }
 0x1e8   :  { %v13958_v26 = vsel %vm20785_vm10, %v20784_v32, %v1368_v30  ;;  %20787 = vst [vmem:[#allocation58_spill] sm:$0xff] %v13963_v28  ;;  %20789 = vst [vmem:[#allocation9_spill] sm:$0xff] %v13973_v43  ;;  %vm20791_vm7 = vcmp.gt.f32.partialorder %v20790_v46, 0.0  ;;  %v1504_v16 = vcombine.high %v20792_v61, %v20792_v61  ;;  %vm20793_vm12 = vcmp.gt.f32.partialorder %v20710_v17, 0.0  ;;  %v20795_v36 = vld [vmem:[#allocation16_spill] sm:$0xff]  ;;  %v20801_v19 = vld [vmem:[#allocation14_spill] sm:$0xff] }
 0x1e9   :  { %v13978_v30 = vsel %vm20791_vm7, %v20790_v46, %v1372_v40  ;;  %v13985_v63 = vsel %vm20793_vm12, %v20710_v17, %v1373_v58  ;;  %v13989_v9 = vrot.slane %v20792_v61, %v20795_v36  ;;  %v20797_v4 = vld [vmem:[#allocation28_spill] sm:$0xff]  ;;  %v14000_v40 = vsel %vm1311_vm9, %v20711_v3, %v1375_v13  ;;  %v20802_v44 = vld [vmem:[#allocation26_spill] sm:$0xff] }
 0x1ea   :  { %20794 = vst [vmem:[#allocation59_spill] sm:$0xff] %v13985_v63  ;;  %v1538_v5 = vcombine.high %v20797_v4, %v20797_v4  ;;  %v13995_v56 = vrot.slane %v20797_v4, %v20795_v36  ;;  %20798 = vst [vmem:[#allocation60_spill] sm:$0xff] %v14000_v40  ;;  %v20799_v23 = vld [vmem:[#allocation12_spill] sm:$0xff]  ;;  %v1572_v33 = vcombine.high %v20801_v19, %v20801_v19  ;;  %vm3040_vm4 = vcmask 1041409  }
 0x1eb   :  { %20796 = vst [vmem:[#allocation21_spill] sm:$0xff] %v13989_v9  ;;  %v1555_v17 = vcombine.high %v20799_v23, %v20799_v23  ;;  %v14006_v58 = vrot.slane %v20799_v23, %v20795_v36  ;;  %v14014_v24 = vrot.slane %v20802_v44, %v20795_v36  ;;  %v14021_v13 = vrot.slane %v20801_v19, %v20795_v36  ;;  %v20807_v61 = vld [vmem:[#allocation40_spill] sm:$0xff] }
 0x1ec   :  { %v14017_v3 = vrot.slane %v1538_v5, %v20795_v36  ;;  %v14024_v27 = vrot.slane %v1504_v16, %v20795_v36  ;;  %v14027_v46 = vrot.slane %v1572_v33, %v20795_v36  ;;  %v1589_v4 = vcombine.high %v20807_v61, %v20807_v61  ;;  %v20810_v16 = vld [vmem:[#allocation42_spill] sm:$0xff] }
 0x1ed   :  { %20800 = vst [vmem:[#allocation20_spill] sm:$0xff] %v14006_v58  ;;  %20803 = vst [vmem:[#allocation8_spill] sm:$0xff] %v14014_v24  ;;  %v14033_v23 = vrot.slane %v20807_v61, %v20795_v36  ;;  %v14037_v5 = vcombine.high %v13989_v9, %v13989_v9  ;;  %v14041_v19 = vcombine.high %v13995_v56, %v13995_v56  ;;  %vm3042_vm8 = vcmask 1042434  }
 0x1ee   :  { %20804 = vst [vmem:[#allocation11_spill] sm:$0xff] %v14021_v13  ;;  %20805 = vst [vmem:[#allocation23_spill] sm:$0xff] %v14024_v27  ;;  %v1606_v32 = vcombine.high %v20810_v16, %v20810_v16  ;;  %v14047_v33 = vrot.slane %v20810_v16, %v20795_v36  ;;  %v14051_v24 = vcombine.high %v14017_v3, %v14017_v3  ;;  %vm3044_vm9 = vcmask 1043459  }
 0x1ef   :  { %20806 = vst [vmem:[#allocation22_spill] sm:$0xff] %v14027_v46  ;;  %20808 = vst [vmem:[#allocation10_spill] sm:$0xff] %v14033_v23  ;;  %v14054_v61 = vrot.slane %v1555_v17, %v20795_v36  ;;  %v14058_v44 = vcombine.high %v14006_v58, %v14006_v58  ;;  %v14062_v27 = vcombine.high %v14021_v13, %v14021_v13  ;;  %v20818_v17 = vld [vmem:[#allocation45_spill] sm:$0xff]  ;;  %v20820_v58 = vld [vmem:[#allocation43_spill] sm:$0xff]  ;;  %vm3046_vm2 = vcmask 1044484  }
 0x1f0   :  { %20809 = vst [vmem:[#allocation13_spill] sm:$0xff] %v14037_v5  ;;  %20811 = vst [vmem:[#allocation25_spill] sm:$0xff] %v14047_v33  ;;  %v14066_v5 = vcombine.high %v14027_v46, %v14027_v46  ;;  %v14069_v16 = vrot.slane %v1589_v4, %v20795_v36  ;;  %v14073_v9 = vcombine.high %v14033_v23, %v14033_v23  ;;  %vm3048_vm13 = vcmask 1045509  }
 0x1f1   :  { %20812 = vst [vmem:[#allocation27_spill] sm:$0xff] %v14054_v61  ;;  %20813 = vst [vmem:[#allocation30_spill] sm:$0xff] %v14058_v44  ;;  %v1640_v61 = vcombine.high %v20818_v17, %v20818_v17  ;;  %v14078_v44 = vrot.slane %v1606_v32, %v20795_v36  ;;  %v14084_v46 = vrot.slane %v20818_v17, %v20795_v36  ;;  %v20825_v32 = vld [vmem:[#allocation47_spill] sm:$0xff]  ;;  %vm3050_vm15 = vcmask 1046534  }
 0x1f2   :  { %20814 = vst [vmem:[#allocation33_spill] sm:$0xff] %v14062_v27  ;;  %20815 = vst [vmem:[#allocation24_spill] sm:$0xff] %v14066_v5  ;;  %v20822_v5 = vld [vmem:[#allocation49_spill] sm:$0xff]  ;;  %v14107_v13 = vrot.slane %v20825_v32, %v20795_v36  ;;  %vm3052_vm3 = vcmask 1047559   ;;  %vm21089_vm11 = vcmask 64512  }
 0x1f3   :  { %20816 = vst [vmem:[#allocation28_spill] sm:$0xff] %v14069_v16  ;;  %20817 = vst [vmem:[#allocation12_spill] sm:$0xff] %v14073_v9  ;;  %v1674_v4 = vcombine.high %v20822_v5, %v20822_v5  ;;  %v14090_v16 = vcombine.high %v14047_v33, %v14047_v33  ;;  %v14094_v9 = vrot.slane %v20820_v58, %v20795_v36  ;;  %v20833_v32 = vld [vmem:[#allocation61_spill] sm:$0xff] }
 0x1f4   :  { %20819 = vst [vmem:[#allocation14_spill] sm:$0xff] %v14078_v44  ;;  %20821 = vst [vmem:[#allocation40_spill] sm:$0xff] %v14084_v46  ;;  %v14100_v27 = vrot.slane %v20822_v5, %v20795_v36  ;;  %v14103_v17 = vrot.slane %v1640_v61, %v20795_v36  ;;  %v20828_v44 = vld [vmem:[#allocation53_spill] sm:$0xff]  ;;  %v14117_v23 = vcombine.high %v14084_v46, %v14084_v46  ;;  %v20831_v5 = vld [vmem:[#allocation51_spill] sm:$0xff] }
 0x1f5   :  { %20823 = vst [vmem:[#allocation42_spill] sm:$0xff] %v14090_v16  ;;  %20824 = vst [vmem:[#allocation45_spill] sm:$0xff] %v14094_v9  ;;  %v1708_v16 = vcombine.high %v20828_v44, %v20828_v44  ;;  %v14113_v58 = vrot.slane %v20828_v44, %v20795_v36  ;;  %v14123_v61 = vrot.slane %v20831_v5, %v20795_v36  ;;  %v20836_v33 = vld [vmem:[#allocation57_spill] sm:$0xff] }
 0x1f6   :  { %20826 = vst [vmem:[#allocation49_spill] sm:$0xff] %v14103_v17  ;;  %20827 = vst [vmem:[#allocation67_spill] sm:$0xff] %v14107_v13  ;;  %v1742_v13 = vcombine.high %v20833_v32, %v20833_v32  ;;  %v14128_v17 = vrot.slane %v1674_v4, %v20795_v36  ;;  %v14132_v44 = vcombine.high %v14100_v27, %v14100_v27  ;;  %v20840_v4 = vld [vmem:[#allocation63_spill] sm:$0xff] }
 0x1f7   :  { %20829 = vst [vmem:[#allocation53_spill] sm:$0xff] %v14113_v58  ;;  %20830 = vst [vmem:[#allocation68_spill] sm:$0xff] %v14117_v23  ;;  %v14138_v9 = vrot.slane %v20833_v32, %v20795_v36  ;;  %v14141_v5 = vrot.slane %v1708_v16, %v20795_v36  ;;  %v14145_v46 = vrot.slane %v20836_v33, %v20795_v36  ;;  %v20844_v16 = vld [vmem:[#allocation62_spill] sm:$0xff] }
 0x1f8   :  { %20832 = vst [vmem:[#allocation69_spill] sm:$0xff] %v14123_v61  ;;  %20834 = vst [vmem:[#allocation61_spill] sm:$0xff] %v14128_v17  ;;  %v1776_v61 = vcombine.high %v20840_v4, %v20840_v4  ;;  %v14151_v17 = vrot.slane %v20840_v4, %v20795_v36  ;;  %v14155_v23 = vcombine.high %v14113_v58, %v14113_v58 }
 0x1f9   :  { %20835 = vst [vmem:[#allocation70_spill] sm:$0xff] %v14132_v44  ;;  %20837 = vst [vmem:[#allocation71_spill] sm:$0xff] %v14138_v9  ;;  %v14158_v32 = vrot.slane %v1742_v13, %v20795_v36  ;;  %v14166_v33 = vcombine.high %v14138_v9, %v14138_v9  ;;  %v14170_v4 = vrot.slane %v20844_v16, %v20795_v36  ;;  %v20847_v44 = vld [vmem:[#allocation64_spill] sm:$0xff] }
 0x1fa   :  { %20838 = vst [vmem:[#allocation72_spill] sm:$0xff] %v14141_v5  ;;  %20839 = vst [vmem:[#allocation73_spill] sm:$0xff] %v14145_v46  ;;  %v1810_v46 = vcombine.high %v13734_v38, %v13734_v38  ;;  %v14176_v13 = vrot.slane %v13734_v38, %v20795_v36  ;;  %v14179_v5 = vrot.slane %v1776_v61, %v20795_v36 }
 0x1fb   :  { %20841 = vst [vmem:[#allocation63_spill] sm:$0xff] %v14151_v17  ;;  %20842 = vst [vmem:[#allocation74_spill] sm:$0xff] %v14155_v23  ;;  %v14183_v58 = vrot.slane %v20847_v44, %v20795_v36  ;;  %v14189_v16 = vrot.slane %v13748_v6, %v20795_v36  ;;  %v14193_v23 = vcombine.high %v14151_v17, %v14151_v17 }
 0x1fc   :  { %20843 = vst [vmem:[#allocation75_spill] sm:$0xff] %v14158_v32  ;;  %20845 = vst [vmem:[#allocation76_spill] sm:$0xff] %v14166_v33  ;;  %v1844_v32 = vcombine.high %v13748_v6, %v13748_v6  ;;  %v14196_v38 = vrot.slane %v1810_v46, %v20795_v36  ;;  %v1878_v44 = vcombine.high %v13761_v14, %v13761_v14 }
 0x1fd   :  { %20846 = vst [vmem:[#allocation77_spill] sm:$0xff] %v14170_v4  ;;  %20848 = vst [vmem:[#allocation78_spill] sm:$0xff] %v14176_v13  ;;  %v14208_v6 = vrot.slane %v13742_v54, %v20795_v36  ;;  %v14214_v46 = vrot.slane %v13761_v14, %v20795_v36  ;;  %v1912_v17 = vcombine.high %v13773_v48, %v13773_v48 }
 0x1fe   :  { %20849 = vst [vmem:[#allocation79_spill] sm:$0xff] %v14179_v5  ;;  %20850 = vst [vmem:[#allocation80_spill] sm:$0xff] %v14183_v58  ;;  %v14204_v58 = vcombine.high %v14176_v13, %v14176_v13  ;;  %v14217_v61 = vrot.slane %v1844_v32, %v20795_v36  ;;  %v14227_v54 = vrot.slane %v13773_v48, %v20795_v36 }
 0x1ff   :  { %20851 = vst [vmem:[#allocation81_spill] sm:$0xff] %v14189_v16  ;;  %20852 = vst [vmem:[#allocation82_spill] sm:$0xff] %v14193_v23  ;;  %v14221_v23 = vrot.slane %v13754_v34, %v20795_v36  ;;  %v14231_v5 = vcombine.high %v14189_v16, %v14189_v16  ;;  %v14234_v14 = vrot.slane %v1878_v44, %v20795_v36 }
 0x200   :  { %20853 = vst [vmem:[#allocation83_spill] sm:$0xff] %v14196_v38  ;;  %20854 = vst [vmem:[#allocation84_spill] sm:$0xff] %v14204_v58  ;;  %v14242_v34 = vcombine.high %v14214_v46, %v14214_v46  ;;  %v14246_v48 = vrot.slane %v13767_v55, %v20795_v36  ;;  %v14252_v44 = vrot.slane %v13785_v11, %v20795_v36 }
 0x201   :  { %20855 = vst [vmem:[#allocation85_spill] sm:$0xff] %v14208_v6  ;;  %20856 = vst [vmem:[#allocation86_spill] sm:$0xff] %v14214_v46  ;;  %v14255_v32 = vrot.slane %v1912_v17, %v20795_v36  ;;  %v1980_v16 = vcombine.high %v13797_v49, %v13797_v49  ;;  %v14265_v55 = vrot.slane %v13797_v49, %v20795_v36 }
 0x202   :  { %20857 = vst [vmem:[#allocation87_spill] sm:$0xff] %v14217_v61  ;;  %20858 = vst [vmem:[#allocation88_spill] sm:$0xff] %v14221_v23  ;;  %v1946_v23 = vcombine.high %v13785_v11, %v13785_v11  ;;  %v14269_v61 = vcombine.high %v14227_v54, %v14227_v54  ;;  %v14284_v49 = vrot.slane %v13791_v20, %v20795_v36 }
 0x203   :  { %20859 = vst [vmem:[#allocation89_spill] sm:$0xff] %v14227_v54  ;;  %20860 = vst [vmem:[#allocation90_spill] sm:$0xff] %v14231_v5  ;;  %v14259_v5 = vrot.slane %v13779_v12, %v20795_v36  ;;  %v14280_v12 = vcombine.high %v14252_v44, %v14252_v44  ;;  %v14293_v17 = vrot.slane %v1980_v16, %v20795_v36 }
 0x204   :  { %20861 = vst [vmem:[#allocation91_spill] sm:$0xff] %v14234_v14  ;;  %20862 = vst [vmem:[#allocation92_spill] sm:$0xff] %v14242_v34  ;;  %v14272_v11 = vrot.slane %v1946_v23, %v20795_v36  ;;  %v14290_v23 = vrot.slane %v13809_v59, %v20795_v36  ;;  %v2048_v54 = vcombine.high %v13821_v47, %v13821_v47 }
 0x205   :  { %20863 = vst [vmem:[#allocation93_spill] sm:$0xff] %v14246_v48  ;;  %20864 = vst [vmem:[#allocation94_spill] sm:$0xff] %v14252_v44  ;;  %v14303_v20 = vrot.slane %v13821_v47, %v20795_v36  ;;  %v14322_v47 = vrot.slane %v13815_v15, %v20795_v36  ;;  %v2150_v15 = vcombine.high %v13857_v39, %v13857_v39 }
 0x206   :  { %20865 = vst [vmem:[#allocation95_spill] sm:$0xff] %v14255_v32  ;;  %20866 = vst [vmem:[#allocation96_spill] sm:$0xff] %v14259_v5  ;;  %v2014_v5 = vcombine.high %v13809_v59, %v13809_v59  ;;  %v14307_v32 = vcombine.high %v14265_v55, %v14265_v55  ;;  %v14331_v16 = vrot.slane %v2048_v54, %v20795_v36 }
 0x207   :  { %20867 = vst [vmem:[#allocation97_spill] sm:$0xff] %v14265_v55  ;;  %20868 = vst [vmem:[#allocation98_spill] sm:$0xff] %v14269_v61  ;;  %v14297_v61 = vrot.slane %v13803_v21, %v20795_v36  ;;  %v14318_v21 = vcombine.high %v14290_v23, %v14290_v23 }
 0x208   :  { %20869 = vst [vmem:[#allocation99_spill] sm:$0xff] %v14272_v11  ;;  %20870 = vst [vmem:[#allocation100_spill] sm:$0xff] %v14280_v12  ;;  %v14310_v59 = vrot.slane %v2014_v5, %v20795_v36  ;;  %v14328_v5 = vrot.slane %v13833_v8, %v20795_v36 }
 0x209   :  { %20871 = vst [vmem:[#allocation101_spill] sm:$0xff] %v14284_v49  ;;  %20872 = vst [vmem:[#allocation102_spill] sm:$0xff] %v14290_v23  ;;  %v2184_v23 = vcombine.high %v13869_v18, %v13869_v18 }
 0x20a   :  { %20873 = vst [vmem:[#allocation103_spill] sm:$0xff] %v14293_v17  ;;  %20874 = vst [vmem:[#allocation104_spill] sm:$0xff] %v14297_v61  ;;  %v2082_v61 = vcombine.high %v13833_v8, %v13833_v8  ;;  %v14345_v17 = vcombine.high %v14303_v20, %v14303_v20 }
 0x20b   :  { %20875 = vst [vmem:[#allocation105_spill] sm:$0xff] %v14303_v20  ;;  %20876 = vst [vmem:[#allocation106_spill] sm:$0xff] %v14307_v32 }
 0x20c   :  { %20877 = vst [vmem:[#allocation107_spill] sm:$0xff] %v14310_v59  ;;  %20878 = vst [vmem:[#allocation108_spill] sm:$0xff] %v14318_v21  ;;  %v14335_v59 = vrot.slane %v13827_v45, %v20795_v36  ;;  %v2116_v21 = vcombine.high %v13845_v37, %v13845_v37  ;;  %v14348_v8 = vrot.slane %v2082_v61, %v20795_v36 }
 0x20d   :  { %20879 = vst [vmem:[#allocation109_spill] sm:$0xff] %v14322_v47  ;;  %20880 = vst [vmem:[#allocation110_spill] sm:$0xff] %v14331_v16  ;;  %v14341_v47 = vrot.slane %v13845_v37, %v20795_v36  ;;  %v14356_v45 = vcombine.high %v14328_v5, %v14328_v5  ;;  %v14360_v37 = vrot.slane %v13839_v7, %v20795_v36 }
 0x20e   :  { %20881 = vst [vmem:[#allocation111_spill] sm:$0xff] %v14335_v59  ;;  %20883 = vst [vmem:[#allocation113_spill] sm:$0xff] %v14345_v17  ;;  %v14366_v61 = vrot.slane %v13857_v39, %v20795_v36  ;;  %v14369_v54 = vrot.slane %v2116_v21, %v20795_v36  ;;  %v14373_v16 = vrot.slane %v13851_v41, %v20795_v36 }
 0x20f   :  { %20882 = vst [vmem:[#allocation112_spill] sm:$0xff] %v14341_v47  ;;  %v14379_v7 = vrot.slane %v13869_v18, %v20795_v36  ;;  %v14383_v59 = vcombine.high %v14341_v47, %v14341_v47  ;;  %v14386_v39 = vrot.slane %v2150_v15, %v20795_v36  ;;  %v14398_v18 = vrot.slane %v13863_v57, %v20795_v36  ;;  %vm21095_vm0 = vmmov %vm21089_vm11 }
 0x210   :  { %20884 = vst [vmem:[#allocation114_spill] sm:$0xff] %v14369_v54  ;;  %20885 = vst [vmem:[#allocation115_spill] sm:$0xff] %v14373_v16  ;;  %v2218_v16 = vcombine.high %v13881_v25, %v13881_v25  ;;  %v14394_v41 = vcombine.high %v14366_v61, %v14366_v61  ;;  %v14404_v15 = vrot.slane %v13881_v25, %v20795_v36 }
 0x211   :  { %20886 = vst [vmem:[#allocation116_spill] sm:$0xff] %v14379_v7  ;;  %20887 = vst [vmem:[#allocation117_spill] sm:$0xff] %v14383_v59  ;;  %v14407_v21 = vrot.slane %v2184_v23, %v20795_v36  ;;  %v14411_v59 = vrot.slane %v13875_v1, %v20795_v36  ;;  %v2252_v47 = vcombine.high %v13893_v42, %v13893_v42 }
 0x212   :  { %20888 = vst [vmem:[#allocation118_spill] sm:$0xff] %v14404_v15  ;;  %v14417_v57 = vrot.slane %v13893_v42, %v20795_v36  ;;  %v14421_v54 = vcombine.high %v14379_v7, %v14379_v7  ;;  %v14424_v25 = vrot.slane %v2218_v16, %v20795_v36  ;;  %v14432_v1 = vcombine.high %v14404_v15, %v14404_v15  ;;  %vm21103_vm5 = vmmov %vm21095_vm0 }
 0x213   :  { %20889 = vst [vmem:[#allocation119_spill] sm:$0xff] %v14407_v21  ;;  %20890 = vst [vmem:[#allocation120_spill] sm:$0xff] %v14411_v59  ;;  %v2286_v59 = vcombine.high %v13905_v0, %v13905_v0  ;;  %v14436_v42 = vrot.slane %v13887_v62, %v20795_v36  ;;  %v14442_v16 = vrot.slane %v13905_v0, %v20795_v36 }
 0x214   :  { %20891 = vst [vmem:[#allocation121_spill] sm:$0xff] %v14417_v57  ;;  %20892 = vst [vmem:[#allocation122_spill] sm:$0xff] %v14421_v54  ;;  %v14445_v23 = vrot.slane %v2252_v47, %v20795_v36  ;;  %v14449_v54 = vrot.slane %v13899_v52, %v20795_v36  ;;  %v2320_v7 = vcombine.high %v13917_v29, %v13917_v29 }
 0x215   :  { %20893 = vst [vmem:[#allocation123_spill] sm:$0xff] %v14432_v1  ;;  %20894 = vst [vmem:[#allocation124_spill] sm:$0xff] %v14436_v42  ;;  %v14455_v62 = vrot.slane %v13917_v29, %v20795_v36  ;;  %v14459_v21 = vcombine.high %v14417_v57, %v14417_v57  ;;  %v14462_v0 = vrot.slane %v2286_v59, %v20795_v36 }
 0x216   :  { %20895 = vst [vmem:[#allocation125_spill] sm:$0xff] %v14442_v16  ;;  %20896 = vst [vmem:[#allocation126_spill] sm:$0xff] %v14445_v23  ;;  %v14470_v52 = vcombine.high %v14442_v16, %v14442_v16  ;;  %v14474_v29 = vrot.slane %v13911_v31, %v20795_v36  ;;  %v14480_v59 = vrot.slane %v13928_v51, %v20795_v36 }
 0x217   :  { %20897 = vst [vmem:[#allocation127_spill] sm:$0xff] %v14449_v54  ;;  %20898 = vst [vmem:[#allocation128_spill] sm:$0xff] %v14455_v62  ;;  %v2354_v54 = vcombine.high %v13928_v51, %v13928_v51  ;;  %v14483_v47 = vrot.slane %v2320_v7, %v20795_v36  ;;  %v2388_v57 = vcombine.high %v13938_v60, %v13938_v60 }
 0x218   :  { %20899 = vst [vmem:[#allocation129_spill] sm:$0xff] %v14459_v21  ;;  %20900 = vst [vmem:[#allocation130_spill] sm:$0xff] %v14462_v0  ;;  %v14487_v21 = vrot.slane %v13923_v35, %v20795_v36  ;;  %v14493_v31 = vrot.slane %v13938_v60, %v20795_v36  ;;  %v14497_v23 = vcombine.high %v14455_v62, %v14455_v62 }
 0x219   :  { %20901 = vst [vmem:[#allocation131_spill] sm:$0xff] %v14470_v52  ;;  %20902 = vst [vmem:[#allocation132_spill] sm:$0xff] %v14474_v29  ;;  %v14500_v51 = vrot.slane %v2354_v54, %v20795_v36  ;;  %v14508_v35 = vcombine.high %v14480_v59, %v14480_v59  ;;  %v14512_v60 = vrot.slane %v13933_v22, %v20795_v36 }
 0x21a   :  { %20903 = vst [vmem:[#allocation133_spill] sm:$0xff] %v14480_v59  ;;  %20904 = vst [vmem:[#allocation134_spill] sm:$0xff] %v14483_v47  ;;  %v14518_v54 = vrot.slane %v13948_v2, %v20795_v36  ;;  %v14521_v7 = vrot.slane %v2388_v57, %v20795_v36  ;;  %v2456_v62 = vcombine.high %v13958_v26, %v13958_v26 }
 0x21b   :  { %20905 = vst [vmem:[#allocation135_spill] sm:$0xff] %v14487_v21  ;;  %20906 = vst [vmem:[#allocation136_spill] sm:$0xff] %v14493_v31  ;;  %v2422_v21 = vcombine.high %v13948_v2, %v13948_v2  ;;  %v14531_v22 = vrot.slane %v13958_v26, %v20795_v36  ;;  %v14535_v47 = vcombine.high %v14493_v31, %v14493_v31 }
 0x21c   :  { %20907 = vst [vmem:[#allocation137_spill] sm:$0xff] %v14497_v23  ;;  %20908 = vst [vmem:[#allocation138_spill] sm:$0xff] %v14500_v51  ;;  %v14525_v23 = vrot.slane %v13943_v53, %v20795_v36  ;;  %v14546_v53 = vcombine.high %v14518_v54, %v14518_v54  ;;  %v14550_v26 = vrot.slane %v13953_v10, %v20795_v36 }
 0x21d   :  { %20909 = vst [vmem:[#allocation139_spill] sm:$0xff] %v14508_v35  ;;  %20910 = vst [vmem:[#allocation140_spill] sm:$0xff] %v14512_v60  ;;  %v14538_v2 = vrot.slane %v2422_v21, %v20795_v36  ;;  %v14556_v21 = vrot.slane %v13968_v50, %v20795_v36  ;;  %v14559_v57 = vrot.slane %v2456_v62, %v20795_v36 }
 0x21e   :  { %20911 = vst [vmem:[#allocation141_spill] sm:$0xff] %v14518_v54  ;;  %20912 = vst [vmem:[#allocation142_spill] sm:$0xff] %v14521_v7  ;;  %v2524_v31 = vcombine.high %v13978_v30, %v13978_v30  ;;  %v14569_v10 = vrot.slane %v13978_v30, %v20795_v36  ;;  %v14573_v7 = vcombine.high %v14531_v22, %v14531_v22 }
 0x21f   :  { %20913 = vst [vmem:[#allocation143_spill] sm:$0xff] %v14525_v23  ;;  %20914 = vst [vmem:[#allocation144_spill] sm:$0xff] %v14531_v22  ;;  %v2490_v23 = vcombine.high %v13968_v50, %v13968_v50  ;;  %v20931_v22 = vld [vmem:[#allocation7_spill] sm:$0xff] }
 0x220   :  { %20915 = vst [vmem:[#allocation145_spill] sm:$0xff] %v14535_v47  ;;  %20916 = vst [vmem:[#allocation146_spill] sm:$0xff] %v14538_v2  ;;  %v14563_v47 = vrot.slane %v13963_v28, %v20795_v36  ;;  %v14586_v28 = vcombine.high %v14556_v21, %v14556_v21  ;;  %v14597_v62 = vrot.slane %v2524_v31, %v20795_v36 }
 0x221   :  { %20917 = vst [vmem:[#allocation147_spill] sm:$0xff] %v14546_v53  ;;  %20918 = vst [vmem:[#allocation148_spill] sm:$0xff] %v14550_v26  ;;  %v14576_v50 = vrot.slane %v2490_v23, %v20795_v36  ;;  %v14609_v30 = vrot.slane %v13995_v56, %v20931_v22  ;;  %v14617_v31 = vrot.slane %v14017_v3, %v20931_v22 }
 0x222   :  { %20919 = vst [vmem:[#allocation149_spill] sm:$0xff] %v14556_v21  ;;  %20920 = vst [vmem:[#allocation150_spill] sm:$0xff] %v14559_v57  ;;  %v14592_v57 = vrot.slane %v13985_v63, %v20795_v36  ;;  %v14621_v23 = vrot.slane %v14051_v24, %v20931_v22  ;;  %v20936_v63 = vld [vmem:[#allocation20_spill] sm:$0xff] }
 0x223   :  { %20921 = vst [vmem:[#allocation151_spill] sm:$0xff] %v14563_v47  ;;  %20922 = vst [vmem:[#allocation152_spill] sm:$0xff] %v14569_v10  ;;  %v14582_v47 = vrot.slane %v13973_v43, %v20795_v36  ;;  %v14601_v43 = vcombine.high %v14569_v10, %v14569_v10  ;;  %v20942_v10 = vld [vmem:[#allocation42_spill] sm:$0xff] }
 0x224   :  { %20923 = vst [vmem:[#allocation153_spill] sm:$0xff] %v14573_v7  ;;  %20924 = vst [vmem:[#allocation154_spill] sm:$0xff] %v14576_v50  ;;  %v14605_v7 = vrot.slane %v14000_v40, %v20795_v36  ;;  %v14625_v40 = vrot.slane %v20936_v63, %v20931_v22  ;;  %v20940_v36 = vld [vmem:[#allocation25_spill] sm:$0xff]  ;;  %v14637_v17 = vrot.slane %v20942_v10, %v20931_v22 }
 0x225   :  { %20925 = vst [vmem:[#allocation155_spill] sm:$0xff] %v14582_v47  ;;  %20926 = vst [vmem:[#allocation156_spill] sm:$0xff] %v14586_v28 }
 0x226   :  { %20927 = vst [vmem:[#allocation157_spill] sm:$0xff] %v14592_v57  ;;  %20928 = vst [vmem:[#allocation158_spill] sm:$0xff] %v14597_v62  ;;  %v14613_v57 = vrot.slane %v14041_v19, %v20931_v22 }
 0x227   :  { %20929 = vst [vmem:[#allocation159_spill] sm:$0xff] %v14601_v43  ;;  %20930 = vst [vmem:[#allocation160_spill] sm:$0xff] %v14605_v7  ;;  %v20938_v7 = vld [vmem:[#allocation30_spill] sm:$0xff]  ;;  %v14633_v43 = vrot.slane %v20940_v36, %v20931_v22 }
 0x228   :  { %20932 = vst [vmem:[#allocation161_spill] sm:$0xff] %v14609_v30  ;;  %20933 = vst [vmem:[#allocation162_spill] sm:$0xff] %v14613_v57  ;;  %v14629_v62 = vrot.slane %v20938_v7, %v20931_v22 }
 0x229   :  { %20934 = vst [vmem:[#allocation163_spill] sm:$0xff] %v14617_v31  ;;  %20935 = vst [vmem:[#allocation164_spill] sm:$0xff] %v14621_v23  ;;  %v20944_v31 = vld [vmem:[#allocation14_spill] sm:$0xff]  ;;  %v20946_v23 = vld [vmem:[#allocation45_spill] sm:$0xff] }
 0x22a   :  { %20937 = vst [vmem:[#allocation20_spill] sm:$0xff] %v14625_v40  ;;  %20939 = vst [vmem:[#allocation165_spill] sm:$0xff] %v14629_v62  ;;  %v14641_v20 = vrot.slane %v20944_v31, %v20931_v22  ;;  %v14645_v32 = vrot.slane %v20946_v23, %v20931_v22  ;;  %v14649_v40 = vrot.slane %v14100_v27, %v20931_v22  ;;  %v20949_v62 = vld [vmem:[#allocation70_spill] sm:$0xff]  ;;  %v20957_v23 = vld [vmem:[#allocation75_spill] sm:$0xff] }
 0x22b   :  { %20941 = vst [vmem:[#allocation25_spill] sm:$0xff] %v14633_v43  ;;  %20943 = vst [vmem:[#allocation42_spill] sm:$0xff] %v14637_v17  ;;  %v14653_v7 = vrot.slane %v20949_v62, %v20931_v22  ;;  %v20951_v43 = vld [vmem:[#allocation61_spill] sm:$0xff] }
 0x22c   :  { %20945 = vst [vmem:[#allocation14_spill] sm:$0xff] %v14641_v20  ;;  %20947 = vst [vmem:[#allocation166_spill] sm:$0xff] %v14645_v32  ;;  %v14657_v55 = vrot.slane %v20951_v43, %v20931_v22  ;;  %v20953_v17 = vld [vmem:[#allocation69_spill] sm:$0xff]  ;;  %v14665_v32 = vrot.slane %v14138_v9, %v20931_v22 }
 0x22d   :  { %20948 = vst [vmem:[#allocation167_spill] sm:$0xff] %v14649_v40  ;;  %20950 = vst [vmem:[#allocation70_spill] sm:$0xff] %v14653_v7  ;;  %v14661_v20 = vrot.slane %v20953_v17, %v20931_v22  ;;  %v14669_v40 = vrot.slane %v14166_v33, %v20931_v22  ;;  %v14673_v7 = vrot.slane %v20957_v23, %v20931_v22 }
 0x22e   :  { %20952 = vst [vmem:[#allocation61_spill] sm:$0xff] %v14657_v55  ;;  %20955 = vst [vmem:[#allocation169_spill] sm:$0xff] %v14665_v32  ;;  %v14677_v55 = vrot.slane %v14170_v4, %v20931_v22  ;;  %v14681_v17 = vrot.slane %v14176_v13, %v20931_v22  ;;  %v14689_v32 = vrot.slane %v14196_v38, %v20931_v22 }
 0x22f   :  { %20954 = vst [vmem:[#allocation168_spill] sm:$0xff] %v14661_v20  ;;  %20956 = vst [vmem:[#allocation170_spill] sm:$0xff] %v14669_v40  ;;  %v14685_v20 = vrot.slane %v14204_v58, %v20931_v22  ;;  %v14693_v40 = vrot.slane %v14208_v6, %v20931_v22 }
 0x230   :  { %20958 = vst [vmem:[#allocation171_spill] sm:$0xff] %v14673_v7  ;;  %20959 = vst [vmem:[#allocation172_spill] sm:$0xff] %v14677_v55  ;;  %v14697_v7 = vrot.slane %v14214_v46, %v20931_v22  ;;  %v14701_v55 = vrot.slane %v14242_v34, %v20931_v22 }
 0x231   :  { %20960 = vst [vmem:[#allocation173_spill] sm:$0xff] %v14681_v17  ;;  %20961 = vst [vmem:[#allocation174_spill] sm:$0xff] %v14685_v20  ;;  %v14705_v17 = vrot.slane %v14234_v14, %v20931_v22  ;;  %v14709_v20 = vrot.slane %v14246_v48, %v20931_v22 }
 0x232   :  { %20962 = vst [vmem:[#allocation175_spill] sm:$0xff] %v14689_v32  ;;  %20963 = vst [vmem:[#allocation176_spill] sm:$0xff] %v14693_v40  ;;  %v14713_v32 = vrot.slane %v14252_v44, %v20931_v22  ;;  %v14717_v40 = vrot.slane %v14280_v12, %v20931_v22 }
 0x233   :  { %20964 = vst [vmem:[#allocation177_spill] sm:$0xff] %v14697_v7  ;;  %20965 = vst [vmem:[#allocation178_spill] sm:$0xff] %v14701_v55  ;;  %v14721_v7 = vrot.slane %v14272_v11, %v20931_v22  ;;  %v14725_v55 = vrot.slane %v14284_v49, %v20931_v22  ;;  %v21010_v49 = vld [vmem:[#allocation22_spill] sm:$0xff] }
 0x234   :  { %20966 = vst [vmem:[#allocation179_spill] sm:$0xff] %v14705_v17  ;;  %20967 = vst [vmem:[#allocation180_spill] sm:$0xff] %v14709_v20  ;;  %v14729_v17 = vrot.slane %v14328_v5, %v20931_v22  ;;  %v14733_v20 = vrot.slane %v14356_v45, %v20931_v22 }
 0x235   :  { %20968 = vst [vmem:[#allocation181_spill] sm:$0xff] %v14713_v32  ;;  %20969 = vst [vmem:[#allocation182_spill] sm:$0xff] %v14717_v40  ;;  %v14737_v32 = vrot.slane %v14348_v8, %v20931_v22  ;;  %v14741_v40 = vrot.slane %v14360_v37, %v20931_v22 }
 0x236   :  { %20970 = vst [vmem:[#allocation183_spill] sm:$0xff] %v14721_v7  ;;  %20971 = vst [vmem:[#allocation184_spill] sm:$0xff] %v14725_v55  ;;  %v14745_v7 = vrot.slane %v14366_v61, %v20931_v22  ;;  %v14749_v55 = vrot.slane %v14394_v41, %v20931_v22 }
 0x237   :  { %20972 = vst [vmem:[#allocation185_spill] sm:$0xff] %v14729_v17  ;;  %20973 = vst [vmem:[#allocation186_spill] sm:$0xff] %v14733_v20  ;;  %v14753_v17 = vrot.slane %v14386_v39, %v20931_v22  ;;  %v14757_v20 = vrot.slane %v14398_v18, %v20931_v22 }
 0x238   :  { %20974 = vst [vmem:[#allocation187_spill] sm:$0xff] %v14737_v32  ;;  %20975 = vst [vmem:[#allocation188_spill] sm:$0xff] %v14741_v40  ;;  %v14761_v32 = vrot.slane %v14404_v15, %v20931_v22  ;;  %v14765_v40 = vrot.slane %v14432_v1, %v20931_v22  ;;  %v2098_v15 = vcombine.high %v14348_v8, %v14348_v8 }
 0x239   :  { %20976 = vst [vmem:[#allocation189_spill] sm:$0xff] %v14745_v7  ;;  %20977 = vst [vmem:[#allocation190_spill] sm:$0xff] %v14749_v55  ;;  %v14769_v7 = vrot.slane %v14424_v25, %v20931_v22  ;;  %v14773_v55 = vrot.slane %v14436_v42, %v20931_v22 }
 0x23a   :  { %20978 = vst [vmem:[#allocation191_spill] sm:$0xff] %v14753_v17  ;;  %20979 = vst [vmem:[#allocation192_spill] sm:$0xff] %v14757_v20  ;;  %v14777_v17 = vrot.slane %v14442_v16, %v20931_v22  ;;  %v14781_v20 = vrot.slane %v14470_v52, %v20931_v22 }
 0x23b   :  { %20980 = vst [vmem:[#allocation193_spill] sm:$0xff] %v14761_v32  ;;  %20981 = vst [vmem:[#allocation194_spill] sm:$0xff] %v14765_v40  ;;  %v14785_v32 = vrot.slane %v14462_v0, %v20931_v22  ;;  %v14789_v40 = vrot.slane %v14474_v29, %v20931_v22 }
 0x23c   :  { %20982 = vst [vmem:[#allocation195_spill] sm:$0xff] %v14769_v7  ;;  %20983 = vst [vmem:[#allocation196_spill] sm:$0xff] %v14773_v55  ;;  %v14793_v7 = vrot.slane %v14480_v59, %v20931_v22  ;;  %v14797_v55 = vrot.slane %v14508_v35, %v20931_v22 }
 0x23d   :  { %20984 = vst [vmem:[#allocation197_spill] sm:$0xff] %v14777_v17  ;;  %20985 = vst [vmem:[#allocation198_spill] sm:$0xff] %v14781_v20  ;;  %v14801_v17 = vrot.slane %v14500_v51, %v20931_v22  ;;  %v14805_v20 = vrot.slane %v14512_v60, %v20931_v22 }
 0x23e   :  { %20986 = vst [vmem:[#allocation199_spill] sm:$0xff] %v14785_v32  ;;  %20987 = vst [vmem:[#allocation200_spill] sm:$0xff] %v14789_v40  ;;  %v14809_v32 = vrot.slane %v14518_v54, %v20931_v22  ;;  %v14813_v40 = vrot.slane %v14546_v53, %v20931_v22 }
 0x23f   :  { %20988 = vst [vmem:[#allocation201_spill] sm:$0xff] %v14793_v7  ;;  %20989 = vst [vmem:[#allocation202_spill] sm:$0xff] %v14797_v55  ;;  %v14817_v7 = vrot.slane %v14538_v2, %v20931_v22  ;;  %v14821_v55 = vrot.slane %v14550_v26, %v20931_v22 }
 0x240   :  { %20990 = vst [vmem:[#allocation203_spill] sm:$0xff] %v14801_v17  ;;  %20991 = vst [vmem:[#allocation204_spill] sm:$0xff] %v14805_v20  ;;  %v14825_v17 = vrot.slane %v14556_v21, %v20931_v22  ;;  %v14829_v20 = vrot.slane %v14586_v28, %v20931_v22  ;;  %v14924_v21 = vrot.slane %v21010_v49, %v20931_v22 }
 0x241   :  { %20992 = vst [vmem:[#allocation205_spill] sm:$0xff] %v14809_v32  ;;  %20993 = vst [vmem:[#allocation206_spill] sm:$0xff] %v14813_v40  ;;  %v14833_v32 = vrot.slane %v14576_v50, %v20931_v22  ;;  %v14837_v40 = vrot.slane %v14582_v47, %v20931_v22  ;;  %v21006_v47 = vld [vmem:[#allocation11_spill] sm:$0xff] }
 0x242   :  { %20994 = vst [vmem:[#allocation207_spill] sm:$0xff] %v14817_v7  ;;  %20995 = vst [vmem:[#allocation208_spill] sm:$0xff] %v14821_v55  ;;  %v14842_v55 = vsel %vm3040_vm4, %v14613_v57, %v14609_v30  ;;  %v21001_v7 = vld [vmem:[#allocation5_spill] sm:$0xff]  ;;  %v14916_v57 = vrot.slane %v21006_v47, %v20931_v22 }
 0x243   :  { %20996 = vst [vmem:[#allocation209_spill] sm:$0xff] %v14825_v17  ;;  %20997 = vst [vmem:[#allocation210_spill] sm:$0xff] %v14829_v20  ;;  %v21008_v17 = vld [vmem:[#allocation33_spill] sm:$0xff]  ;;  %v21012_v20 = vld [vmem:[#allocation10_spill] sm:$0xff] }
 0x244   :  { %20998 = vst [vmem:[#allocation211_spill] sm:$0xff] %v14833_v32  ;;  %20999 = vst [vmem:[#allocation212_spill] sm:$0xff] %v14837_v40  ;;  %v21002_v32 = vld [vmem:[#allocation21_spill] sm:$0xff]  ;;  %v14920_v50 = vrot.slane %v21008_v17, %v20931_v22  ;;  %v14928_v28 = vrot.slane %v21012_v20, %v20931_v22 }
 0x245   :  { %21000 = vst [vmem:[#allocation213_spill] sm:$0xff] %v14842_v55  ;;  %v14908_v30 = vrot.slane %v21002_v32, %v20931_v22  ;;  %v21004_v40 = vld [vmem:[#allocation13_spill] sm:$0xff]  ;;  %21007 = vst [vmem:[#allocation216_spill] sm:$0xff] %v14916_v57 }
 0x246   :  { %v14912_v55 = vrot.slane %v21004_v40, %v20931_v22  ;;  %21009 = vst [vmem:[#allocation217_spill] sm:$0xff] %v14920_v50  ;;  %21011 = vst [vmem:[#allocation218_spill] sm:$0xff] %v14924_v21  ;;  %v21018_v57 = vld [vmem:[#allocation53_spill] sm:$0xff]  ;;  %v21020_v50 = vld [vmem:[#allocation74_spill] sm:$0xff] }
 0x247   :  { %21003 = vst [vmem:[#allocation214_spill] sm:$0xff] %v14908_v30  ;;  %21013 = vst [vmem:[#allocation219_spill] sm:$0xff] %v14928_v28  ;;  %v21014_v30 = vld [vmem:[#allocation40_spill] sm:$0xff]  ;;  %v14940_v11 = vrot.slane %v21018_v57, %v20931_v22  ;;  %v14944_v53 = vrot.slane %v21020_v50, %v20931_v22  ;;  %v21022_v21 = vld [vmem:[#allocation63_spill] sm:$0xff] }
 0x248   :  { %21005 = vst [vmem:[#allocation215_spill] sm:$0xff] %v14912_v55  ;;  %v14932_v12 = vrot.slane %v21014_v30, %v20931_v22  ;;  %v21016_v55 = vld [vmem:[#allocation68_spill] sm:$0xff]  ;;  %v14948_v54 = vrot.slane %v21022_v21, %v20931_v22  ;;  %v21024_v28 = vld [vmem:[#allocation82_spill] sm:$0xff]  ;;  %vm21112_vm1 = vmmov %vm21095_vm0 }
 0x249   :  { %v14936_v44 = vrot.slane %v21016_v55, %v20931_v22  ;;  %21019 = vst [vmem:[#allocation222_spill] sm:$0xff] %v14940_v11  ;;  %21021 = vst [vmem:[#allocation223_spill] sm:$0xff] %v14944_v53  ;;  %v14952_v26 = vrot.slane %v21024_v28, %v20931_v22  ;;  %v21030_v11 = vld [vmem:[#allocation89_spill] sm:$0xff]  ;;  %v21032_v53 = vld [vmem:[#allocation98_spill] sm:$0xff] }
 0x24a   :  { %21015 = vst [vmem:[#allocation220_spill] sm:$0xff] %v14932_v12  ;;  %21023 = vst [vmem:[#allocation224_spill] sm:$0xff] %v14948_v54  ;;  %v21026_v12 = vld [vmem:[#allocation81_spill] sm:$0xff]  ;;  %v14964_v46 = vrot.slane %v21030_v11, %v20931_v22  ;;  %v14968_v48 = vrot.slane %v21032_v53, %v20931_v22 }
 0x24b   :  { %21017 = vst [vmem:[#allocation221_spill] sm:$0xff] %v14936_v44  ;;  %21025 = vst [vmem:[#allocation225_spill] sm:$0xff] %v14952_v26  ;;  %v14956_v2 = vrot.slane %v21026_v12, %v20931_v22  ;;  %v21028_v44 = vld [vmem:[#allocation90_spill] sm:$0xff]  ;;  %v21034_v54 = vld [vmem:[#allocation97_spill] sm:$0xff] }
 0x24c   :  { %v14960_v34 = vrot.slane %v21028_v44, %v20931_v22  ;;  %21031 = vst [vmem:[#allocation228_spill] sm:$0xff] %v14964_v46  ;;  %21033 = vst [vmem:[#allocation229_spill] sm:$0xff] %v14968_v48  ;;  %v14972_v14 = vrot.slane %v21034_v54, %v20931_v22  ;;  %v21036_v26 = vld [vmem:[#allocation106_spill] sm:$0xff]  ;;  %v21042_v46 = vld [vmem:[#allocation112_spill] sm:$0xff] }
 0x24d   :  { %21027 = vst [vmem:[#allocation226_spill] sm:$0xff] %v14956_v2  ;;  %v14976_v35 = vrot.slane %v21036_v26, %v20931_v22  ;;  %v21038_v2 = vld [vmem:[#allocation105_spill] sm:$0xff]  ;;  %v14988_v51 = vrot.slane %v21042_v46, %v20931_v22  ;;  %vm21123_vm14 = vmmov %vm21095_vm0 }
 0x24e   :  { %21029 = vst [vmem:[#allocation227_spill] sm:$0xff] %v14960_v34  ;;  %21035 = vst [vmem:[#allocation230_spill] sm:$0xff] %v14972_v14  ;;  %v14980_v59 = vrot.slane %v21038_v2, %v20931_v22  ;;  %v21040_v34 = vld [vmem:[#allocation113_spill] sm:$0xff]  ;;  %v21046_v14 = vld [vmem:[#allocation116_spill] sm:$0xff] }
 0x24f   :  { %21037 = vst [vmem:[#allocation231_spill] sm:$0xff] %v14976_v35  ;;  %v14984_v60 = vrot.slane %v21040_v34, %v20931_v22  ;;  %21043 = vst [vmem:[#allocation234_spill] sm:$0xff] %v14988_v51  ;;  %v21044_v48 = vld [vmem:[#allocation117_spill] sm:$0xff]  ;;  %v14996_v13 = vrot.slane %v21046_v14, %v20931_v22  ;;  %v21048_v35 = vld [vmem:[#allocation122_spill] sm:$0xff] }
 0x250   :  { %21039 = vst [vmem:[#allocation232_spill] sm:$0xff] %v14980_v59  ;;  %v14992_v58 = vrot.slane %v21044_v48, %v20931_v22  ;;  %v15000_v6 = vrot.slane %v21048_v35, %v20931_v22  ;;  %v21050_v59 = vld [vmem:[#allocation121_spill] sm:$0xff]  ;;  %v21054_v51 = vld [vmem:[#allocation128_spill] sm:$0xff]  ;;  %vm21135_vm6 = vmmov %vm21095_vm0 }
 0x251   :  { %21041 = vst [vmem:[#allocation233_spill] sm:$0xff] %v14984_v60  ;;  %21047 = vst [vmem:[#allocation236_spill] sm:$0xff] %v14996_v13  ;;  %v15004_v38 = vrot.slane %v21050_v59, %v20931_v22  ;;  %v21052_v60 = vld [vmem:[#allocation129_spill] sm:$0xff]  ;;  %v15012_v16 = vrot.slane %v21054_v51, %v20931_v22  ;;  %v21058_v13 = vld [vmem:[#allocation136_spill] sm:$0xff] }
 0x252   :  { %21045 = vst [vmem:[#allocation235_spill] sm:$0xff] %v14992_v58  ;;  %21049 = vst [vmem:[#allocation237_spill] sm:$0xff] %v15000_v6  ;;  %v15008_v52 = vrot.slane %v21052_v60, %v20931_v22  ;;  %v21056_v58 = vld [vmem:[#allocation137_spill] sm:$0xff]  ;;  %v15020_v0 = vrot.slane %v21058_v13, %v20931_v22  ;;  %v21071_v51 = vld [vmem:[#allocation27_spill] sm:$0xff] }
 0x253   :  { %21051 = vst [vmem:[#allocation238_spill] sm:$0xff] %v15004_v38  ;;  %21055 = vst [vmem:[#allocation240_spill] sm:$0xff] %v15012_v16  ;;  %v15016_v29 = vrot.slane %v21056_v58, %v20931_v22  ;;  %v21060_v6 = vld [vmem:[#allocation145_spill] sm:$0xff]  ;;  %v21062_v38 = vld [vmem:[#allocation144_spill] sm:$0xff] }
 0x254   :  { %21053 = vst [vmem:[#allocation239_spill] sm:$0xff] %v15008_v52  ;;  %21059 = vst [vmem:[#allocation242_spill] sm:$0xff] %v15020_v0  ;;  %v15024_v33 = vrot.slane %v21060_v6, %v20931_v22  ;;  %v15028_v9 = vrot.slane %v21062_v38, %v20931_v22  ;;  %v21064_v52 = vld [vmem:[#allocation153_spill] sm:$0xff]  ;;  %v21066_v16 = vld [vmem:[#allocation152_spill] sm:$0xff]  ;;  %v15114_v0 = vcombine.high %v21071_v51, %v21071_v51 }
 0x255   :  { %21057 = vst [vmem:[#allocation241_spill] sm:$0xff] %v15016_v29  ;;  %v15032_v4 = vrot.slane %v21064_v52, %v20931_v22  ;;  %v15036_v23 = vrot.slane %v21066_v16, %v20931_v22  ;;  %v21068_v29 = vld [vmem:[#allocation159_spill] sm:$0xff]  ;;  %v21076_v38 = vld [vmem:[#allocation16_spill] sm:$0xff]  ;;  %v21077_v6 = vld [vmem:[#allocation46_spill] sm:$0xff] }
 0x256   :  { %21061 = vst [vmem:[#allocation243_spill] sm:$0xff] %v15024_v33  ;;  %21063 = vst [vmem:[#allocation244_spill] sm:$0xff] %v15028_v9  ;;  %v15040_v1 = vrot.slane %v21068_v29, %v20931_v22  ;;  %v20199_v33 = vmov 0.0   ;;  %v3222_v9 = vrot.slane %v15114_v0, %v21001_v7  ;;  %v21074_v29 = vrot.slane %v14041_v19, %v21001_v7 }
 0x257   :  { %21065 = vst [vmem:[#allocation245_spill] sm:$0xff] %v15032_v4  ;;  %21067 = vst [vmem:[#allocation246_spill] sm:$0xff] %v15036_v23  ;;  %11331 = vmatprep.mubr.f32.mxu0 %v20199_v33  ;;  %11343 = vmatprep.mubr.f32.mxu1 %v20199_v33  ;;  %v3218_v4 = vrot.slane %v21071_v51, %v21001_v7  ;;  %v21073_v33 = vrot.slane %v13995_v56, %v21001_v7 }
 0x258   :  { %21069 = vst [vmem:[#allocation247_spill] sm:$0xff] %v15040_v1  ;;  %v21072_v1 = vld [vmem:[#allocation30_spill] sm:$0xff]  ;;  %v21078_v13 = vcombine.high %v21077_v6, %v21077_v6  ;;  %v2114_v56 = vcombine.high %v14360_v37, %v14360_v37  ;;  %v3426_v19 = vrot.slane %v14348_v8, %v21001_v7  ;;  %v21081_v6 = vrot.slane %v20936_v63, %v21001_v7  ;;  %vm21148_vm10 = vmmov %vm21095_vm0 }
 0x259   :  { %v3214_v42 = vrot.slane %v21072_v1, %v21001_v7  ;;  %v3639_v16 = vsel %vm3040_vm4, %v21074_v29, %v21073_v33  ;;  %v21075_v1 = vrot.slane %v14017_v3, %v21001_v7  ;;  %v21079_v33 = vrot.slane %v14051_v24, %v21001_v7  ;;  %vm21160_vm7 = vmmov %vm21095_vm0 }
 0x25a   :  { %v15143_v58 = vrot.slane %v21078_v13, %v21076_v38  ;;  %v15154_v3 = vrot.slane %v2098_v15, %v20931_v22  ;;  %v3434_v13 = vrot.slane %v14360_v37, %v21001_v7  ;;  %v15168_v24 = vrot.slane %v2114_v56, %v20931_v22  ;;  %vm21173_vm12 = vmmov %vm21095_vm0 }
 0x25b   :  { %v3640_v52 = vsel %vm3042_vm8, %v21075_v1, %v3639_v16  ;;  %v3430_v16 = vrot.slane %v2098_v15, %v21001_v7  ;;  %v21083_v37 = vrot.slane %v14328_v5, %v21001_v7  ;;  %v21084_v63 = vrot.slane %v14356_v45, %v21001_v7 }
 0x25c   :  { %v3641_v29 = vsel %vm3044_vm9, %v21079_v33, %v3640_v52  ;;  %21080 = vst [vmem:[#allocation27_spill] sm:$0xff] %v15154_v3  ;;  %v15165_v8 = vcombine.high %v15143_v58, %v15143_v58  ;;  %21082 = vst [vmem:[#allocation30_spill] sm:$0xff] %v15168_v24  ;;  %v3438_v52 = vrot.slane %v2114_v56, %v21001_v7 }
 0x25d   :  { %v3642_v1 = vsel %vm3046_vm2, %v21081_v6, %v3641_v29  ;;  %v3442_v15 = vrot.slane %v15143_v58, %v21001_v7  ;;  %v3688_v29 = vsel %vm3040_vm4, %v21084_v63, %v21083_v37  ;;  %v1622_v6 = vcombine.high %v20944_v31, %v20944_v31  ;;  %v21086_v37 = vld [vmem:[#allocation43_spill] sm:$0xff] }
 0x25e   :  { %v3643_v33 = vsel %vm3048_vm13, %v3214_v42, %v3642_v1  ;;  %v3446_v42 = vrot.slane %v15165_v8, %v21001_v7  ;;  %v3689_v1 = vsel %vm3042_vm8, %v3426_v19, %v3688_v29  ;;  %v21087_v63 = vcombine.high %v21086_v37, %v21086_v37 }
 0x25f   :  { %v3644_v60 = vsel %vm3050_vm15, %v3218_v4, %v3643_v33  ;;  %v3690_v45 = vsel %vm3044_vm9, %v3430_v16, %v3689_v1  ;;  %v21088_v4 = vld [vmem:[#allocation45_spill] sm:$0xff]  ;;  %v15205_v19 = vrot.slane %v1622_v6, %v20931_v22 }
 0x260   :  { %v15190_v5 = vsel %vm3052_vm3, %v3222_v9, %v3644_v60  ;;  %v15197_v59 = vrot.slane %v21087_v63, %v21076_v38  ;;  %v1638_v33 = vcombine.high %v21088_v4, %v21088_v4  ;;  %v3691_v56 = vsel %vm3046_vm2, %v3434_v13, %v3690_v45 }
 0x261   :  { %21085 = vst [vmem:[#allocation46_spill] sm:$0xff] %v15190_v5  ;;  %11332 = vmatmul.mubr.msk.f32.vlgmr.msra.gmra.mrb[64].mxu0 %vm21089_vm11, %v15190_v5  ;;  %21090 = vst [vmem:[#allocation43_spill] sm:$0xff] %v15205_v19  ;;  %v3234_v9 = vrot.slane %v20944_v31, %v21001_v7  ;;  %v3238_v60 = vrot.slane %v1622_v6, %v21001_v7  ;;  %v3692_v16 = vsel %vm3048_vm13, %v3438_v52, %v3691_v56 }
 0x262   :  { %v15213_v29 = vcombine.high %v15197_v59, %v15197_v59  ;;  %v15216_v1 = vrot.slane %v1638_v33, %v20931_v22  ;;  %v3242_v13 = vrot.slane %v21088_v4, %v21001_v7  ;;  %v3693_v45 = vsel %vm3050_vm15, %v3442_v15, %v3692_v16  ;;  %v21096_v16 = vld [vmem:[#allocation66_spill] sm:$0xff]  ;;  %vm21185_vm11 = vmmov %vm21095_vm0 }
 0x263   :  { %v3246_v37 = vrot.slane %v1638_v33, %v21001_v7  ;;  %v3250_v31 = vrot.slane %v15197_v59, %v21001_v7  ;;  %v21092_v52 = vrot.slane %v20940_v36, %v21001_v7  ;;  %v21093_v6 = vrot.slane %v20942_v10, %v21001_v7  ;;  %v15242_v36 = vld [vmem:[%s19777_s1 + $0xa0] sm:$0xff] }
 0x264   :  { %21091 = vst [vmem:[#allocation45_spill] sm:$0xff] %v15216_v1  ;;  %v15232_v63 = vsel %vm3052_vm3, %v3446_v42, %v3693_v45  ;;  %v3254_v15 = vrot.slane %v15213_v29, %v21001_v7  ;;  %v2166_v42 = vcombine.high %v14386_v39, %v14386_v39  ;;  %v21097_v45 = vcombine.high %v21096_v16, %v21096_v16 }
 0x265   :  { %v3646_v56 = vsel %vm3040_vm4, %v21093_v6, %v21092_v52  ;;  %21094 = vst [vmem:[#allocation248_spill] sm:$0xff] %v15232_v63  ;;  %11344 = vmatmul.mubr.msk.f32.vlgmr.msra.gmra.mrb[0].mxu1 %vm21095_vm0, %v15232_v63  ;;  %v11965_v6 = vld [vmem:[%s19777_s1 + $0x90] sm:$0xff]  ;;  %v21098_v16 = vrot.slane %v14366_v61, %v21001_v7 }
 0x266   :  { %v3647_v33 = vsel %vm3042_vm8, %v3234_v9, %v3646_v56  ;;  %v15253_v52 = vrot.slane %v21097_v45, %v21076_v38  ;;  %v2182_v9 = vcombine.high %v14398_v18, %v14398_v18  ;;  %11356 = vmatpush3.msra.mxu1 %v11965_v6  ;;  %v21099_v45 = vrot.slane %v14394_v41, %v21001_v7 }
 0x267   :  { %v3648_v10 = vsel %vm3044_vm9, %v3238_v60, %v3647_v33  ;;  %v3458_v60 = vrot.slane %v14386_v39, %v21001_v7  ;;  %v3466_v33 = vrot.slane %v14398_v18, %v21001_v7  ;;  %11381 = vmatprep.subr.mxu1 %v15242_v36  ;;  %v3462_v41 = vrot.slane %v2166_v42, %v21001_v7 }
 0x268   :  { %v3649_v56 = vsel %vm3046_vm2, %v3242_v13, %v3648_v10  ;;  %v3695_v4 = vsel %vm3040_vm4, %v21099_v45, %v21098_v16  ;;  %v15275_v6 = vcombine.high %v15253_v52, %v15253_v52  ;;  %v15278_v13 = vrot.slane %v2166_v42, %v20931_v22  ;;  %v21104_v42 = vld [vmem:[#allocation51_spill] sm:$0xff] }
 0x269   :  { %v3650_v63 = vsel %vm3048_vm13, %v3246_v37, %v3649_v56  ;;  %v15281_v39 = vrot.slane %v2182_v9, %v20931_v22  ;;  %v3470_v18 = vrot.slane %v2182_v9, %v21001_v7  ;;  %v3474_v37 = vrot.slane %v15253_v52, %v21001_v7 }
 0x26a   :  { %21100 = vst [vmem:[#allocation66_spill] sm:$0xff] %v15278_v13  ;;  %v3651_v61 = vsel %vm3050_vm15, %v3250_v31, %v3650_v63  ;;  %v3478_v16 = vrot.slane %v15275_v6, %v21001_v7  ;;  %v3696_v45 = vsel %vm3042_vm8, %v3458_v60, %v3695_v4  ;;  %v1690_v63 = vcombine.high %v20951_v43, %v20951_v43 }
 0x26b   :  { %21101 = vst [vmem:[#allocation249_spill] sm:$0xff] %v15281_v39  ;;  %v15290_v10 = vsel %vm3052_vm3, %v3254_v15, %v3651_v61  ;;  %v3697_v31 = vsel %vm3044_vm9, %v3462_v41, %v3696_v45  ;;  %v21105_v15 = vcombine.high %v21104_v42, %v21104_v42  ;;  %v21106_v61 = vld [vmem:[#allocation69_spill] sm:$0xff]  ;;  %v3266_v4 = vrot.slane %v20951_v43, %v21001_v7 }
 0x26c   :  { %21102 = vst [vmem:[#allocation250_spill] sm:$0xff] %v15290_v10  ;;  %11334 = vmatprep.mubr.msk.f32.mxu0 %vm21103_vm5, %v15290_v10  ;;  %v1706_v56 = vcombine.high %v21106_v61, %v21106_v61  ;;  %v3698_v5 = vsel %vm3046_vm2, %v3466_v33, %v3697_v31  ;;  %v3274_v60 = vrot.slane %v21106_v61, %v21001_v7  ;;  %vm21210_vm5 = vmmov %vm21095_vm0 }
 0x26d   :  { %v15306_v9 = vrot.slane %v21105_v15, %v21076_v38  ;;  %v21107_v41 = vrot.slane %v14100_v27, %v21001_v7  ;;  %v21108_v45 = vrot.slane %v20949_v62, %v21001_v7  ;;  %v3699_v15 = vsel %vm3048_vm13, %v3470_v18, %v3698_v5 }
 0x26e   :  { %v15328_v33 = vrot.slane %v1690_v63, %v20931_v22  ;;  %v15331_v43 = vrot.slane %v1706_v56, %v20931_v22  ;;  %v3700_v31 = vsel %vm3050_vm15, %v3474_v37, %v3699_v15  ;;  %v3270_v27 = vrot.slane %v1690_v63, %v21001_v7  ;;  %v21113_v63 = vld [vmem:[#allocation52_spill] sm:$0xff] }
 0x26f   :  { %v3653_v42 = vsel %vm3040_vm4, %v21108_v45, %v21107_v41  ;;  %v15325_v10 = vcombine.high %v15306_v9, %v15306_v9  ;;  %v3278_v62 = vrot.slane %v1706_v56, %v21001_v7  ;;  %v3282_v61 = vrot.slane %v15306_v9, %v21001_v7 }
 0x270   :  { %21109 = vst [vmem:[#allocation51_spill] sm:$0xff] %v15328_v33  ;;  %21110 = vst [vmem:[#allocation69_spill] sm:$0xff] %v15331_v43  ;;  %v15339_v5 = vsel %vm3052_vm3, %v3478_v16, %v3700_v31  ;;  %v3654_v45 = vsel %vm3042_vm8, %v3266_v4, %v3653_v42  ;;  %v2234_v56 = vcombine.high %v14424_v25, %v14424_v25  ;;  %v21115_v31 = vld [vmem:[#allocation124_spill] sm:$0xff] }
 0x271   :  { %21111 = vst [vmem:[#allocation251_spill] sm:$0xff] %v15339_v5  ;;  %v3286_v41 = vrot.slane %v15325_v10, %v21001_v7  ;;  %11346 = vmatprep.mubr.msk.f32.mxu1 %vm21112_vm1, %v15339_v5  ;;  %v3655_v37 = vsel %vm3044_vm9, %v3270_v27, %v3654_v45  ;;  %v21114_v16 = vcombine.high %v21113_v63, %v21113_v63  ;;  %v21116_v27 = vld [vmem:[#allocation118_spill] sm:$0xff]  ;;  %v21118_v5 = vld [vmem:[#allocation123_spill] sm:$0xff]  ;;  %vm21223_vm1 = vmmov %vm21095_vm0 }
 0x272   :  { %v2250_v18 = vcombine.high %v21115_v31, %v21115_v31  ;;  %v3656_v35 = vsel %vm3046_vm2, %v3274_v60, %v3655_v37  ;;  %v3490_v4 = vrot.slane %v14424_v25, %v21001_v7  ;;  %v3498_v42 = vrot.slane %v21115_v31, %v21001_v7 }
 0x273   :  { %v15355_v15 = vrot.slane %v21114_v16, %v21076_v38  ;;  %v21117_v45 = vrot.slane %v21116_v27, %v21001_v7  ;;  %v21119_v14 = vrot.slane %v21118_v5, %v21001_v7  ;;  %v3657_v16 = vsel %vm3048_vm13, %v3278_v62, %v3656_v35  ;;  %v21127_v62 = vld [vmem:[#allocation77_spill] sm:$0xff] }
 0x274   :  { %v15377_v60 = vrot.slane %v2234_v56, %v20931_v22  ;;  %v15380_v25 = vrot.slane %v2250_v18, %v20931_v22  ;;  %v3658_v37 = vsel %vm3050_vm15, %v3282_v61, %v3657_v16  ;;  %v3494_v31 = vrot.slane %v2234_v56, %v21001_v7  ;;  %v21125_v16 = vld [vmem:[#allocation62_spill] sm:$0xff] }
 0x275   :  { %v3702_v63 = vsel %vm3040_vm4, %v21119_v14, %v21117_v45  ;;  %v15374_v48 = vcombine.high %v15355_v15, %v15355_v15  ;;  %v3502_v5 = vrot.slane %v2250_v18, %v21001_v7  ;;  %v3506_v14 = vrot.slane %v15355_v15, %v21001_v7  ;;  %v21124_v18 = vld [vmem:[#allocation75_spill] sm:$0xff] }
 0x276   :  { %21120 = vst [vmem:[#allocation52_spill] sm:$0xff] %v15377_v60  ;;  %21121 = vst [vmem:[#allocation124_spill] sm:$0xff] %v15380_v25  ;;  %v15388_v35 = vsel %vm3052_vm3, %v3286_v41, %v3658_v37  ;;  %v3703_v45 = vsel %vm3042_vm8, %v3490_v4, %v3702_v63  ;;  %v1758_v56 = vcombine.high %v21124_v18, %v21124_v18 }
 0x277   :  { %21122 = vst [vmem:[#allocation118_spill] sm:$0xff] %v15388_v35  ;;  %v3510_v27 = vrot.slane %v15374_v48, %v21001_v7  ;;  %11335 = vmatmul.mubr.msk.f32.gmra.mrb[66].mxu0 %vm21123_vm14, %v15388_v35  ;;  %v3704_v61 = vsel %vm3044_vm9, %v3494_v31, %v3703_v45  ;;  %v21126_v41 = vcombine.high %v21125_v16, %v21125_v16  ;;  %v21128_v31 = vld [vmem:[#allocation71_spill] sm:$0xff]  ;;  %v21130_v35 = vld [vmem:[#allocation76_spill] sm:$0xff]  ;;  %vm21232_vm14 = vcmask 1040384  }
 0x278   :  { %v1774_v46 = vcombine.high %v21127_v62, %v21127_v62  ;;  %v3705_v34 = vsel %vm3046_vm2, %v3498_v42, %v3704_v61  ;;  %v3298_v4 = vrot.slane %v21124_v18, %v21001_v7  ;;  %v3306_v63 = vrot.slane %v21127_v62, %v21001_v7 }
 0x279   :  { %v15404_v37 = vrot.slane %v21126_v41, %v21076_v38  ;;  %v21129_v45 = vrot.slane %v21128_v31, %v21001_v7  ;;  %v21131_v2 = vrot.slane %v21130_v35, %v21001_v7  ;;  %v3706_v41 = vsel %vm3048_vm13, %v3502_v5, %v3705_v34  ;;  %v21139_v5 = vld [vmem:[#allocation132_spill] sm:$0xff] }
 0x27a   :  { %v15426_v42 = vrot.slane %v1758_v56, %v20931_v22  ;;  %v15429_v61 = vrot.slane %v1774_v46, %v20931_v22  ;;  %v3707_v62 = vsel %vm3050_vm15, %v3506_v14, %v3706_v41  ;;  %v3302_v18 = vrot.slane %v1758_v56, %v21001_v7  ;;  %v21137_v41 = vld [vmem:[#allocation19_spill] sm:$0xff] }
 0x27b   :  { %v3660_v16 = vsel %vm3040_vm4, %v21131_v2, %v21129_v45  ;;  %v15423_v26 = vcombine.high %v15404_v37, %v15404_v37  ;;  %v3310_v35 = vrot.slane %v1774_v46, %v21001_v7  ;;  %v3314_v2 = vrot.slane %v15404_v37, %v21001_v7  ;;  %v21136_v46 = vld [vmem:[#allocation130_spill] sm:$0xff] }
 0x27c   :  { %21132 = vst [vmem:[#allocation123_spill] sm:$0xff] %v15426_v42  ;;  %21133 = vst [vmem:[#allocation75_spill] sm:$0xff] %v15429_v61  ;;  %v15437_v34 = vsel %vm3052_vm3, %v3510_v27, %v3707_v62  ;;  %v3661_v45 = vsel %vm3042_vm8, %v3298_v4, %v3660_v16  ;;  %v2302_v56 = vcombine.high %v21136_v46, %v21136_v46 }
 0x27d   :  { %21134 = vst [vmem:[#allocation62_spill] sm:$0xff] %v15437_v34  ;;  %v3318_v31 = vrot.slane %v15423_v26, %v21001_v7  ;;  %11347 = vmatmul.mubr.msk.f32.gmra.mrb[2].mxu1 %vm21135_vm6, %v15437_v34  ;;  %v3662_v14 = vsel %vm3044_vm9, %v3302_v18, %v3661_v45  ;;  %v21138_v27 = vcombine.high %v21137_v41, %v21137_v41  ;;  %v21140_v18 = vld [vmem:[#allocation125_spill] sm:$0xff]  ;;  %v21142_v34 = vld [vmem:[#allocation131_spill] sm:$0xff]  ;;  %vm21242_vm6 = vmmov %vm21095_vm0 }
 0x27e   :  { %v2318_v54 = vcombine.high %v21139_v5, %v21139_v5  ;;  %v3663_v53 = vsel %vm3046_vm2, %v3306_v63, %v3662_v14  ;;  %v3522_v4 = vrot.slane %v21136_v46, %v21001_v7  ;;  %v3530_v16 = vrot.slane %v21139_v5, %v21001_v7 }
 0x27f   :  { %v15453_v62 = vrot.slane %v21138_v27, %v21076_v38  ;;  %v21141_v45 = vrot.slane %v21140_v18, %v21001_v7  ;;  %v21143_v11 = vrot.slane %v21142_v34, %v21001_v7  ;;  %v3664_v27 = vsel %vm3048_vm13, %v3310_v35, %v3663_v53  ;;  %v21152_v35 = vld [vmem:[#allocation85_spill] sm:$0xff] }
 0x280   :  { %v15475_v63 = vrot.slane %v2302_v56, %v20931_v22  ;;  %v15478_v14 = vrot.slane %v2318_v54, %v20931_v22  ;;  %v3665_v5 = vsel %vm3050_vm15, %v3314_v2, %v3664_v27  ;;  %v3526_v46 = vrot.slane %v2302_v56, %v21001_v7  ;;  %v21150_v27 = vld [vmem:[#allocation31_spill] sm:$0xff] }
 0x281   :  { %v3709_v41 = vsel %vm3040_vm4, %v21143_v11, %v21141_v45  ;;  %v15472_v44 = vcombine.high %v15453_v62, %v15453_v62  ;;  %v3534_v34 = vrot.slane %v2318_v54, %v21001_v7  ;;  %v3538_v11 = vrot.slane %v15453_v62, %v21001_v7  ;;  %v21149_v54 = vld [vmem:[#allocation83_spill] sm:$0xff] }
 0x282   :  { %21145 = vst [vmem:[#allocation71_spill] sm:$0xff] %v15475_v63  ;;  %21146 = vst [vmem:[#allocation76_spill] sm:$0xff] %v15478_v14  ;;  %v15486_v53 = vsel %vm3052_vm3, %v3318_v31, %v3665_v5  ;;  %v3710_v45 = vsel %vm3042_vm8, %v3522_v4, %v3709_v41  ;;  %v1826_v56 = vcombine.high %v21149_v54, %v21149_v54 }
 0x283   :  { %21144 = vst [vmem:[#allocation77_spill] sm:$0xff] %v15472_v44  ;;  %21147 = vst [vmem:[#allocation130_spill] sm:$0xff] %v15486_v53  ;;  %v3542_v18 = vrot.slane %v15472_v44, %v21001_v7  ;;  %11337 = vmatprep.mubr.msk.f32.mxu0 %vm21148_vm10, %v15486_v53  ;;  %v3711_v2 = vsel %vm3044_vm9, %v3526_v46, %v3710_v45  ;;  %v21151_v31 = vcombine.high %v21150_v27, %v21150_v27  ;;  %v21153_v46 = vld [vmem:[#allocation78_spill] sm:$0xff]  ;;  %v21155_v53 = vld [vmem:[#allocation84_spill] sm:$0xff] }
 0x284   :  { %v1842_v12 = vcombine.high %v21152_v35, %v21152_v35  ;;  %v3712_v28 = vsel %vm3046_vm2, %v3530_v16, %v3711_v2  ;;  %v3330_v4 = vrot.slane %v21149_v54, %v21001_v7  ;;  %v3338_v41 = vrot.slane %v21152_v35, %v21001_v7  ;;  %vm21247_vm10 = vmmov %vm21095_vm0 }
 0x285   :  { %v15502_v5 = vrot.slane %v21151_v31, %v21076_v38  ;;  %v21154_v45 = vrot.slane %v21153_v46, %v21001_v7  ;;  %v21156_v21 = vrot.slane %v21155_v53, %v21001_v7  ;;  %v3713_v31 = vsel %vm3048_vm13, %v3534_v34, %v3712_v28  ;;  %v21164_v34 = vld [vmem:[#allocation140_spill] sm:$0xff] }
 0x286   :  { %v15524_v16 = vrot.slane %v1826_v56, %v20931_v22  ;;  %v15527_v2 = vrot.slane %v1842_v12, %v20931_v22  ;;  %v3714_v35 = vsel %vm3050_vm15, %v3538_v11, %v3713_v31  ;;  %v3334_v54 = vrot.slane %v1826_v56, %v21001_v7  ;;  %v21162_v31 = vld [vmem:[#allocation18_spill] sm:$0xff] }
 0x287   :  { %v3667_v27 = vsel %vm3040_vm4, %v21156_v21, %v21154_v45  ;;  %v15521_v50 = vcombine.high %v15502_v5, %v15502_v5  ;;  %v3342_v53 = vrot.slane %v1842_v12, %v21001_v7  ;;  %v3346_v21 = vrot.slane %v15502_v5, %v21001_v7  ;;  %v21161_v12 = vld [vmem:[#allocation138_spill] sm:$0xff] }
 0x288   :  { %21157 = vst [vmem:[#allocation19_spill] sm:$0xff] %v15524_v16  ;;  %21158 = vst [vmem:[#allocation132_spill] sm:$0xff] %v15527_v2  ;;  %v15535_v28 = vsel %vm3052_vm3, %v3542_v18, %v3714_v35  ;;  %v3668_v45 = vsel %vm3042_vm8, %v3330_v4, %v3667_v27  ;;  %v2370_v56 = vcombine.high %v21161_v12, %v21161_v12 }
 0x289   :  { %21159 = vst [vmem:[#allocation125_spill] sm:$0xff] %v15535_v28  ;;  %v3350_v46 = vrot.slane %v15521_v50, %v21001_v7  ;;  %11349 = vmatprep.mubr.msk.f32.mxu1 %vm21160_vm7, %v15535_v28  ;;  %v3669_v11 = vsel %vm3044_vm9, %v3334_v54, %v3668_v45  ;;  %v21163_v18 = vcombine.high %v21162_v31, %v21162_v31  ;;  %v21165_v54 = vld [vmem:[#allocation133_spill] sm:$0xff]  ;;  %v21167_v28 = vld [vmem:[#allocation139_spill] sm:$0xff]  ;;  %vm21255_vm7 = vmmov %vm21232_vm14 }
 0x28a   :  { %v2386_v57 = vcombine.high %v21164_v34, %v21164_v34  ;;  %v3670_v55 = vsel %vm3046_vm2, %v3338_v41, %v3669_v11  ;;  %v3554_v4 = vrot.slane %v21161_v12, %v21001_v7  ;;  %v3562_v27 = vrot.slane %v21164_v34, %v21001_v7 }
 0x28b   :  { %v15551_v35 = vrot.slane %v21163_v18, %v21076_v38  ;;  %v21166_v45 = vrot.slane %v21165_v54, %v21001_v7  ;;  %v21168_v30 = vrot.slane %v21167_v28, %v21001_v7  ;;  %v3671_v18 = vsel %vm3048_vm13, %v3342_v53, %v3670_v55  ;;  %v21177_v53 = vld [vmem:[#allocation93_spill] sm:$0xff] }
 0x28c   :  { %v15573_v41 = vrot.slane %v2370_v56, %v20931_v22  ;;  %v15576_v11 = vrot.slane %v2386_v57, %v20931_v22  ;;  %v3672_v34 = vsel %vm3050_vm15, %v3346_v21, %v3671_v18  ;;  %v3558_v12 = vrot.slane %v2370_v56, %v21001_v7  ;;  %v21175_v18 = vld [vmem:[#allocation35_spill] sm:$0xff] }
 0x28d   :  { %v3716_v31 = vsel %vm3040_vm4, %v21168_v30, %v21166_v45  ;;  %v15570_v20 = vcombine.high %v15551_v35, %v15551_v35  ;;  %v3566_v28 = vrot.slane %v2386_v57, %v21001_v7  ;;  %v3570_v30 = vrot.slane %v15551_v35, %v21001_v7  ;;  %v21174_v57 = vld [vmem:[#allocation91_spill] sm:$0xff] }
 0x28e   :  { %21170 = vst [vmem:[#allocation83_spill] sm:$0xff] %v15573_v41  ;;  %21171 = vst [vmem:[#allocation31_spill] sm:$0xff] %v15576_v11  ;;  %v15584_v55 = vsel %vm3052_vm3, %v3350_v46, %v3672_v34  ;;  %v3717_v45 = vsel %vm3042_vm8, %v3554_v4, %v3716_v31  ;;  %v1894_v56 = vcombine.high %v21174_v57, %v21174_v57 }
 0x28f   :  { %21169 = vst [vmem:[#allocation131_spill] sm:$0xff] %v15570_v20  ;;  %21172 = vst [vmem:[#allocation85_spill] sm:$0xff] %v15584_v55  ;;  %v3574_v54 = vrot.slane %v15570_v20, %v21001_v7  ;;  %11338 = vmatmul.mubr.msk.f32.gmra.mrb[68].mxu0 %vm21173_vm12, %v15584_v55  ;;  %v3718_v21 = vsel %vm3044_vm9, %v3558_v12, %v3717_v45  ;;  %v21176_v46 = vcombine.high %v21175_v18, %v21175_v18  ;;  %v21178_v12 = vld [vmem:[#allocation86_spill] sm:$0xff]  ;;  %v21180_v55 = vld [vmem:[#allocation92_spill] sm:$0xff] }
 0x290   :  { %v1910_v49 = vcombine.high %v21177_v53, %v21177_v53  ;;  %v3719_v17 = vsel %vm3046_vm2, %v3562_v27, %v3718_v21  ;;  %v3362_v4 = vrot.slane %v21174_v57, %v21001_v7  ;;  %v3370_v31 = vrot.slane %v21177_v53, %v21001_v7  ;;  %vm21256_vm12 = vmmov %vm21095_vm0 }
 0x291   :  { %v15600_v34 = vrot.slane %v21176_v46, %v21076_v38  ;;  %v21179_v45 = vrot.slane %v21178_v12, %v21001_v7  ;;  %v21181_v47 = vrot.slane %v21180_v55, %v21001_v7  ;;  %v3720_v46 = vsel %vm3048_vm13, %v3566_v28, %v3719_v17  ;;  %v21190_v28 = vld [vmem:[#allocation148_spill] sm:$0xff] }
 0x292   :  { %v15622_v27 = vrot.slane %v1894_v56, %v20931_v22  ;;  %v15625_v21 = vrot.slane %v1910_v49, %v20931_v22  ;;  %v3721_v53 = vsel %vm3050_vm15, %v3570_v30, %v3720_v46  ;;  %v3366_v57 = vrot.slane %v1894_v56, %v21001_v7  ;;  %v21187_v46 = vld [vmem:[#allocation6_spill] sm:$0xff] }
 0x293   :  { %v3674_v18 = vsel %vm3040_vm4, %v21181_v47, %v21179_v45  ;;  %v15619_v40 = vcombine.high %v15600_v34, %v15600_v34  ;;  %v3374_v55 = vrot.slane %v1910_v49, %v21001_v7  ;;  %v3378_v47 = vrot.slane %v15600_v34, %v21001_v7  ;;  %v21186_v49 = vld [vmem:[#allocation146_spill] sm:$0xff] }
 0x294   :  { %21182 = vst [vmem:[#allocation78_spill] sm:$0xff] %v15622_v27  ;;  %21183 = vst [vmem:[#allocation84_spill] sm:$0xff] %v15625_v21  ;;  %v15633_v17 = vsel %vm3052_vm3, %v3574_v54, %v3721_v53  ;;  %v3675_v45 = vsel %vm3042_vm8, %v3362_v4, %v3674_v18  ;;  %v2438_v56 = vcombine.high %v21186_v49, %v21186_v49 }
 0x295   :  { %21184 = vst [vmem:[#allocation138_spill] sm:$0xff] %v15633_v17  ;;  %v3382_v12 = vrot.slane %v15619_v40, %v21001_v7  ;;  %11350 = vmatmul.mubr.msk.f32.gmra.mrb[4].mxu1 %vm21185_vm11, %v15633_v17  ;;  %v3676_v30 = vsel %vm3044_vm9, %v3366_v57, %v3675_v45  ;;  %v21188_v54 = vcombine.high %v21187_v46, %v21187_v46  ;;  %v21191_v57 = vld [vmem:[#allocation141_spill] sm:$0xff]  ;;  %v21193_v17 = vld [vmem:[#allocation147_spill] sm:$0xff]  ;;  %vm21261_vm11 = vmmov %vm21255_vm7 }
 0x296   :  { %v2454_v32 = vcombine.high %v21190_v28, %v21190_v28  ;;  %v3677_v23 = vsel %vm3046_vm2, %v3370_v31, %v3676_v30  ;;  %v3586_v4 = vrot.slane %v21186_v49, %v21001_v7  ;;  %v3594_v18 = vrot.slane %v21190_v28, %v21001_v7 }
 0x297   :  { %v15649_v53 = vrot.slane %v21188_v54, %v21076_v38  ;;  %v21192_v45 = vrot.slane %v21191_v57, %v21001_v7  ;;  %v21194_v20 = vrot.slane %v21193_v17, %v21001_v7  ;;  %v3678_v54 = vsel %vm3048_vm13, %v3374_v55, %v3677_v23  ;;  %v21202_v55 = vld [vmem:[#allocation101_spill] sm:$0xff] }
 0x298   :  { %v15671_v31 = vrot.slane %v2438_v56, %v20931_v22  ;;  %v15674_v30 = vrot.slane %v2454_v32, %v20931_v22  ;;  %v3679_v28 = vsel %vm3050_vm15, %v3378_v47, %v3678_v54  ;;  %v3590_v49 = vrot.slane %v2438_v56, %v21001_v7  ;;  %v21200_v54 = vld [vmem:[#allocation17_spill] sm:$0xff] }
 0x299   :  { %21189 = vst [vmem:[#allocation18_spill] sm:$0xff] %v15649_v53  ;;  %v3723_v46 = vsel %vm3040_vm4, %v21194_v20, %v21192_v45  ;;  %v15668_v11 = vcombine.high %v15649_v53, %v15649_v53  ;;  %v3598_v17 = vrot.slane %v2454_v32, %v21001_v7  ;;  %v3602_v20 = vrot.slane %v15649_v53, %v21001_v7  ;;  %v21199_v32 = vld [vmem:[#allocation99_spill] sm:$0xff] }
 0x29a   :  { %21196 = vst [vmem:[#allocation133_spill] sm:$0xff] %v15671_v31  ;;  %21197 = vst [vmem:[#allocation139_spill] sm:$0xff] %v15674_v30  ;;  %v15682_v23 = vsel %vm3052_vm3, %v3382_v12, %v3679_v28  ;;  %v3724_v45 = vsel %vm3042_vm8, %v3586_v4, %v3723_v46  ;;  %v1962_v56 = vcombine.high %v21199_v32, %v21199_v32 }
 0x29b   :  { %21195 = vst [vmem:[#allocation140_spill] sm:$0xff] %v15668_v11  ;;  %21198 = vst [vmem:[#allocation91_spill] sm:$0xff] %v15682_v23  ;;  %v3606_v57 = vrot.slane %v15668_v11, %v21001_v7  ;;  %11340 = vmatprep.mubr.msk.f32.mxu0 %vm21095_vm0, %v15682_v23  ;;  %v3725_v47 = vsel %vm3044_vm9, %v3590_v49, %v3724_v45  ;;  %v21201_v12 = vcombine.high %v21200_v54, %v21200_v54  ;;  %v21203_v49 = vld [vmem:[#allocation94_spill] sm:$0xff]  ;;  %v21205_v23 = vld [vmem:[#allocation100_spill] sm:$0xff] }
 0x29c   :  { %v1978_v30 = vcombine.high %v21202_v55, %v21202_v55  ;;  %v3726_v11 = vsel %vm3046_vm2, %v3594_v18, %v3725_v47  ;;  %v3394_v4 = vrot.slane %v21199_v32, %v21001_v7  ;;  %v3402_v46 = vrot.slane %v21202_v55, %v21001_v7 }
 0x29d   :  { %v15698_v28 = vrot.slane %v21201_v12, %v21076_v38  ;;  %v21204_v45 = vrot.slane %v21203_v49, %v21001_v7  ;;  %v21206_v31 = vrot.slane %v21205_v23, %v21001_v7  ;;  %v3727_v12 = vsel %vm3048_vm13, %v3598_v17, %v3726_v11  ;;  %v21214_v17 = vld [vmem:[#allocation155_spill] sm:$0xff] }
 0x29e   :  { %v15720_v18 = vrot.slane %v1962_v56, %v20931_v22  ;;  %v15723_v47 = vrot.slane %v1978_v30, %v20931_v22  ;;  %v3728_v55 = vsel %vm3050_vm15, %v3602_v20, %v3727_v12  ;;  %v3398_v32 = vrot.slane %v1962_v56, %v21001_v7  ;;  %v21212_v12 = vld [vmem:[#allocation9_spill] sm:$0xff] }
 0x29f   :  { %v3681_v54 = vsel %vm3040_vm4, %v21206_v31, %v21204_v45  ;;  %v15717_v44 = vcombine.high %v15698_v28, %v15698_v28  ;;  %v3406_v23 = vrot.slane %v1978_v30, %v21001_v7  ;;  %v3410_v31 = vrot.slane %v15698_v28, %v21001_v7  ;;  %v21211_v30 = vld [vmem:[#allocation154_spill] sm:$0xff] }
 0x2a0   :  { %21207 = vst [vmem:[#allocation35_spill] sm:$0xff] %v15720_v18  ;;  %21208 = vst [vmem:[#allocation93_spill] sm:$0xff] %v15723_v47  ;;  %v15731_v11 = vsel %vm3052_vm3, %v3606_v57, %v3728_v55  ;;  %v3682_v45 = vsel %vm3042_vm8, %v3394_v4, %v3681_v54  ;;  %v2506_v56 = vcombine.high %v21211_v30, %v21211_v30 }
 0x2a1   :  { %21209 = vst [vmem:[#allocation86_spill] sm:$0xff] %v15731_v11  ;;  %v3414_v49 = vrot.slane %v15717_v44, %v21001_v7  ;;  %11352 = vmatprep.mubr.msk.f32.mxu1 %vm21210_vm5, %v15731_v11  ;;  %v3683_v20 = vsel %vm3044_vm9, %v3398_v32, %v3682_v45  ;;  %v21213_v57 = vcombine.high %v21212_v12, %v21212_v12  ;;  %v21215_v32 = vld [vmem:[#allocation149_spill] sm:$0xff]  ;;  %v21217_v11 = vld [vmem:[#allocation156_spill] sm:$0xff]  ;;  %vm21272_vm5 = vmmov %vm21255_vm7 }
 0x2a2   :  { %v2522_v41 = vcombine.high %v21214_v17, %v21214_v17  ;;  %v3684_v14 = vsel %vm3046_vm2, %v3402_v46, %v3683_v20  ;;  %v3618_v4 = vrot.slane %v21211_v30, %v21001_v7  ;;  %v3626_v54 = vrot.slane %v21214_v17, %v21001_v7 }
 0x2a3   :  { %v15747_v55 = vrot.slane %v21213_v57, %v21076_v38  ;;  %v21216_v45 = vrot.slane %v21215_v32, %v21001_v7  ;;  %v21218_v53 = vrot.slane %v21217_v11, %v21001_v7  ;;  %v3685_v57 = vsel %vm3048_vm13, %v3406_v23, %v3684_v14 }
 0x2a4   :  { %v15769_v46 = vrot.slane %v2506_v56, %v20931_v22  ;;  %v15772_v20 = vrot.slane %v2522_v41, %v20931_v22  ;;  %v3686_v17 = vsel %vm3050_vm15, %v3410_v31, %v3685_v57  ;;  %v3622_v30 = vrot.slane %v2506_v56, %v21001_v7 }
 0x2a5   :  { %v3730_v12 = vsel %vm3040_vm4, %v21218_v53, %v21216_v45  ;;  %v15766_v38 = vcombine.high %v15747_v55, %v15747_v55  ;;  %v3630_v11 = vrot.slane %v2522_v41, %v21001_v7  ;;  %v3634_v53 = vrot.slane %v15747_v55, %v21001_v7 }
 0x2a6   :  { %21220 = vst [vmem:[#allocation146_spill] sm:$0xff] %v15769_v46  ;;  %21221 = vst [vmem:[#allocation6_spill] sm:$0xff] %v15772_v20  ;;  %v15780_v14 = vsel %vm3052_vm3, %v3414_v49, %v3686_v17  ;;  %v3731_v45 = vsel %vm3042_vm8, %v3618_v4, %v3730_v12  ;;  %v21224_v41 = vmov 0.0   ;;  %v15793_v57 = vrot.slane %v21071_v51, %v20931_v22  ;;  %v21226_v49 = vld [vmem:[#allocation213_spill] sm:$0xff]  ;;  %v21227_v17 = vld [vmem:[#allocation163_spill] sm:$0xff] }
 0x2a7   :  { %21219 = vst [vmem:[#allocation92_spill] sm:$0xff] %v15766_v38  ;;  %21222 = vst [vmem:[#allocation148_spill] sm:$0xff] %v15780_v14  ;;  %v3638_v32 = vrot.slane %v15766_v38, %v21001_v7  ;;  %11341 = vmatmul.mubr.msk.f32.gmra.mrb[70].mxu0 %vm21223_vm1, %v15780_v14  ;;  %v3732_v31 = vsel %vm3044_vm9, %v3622_v30, %v3731_v45  ;;  %v3146_v56 = vrot.slane %v21224_v41, 7  ;;  %v21228_v7 = vld [vmem:[#allocation164_spill] sm:$0xff]  ;;  %v21230_v30 = vld [vmem:[#allocation25_spill] sm:$0xff] }
 0x2a8   :  { %21225 = vst [vmem:[#allocation141_spill] sm:$0xff] %v15793_v57  ;;  %v3043_v23 = vsel %vm3042_vm8, %v21227_v17, %v21226_v49  ;;  %v3733_v20 = vsel %vm3046_vm2, %v3626_v54, %v3732_v31  ;;  %v15803_v12 = vrot.slane %v15197_v59, %v20931_v22  ;;  %v21231_v45 = vld [vmem:[#allocation42_spill] sm:$0xff]  ;;  %v21234_v38 = vld [vmem:[#allocation20_spill] sm:$0xff]  ;;  %vm21273_vm1 = vmmov %vm21095_vm0 }
 0x2a9   :  { %v3045_v4 = vsel %vm3044_vm9, %v21228_v7, %v3043_v23  ;;  %v3054_v14 = vsel %vm3040_vm4, %v21231_v45, %v21230_v30  ;;  %v3734_v51 = vsel %vm3048_vm13, %v3630_v11, %v3733_v20  ;;  %v15810_v41 = vsel %vm21232_vm14, 0.0, %v3146_v56  ;;  %v21235_v54 = vld [vmem:[#allocation14_spill] sm:$0xff]  ;;  %v21236_v7 = vld [vmem:[#allocation165_spill] sm:$0xff]  ;;  %vm21278_vm14 = vmmov %vm21272_vm5 }
 0x2aa   :  { %21229 = vst [vmem:[#allocation147_spill] sm:$0xff] %v15803_v12  ;;  %21233 = vst [vmem:[#allocation99_spill] sm:$0xff] %v15810_v41  ;;  %v3047_v49 = vsel %vm3046_vm2, %v21234_v38, %v3045_v4  ;;  %v3055_v31 = vsel %vm3042_vm8, %v21235_v54, %v3054_v14  ;;  %v3735_v23 = vsel %vm3050_vm15, %v3634_v53, %v3734_v51  ;;  %v21239_v4 = vld [vmem:[#allocation166_spill] sm:$0xff]  ;;  %v21240_v53 = vld [vmem:[#allocation167_spill] sm:$0xff] }
 0x2ab   :  { %v3049_v59 = vsel %vm3048_vm13, %v21236_v7, %v3047_v49  ;;  %v3056_v17 = vsel %vm3044_vm9, %v15205_v19, %v3055_v31  ;;  %v15823_v20 = vrot.slane %v15306_v9, %v20931_v22  ;;  %v15826_v11 = vsel %vm3052_vm3, %v3638_v32, %v3735_v23  ;;  %v21241_v51 = vld [vmem:[#allocation70_spill] sm:$0xff]  ;;  %v21245_v23 = vld [vmem:[#allocation61_spill] sm:$0xff] }
 0x2ac   :  { %21238 = vst [vmem:[#allocation101_spill] sm:$0xff] %v15826_v11  ;;  %v3051_v56 = vsel %vm3050_vm15, %v15793_v57, %v3049_v59  ;;  %v3057_v14 = vsel %vm3046_vm2, %v21239_v4, %v3056_v17  ;;  %v3061_v49 = vsel %vm3040_vm4, %v21241_v51, %v21240_v53  ;;  %11353 = vmatmul.mubr.msk.f32.gmra.mrb[6].mxu1 %vm21242_vm6, %v15826_v11  ;;  %v21253_v53 = vld [vmem:[#allocation171_spill] sm:$0xff]  ;;  %vm21282_vm6 = vmmov %vm21095_vm0  ;;  %v21406_v7 = vld [vmem:[#allocation57_spill] sm:$0xff] }
 0x2ad   :  { %21237 = vst [vmem:[#allocation17_spill] sm:$0xff] %v15823_v20  ;;  %v21243_v9 = vrot.slane %v15114_v0, %v20931_v22  ;;  %v3058_v32 = vsel %vm3048_vm13, %v15216_v1, %v3057_v14  ;;  %v3062_v59 = vsel %vm3042_vm8, %v21245_v23, %v3061_v49  ;;  %v15849_v17 = vrot.slane %v15404_v37, %v20931_v22  ;;  %v21249_v14 = vld [vmem:[#allocation170_spill] sm:$0xff]  ;;  %v21252_v23 = vld [vmem:[#allocation168_spill] sm:$0xff]  ;;  %v21408_v45 = vld [vmem:[#allocation73_spill] sm:$0xff] }
 0x2ae   :  { %11357 = vmatprep.mubr.msk.f32.mxu1 %vm21247_vm10, %v15810_v41  ;;  %v3059_v0 = vsel %vm3050_vm15, %v15803_v12, %v3058_v32  ;;  %v21250_v49 = vrot.slane %v15213_v29, %v20931_v22  ;;  %v15873_v32 = vrot.slane %v15502_v5, %v20931_v22  ;;  %v21257_v5 = vld [vmem:[#allocation172_spill] sm:$0xff]  ;;  %vm21290_vm10 = vmmov %vm21272_vm5  ;;  %v21407_v54 = vcombine.high %v21406_v7, %v21406_v7 }
 0x2af   :  { %v15841_v31 = vsel %vm3052_vm3, %v21243_v9, %v3051_v56  ;;  %21246 = vst [vmem:[#allocation100_spill] sm:$0xff] %v15849_v17  ;;  %v3063_v56 = vsel %vm3044_vm9, %v15328_v33, %v3062_v59  ;;  %v21248_v9 = vld [vmem:[#allocation169_spill] sm:$0xff]  ;;  %v21403_v12 = vld [vmem:[#allocation72_spill] sm:$0xff]  ;;  %v16314_v30 = vcombine.high %v21408_v45, %v21408_v45 }
 0x2b0   :  { %21244 = vst [vmem:[#allocation94_spill] sm:$0xff] %v15841_v31  ;;  %v3147_v11 = vrot.slane %v15841_v31, 7  ;;  %v3068_v1 = vsel %vm3040_vm4, %v21249_v14, %v21248_v9  ;;  %v15865_v37 = vsel %vm3052_vm3, %v21250_v49, %v3059_v0  ;;  %v3064_v51 = vsel %vm3046_vm2, %v21252_v23, %v3063_v56  ;;  %21254 = vst [vmem:[#allocation9_spill] sm:$0xff] %v15873_v32  ;;  %v15884_v56 = vld [vmem:[%s19777_s1 + $0xa8] sm:$0xff]  ;;  %v16283_v9 = vld [vmem:[%s19777_s1 + $0xb0] sm:$0xff] }
 0x2b1   :  { %21251 = vst [vmem:[#allocation154_spill] sm:$0xff] %v15865_v37  ;;  %v3069_v4 = vsel %vm3042_vm8, %v21253_v53, %v3068_v1  ;;  %v3148_v14 = vrot.slane %v15865_v37, 7  ;;  %v3065_v29 = vsel %vm3048_vm13, %v15331_v43, %v3064_v51  ;;  %v21258_v49 = vld [vmem:[#allocation173_spill] sm:$0xff]  ;;  %v21259_v53 = vld [vmem:[#allocation174_spill] sm:$0xff]  ;;  %v16296_v57 = vcombine.high %v21403_v12, %v21403_v12 }
 0x2b2   :  { %v3177_v59 = vsel %vm21255_vm7, 0.0, %v3147_v11  ;;  %v3070_v0 = vsel %vm3044_vm9, %v15426_v42, %v3069_v4  ;;  %v3066_v1 = vsel %vm3050_vm15, %v15823_v20, %v3065_v29  ;;  %v3075_v51 = vsel %vm3040_vm4, %v21259_v53, %v21258_v49  ;;  %v21266_v43 = vld [vmem:[#allocation178_spill] sm:$0xff]  ;;  %vm21291_vm7 = vmmov %vm21095_vm0 }
 0x2b3   :  { %11358 = vmatmul.mubr.msk.f32.vlgmr.msra.gmra.mrb[8].mxu1 %vm21256_vm12, %v3177_v59  ;;  %v3071_v11 = vsel %vm3046_vm2, %v21257_v5, %v3070_v0  ;;  %v15896_v4 = vrot.slane %v15600_v34, %v20931_v22  ;;  %v3178_v42 = vsel %vm21261_vm11, 0.0, %v3148_v14  ;;  %v21262_v59 = vrot.slane %v15325_v10, %v20931_v22  ;;  %v21264_v5 = vld [vmem:[#allocation175_spill] sm:$0xff]  ;;  %v21265_v10 = vld [vmem:[#allocation177_spill] sm:$0xff]  ;;  %vm21296_vm12 = vmmov %vm21272_vm5 }
 0x2b4   :  { %11382 = vmatpush3.msra.mxu1 %v15242_v36  ;;  %v3072_v0 = vsel %vm3048_vm13, %v15429_v61, %v3071_v11  ;;  %v3076_v20 = vsel %vm3042_vm8, %v21264_v5, %v3075_v51  ;;  %11360 = vmatprep.mubr.msk.f32.mxu1 %vm21095_vm0, %v3178_v42  ;;  %v21267_v11 = vrot.slane %v15423_v26, %v20931_v22  ;;  %v21269_v42 = vld [vmem:[#allocation176_spill] sm:$0xff]  ;;  %v21270_v61 = vld [vmem:[#allocation179_spill] sm:$0xff]  ;;  %vm21300_vm11 = vmmov %vm21095_vm0 }
 0x2b5   :  { %21260 = vst [vmem:[#allocation155_spill] sm:$0xff] %v15896_v4  ;;  %v15904_v29 = vsel %vm3052_vm3, %v21262_v59, %v3066_v1  ;;  %v3073_v36 = vsel %vm3050_vm15, %v15849_v17, %v3072_v0  ;;  %v3077_v14 = vsel %vm3044_vm9, %v15524_v16, %v3076_v20  ;;  %v3082_v1 = vsel %vm3040_vm4, %v21266_v43, %v21265_v10  ;;  %vm21308_vm0 = vmmov %vm21272_vm5 }
 0x2b6   :  { %21263 = vst [vmem:[#allocation149_spill] sm:$0xff] %v15904_v29  ;;  %v3149_v34 = vrot.slane %v15904_v29, 7  ;;  %11407 = vmatprep.subr.mxu1 %v15884_v56  ;;  %v15924_v51 = vsel %vm3052_vm3, %v21267_v11, %v3073_v36  ;;  %v3078_v59 = vsel %vm3046_vm2, %v21269_v42, %v3077_v14  ;;  %v3083_v0 = vsel %vm3042_vm8, %v21270_v61, %v3082_v1  ;;  %v21274_v1 = vld [vmem:[#allocation180_spill] sm:$0xff]  ;;  %v21276_v61 = vld [vmem:[#allocation182_spill] sm:$0xff] }
 0x2b7   :  { %21268 = vst [vmem:[#allocation156_spill] sm:$0xff] %v15924_v51  ;;  %v15932_v20 = vrot.slane %v15698_v28, %v20931_v22  ;;  %v3150_v43 = vrot.slane %v15924_v51, 7  ;;  %v3079_v26 = vsel %vm3048_vm13, %v15527_v2, %v3078_v59  ;;  %v3084_v36 = vsel %vm3044_vm9, %v15622_v27, %v3083_v0  ;;  %v21275_v28 = vld [vmem:[#allocation181_spill] sm:$0xff]  ;;  %v21390_v2 = vld [vmem:[#allocation67_spill] sm:$0xff] }
 0x2b8   :  { %v3179_v17 = vsel %vm21272_vm5, 0.0, %v3149_v34  ;;  %v3080_v14 = vsel %vm3050_vm15, %v15873_v32, %v3079_v26  ;;  %v3085_v11 = vsel %vm3046_vm2, %v21274_v1, %v3084_v36  ;;  %v3089_v34 = vsel %vm3040_vm4, %v21276_v61, %v21275_v28  ;;  %v21281_v36 = vld [vmem:[#allocation183_spill] sm:$0xff]  ;;  %v21284_v28 = vld [vmem:[#allocation186_spill] sm:$0xff]  ;;  %vm21309_vm5 = vmmov %vm21273_vm1 }
 0x2b9   :  { %21271 = vst [vmem:[#allocation213_spill] sm:$0xff] %v15932_v20  ;;  %11361 = vmatmul.mubr.msk.f32.gmra.mrb[10].mxu1 %vm21273_vm1, %v3179_v17  ;;  %v15950_v42 = vrot.slane %v15143_v58, %v20931_v22  ;;  %v3180_v59 = vsel %vm21278_vm14, 0.0, %v3150_v43  ;;  %v21279_v0 = vrot.slane %v15521_v50, %v20931_v22  ;;  %v3086_v26 = vsel %vm3048_vm13, %v15625_v21, %v3085_v11  ;;  %v21283_v50 = vld [vmem:[#allocation185_spill] sm:$0xff]  ;;  %vm21314_vm14 = vmmov %vm21308_vm0 }
 0x2ba   :  { %v3090_v1 = vsel %vm3042_vm8, %v21281_v36, %v3089_v34  ;;  %11363 = vmatprep.mubr.msk.f32.mxu1 %vm21282_vm6, %v3180_v59  ;;  %v3087_v58 = vsel %vm3050_vm15, %v15896_v4, %v3086_v26  ;;  %v21285_v11 = vrot.slane %v15619_v40, %v20931_v22  ;;  %v21287_v34 = vld [vmem:[#allocation184_spill] sm:$0xff]  ;;  %v21288_v36 = vld [vmem:[#allocation187_spill] sm:$0xff]  ;;  %v15984_v26 = vrot.slane %v15253_v52, %v20931_v22  ;;  %v21293_v52 = vld [vmem:[#allocation189_spill] sm:$0xff] }
 0x2bb   :  { %21277 = vst [vmem:[#allocation252_spill] sm:$0xff] %v15950_v42  ;;  %v15957_v17 = vsel %vm3052_vm3, %v21279_v0, %v3080_v14  ;;  %v3091_v43 = vsel %vm3044_vm9, %v15720_v18, %v3090_v1  ;;  %v3096_v14 = vsel %vm3040_vm4, %v21284_v28, %v21283_v50  ;;  %v16002_v50 = vrot.slane %v15355_v15, %v20931_v22  ;;  %vm21326_vm6 = vmmov %vm21273_vm1  ;;  %v21386_v18 = vld [vmem:[#allocation49_spill] sm:$0xff] }
 0x2bc   :  { %21280 = vst [vmem:[#allocation253_spill] sm:$0xff] %v15957_v17  ;;  %v3151_v61 = vrot.slane %v15957_v17, 7  ;;  %v15976_v0 = vsel %vm3052_vm3, %v21285_v11, %v3087_v58  ;;  %v3092_v59 = vsel %vm3046_vm2, %v21287_v34, %v3091_v43  ;;  %v3097_v21 = vsel %vm3042_vm8, %v21288_v36, %v3096_v14  ;;  %21289 = vst [vmem:[#allocation255_spill] sm:$0xff] %v15984_v26  ;;  %v21292_v14 = vld [vmem:[#allocation188_spill] sm:$0xff]  ;;  %v21294_v36 = vld [vmem:[#allocation190_spill] sm:$0xff] }
 0x2bd   :  { %21286 = vst [vmem:[#allocation254_spill] sm:$0xff] %v15976_v0  ;;  %v3152_v28 = vrot.slane %v15976_v0, 7  ;;  %v3093_v40 = vsel %vm3048_vm13, %v15723_v47, %v3092_v59  ;;  %v3098_v58 = vsel %vm3044_vm9, %v15154_v3, %v3097_v21  ;;  %21295 = vst [vmem:[#allocation256_spill] sm:$0xff] %v16002_v50  ;;  %v21297_v21 = vrot.slane %v15717_v44, %v20931_v22  ;;  %v21301_v44 = vld [vmem:[#allocation193_spill] sm:$0xff]  ;;  %v21385_v47 = vld [vmem:[#allocation218_spill] sm:$0xff] }
 0x2be   :  { %v3181_v1 = vsel %vm21290_vm10, 0.0, %v3151_v61  ;;  %v3094_v43 = vsel %vm3050_vm15, %v15932_v20, %v3093_v40  ;;  %v3099_v11 = vsel %vm3046_vm2, %v21292_v14, %v3098_v58  ;;  %v3103_v61 = vsel %vm3040_vm4, %v21294_v36, %v21293_v52  ;;  %v21299_v58 = vld [vmem:[#allocation191_spill] sm:$0xff]  ;;  %v21302_v36 = vld [vmem:[#allocation194_spill] sm:$0xff]  ;;  %vm21327_vm10 = vmmov %vm21308_vm0 }
 0x2bf   :  { %11364 = vmatmul.mubr.msk.f32.gmra.mrb[12].mxu1 %vm21291_vm7, %v3181_v1  ;;  %v3182_v59 = vsel %vm21296_vm12, 0.0, %v3152_v28  ;;  %v16009_v1 = vsel %vm3052_vm3, %v21297_v21, %v3094_v43  ;;  %v3100_v40 = vsel %vm3048_vm13, %v15168_v24, %v3099_v11  ;;  %v3104_v14 = vsel %vm3042_vm8, %v21299_v58, %v3103_v61  ;;  %v21305_v61 = vld [vmem:[#allocation192_spill] sm:$0xff]  ;;  %v21306_v24 = vld [vmem:[#allocation195_spill] sm:$0xff]  ;;  %vm21330_vm7 = vmmov %vm21273_vm1 }
 0x2c0   :  { %21298 = vst [vmem:[#allocation257_spill] sm:$0xff] %v16009_v1  ;;  %11366 = vmatprep.mubr.msk.f32.mxu1 %vm21300_vm11, %v3182_v59  ;;  %v3153_v3 = vrot.slane %v16009_v1, 7  ;;  %v3101_v15 = vsel %vm3050_vm15, %v15950_v42, %v3100_v40  ;;  %v3105_v28 = vsel %vm3044_vm9, %v15278_v13, %v3104_v14  ;;  %v3110_v43 = vsel %vm3040_vm4, %v21302_v36, %v21301_v44  ;;  %vm21335_vm12 = vmmov %vm21308_vm0  ;;  %v21382_v52 = vld [vmem:[#allocation216_spill] sm:$0xff]  ;;  %v21383_v20 = vld [vmem:[#allocation217_spill] sm:$0xff] }
 0x2c1   :  { %v21303_v11 = vrot.slane %v15165_v8, %v20931_v22  ;;  %v3106_v59 = vsel %vm3046_vm2, %v21305_v61, %v3105_v28  ;;  %v3111_v58 = vsel %vm3042_vm8, %v21306_v24, %v3110_v43  ;;  %v16036_v40 = vrot.slane %v15453_v62, %v20931_v22  ;;  %v21310_v43 = vld [vmem:[#allocation196_spill] sm:$0xff]  ;;  %v21311_v62 = vld [vmem:[#allocation197_spill] sm:$0xff]  ;;  %v21312_v24 = vld [vmem:[#allocation198_spill] sm:$0xff] }
 0x2c2   :  { %v3183_v14 = vsel %vm21308_vm0, 0.0, %v3153_v3  ;;  %v3107_v8 = vsel %vm3048_vm13, %v15281_v39, %v3106_v59  ;;  %v3117_v3 = vsel %vm3040_vm4, %v21312_v24, %v21311_v62  ;;  %v16054_v61 = vrot.slane %v15551_v35, %v20931_v22  ;;  %vm21344_vm11 = vmmov %vm21273_vm1 }
 0x2c3   :  { %v16028_v21 = vsel %vm3052_vm3, %v21303_v11, %v3101_v15  ;;  %21307 = vst [vmem:[#allocation259_spill] sm:$0xff] %v16036_v40  ;;  %v3112_v15 = vsel %vm3044_vm9, %v15377_v60, %v3111_v58  ;;  %11367 = vmatmul.mubr.msk.f32.gmra.mrb[14].mxu1 %vm21309_vm5, %v3183_v14  ;;  %v3108_v28 = vsel %vm3050_vm15, %v15984_v26, %v3107_v8  ;;  %vm21352_vm5 = vmmov %vm21273_vm1  ;;  %v21357_v26 = vld [vmem:[#allocation8_spill] sm:$0xff]  ;;  %v21391_v10 = vmov 0.0  }
 0x2c4   :  { %21304 = vst [vmem:[#allocation258_spill] sm:$0xff] %v16028_v21  ;;  %v3154_v42 = vrot.slane %v16028_v21, 7  ;;  %v3113_v11 = vsel %vm3046_vm2, %v21310_v43, %v3112_v15  ;;  %21313 = vst [vmem:[#allocation260_spill] sm:$0xff] %v16054_v61  ;;  %11369 = vmatprep.mubr.msk.f32.mxu1 %vm21273_vm1, %v15810_v41  ;;  %v21315_v59 = vrot.slane %v15275_v6, %v20931_v22  ;;  %v21317_v15 = vld [vmem:[#allocation199_spill] sm:$0xff]  ;;  %v21318_v41 = vld [vmem:[#allocation201_spill] sm:$0xff] }
 0x2c5   :  { %v3114_v8 = vsel %vm3048_vm13, %v15380_v25, %v3113_v11  ;;  %v3118_v24 = vsel %vm3042_vm8, %v21317_v15, %v3117_v3  ;;  %v21319_v43 = vld [vmem:[#allocation202_spill] sm:$0xff]  ;;  %v21323_v15 = vld [vmem:[#allocation203_spill] sm:$0xff]  ;;  %vm21358_vm1 = vmmov %vm21308_vm0  ;;  %v16236_v4 = vcombine.high %v21386_v18, %v21386_v18  ;;  %v16326_v7 = vrot.slane %v21403_v12, %v20931_v22 }
 0x2c6   :  { %v3184_v58 = vsel %vm21314_vm14, 0.0, %v3154_v42  ;;  %v16063_v14 = vsel %vm3052_vm3, %v21315_v59, %v3108_v28  ;;  %v3115_v62 = vsel %vm3050_vm15, %v16002_v50, %v3114_v8  ;;  %v3119_v42 = vsel %vm3044_vm9, %v15475_v63, %v3118_v24  ;;  %v21322_v59 = vld [vmem:[#allocation200_spill] sm:$0xff]  ;;  %v21324_v8 = vld [vmem:[#allocation18_spill] sm:$0xff]  ;;  %vm21366_vm14 = vmmov %vm21352_vm5 }
 0x2c7   :  { %21316 = vst [vmem:[#allocation261_spill] sm:$0xff] %v16063_v14  ;;  %v3155_v35 = vrot.slane %v16063_v14, 7  ;;  %v3124_v6 = vsel %vm3040_vm4, %v21319_v43, %v21318_v41  ;;  %v21320_v28 = vrot.slane %v15374_v48, %v20931_v22  ;;  %v3120_v3 = vsel %vm3046_vm2, %v21322_v59, %v3119_v42  ;;  %11370 = vmatmul.mubr.msk.f32.gmra.mrb[0].mxu1 %vm21326_vm6, %v3184_v58  ;;  %v21328_v48 = vld [vmem:[#allocation76_spill] sm:$0xff]  ;;  %v21332_v59 = vld [vmem:[#allocation205_spill] sm:$0xff]  ;;  %v21333_v58 = vld [vmem:[#allocation206_spill] sm:$0xff] }
 0x2c8   :  { %v3125_v25 = vsel %vm3042_vm8, %v21323_v15, %v3124_v6  ;;  %v16089_v50 = vrot.slane %v21324_v8, %v20931_v22  ;;  %v21331_v6 = vld [vmem:[#allocation204_spill] sm:$0xff]  ;;  %v16108_v15 = vrot.slane %v15747_v55, %v20931_v22  ;;  %v21343_v41 = vld [vmem:[#allocation210_spill] sm:$0xff]  ;;  %vm21375_vm6 = vmmov %vm21308_vm0  ;;  %21411 = vst [vmem:[#allocation57_spill] sm:$0xff] %v16326_v7 }
 0x2c9   :  { %v16081_v11 = vsel %vm3052_vm3, %v21320_v28, %v3115_v62  ;;  %v3185_v24 = vsel %vm21327_vm10, 0.0, %v3155_v35  ;;  %v3121_v62 = vsel %vm3048_vm13, %v21328_v48, %v3120_v3  ;;  %v21329_v28 = vld [vmem:[#allocation83_spill] sm:$0xff]  ;;  %v3131_v35 = vsel %vm3040_vm4, %v21333_v58, %v21332_v59  ;;  %v21336_v48 = vld [vmem:[#allocation77_spill] sm:$0xff]  ;;  %vm21378_vm10 = vmmov %vm21352_vm5 }
 0x2ca   :  { %21321 = vst [vmem:[#allocation262_spill] sm:$0xff] %v16081_v11  ;;  %21325 = vst [vmem:[#allocation18_spill] sm:$0xff] %v16089_v50  ;;  %v3156_v63 = vrot.slane %v16081_v11, 7  ;;  %v3126_v43 = vsel %vm3044_vm9, %v21329_v28, %v3125_v25  ;;  %11372 = vmatprep.mubr.msk.f32.mxu1 %vm21330_vm7, %v3185_v24  ;;  %v3122_v42 = vsel %vm3050_vm15, %v16036_v40, %v3121_v62  ;;  %v21339_v62 = vld [vmem:[#allocation31_spill] sm:$0xff]  ;;  %v21341_v58 = vld [vmem:[#allocation133_spill] sm:$0xff] }
 0x2cb   :  { %v3127_v8 = vsel %vm3046_vm2, %v21331_v6, %v3126_v43  ;;  %21334 = vst [vmem:[#allocation263_spill] sm:$0xff] %v16108_v15  ;;  %v21337_v25 = vrot.slane %v21336_v48, %v20931_v22  ;;  %v21340_v43 = vld [vmem:[#allocation207_spill] sm:$0xff]  ;;  %v21342_v59 = vld [vmem:[#allocation209_spill] sm:$0xff]  ;;  %vm21384_vm7 = vmmov %vm21308_vm0 }
 0x2cc   :  { %v3186_v3 = vsel %vm21335_vm12, 0.0, %v3156_v63  ;;  %v3128_v40 = vsel %vm3048_vm13, %v21339_v62, %v3127_v8  ;;  %v3132_v6 = vsel %vm3042_vm8, %v21340_v43, %v3131_v35  ;;  %v3138_v48 = vsel %vm3040_vm4, %v21343_v41, %v21342_v59  ;;  %v21348_v35 = vld [vmem:[#allocation208_spill] sm:$0xff]  ;;  %v21349_v43 = vld [vmem:[#allocation211_spill] sm:$0xff]  ;;  %vm21387_vm12 = vmmov %vm21352_vm5 }
 0x2cd   :  { %v16115_v24 = vsel %vm3052_vm3, %v21337_v25, %v3122_v42  ;;  %v3129_v55 = vsel %vm3050_vm15, %v16054_v61, %v3128_v40  ;;  %v3133_v63 = vsel %vm3044_vm9, %v21341_v58, %v3132_v6  ;;  %11373 = vmatmul.mubr.msk.f32.gmra.mrb[2].mxu1 %vm21344_vm11, %v3186_v3  ;;  %v21345_v42 = vld [vmem:[#allocation131_spill] sm:$0xff]  ;;  %v3139_v40 = vsel %vm3042_vm8, %v21349_v43, %v3138_v48  ;;  %v21353_v48 = vld [vmem:[#allocation212_spill] sm:$0xff]  ;;  %vm21404_vm11 = vmmov %vm21352_vm5 }
 0x2ce   :  { %21338 = vst [vmem:[#allocation77_spill] sm:$0xff] %v16115_v24  ;;  %v3157_v28 = vrot.slane %v16115_v24, 7  ;;  %v21346_v8 = vrot.slane %v21345_v42, %v20931_v22  ;;  %v3134_v62 = vsel %vm3046_vm2, %v21348_v35, %v3133_v63  ;;  %v21350_v61 = vld [vmem:[#allocation23_spill] sm:$0xff]  ;;  %v21354_v43 = vld [vmem:[#allocation16_spill] sm:$0xff]  ;;  %v21355_v35 = vld [vmem:[#allocation26_spill] sm:$0xff] }
 0x2cf   :  { %v16142_v6 = vcombine.high %v21350_v61, %v21350_v61  ;;  %v21351_v59 = vld [vmem:[#allocation139_spill] sm:$0xff]  ;;  %v16310_v38 = vrot.slane %v21407_v54, %v21354_v43  ;;  %v16330_v54 = vrot.slane %v16296_v57, %v20931_v22 }
 0x2d0   :  { %v16134_v25 = vsel %vm3052_vm3, %v21346_v8, %v3129_v55  ;;  %v3187_v41 = vsel %vm21308_vm0, 0.0, %v3157_v28  ;;  %v3135_v42 = vsel %vm3048_vm13, %v21351_v59, %v3134_v62  ;;  %v3140_v55 = vsel %vm3044_vm9, %v15769_v46, %v3139_v40  ;;  %v21359_v46 = vld [vmem:[#allocation140_spill] sm:$0xff]  ;;  %v21373_v59 = vld [vmem:[#allocation214_spill] sm:$0xff]  ;;  %vm21409_vm0 = vmmov %vm21352_vm5 }
 0x2d1   :  { %21347 = vst [vmem:[#allocation131_spill] sm:$0xff] %v16134_v25  ;;  %v3158_v3 = vrot.slane %v16134_v25, 7  ;;  %11375 = vmatprep.mubr.msk.f32.mxu1 %vm21352_vm5, %v3187_v41  ;;  %v3136_v63 = vsel %vm3050_vm15, %v16089_v50, %v3135_v42  ;;  %v3141_v8 = vsel %vm3046_vm2, %v21353_v48, %v3140_v55  ;;  %v21356_v28 = vcombine.high %v21355_v35, %v21355_v35  ;;  %v21362_v50 = vld [vmem:[#allocation6_spill] sm:$0xff]  ;;  %vm21410_vm5 = vmmov %vm21358_vm1 }
 0x2d2   :  { %v16163_v62 = vcombine.high %v21357_v26, %v21357_v26  ;;  %v21360_v41 = vrot.slane %v21359_v46, %v20931_v22  ;;  %v3142_v55 = vsel %vm3048_vm13, %v21362_v50, %v3141_v8  ;;  %v16176_v35 = vrot.slane %v21350_v61, %v20931_v22  ;;  %v21368_v8 = vld [vmem:[#allocation92_spill] sm:$0xff]  ;;  %21412 = vst [vmem:[#allocation73_spill] sm:$0xff] %v16330_v54 }
 0x2d3   :  { %v16159_v58 = vrot.slane %v21356_v28, %v21354_v43  ;;  %v3188_v40 = vsel %vm21358_vm1, 0.0, %v3158_v3  ;;  %v21364_v28 = vld [vmem:[#allocation102_spill] sm:$0xff]  ;;  %v3143_v46 = vsel %vm3050_vm15, %v16108_v15, %v3142_v55  ;;  %v21374_v55 = vld [vmem:[#allocation215_spill] sm:$0xff] }
 0x2d4   :  { %v16170_v42 = vsel %vm3052_vm3, %v21360_v41, %v3136_v63  ;;  %21363 = vst [vmem:[#allocation26_spill] sm:$0xff] %v16176_v35  ;;  %v16180_v48 = vrot.slane %v21364_v28, %v20931_v22  ;;  %11376 = vmatmul.mubr.msk.f32.gmra.mrb[4].mxu1 %vm21366_vm14, %v3188_v40  ;;  %v16188_v63 = vrot.slane %v16142_v6, %v20931_v22  ;;  %vm21419_vm14 = vmmov %vm21409_vm0 }
 0x2d5   :  { %21361 = vst [vmem:[#allocation23_spill] sm:$0xff] %v16170_v42  ;;  %v3159_v3 = vrot.slane %v16170_v42, 7  ;;  %v21369_v41 = vrot.slane %v21368_v8, %v20931_v22  ;;  %v16198_v28 = vrot.slane %v21357_v26, %v20931_v22  ;;  %v16202_v40 = vrot.slane %v16163_v62, %v20931_v22  ;;  %v21376_v8 = vld [vmem:[#allocation24_spill] sm:$0xff] }
 0x2d6   :  { %21365 = vst [vmem:[#allocation8_spill] sm:$0xff] %v16180_v48  ;;  %21367 = vst [vmem:[#allocation140_spill] sm:$0xff] %v16188_v63  ;;  %v4739_v15 = vsel %vm3042_vm8, %v21374_v55, %v21373_v59  ;;  %v16218_v36 = vrot.slane %v16159_v58, %v20931_v22 }
 0x2d7   :  { %v16194_v50 = vsel %vm3052_vm3, %v21369_v41, %v3143_v46  ;;  %21371 = vst [vmem:[#allocation264_spill] sm:$0xff] %v16198_v28  ;;  %21372 = vst [vmem:[#allocation265_spill] sm:$0xff] %v16202_v40  ;;  %v3189_v60 = vsel %vm21375_vm6, 0.0, %v3159_v3  ;;  %v4740_v46 = vsel %vm3044_vm9, %v16176_v35, %v4739_v15  ;;  %v16213_v41 = vrot.slane %v21376_v8, %v20931_v22  ;;  %v21380_v3 = vld [vmem:[#allocation12_spill] sm:$0xff] }
 0x2d8   :  { %21370 = vst [vmem:[#allocation92_spill] sm:$0xff] %v16194_v50  ;;  %v3160_v39 = vrot.slane %v16194_v50, 7  ;;  %11378 = vmatprep.mubr.msk.f32.mxu1 %vm21378_vm10, %v3189_v60  ;;  %21379 = vst [vmem:[#allocation266_spill] sm:$0xff] %v16218_v36  ;;  %v4741_v44 = vsel %vm3046_vm2, %v16188_v63, %v4740_v46  ;;  %v16224_v13 = vrot.slane %v21380_v3, %v20931_v22 }
 0x2d9   :  { %21377 = vst [vmem:[#allocation24_spill] sm:$0xff] %v16213_v41  ;;  %v4745_v15 = vsel %vm3042_vm8, %v21383_v20, %v21382_v52  ;;  %v4742_v60 = vsel %vm3048_vm13, %v16198_v28, %v4741_v44  ;;  %vm21422_vm6 = vmmov %vm21409_vm0  ;;  %v21445_v28 = vld [vmem:[#allocation95_spill] sm:$0xff] }
 0x2da   :  { %21381 = vst [vmem:[#allocation12_spill] sm:$0xff] %v16224_v13  ;;  %v3190_v48 = vsel %vm21384_vm7, 0.0, %v3160_v39  ;;  %v4746_v34 = vsel %vm3044_vm9, %v21385_v47, %v4745_v15  ;;  %v4743_v46 = vsel %vm3050_vm15, %v16202_v40, %v4742_v60  ;;  %v21388_v39 = vld [vmem:[#allocation47_spill] sm:$0xff]  ;;  %v16251_v15 = vcombine.high %v21390_v2, %v21390_v2  ;;  %vm21423_vm10 = vmmov %vm21358_vm1 }
 0x2db   :  { %11379 = vmatmul.mubr.msk.f32.gmra.mrb[6].mxu1 %vm21387_vm12, %v3190_v48  ;;  %v4747_v32 = vsel %vm3046_vm2, %v16213_v41, %v4746_v34  ;;  %v21389_v27 = vcombine.high %v21388_v39, %v21388_v39  ;;  %v21392_v48 = vld [vmem:[#allocation28_spill] sm:$0xff]  ;;  %v21394_v60 = vld [vmem:[#allocation219_spill] sm:$0xff]  ;;  %v16262_v34 = vrot.slane %v21386_v18, %v20931_v22  ;;  %v4744_v53 = vsel %vm3052_vm3, %v16218_v36, %v4743_v46  ;;  %vm21434_vm7 = vmmov %vm21409_vm0 }
 0x2dc   :  { %11383 = vmatprep.mubr.f32.mxu1 %v21391_v10  ;;  %v16256_v16 = vrot.slane %v21392_v48, %v20931_v22  ;;  %v4748_v5 = vsel %vm3048_vm13, %v21394_v60, %v4747_v32  ;;  %v21397_v39 = vld [vmem:[#allocation108_spill] sm:$0xff]  ;;  %v16278_v32 = vrot.slane %v21390_v2, %v20931_v22  ;;  %v21431_v41 = vld [vmem:[#allocation87_spill] sm:$0xff]  ;;  %vm21437_vm12 = vmmov %vm21409_vm0 }
 0x2dd   :  { %v16247_v44 = vrot.slane %v21389_v27, %v21354_v43  ;;  %21395 = vst [vmem:[#allocation47_spill] sm:$0xff] %v16262_v34  ;;  %v16266_v27 = vrot.slane %v16236_v4, %v20931_v22  ;;  %v16270_v23 = vrot.slane %v21397_v39, %v20931_v22  ;;  %v4749_v49 = vsel %vm3050_vm15, %v16224_v13, %v4748_v5  ;;  %v21401_v46 = vld [vmem:[#allocation220_spill] sm:$0xff]  ;;  %v21417_v13 = vld [vmem:[#allocation223_spill] sm:$0xff] }
 0x2de   :  { %21393 = vst [vmem:[#allocation49_spill] sm:$0xff] %v16256_v16  ;;  %21399 = vst [vmem:[#allocation267_spill] sm:$0xff] %v16278_v32  ;;  %v4750_v33 = vsel %vm3052_vm3, %v16256_v16, %v4749_v49  ;;  %v16289_v39 = vrot.slane %v16251_v15, %v20931_v22 }
 0x2df   :  { %21396 = vst [vmem:[#allocation67_spill] sm:$0xff] %v16266_v27  ;;  %21398 = vst [vmem:[#allocation28_spill] sm:$0xff] %v16270_v23  ;;  %v21402_v23 = vld [vmem:[#allocation221_spill] sm:$0xff]  ;;  %11384 = vmatmul.mubr.msk.f32.vlgmr.msra.gmra.mrb[8].mxu1 %vm21404_vm11, %v15841_v31  ;;  %v16302_v19 = vrot.slane %v16247_v44, %v20931_v22  ;;  %v16320_v31 = vsel %vm21410_vm5, 0.0, %v4744_v53 }
 0x2e0   :  { %21400 = vst [vmem:[#allocation268_spill] sm:$0xff] %v16289_v39  ;;  %v4751_v5 = vsel %vm3042_vm8, %v21402_v23, %v21401_v46  ;;  %11408 = vmatpush3.msra.mxu1 %v15884_v56  ;;  %11386 = vmatprep.mubr.msk.f32.mxu1 %vm21409_vm0, %v15865_v37  ;;  %v16334_v56 = vsel %vm21358_vm1, 0.0, %v4750_v33  ;;  %v16340_v37 = vrot.slane %v21408_v45, %v20931_v22  ;;  %v21416_v33 = vld [vmem:[#allocation222_spill] sm:$0xff]  ;;  %vm21438_vm11 = vmmov %vm21358_vm1 }
 0x2e1   :  { %21405 = vst [vmem:[#allocation72_spill] sm:$0xff] %v16302_v19  ;;  %v4752_v49 = vsel %vm3044_vm9, %v16262_v34, %v4751_v5  ;;  %11433 = vmatprep.subr.mxu1 %v16283_v9  ;;  %v4757_v34 = vsel %vm3042_vm8, %v21417_v13, %v21416_v33  ;;  %vm21452_vm5 = vmmov %vm21358_vm1 }
 0x2e2   :  { %v4753_v5 = vsel %vm3046_vm2, %v16266_v27, %v4752_v49  ;;  %21413 = vst [vmem:[#allocation269_spill] sm:$0xff] %v16340_v37  ;;  %v16344_v49 = vrot.slane %v16314_v30, %v20931_v22  ;;  %v16350_v27 = vrot.slane %v16310_v38, %v20931_v22  ;;  %vm21464_vm1 = vmmov %vm21409_vm0 }
 0x2e3   :  { %v4754_v53 = vsel %vm3048_vm13, %v16278_v32, %v4753_v5  ;;  %v21418_v5 = vld [vmem:[#allocation79_spill] sm:$0xff]  ;;  %11387 = vmatmul.mubr.msk.f32.gmra.mrb[10].mxu1 %vm21419_vm14, %v15904_v29  ;;  %v21424_v29 = vld [vmem:[#allocation64_spill] sm:$0xff]  ;;  %vm21468_vm14 = vmmov %vm21409_vm0 }
 0x2e4   :  { %21414 = vst [vmem:[#allocation270_spill] sm:$0xff] %v16344_v49  ;;  %v4755_v16 = vsel %vm3050_vm15, %v16289_v39, %v4754_v53  ;;  %21415 = vst [vmem:[#allocation271_spill] sm:$0xff] %v16350_v27  ;;  %v16357_v32 = vcombine.high %v21418_v5, %v21418_v5  ;;  %v4758_v53 = vsel %vm3044_vm9, %v16326_v7, %v4757_v34  ;;  %v21420_v39 = vld [vmem:[#allocation80_spill] sm:$0xff]  ;;  %11389 = vmatprep.mubr.msk.f32.mxu1 %vm21422_vm6, %v15924_v51 }
 0x2e5   :  { %v4756_v60 = vsel %vm3052_vm3, %v16302_v19, %v4755_v16  ;;  %v16367_v36 = vcombine.high %v21420_v39, %v21420_v39  ;;  %v16371_v13 = vrot.slane %v21418_v5, %v20931_v22  ;;  %v4759_v16 = vsel %vm3046_vm2, %v16330_v54, %v4758_v53  ;;  %v21429_v51 = vld [vmem:[#allocation224_spill] sm:$0xff]  ;;  %v21430_v54 = vld [vmem:[#allocation225_spill] sm:$0xff]  ;;  %vm21469_vm6 = vmmov %vm21452_vm5 }
 0x2e6   :  { %v16376_v33 = vsel %vm21423_vm10, 0.0, %v4756_v60  ;;  %v21425_v34 = vcombine.high %v21424_v29, %v21424_v29  ;;  %v16388_v7 = vrot.slane %v16357_v32, %v20931_v22  ;;  %v4760_v23 = vsel %vm3048_vm13, %v16340_v37, %v4759_v16  ;;  %v21432_v37 = vld [vmem:[#allocation34_spill] sm:$0xff]  ;;  %vm21480_vm10 = vmmov %vm21409_vm0 }
 0x2e7   :  { %21421 = vst [vmem:[#allocation79_spill] sm:$0xff] %v16371_v13  ;;  %v16394_v60 = vrot.slane %v21420_v39, %v20931_v22  ;;  %v16398_v53 = vrot.slane %v16367_v36, %v20931_v22  ;;  %v4763_v29 = vsel %vm3042_vm8, %v21430_v54, %v21429_v51  ;;  %v16409_v16 = vcombine.high %v21431_v41, %v21431_v41 }
 0x2e8   :  { %v16384_v19 = vrot.slane %v21425_v34, %v21354_v43  ;;  %21426 = vst [vmem:[#allocation80_spill] sm:$0xff] %v16388_v7  ;;  %v4761_v34 = vsel %vm3050_vm15, %v16344_v49, %v4760_v23  ;;  %v4764_v46 = vsel %vm3044_vm9, %v16371_v13, %v4763_v29  ;;  %v21433_v40 = vcombine.high %v21432_v37, %v21432_v37  ;;  %v21435_v29 = vld [vmem:[#allocation88_spill] sm:$0xff] }
 0x2e9   :  { %21427 = vst [vmem:[#allocation64_spill] sm:$0xff] %v16394_v60  ;;  %21428 = vst [vmem:[#allocation272_spill] sm:$0xff] %v16398_v53  ;;  %11390 = vmatmul.mubr.msk.f32.gmra.mrb[12].mxu1 %vm21434_vm7, %v15957_v17  ;;  %v4762_v54 = vsel %vm3052_vm3, %v16350_v27, %v4761_v34  ;;  %v4765_v23 = vsel %vm3046_vm2, %v16388_v7, %v4764_v46  ;;  %v16425_v49 = vcombine.high %v21435_v29, %v21435_v29  ;;  %v21443_v27 = vld [vmem:[#allocation226_spill] sm:$0xff]  ;;  %v21444_v7 = vld [vmem:[#allocation227_spill] sm:$0xff] }
 0x2ea   :  { %v16415_v47 = vrot.slane %v21433_v40, %v21354_v43  ;;  %v16429_v13 = vrot.slane %v21431_v41, %v20931_v22  ;;  %11392 = vmatprep.mubr.msk.f32.mxu1 %vm21437_vm12, %v15976_v0  ;;  %v16434_v37 = vsel %vm21438_vm11, 0.0, %v4762_v54  ;;  %v16438_v40 = vrot.slane %v16384_v19, %v20931_v22  ;;  %vm21481_vm7 = vmmov %vm21452_vm5 }
 0x2eb   :  { %v4766_v46 = vsel %vm3048_vm13, %v16394_v60, %v4765_v23  ;;  %v16444_v34 = vrot.slane %v16409_v16, %v20931_v22  ;;  %v16450_v0 = vrot.slane %v21435_v29, %v20931_v22  ;;  %v16454_v54 = vrot.slane %v16425_v49, %v20931_v22  ;;  %vm21485_vm12 = vmmov %vm21409_vm0 }
 0x2ec   :  { %21436 = vst [vmem:[#allocation87_spill] sm:$0xff] %v16429_v13  ;;  %21439 = vst [vmem:[#allocation34_spill] sm:$0xff] %v16438_v40  ;;  %v4767_v17 = vsel %vm3050_vm15, %v16398_v53, %v4766_v46  ;;  %v4769_v51 = vsel %vm3042_vm8, %v21444_v7, %v21443_v27  ;;  %v16465_v46 = vcombine.high %v21445_v28, %v21445_v28  ;;  %v21447_v53 = vld [vmem:[#allocation15_spill] sm:$0xff]  ;;  %v21457_v27 = vld [vmem:[#allocation229_spill] sm:$0xff] }
 0x2ed   :  { %21440 = vst [vmem:[#allocation88_spill] sm:$0xff] %v16444_v34  ;;  %21441 = vst [vmem:[#allocation273_spill] sm:$0xff] %v16450_v0  ;;  %v4768_v23 = vsel %vm3052_vm3, %v16438_v40, %v4767_v17  ;;  %v4770_v60 = vsel %vm3044_vm9, %v16429_v13, %v4769_v51  ;;  %v21448_v20 = vcombine.high %v21447_v53, %v21447_v53  ;;  %11393 = vmatmul.mubr.msk.f32.gmra.mrb[14].mxu1 %vm21409_vm0, %v16009_v1  ;;  %v21450_v17 = vld [vmem:[#allocation96_spill] sm:$0xff] }
 0x2ee   :  { %21442 = vst [vmem:[#allocation274_spill] sm:$0xff] %v16454_v54  ;;  %21446 = vst [vmem:[#allocation95_spill] sm:$0xff] %v16465_v46  ;;  %v16477_v7 = vrot.slane %v16415_v47, %v20931_v22  ;;  %v4771_v51 = vsel %vm3046_vm2, %v16444_v34, %v4770_v60  ;;  %v16483_v40 = vcombine.high %v21450_v17, %v21450_v17  ;;  %11395 = vmatprep.mubr.f32.mxu1 %v21391_v10 }
 0x2ef   :  { %v16471_v52 = vrot.slane %v21448_v20, %v21354_v43  ;;  %v16487_v13 = vrot.slane %v21445_v28, %v20931_v22  ;;  %v16491_v20 = vsel %vm21452_vm5, 0.0, %v4768_v23  ;;  %v4772_v53 = vsel %vm3048_vm13, %v16450_v0, %v4771_v51  ;;  %v21456_v23 = vld [vmem:[#allocation228_spill] sm:$0xff]  ;;  %v21458_v51 = vld [vmem:[#allocation103_spill] sm:$0xff]  ;;  %vm21497_vm11 = vmmov %vm21409_vm0 }
 0x2f0   :  { %21449 = vst [vmem:[#allocation15_spill] sm:$0xff] %v16477_v7  ;;  %v16497_v1 = vrot.slane %v16465_v46, %v20931_v22  ;;  %v16501_v60 = vrot.slane %v21450_v17, %v20931_v22  ;;  %v4773_v34 = vsel %vm3050_vm15, %v16454_v54, %v4772_v53  ;;  %v4775_v63 = vsel %vm3042_vm8, %v21457_v27, %v21456_v23  ;;  %v21460_v53 = vld [vmem:[#allocation41_spill] sm:$0xff]  ;;  %v21462_v17 = vld [vmem:[#allocation104_spill] sm:$0xff]  ;;  %vm21498_vm0 = vmmov %vm21452_vm5 }
 0x2f1   :  { %21451 = vst [vmem:[#allocation275_spill] sm:$0xff] %v16487_v13  ;;  %v16507_v10 = vrot.slane %v16471_v52, %v20931_v22  ;;  %v16514_v0 = vcombine.high %v21458_v51, %v21458_v51  ;;  %v4774_v35 = vsel %vm3052_vm3, %v16477_v7, %v4773_v34  ;;  %v4776_v55 = vsel %vm3044_vm9, %v16487_v13, %v4775_v63  ;;  %v21474_v13 = vld [vmem:[#allocation231_spill] sm:$0xff]  ;;  %vm21501_vm5 = vmmov %vm21464_vm1 }
 0x2f2   :  { %21453 = vst [vmem:[#allocation276_spill] sm:$0xff] %v16497_v1  ;;  %21454 = vst [vmem:[#allocation277_spill] sm:$0xff] %v16501_v60  ;;  %v21461_v54 = vcombine.high %v21460_v53, %v21460_v53  ;;  %v16528_v46 = vcombine.high %v21462_v17, %v21462_v17  ;;  %11396 = vmatmul.mubr.msk.f32.gmra.mrb[0].mxu1 %vm21464_vm1, %v16028_v21  ;;  %v16534_v27 = vrot.slane %v16483_v40, %v20931_v22 }
 0x2f3   :  { %21455 = vst [vmem:[#allocation278_spill] sm:$0xff] %v16507_v10  ;;  %21459 = vst [vmem:[#allocation279_spill] sm:$0xff] %v16514_v0  ;;  %v4777_v63 = vsel %vm3046_vm2, %v16497_v1, %v4776_v55  ;;  %v16540_v34 = vrot.slane %v21458_v51, %v20931_v22  ;;  %11398 = vmatprep.mubr.msk.f32.mxu1 %vm21468_vm14, %v16063_v14  ;;  %v16549_v53 = vsel %vm21469_vm6, 0.0, %v4774_v35  ;;  %v21473_v35 = vld [vmem:[#allocation230_spill] sm:$0xff] }
 0x2f4   :  { %v16524_v59 = vrot.slane %v21461_v54, %v21354_v43  ;;  %21463 = vst [vmem:[#allocation41_spill] sm:$0xff] %v16528_v46  ;;  %21465 = vst [vmem:[#allocation280_spill] sm:$0xff] %v16534_v27  ;;  %v16544_v54 = vrot.slane %v16514_v0, %v20931_v22  ;;  %v4778_v21 = vsel %vm3048_vm13, %v16501_v60, %v4777_v63  ;;  %v21475_v63 = vld [vmem:[#allocation110_spill] sm:$0xff]  ;;  %v21477_v0 = vld [vmem:[#allocation111_spill] sm:$0xff] }
 0x2f5   :  { %21466 = vst [vmem:[#allocation281_spill] sm:$0xff] %v16540_v34  ;;  %v16555_v55 = vrot.slane %v21462_v17, %v20931_v22  ;;  %v16559_v1 = vrot.slane %v16528_v46, %v20931_v22  ;;  %v4779_v7 = vsel %vm3050_vm15, %v16534_v27, %v4778_v21  ;;  %v4781_v23 = vsel %vm3042_vm8, %v21474_v13, %v21473_v35  ;;  %vm21514_vm14 = vmmov %vm21498_vm0 }
 0x2f6   :  { %21467 = vst [vmem:[#allocation282_spill] sm:$0xff] %v16544_v54  ;;  %v16565_v14 = vrot.slane %v16524_v59, %v20931_v22  ;;  %v16572_v60 = vcombine.high %v21475_v63, %v21475_v63  ;;  %v4780_v17 = vsel %vm3052_vm3, %v16507_v10, %v4779_v7  ;;  %v4782_v46 = vsel %vm3044_vm9, %v16540_v34, %v4781_v23  ;;  %v21482_v10 = vld [vmem:[#allocation65_spill] sm:$0xff]  ;;  %vm21517_vm6 = vmmov %vm21464_vm1 }
 0x2f7   :  { %21470 = vst [vmem:[#allocation283_spill] sm:$0xff] %v16555_v55  ;;  %21471 = vst [vmem:[#allocation284_spill] sm:$0xff] %v16559_v1  ;;  %v16580_v21 = vcombine.high %v21477_v0, %v21477_v0  ;;  %v16584_v27 = vrot.slane %v21475_v63, %v20931_v22  ;;  %11399 = vmatmul.mubr.msk.f32.gmra.mrb[2].mxu1 %vm21480_vm10, %v16081_v11  ;;  %v16589_v13 = vsel %vm21481_vm7, 0.0, %v4780_v17  ;;  %v21490_v63 = vld [vmem:[#allocation114_spill] sm:$0xff] }
 0x2f8   :  { %21472 = vst [vmem:[#allocation285_spill] sm:$0xff] %v16565_v14  ;;  %21476 = vst [vmem:[#allocation286_spill] sm:$0xff] %v16572_v60  ;;  %v4783_v7 = vsel %vm3046_vm2, %v16544_v54, %v4782_v46  ;;  %v21483_v23 = vcombine.high %v21482_v10, %v21482_v10  ;;  %v16601_v35 = vrot.slane %v16572_v60, %v20931_v22  ;;  %11401 = vmatprep.mubr.msk.f32.mxu1 %vm21485_vm12, %v16115_v24  ;;  %v21488_v10 = vld [vmem:[#allocation232_spill] sm:$0xff] }
 0x2f9   :  { %21478 = vst [vmem:[#allocation287_spill] sm:$0xff] %v16580_v21  ;;  %21479 = vst [vmem:[#allocation288_spill] sm:$0xff] %v16584_v27  ;;  %v4784_v17 = vsel %vm3048_vm13, %v16555_v55, %v4783_v7  ;;  %v16609_v11 = vrot.slane %v21477_v0, %v20931_v22  ;;  %v16613_v46 = vrot.slane %v16580_v21, %v20931_v22  ;;  %v21492_v55 = vld [vmem:[#allocation48_spill] sm:$0xff] }
 0x2fa   :  { %v16597_v34 = vrot.slane %v21483_v23, %v21354_v43  ;;  %21484 = vst [vmem:[#allocation65_spill] sm:$0xff] %v16601_v35  ;;  %v21489_v23 = vld [vmem:[#allocation233_spill] sm:$0xff]  ;;  %v4785_v60 = vsel %vm3050_vm15, %v16559_v1, %v4784_v17  ;;  %v16624_v7 = vcombine.high %v21490_v63, %v21490_v63  ;;  %v21493_v0 = vcombine.high %v21492_v55, %v21492_v55  ;;  %v21494_v17 = vld [vmem:[#allocation115_spill] sm:$0xff]  ;;  %vm21531_vm10 = vmmov %vm21464_vm1 }
 0x2fb   :  { %21486 = vst [vmem:[#allocation289_spill] sm:$0xff] %v16609_v11  ;;  %21487 = vst [vmem:[#allocation290_spill] sm:$0xff] %v16613_v46  ;;  %v4787_v54 = vsel %vm3042_vm8, %v21489_v23, %v21488_v10  ;;  %v4786_v51 = vsel %vm3052_vm3, %v16565_v14, %v4785_v60  ;;  %v16638_v1 = vcombine.high %v21494_v17, %v21494_v17  ;;  %11402 = vmatmul.mubr.msk.f32.gmra.mrb[4].mxu1 %vm21497_vm11, %v16134_v25  ;;  %v21506_v10 = vld [vmem:[#allocation119_spill] sm:$0xff] }
 0x2fc   :  { %v4788_v24 = vsel %vm3044_vm9, %v16584_v27, %v4787_v54  ;;  %21491 = vst [vmem:[#allocation291_spill] sm:$0xff] %v16624_v7  ;;  %v16630_v21 = vrot.slane %v21493_v0, %v21354_v43  ;;  %v16642_v54 = vrot.slane %v21490_v63, %v20931_v22  ;;  %v16647_v0 = vsel %vm21498_vm0, 0.0, %v4786_v51  ;;  %11404 = vmatprep.mubr.msk.f32.mxu1 %vm21501_vm5, %v16170_v42  ;;  %vm21535_vm7 = vmmov %vm21464_vm1 }
 0x2fd   :  { %v4789_v23 = vsel %vm3046_vm2, %v16601_v35, %v4788_v24  ;;  %21495 = vst [vmem:[#allocation48_spill] sm:$0xff] %v16638_v1  ;;  %v16651_v60 = vrot.slane %v16597_v34, %v20931_v22  ;;  %v16657_v55 = vrot.slane %v16624_v7, %v20931_v22  ;;  %v16665_v51 = vrot.slane %v21494_v17, %v20931_v22  ;;  %v21504_v35 = vld [vmem:[#allocation234_spill] sm:$0xff]  ;;  %vm21536_vm12 = vmmov %vm21498_vm0 }
 0x2fe   :  { %21496 = vst [vmem:[#allocation292_spill] sm:$0xff] %v16642_v54  ;;  %v4790_v24 = vsel %vm3048_vm13, %v16609_v11, %v4789_v23  ;;  %v16669_v14 = vrot.slane %v16638_v1, %v20931_v22  ;;  %v21505_v23 = vld [vmem:[#allocation235_spill] sm:$0xff]  ;;  %v16690_v7 = vrot.slane %v16630_v21, %v20931_v22  ;;  %vm21545_vm11 = vmmov %vm21498_vm0 }
 0x2ff   :  { %21499 = vst [vmem:[#allocation293_spill] sm:$0xff] %v16651_v60  ;;  %21500 = vst [vmem:[#allocation294_spill] sm:$0xff] %v16657_v55  ;;  %v4791_v25 = vsel %vm3050_vm15, %v16613_v46, %v4790_v24  ;;  %v4793_v11 = vsel %vm3042_vm8, %v21505_v23, %v21504_v35  ;;  %v16680_v24 = vcombine.high %v21506_v10, %v21506_v10  ;;  %v21508_v46 = vld [vmem:[#allocation50_spill] sm:$0xff]  ;;  %11405 = vmatmul.mubr.msk.f32.gmra.mrb[6].mxu1 %vm21464_vm1, %v16194_v50  ;;  %v21519_v23 = vld [vmem:[#allocation236_spill] sm:$0xff] }
 0x300   :  { %21502 = vst [vmem:[#allocation295_spill] sm:$0xff] %v16665_v51  ;;  %21503 = vst [vmem:[#allocation296_spill] sm:$0xff] %v16669_v14  ;;  %v4792_v27 = vsel %vm3052_vm3, %v16651_v60, %v4791_v25  ;;  %v4794_v42 = vsel %vm3044_vm9, %v16642_v54, %v4793_v11  ;;  %v21509_v17 = vcombine.high %v21508_v46, %v21508_v46  ;;  %v21512_v60 = vld [vmem:[#allocation120_spill] sm:$0xff]  ;;  %11409 = vmatprep.mubr.msk.f32.mxu1 %vm21517_vm6, %v16320_v31  ;;  %v21521_v35 = vld [vmem:[#allocation126_spill] sm:$0xff] }
 0x301   :  { %21507 = vst [vmem:[#allocation297_spill] sm:$0xff] %v16680_v24  ;;  %21511 = vst [vmem:[#allocation298_spill] sm:$0xff] %v16690_v7  ;;  %v4795_v25 = vsel %vm3046_vm2, %v16657_v55, %v4794_v42  ;;  %v16696_v11 = vcombine.high %v21512_v60, %v21512_v60  ;;  %v16700_v54 = vrot.slane %v21506_v10, %v20931_v22  ;;  %v16705_v46 = vsel %vm21514_vm14, 0.0, %v4792_v27 }
 0x302   :  { %v16686_v1 = vrot.slane %v21509_v17, %v21354_v43  ;;  %v4796_v17 = vsel %vm3048_vm13, %v16665_v51, %v4795_v25  ;;  %v16711_v42 = vrot.slane %v16680_v24, %v20931_v22  ;;  %v16715_v55 = vrot.slane %v21512_v60, %v20931_v22  ;;  %v21520_v25 = vld [vmem:[#allocation237_spill] sm:$0xff]  ;;  %vm21548_vm0 = vmmov %vm21464_vm1 }
 0x303   :  { %21513 = vst [vmem:[#allocation299_spill] sm:$0xff] %v16700_v54  ;;  %v4797_v50 = vsel %vm3050_vm15, %v16669_v14, %v4796_v17  ;;  %v4799_v51 = vsel %vm3042_vm8, %v21520_v25, %v21519_v23  ;;  %v16730_v24 = vcombine.high %v21521_v35, %v21521_v35  ;;  %v21523_v17 = vld [vmem:[#allocation54_spill] sm:$0xff]  ;;  %v16748_v25 = vrot.slane %v16696_v11, %v20931_v22  ;;  %v21538_v23 = vld [vmem:[#allocation239_spill] sm:$0xff]  ;;  %vm21552_vm5 = vmmov %vm21548_vm0 }
 0x304   :  { %21510 = vst [vmem:[#allocation50_spill] sm:$0xff] %v16686_v1  ;;  %21515 = vst [vmem:[#allocation300_spill] sm:$0xff] %v16711_v42  ;;  %v16723_v27 = vrot.slane %v16686_v1, %v20931_v22  ;;  %v4798_v60 = vsel %vm3052_vm3, %v16690_v7, %v4797_v50  ;;  %v4800_v31 = vsel %vm3044_vm9, %v16700_v54, %v4799_v51  ;;  %v21526_v1 = vld [vmem:[#allocation127_spill] sm:$0xff]  ;;  %11410 = vmatmul.mubr.msk.f32.vlgmr.msra.gmra.mrb[8].mxu1 %vm21531_vm10, %v16334_v56 }
 0x305   :  { %21516 = vst [vmem:[#allocation301_spill] sm:$0xff] %v16715_v55  ;;  %21522 = vst [vmem:[#allocation303_spill] sm:$0xff] %v16730_v24  ;;  %v21524_v14 = vcombine.high %v21523_v17, %v21523_v17  ;;  %v16744_v63 = vcombine.high %v21526_v1, %v21526_v1  ;;  %v4801_v50 = vsel %vm3046_vm2, %v16711_v42, %v4800_v31  ;;  %11434 = vmatpush3.msra.mxu1 %v16283_v9 }
 0x306   :  { %21518 = vst [vmem:[#allocation302_spill] sm:$0xff] %v16723_v27  ;;  %21528 = vst [vmem:[#allocation305_spill] sm:$0xff] %v16748_v25  ;;  %v16754_v51 = vrot.slane %v21521_v35, %v20931_v22  ;;  %v16758_v17 = vrot.slane %v16730_v24, %v20931_v22  ;;  %v4802_v7 = vsel %vm3048_vm13, %v16715_v55, %v4801_v50  ;;  %11412 = vmatprep.mubr.msk.f32.mxu1 %vm21535_vm7, %v16376_v33  ;;  %v21537_v55 = vld [vmem:[#allocation238_spill] sm:$0xff] }
 0x307   :  { %v16740_v10 = vrot.slane %v21524_v14, %v21354_v43  ;;  %21527 = vst [vmem:[#allocation304_spill] sm:$0xff] %v16744_v63  ;;  %v16763_v14 = vld [vmem:[%s19777_s1 + $0xb8] sm:$0xff]  ;;  %v16771_v31 = vrot.slane %v21526_v1, %v20931_v22  ;;  %v16775_v42 = vrot.slane %v16744_v63, %v20931_v22  ;;  %v16785_v56 = vsel %vm21536_vm12, 0.0, %v4798_v60  ;;  %v21539_v1 = vld [vmem:[#allocation134_spill] sm:$0xff]  ;;  %vm21562_vm1 = vmmov %vm21545_vm11 }
 0x308   :  { %21529 = vst [vmem:[#allocation306_spill] sm:$0xff] %v16754_v51  ;;  %21530 = vst [vmem:[#allocation307_spill] sm:$0xff] %v16758_v17  ;;  %v4803_v50 = vsel %vm3050_vm15, %v16748_v25, %v4802_v7  ;;  %v4805_v63 = vsel %vm3042_vm8, %v21538_v23, %v21537_v55  ;;  %v16794_v24 = vcombine.high %v21539_v1, %v21539_v1  ;;  %v21541_v60 = vld [vmem:[#allocation55_spill] sm:$0xff]  ;;  %11459 = vmatprep.subr.mxu1 %v16763_v14 }
 0x309   :  { %21525 = vst [vmem:[#allocation54_spill] sm:$0xff] %v16740_v10  ;;  %21532 = vst [vmem:[#allocation308_spill] sm:$0xff] %v16771_v31  ;;  %v16779_v54 = vrot.slane %v16740_v10, %v20931_v22  ;;  %v4804_v9 = vsel %vm3052_vm3, %v16723_v27, %v4803_v50  ;;  %v4806_v33 = vsel %vm3044_vm9, %v16754_v51, %v4805_v63  ;;  %v21543_v7 = vld [vmem:[#allocation135_spill] sm:$0xff]  ;;  %11413 = vmatmul.mubr.msk.f32.gmra.mrb[10].mxu1 %vm21548_vm0, %v16434_v37  ;;  %v21555_v51 = vld [vmem:[#allocation142_spill] sm:$0xff] }
 0x30a   :  { %21533 = vst [vmem:[#allocation309_spill] sm:$0xff] %v16775_v42  ;;  %21540 = vst [vmem:[#allocation311_spill] sm:$0xff] %v16794_v24  ;;  %v21542_v35 = vcombine.high %v21541_v60, %v21541_v60  ;;  %v16808_v25 = vcombine.high %v21543_v7, %v21543_v7  ;;  %v16812_v23 = vsel %vm21545_vm11, 0.0, %v4804_v9  ;;  %v4807_v50 = vsel %vm3046_vm2, %v16758_v17, %v4806_v33  ;;  %v21553_v17 = vld [vmem:[#allocation240_spill] sm:$0xff] }
 0x30b   :  { %21534 = vst [vmem:[#allocation310_spill] sm:$0xff] %v16779_v54  ;;  %v16818_v63 = vrot.slane %v21539_v1, %v20931_v22  ;;  %v4808_v60 = vsel %vm3048_vm13, %v16771_v31, %v4807_v50  ;;  %v16830_v9 = vrot.slane %v21543_v7, %v20931_v22  ;;  %11415 = vmatprep.mubr.msk.f32.mxu1 %vm21552_vm5, %v16491_v20  ;;  %v21554_v50 = vld [vmem:[#allocation241_spill] sm:$0xff]  ;;  %vm21565_vm14 = vmmov %vm21548_vm0 }
 0x30c   :  { %v16804_v10 = vrot.slane %v21542_v35, %v21354_v43  ;;  %21544 = vst [vmem:[#allocation55_spill] sm:$0xff] %v16808_v25  ;;  %v16822_v35 = vrot.slane %v16794_v24, %v20931_v22  ;;  %v16834_v33 = vrot.slane %v16808_v25, %v20931_v22  ;;  %v4809_v37 = vsel %vm3050_vm15, %v16775_v42, %v4808_v60  ;;  %v21557_v25 = vld [vmem:[#allocation56_spill] sm:$0xff]  ;;  %v21559_v42 = vld [vmem:[#allocation143_spill] sm:$0xff]  ;;  %vm21570_vm6 = vmmov %vm21548_vm0 }
 0x30d   :  { %21546 = vst [vmem:[#allocation312_spill] sm:$0xff] %v16818_v63  ;;  %21549 = vst [vmem:[#allocation314_spill] sm:$0xff] %v16830_v9  ;;  %v4811_v31 = vsel %vm3042_vm8, %v21554_v50, %v21553_v17  ;;  %v16849_v55 = vcombine.high %v21555_v51, %v21555_v51  ;;  %v21558_v7 = vcombine.high %v21557_v25, %v21557_v25  ;;  %11416 = vmatmul.mubr.msk.f32.gmra.mrb[12].mxu1 %vm21565_vm14, %v16549_v53 }
 0x30e   :  { %21547 = vst [vmem:[#allocation313_spill] sm:$0xff] %v16822_v35  ;;  %21550 = vst [vmem:[#allocation315_spill] sm:$0xff] %v16834_v33  ;;  %v16838_v27 = vrot.slane %v16804_v10, %v20931_v22  ;;  %v4810_v20 = vsel %vm3052_vm3, %v16779_v54, %v4809_v37  ;;  %v4812_v60 = vsel %vm3044_vm9, %v16818_v63, %v4811_v31  ;;  %v21568_v54 = vld [vmem:[#allocation242_spill] sm:$0xff]  ;;  %11418 = vmatprep.mubr.msk.f32.mxu1 %vm21570_vm6, %v16589_v13 }
 0x30f   :  { %21556 = vst [vmem:[#allocation317_spill] sm:$0xff] %v16849_v55  ;;  %v16855_v24 = vrot.slane %v21558_v7, %v21354_v43  ;;  %v16863_v1 = vcombine.high %v21559_v42, %v21559_v42  ;;  %v16867_v50 = vrot.slane %v21555_v51, %v20931_v22  ;;  %v4862_v17 = vsel %vm21562_vm1, 0.0, %v4810_v20  ;;  %vm21578_vm10 = vmmov %vm21562_vm1 }
 0x310   :  { %21551 = vst [vmem:[#allocation316_spill] sm:$0xff] %v16838_v27  ;;  %v4813_v25 = vsel %vm3046_vm2, %v16822_v35, %v4812_v60  ;;  %v16874_v7 = vrot.slane %v16849_v55, %v20931_v22  ;;  %v16878_v31 = vrot.slane %v21559_v42, %v20931_v22  ;;  %v21569_v35 = vld [vmem:[#allocation243_spill] sm:$0xff]  ;;  %v21573_v42 = vld [vmem:[#allocation58_spill] sm:$0xff]  ;;  %vm21581_vm7 = vmmov %vm21548_vm0 }
 0x311   :  { %21560 = vst [vmem:[#allocation56_spill] sm:$0xff] %v16863_v1  ;;  %21561 = vst [vmem:[#allocation318_spill] sm:$0xff] %v16867_v50  ;;  %v4814_v37 = vsel %vm3048_vm13, %v16830_v9, %v4813_v25  ;;  %v16886_v20 = vrot.slane %v16863_v1, %v20931_v22  ;;  %v16890_v60 = vrot.slane %v16855_v24, %v20931_v22  ;;  %v21571_v9 = vld [vmem:[#allocation150_spill] sm:$0xff]  ;;  %11419 = vmatmul.mubr.msk.f32.gmra.mrb[14].mxu1 %vm21581_vm7, %v16647_v0 }
 0x312   :  { %21563 = vst [vmem:[#allocation319_spill] sm:$0xff] %v16874_v7  ;;  %21564 = vst [vmem:[#allocation320_spill] sm:$0xff] %v16878_v31  ;;  %v4817_v63 = vsel %vm3042_vm8, %v21569_v35, %v21568_v54  ;;  %v4815_v53 = vsel %vm3050_vm15, %v16834_v33, %v4814_v37  ;;  %v16903_v1 = vcombine.high %v21571_v9, %v21571_v9  ;;  %v21575_v37 = vld [vmem:[#allocation151_spill] sm:$0xff] }
 0x313   :  { %21566 = vst [vmem:[#allocation321_spill] sm:$0xff] %v16886_v20  ;;  %21567 = vst [vmem:[#allocation322_spill] sm:$0xff] %v16890_v60  ;;  %v4818_v25 = vsel %vm3044_vm9, %v16867_v50, %v4817_v63  ;;  %v21574_v55 = vcombine.high %v21573_v42, %v21573_v42  ;;  %v4816_v35 = vsel %vm3052_vm3, %v16838_v27, %v4815_v53  ;;  %v21585_v27 = vld [vmem:[#allocation245_spill] sm:$0xff] }
 0x314   :  { %21572 = vst [vmem:[#allocation150_spill] sm:$0xff] %v16903_v1  ;;  %v4819_v13 = vsel %vm3046_vm2, %v16874_v7, %v4818_v25  ;;  %v16917_v33 = vcombine.high %v21575_v37, %v21575_v37  ;;  %v16921_v63 = vrot.slane %v21571_v9, %v20931_v22  ;;  %v4863_v50 = vsel %vm21578_vm10, 0.0, %v4816_v35  ;;  %vm21586_vm12 = vmmov %vm21548_vm0 }
 0x315   :  { %v16909_v51 = vrot.slane %v21574_v55, %v21354_v43  ;;  %v4820_v55 = vsel %vm3048_vm13, %v16878_v31, %v4819_v13  ;;  %v16928_v42 = vrot.slane %v16903_v1, %v20931_v22  ;;  %v16932_v53 = vrot.slane %v21575_v37, %v20931_v22  ;;  %v21584_v31 = vld [vmem:[#allocation244_spill] sm:$0xff]  ;;  %11421 = vmatprep.mubr.msk.f32.mxu1 %vm21586_vm12, %v16705_v46  ;;  %vm21590_vm11 = vmmov %vm21562_vm1 }
 0x316   :  { %21576 = vst [vmem:[#allocation58_spill] sm:$0xff] %v16917_v33  ;;  %21577 = vst [vmem:[#allocation323_spill] sm:$0xff] %v16921_v63  ;;  %v4821_v25 = vsel %vm3050_vm15, %v16886_v20, %v4820_v55  ;;  %v16940_v35 = vrot.slane %v16917_v33, %v20931_v22  ;;  %v4823_v7 = vsel %vm3042_vm8, %v21585_v27, %v21584_v31  ;;  %v21587_v20 = vld [vmem:[#allocation158_spill] sm:$0xff]  ;;  %v21588_v33 = vld [vmem:[#allocation59_spill] sm:$0xff]  ;;  %11422 = vmatmul.mubr.msk.f32.gmra.mrb[0].mxu1 %vm21548_vm0, %v16785_v56 }
 0x317   :  { %21579 = vst [vmem:[#allocation324_spill] sm:$0xff] %v16928_v42  ;;  %21580 = vst [vmem:[#allocation325_spill] sm:$0xff] %v16932_v53  ;;  %v16944_v13 = vrot.slane %v16909_v51, %v20931_v22  ;;  %v4822_v0 = vsel %vm3052_vm3, %v16890_v60, %v4821_v25  ;;  %v4824_v55 = vsel %vm3044_vm9, %v16921_v63, %v4823_v7  ;;  %v21591_v31 = vld [vmem:[#allocation157_spill] sm:$0xff] }
 0x318   :  { %21582 = vst [vmem:[#allocation326_spill] sm:$0xff] %v16940_v35  ;;  %v16957_v54 = vcombine.high %v21587_v20, %v21587_v20  ;;  %v21589_v37 = vcombine.high %v21588_v33, %v21588_v33  ;;  %v4864_v27 = vsel %vm21590_vm11, 0.0, %v4822_v0  ;;  %v4825_v46 = vsel %vm3046_vm2, %v16928_v42, %v4824_v55  ;;  %vm21598_vm5 = vmmov %vm21548_vm0 }
 0x319   :  { %21583 = vst [vmem:[#allocation327_spill] sm:$0xff] %v16944_v13  ;;  %v16970_v25 = vcombine.high %v21591_v31, %v21591_v31  ;;  %v16974_v7 = vrot.slane %v21587_v20, %v20931_v22  ;;  %v4826_v60 = vsel %vm3048_vm13, %v16932_v53, %v4825_v46  ;;  %v21597_v53 = vld [vmem:[#allocation247_spill] sm:$0xff]  ;;  %v17003_v63 = vcombine.high %v16159_v58, %v16159_v58  ;;  %vm21604_vm14 = vmmov %vm21548_vm0 }
 0x31a   :  { %v16963_v1 = vrot.slane %v21589_v37, %v21354_v43  ;;  %v16980_v33 = vrot.slane %v16957_v54, %v20931_v22  ;;  %v16984_v37 = vrot.slane %v21591_v31, %v20931_v22  ;;  %v4827_v55 = vsel %vm3050_vm15, %v16940_v35, %v4826_v60  ;;  %v21596_v43 = vld [vmem:[#allocation246_spill] sm:$0xff]  ;;  %11424 = vmatprep.mubr.msk.f32.mxu1 %vm21598_vm5, %v16812_v23  ;;  %v21599_v35 = vld [vmem:[#allocation5_spill] sm:$0xff]  ;;  %vm21605_vm6 = vmmov %vm21548_vm0 }
 0x31b   :  { %21592 = vst [vmem:[#allocation158_spill] sm:$0xff] %v16970_v25  ;;  %21593 = vst [vmem:[#allocation59_spill] sm:$0xff] %v16974_v7  ;;  %v16996_v46 = vrot.slane %v16970_v25, %v20931_v22  ;;  %v4829_v42 = vsel %vm3042_vm8, %v21597_v53, %v21596_v43  ;;  %v4828_v56 = vsel %vm3052_vm3, %v16944_v13, %v4827_v55  ;;  %v21600_v13 = vld [vmem:[#allocation21_spill] sm:$0xff]  ;;  %11425 = vmatmul.mubr.msk.f32.gmra.mrb[2].mxu1 %vm21604_vm14, %v4862_v17 }
 0x31c   :  { %21594 = vst [vmem:[#allocation157_spill] sm:$0xff] %v16984_v37  ;;  %v16988_v0 = vrot.slane %v16963_v1, %v20931_v22  ;;  %v4830_v60 = vsel %vm3044_vm9, %v16974_v7, %v4829_v42  ;;  %v5087_v22 = vrot.slane %v21350_v61, %v21599_v35  ;;  %v5091_v25 = vrot.slane %v16142_v6, %v21599_v35  ;;  %v21602_v7 = vld [vmem:[#allocation13_spill] sm:$0xff]  ;;  %vm21610_vm10 = vmmov %vm21562_vm1 }
 0x31d   :  { %v4865_v53 = vsel %vm21562_vm1, 0.0, %v4828_v56  ;;  %v4831_v43 = vsel %vm3046_vm2, %v16980_v33, %v4830_v60  ;;  %v5095_v23 = vrot.slane %v21357_v26, %v21599_v35  ;;  %v5099_v55 = vrot.slane %v16163_v62, %v21599_v35  ;;  %11427 = vmatprep.mubr.msk.f32.mxu1 %vm21605_vm6, %v4863_v50  ;;  %vm21614_vm7 = vmmov %vm21548_vm0 }
 0x31e   :  { %21595 = vst [vmem:[#allocation328_spill] sm:$0xff] %v16988_v0  ;;  %v4832_v42 = vsel %vm3048_vm13, %v16984_v37, %v4831_v43  ;;  %v5103_v61 = vrot.slane %v16159_v58, %v21599_v35  ;;  %v5107_v6 = vrot.slane %v17003_v63, %v21599_v35  ;;  %v21601_v56 = vrot.slane %v21600_v13, %v21599_v35  ;;  %vm21617_vm12 = vmmov %vm21548_vm0 }
 0x31f   :  { %v21603_v60 = vrot.slane %v21602_v7, %v21599_v35  ;;  %v4833_v62 = vsel %vm3050_vm15, %v16996_v46, %v4832_v42  ;;  %v17041_v58 = vcombine.high %v21392_v48, %v21392_v48  ;;  %v5131_v37 = vrot.slane %v21380_v3, %v21599_v35  ;;  %v21606_v42 = vld [vmem:[#allocation11_spill] sm:$0xff]  ;;  %11428 = vmatmul.mubr.msk.f32.gmra.mrb[4].mxu1 %vm21614_vm7, %v4864_v27  ;;  %vm21622_vm11 = vmmov %vm21548_vm0 }
 0x320   :  { %v4834_v13 = vsel %vm3052_vm3, %v16988_v0, %v4833_v62  ;;  %v5135_v17 = vrot.slane %v21392_v48, %v21599_v35  ;;  %v21611_v0 = vld [vmem:[#allocation22_spill] sm:$0xff]  ;;  %11430 = vmatprep.mubr.msk.f32.mxu1 %vm21617_vm12, %v4865_v53  ;;  %v5163_v27 = vrot.slane %v16251_v15, %v21599_v35  ;;  %vm21627_vm5 = vmmov %vm21548_vm0 }
 0x321   :  { %v5588_v26 = vsel %vm3040_vm4, %v21603_v60, %v21601_v56  ;;  %v21608_v56 = vld [vmem:[#allocation33_spill] sm:$0xff]  ;;  %v4866_v3 = vsel %vm21610_vm10, 0.0, %v4834_v13  ;;  %v5139_v62 = vrot.slane %v17041_v58, %v21599_v35  ;;  %v17073_v13 = vcombine.high %v16247_v44, %v16247_v44  ;;  %vm21628_vm1 = vmmov %vm21548_vm0 }
 0x322   :  { %v5589_v43 = vsel %vm3042_vm8, %v5087_v22, %v5588_v26  ;;  %v21607_v22 = vrot.slane %v21606_v42, %v21599_v35  ;;  %v21609_v60 = vrot.slane %v21608_v56, %v21599_v35  ;;  %v21613_v42 = vrot.slane %v21376_v8, %v21599_v35  ;;  %vm21633_vm14 = vmmov %vm21548_vm0 }
 0x323   :  { %v5590_v7 = vsel %vm3044_vm9, %v5091_v25, %v5589_v43  ;;  %v21612_v25 = vrot.slane %v21611_v0, %v21599_v35  ;;  %v5155_v8 = vrot.slane %v16236_v4, %v21599_v35  ;;  %v5171_v4 = vrot.slane %v17073_v13, %v21599_v35  ;;  %11431 = vmatmul.mubr.msk.f32.gmra.mrb[6].mxu1 %vm21622_vm11, %v4866_v3  ;;  %vm21640_vm6 = vmmov %vm21548_vm0 }
 0x324   :  { %v5595_v26 = vsel %vm3040_vm4, %v21609_v60, %v21607_v22  ;;  %v5591_v50 = vsel %vm3046_vm2, %v5095_v23, %v5590_v7  ;;  %v5151_v23 = vrot.slane %v21386_v18, %v21599_v35  ;;  %v21615_v7 = vld [vmem:[#allocation10_spill] sm:$0xff]  ;;  %v5159_v60 = vrot.slane %v21390_v2, %v21599_v35  ;;  %vm21649_vm10 = vmmov %vm21548_vm0 }
 0x325   :  { %v5596_v48 = vsel %vm3042_vm8, %v21612_v25, %v5595_v26  ;;  %v5592_v43 = vsel %vm3048_vm13, %v5099_v55, %v5591_v50  ;;  %v21616_v22 = vrot.slane %v21615_v7, %v21599_v35  ;;  %v21618_v25 = vld [vmem:[#allocation40_spill] sm:$0xff]  ;;  %v21625_v7 = vld [vmem:[#allocation74_spill] sm:$0xff]  ;;  %vm21658_vm7 = vmmov %vm21548_vm0 }
 0x326   :  { %v5597_v56 = vsel %vm3044_vm9, %v21613_v42, %v5596_v48  ;;  %v5593_v0 = vsel %vm3050_vm15, %v5103_v61, %v5592_v43  ;;  %v5167_v61 = vrot.slane %v16247_v44, %v21599_v35  ;;  %v21619_v2 = vrot.slane %v21618_v25, %v21599_v35  ;;  %v21620_v48 = vld [vmem:[#allocation68_spill] sm:$0xff]  ;;  %vm21667_vm12 = vmmov %vm21548_vm0 }
 0x327   :  { %v5598_v55 = vsel %vm3046_vm2, %v21616_v22, %v5597_v56  ;;  %v5594_v26 = vsel %vm3052_vm3, %v5107_v6, %v5593_v0  ;;  %v21621_v53 = vrot.slane %v21620_v48, %v21599_v35  ;;  %v5187_v43 = vrot.slane %v16296_v57, %v21599_v35  ;;  %vm21676_vm11 = vmmov %vm21548_vm0 }
 0x328   :  { %v5599_v18 = vsel %vm3048_vm13, %v5131_v37, %v5598_v55  ;;  %v17106_v37 = vcombine.high %v16310_v38, %v16310_v38  ;;  %v5191_v56 = vrot.slane %v21408_v45, %v21599_v35  ;;  %v5195_v0 = vrot.slane %v16314_v30, %v21599_v35  ;;  %11435 = vmatprep.mubr.msk.f32.mxu1 %vm21548_vm0, %v5594_v26 }
 0x329   :  { %v5600_v50 = vsel %vm3050_vm15, %v5135_v17, %v5599_v18  ;;  %v5602_v6 = vsel %vm3040_vm4, %v21621_v53, %v21619_v2  ;;  %v5183_v17 = vrot.slane %v21403_v12, %v21599_v35  ;;  %v21626_v22 = vrot.slane %v21625_v7, %v21599_v35  ;;  %v21629_v2 = vld [vmem:[#allocation63_spill] sm:$0xff]  ;;  %v21631_v53 = vld [vmem:[#allocation82_spill] sm:$0xff] }
 0x32a   :  { %v5601_v15 = vsel %vm3052_vm3, %v5139_v62, %v5600_v50  ;;  %v5603_v44 = vsel %vm3042_vm8, %v5151_v23, %v5602_v6  ;;  %v5199_v62 = vrot.slane %v16310_v38, %v21599_v35  ;;  %v5203_v57 = vrot.slane %v17106_v37, %v21599_v35  ;;  %v21623_v23 = vld [vmem:[#allocation53_spill] sm:$0xff] }
 0x32b   :  { %v5604_v42 = vsel %vm3044_vm9, %v5155_v8, %v5603_v44  ;;  %v21624_v3 = vrot.slane %v21623_v23, %v21599_v35  ;;  %v17135_v30 = vcombine.high %v16384_v19, %v16384_v19  ;;  %v5215_v8 = vrot.slane %v21418_v5, %v21599_v35  ;;  %11436 = vmatmul.mubr.msk.f32.vlgmr.msra.gmra.mrb[8].mxu1 %vm21627_vm5, %v5601_v15  ;;  %v21636_v23 = vld [vmem:[#allocation90_spill] sm:$0xff]  ;;  %vm21694_vm5 = vmmov %vm21548_vm0 }
 0x32c   :  { %v5605_v12 = vsel %vm3046_vm2, %v5159_v60, %v5604_v42  ;;  %v5219_v60 = vrot.slane %v16357_v32, %v21599_v35  ;;  %v5223_v50 = vrot.slane %v21420_v39, %v21599_v35  ;;  %v5227_v25 = vrot.slane %v16367_v36, %v21599_v35  ;;  %11460 = vmatpush3.msra.mxu1 %v16763_v14 }
 0x32d   :  { %v5609_v45 = vsel %vm3040_vm4, %v21626_v22, %v21624_v3  ;;  %v5606_v38 = vsel %vm3048_vm13, %v5163_v27, %v5605_v12  ;;  %v17152_v27 = vld [vmem:[%s19777_s1 + $0xc0] sm:$0xff]  ;;  %v5235_v39 = vrot.slane %v17135_v30, %v21599_v35  ;;  %v21630_v48 = vrot.slane %v21629_v2, %v21599_v35  ;;  %v21643_v2 = vld [vmem:[#allocation98_spill] sm:$0xff] }
 0x32e   :  { %v5610_v55 = vsel %vm3042_vm8, %v5183_v17, %v5609_v45  ;;  %v5607_v26 = vsel %vm3050_vm15, %v5167_v61, %v5606_v38  ;;  %v5231_v61 = vrot.slane %v16384_v19, %v21599_v35  ;;  %v17173_v19 = vcombine.high %v16415_v47, %v16415_v47  ;;  %11485 = vmatprep.subr.mxu1 %v17152_v27  ;;  %v21634_v12 = vld [vmem:[#allocation81_spill] sm:$0xff] }
 0x32f   :  { %v5611_v18 = vsel %vm3044_vm9, %v5187_v43, %v5610_v55  ;;  %v5608_v5 = vsel %vm3052_vm3, %v5171_v4, %v5607_v26  ;;  %v21632_v4 = vrot.slane %v21631_v53, %v21599_v35  ;;  %v5247_v44 = vrot.slane %v21431_v41, %v21599_v35  ;;  %v21638_v55 = vld [vmem:[#allocation95_spill] sm:$0xff] }
 0x330   :  { %v5612_v32 = vsel %vm3046_vm2, %v5191_v56, %v5611_v18  ;;  %11438 = vmatprep.mubr.msk.f32.mxu1 %vm21628_vm1, %v5608_v5  ;;  %v5251_v17 = vrot.slane %v16409_v16, %v21599_v35  ;;  %v5255_v56 = vrot.slane %v21435_v29, %v21599_v35  ;;  %v5263_v41 = vrot.slane %v16415_v47, %v21599_v35  ;;  %vm21703_vm1 = vmmov %vm21548_vm0 }
 0x331   :  { %v5613_v36 = vsel %vm3048_vm13, %v5195_v0, %v5612_v32  ;;  %v5616_v6 = vsel %vm3040_vm4, %v21632_v4, %v21630_v48  ;;  %v5259_v0 = vrot.slane %v16425_v49, %v21599_v35  ;;  %v5267_v16 = vrot.slane %v17173_v19, %v21599_v35  ;;  %v21645_v4 = vld [vmem:[#allocation103_spill] sm:$0xff] }
 0x332   :  { %v5614_v15 = vsel %vm3050_vm15, %v5199_v62, %v5613_v36  ;;  %v5617_v14 = vsel %vm3042_vm8, %v5215_v8, %v5616_v6  ;;  %v21637_v3 = vrot.slane %v21636_v23, %v21599_v35  ;;  %v17205_v22 = vcombine.high %v16471_v52, %v16471_v52  ;;  %v21652_v23 = vld [vmem:[#allocation106_spill] sm:$0xff] }
 0x333   :  { %v5615_v43 = vsel %vm3052_vm3, %v5203_v57, %v5614_v15  ;;  %v5618_v42 = vsel %vm3044_vm9, %v5219_v60, %v5617_v14  ;;  %v21635_v57 = vrot.slane %v21634_v12, %v21599_v35  ;;  %v5279_v47 = vrot.slane %v21445_v28, %v21599_v35  ;;  %v21639_v60 = vld [vmem:[#allocation96_spill] sm:$0xff]  ;;  %v21646_v15 = vld [vmem:[#allocation279_spill] sm:$0xff] }
 0x334   :  { %11439 = vmatmul.mubr.msk.f32.gmra.mrb[10].mxu1 %vm21633_vm14, %v5615_v43  ;;  %v5619_v62 = vsel %vm3046_vm2, %v5223_v50, %v5618_v42  ;;  %v5283_v8 = vrot.slane %v21638_v55, %v21599_v35  ;;  %v5287_v26 = vrot.slane %v21639_v60, %v21599_v35  ;;  %v5295_v28 = vrot.slane %v16471_v52, %v21599_v35  ;;  %v21647_v43 = vld [vmem:[#allocation104_spill] sm:$0xff]  ;;  %vm21711_vm14 = vmmov %vm21548_vm0 }
 0x335   :  { %v5623_v29 = vsel %vm3040_vm4, %v21637_v3, %v21635_v57  ;;  %v5620_v49 = vsel %vm3048_vm13, %v5227_v25, %v5619_v62  ;;  %v5291_v25 = vrot.slane %v16483_v40, %v21599_v35  ;;  %v5299_v32 = vrot.slane %v17205_v22, %v21599_v35  ;;  %v21650_v57 = vld [vmem:[#allocation97_spill] sm:$0xff] }
 0x336   :  { %v5624_v7 = vsel %vm3042_vm8, %v5247_v44, %v5623_v29  ;;  %v5621_v45 = vsel %vm3050_vm15, %v5231_v61, %v5620_v49  ;;  %v21641_v61 = vld [vmem:[#allocation89_spill] sm:$0xff]  ;;  %v17234_v40 = vcombine.high %v16524_v59, %v16524_v59  ;;  %v5311_v6 = vrot.slane %v21645_v4, %v21599_v35 }
 0x337   :  { %v5625_v38 = vsel %vm3044_vm9, %v5251_v17, %v5624_v7  ;;  %v5622_v18 = vsel %vm3052_vm3, %v5235_v39, %v5621_v45  ;;  %v21642_v36 = vrot.slane %v21641_v61, %v21599_v35  ;;  %v21644_v39 = vrot.slane %v21643_v2, %v21599_v35 }
 0x338   :  { %v5626_v50 = vsel %vm3046_vm2, %v5255_v56, %v5625_v38  ;;  %11441 = vmatprep.mubr.msk.f32.mxu1 %vm21640_vm6, %v5622_v18  ;;  %v5315_v14 = vrot.slane %v21646_v15, %v21599_v35  ;;  %v5319_v42 = vrot.slane %v21647_v43, %v21599_v35  ;;  %v21648_v56 = vld [vmem:[#allocation41_spill] sm:$0xff]  ;;  %v5331_v12 = vrot.slane %v17234_v40, %v21599_v35  ;;  %v21663_v15 = vld [vmem:[#allocation114_spill] sm:$0xff]  ;;  %vm21717_vm6 = vmmov %vm21548_vm0 }
 0x339   :  { %v5627_v5 = vsel %vm3048_vm13, %v5259_v0, %v5626_v50  ;;  %v5630_v48 = vsel %vm3040_vm4, %v21644_v39, %v21642_v36  ;;  %v5323_v0 = vrot.slane %v21648_v56, %v21599_v35  ;;  %v21653_v3 = vrot.slane %v21652_v23, %v21599_v35  ;;  %v21659_v39 = vld [vmem:[#allocation105_spill] sm:$0xff]  ;;  %v21665_v56 = vld [vmem:[#allocation115_spill] sm:$0xff] }
 0x33a   :  { %v5628_v52 = vsel %vm3050_vm15, %v5263_v41, %v5627_v5  ;;  %v5631_v53 = vsel %vm3042_vm8, %v5279_v47, %v5630_v48  ;;  %v5327_v41 = vrot.slane %v16524_v59, %v21599_v35  ;;  %v17265_v47 = vcombine.high %v16597_v34, %v16597_v34  ;;  %v21654_v59 = vld [vmem:[#allocation110_spill] sm:$0xff]  ;;  %v21657_v5 = vld [vmem:[#allocation287_spill] sm:$0xff] }
 0x33b   :  { %v5629_v44 = vsel %vm3052_vm3, %v5267_v16, %v5628_v52  ;;  %v5632_v17 = vsel %vm3044_vm9, %v5283_v8, %v5631_v53  ;;  %v21651_v16 = vrot.slane %v21650_v57, %v21599_v35  ;;  %v5343_v45 = vrot.slane %v21654_v59, %v21599_v35  ;;  %v21655_v8 = vld [vmem:[#allocation286_spill] sm:$0xff]  ;;  %v21661_v52 = vld [vmem:[#allocation113_spill] sm:$0xff] }
 0x33c   :  { %11442 = vmatmul.mubr.msk.f32.gmra.mrb[12].mxu1 %vm21649_vm10, %v5629_v44  ;;  %v5633_v62 = vsel %vm3046_vm2, %v5287_v26, %v5632_v17  ;;  %v5347_v60 = vrot.slane %v21655_v8, %v21599_v35  ;;  %v21656_v26 = vld [vmem:[#allocation111_spill] sm:$0xff]  ;;  %v5355_v61 = vrot.slane %v21657_v5, %v21599_v35  ;;  %v5359_v36 = vrot.slane %v16597_v34, %v21599_v35  ;;  %vm21729_vm10 = vmmov %vm21548_vm0 }
 0x33d   :  { %v5637_v29 = vsel %vm3040_vm4, %v21653_v3, %v21651_v16  ;;  %v5634_v49 = vsel %vm3048_vm13, %v5291_v25, %v5633_v62  ;;  %v5351_v18 = vrot.slane %v21656_v26, %v21599_v35  ;;  %v5363_v2 = vrot.slane %v17265_v47, %v21599_v35  ;;  %v21664_v44 = vld [vmem:[#allocation291_spill] sm:$0xff]  ;;  %v21666_v62 = vld [vmem:[#allocation48_spill] sm:$0xff] }
 0x33e   :  { %v5638_v7 = vsel %vm3042_vm8, %v5311_v6, %v5637_v29  ;;  %v5635_v38 = vsel %vm3050_vm15, %v5295_v28, %v5634_v49  ;;  %v21660_v48 = vrot.slane %v21659_v39, %v21599_v35  ;;  %v17294_v4 = vcombine.high %v16630_v21, %v16630_v21  ;;  %v21668_v3 = vld [vmem:[#allocation112_spill] sm:$0xff]  ;;  %v21670_v29 = vld [vmem:[#allocation117_spill] sm:$0xff] }
 0x33f   :  { %v5639_v55 = vsel %vm3044_vm9, %v5315_v14, %v5638_v7  ;;  %v5636_v50 = vsel %vm3052_vm3, %v5299_v32, %v5635_v38  ;;  %v21662_v32 = vrot.slane %v21661_v52, %v21599_v35  ;;  %v5375_v14 = vrot.slane %v21663_v15, %v21599_v35  ;;  %v21672_v38 = vld [vmem:[#allocation50_spill] sm:$0xff] }
 0x340   :  { %v5640_v25 = vsel %vm3046_vm2, %v5319_v42, %v5639_v55  ;;  %11444 = vmatprep.mubr.msk.f32.mxu1 %vm21658_vm7, %v5636_v50  ;;  %v5379_v17 = vrot.slane %v21664_v44, %v21599_v35  ;;  %v5387_v57 = vrot.slane %v21666_v62, %v21599_v35  ;;  %v5391_v16 = vrot.slane %v16630_v21, %v21599_v35  ;;  %v21673_v21 = vld [vmem:[#allocation119_spill] sm:$0xff]  ;;  %v21681_v15 = vld [vmem:[#allocation54_spill] sm:$0xff]  ;;  %vm21739_vm7 = vmmov %vm21548_vm0 }
 0x341   :  { %v5641_v28 = vsel %vm3048_vm13, %v5323_v0, %v5640_v25  ;;  %v5644_v53 = vsel %vm3040_vm4, %v21662_v32, %v21660_v48  ;;  %v5383_v0 = vrot.slane %v21665_v56, %v21599_v35  ;;  %v5395_v23 = vrot.slane %v17294_v4, %v21599_v35  ;;  %v21675_v25 = vld [vmem:[#allocation120_spill] sm:$0xff] }
 0x342   :  { %v5642_v34 = vsel %vm3050_vm15, %v5327_v41, %v5641_v28  ;;  %v5645_v6 = vsel %vm3042_vm8, %v5343_v45, %v5644_v53  ;;  %v21671_v49 = vrot.slane %v21670_v29, %v21599_v35  ;;  %v17325_v55 = vcombine.high %v21672_v38, %v21672_v38  ;;  %v21677_v32 = vld [vmem:[#allocation116_spill] sm:$0xff] }
 0x343   :  { %v5643_v43 = vsel %vm3052_vm3, %v5331_v12, %v5642_v34  ;;  %v5646_v42 = vsel %vm3044_vm9, %v5347_v60, %v5645_v6  ;;  %v21669_v12 = vrot.slane %v21668_v3, %v21599_v35  ;;  %v5407_v8 = vrot.slane %v21673_v21, %v21599_v35  ;;  %v21679_v34 = vld [vmem:[#allocation122_spill] sm:$0xff]  ;;  %v21685_v3 = vld [vmem:[#allocation304_spill] sm:$0xff] }
 0x344   :  { %11445 = vmatmul.mubr.msk.f32.gmra.mrb[14].mxu1 %vm21667_vm12, %v5643_v43  ;;  %v5647_v41 = vsel %vm3046_vm2, %v5351_v18, %v5646_v42  ;;  %v21674_v18 = vld [vmem:[#allocation297_spill] sm:$0xff]  ;;  %v5415_v5 = vrot.slane %v21675_v25, %v21599_v35  ;;  %v5419_v39 = vrot.slane %v16696_v11, %v21599_v35  ;;  %v5423_v48 = vrot.slane %v21672_v38, %v21599_v35  ;;  %v21683_v42 = vld [vmem:[#allocation303_spill] sm:$0xff]  ;;  %vm21742_vm12 = vmmov %vm21548_vm0 }
 0x345   :  { %v5651_v7 = vsel %vm3040_vm4, %v21671_v49, %v21669_v12  ;;  %v5648_v59 = vsel %vm3048_vm13, %v5355_v61, %v5647_v41  ;;  %v5411_v50 = vrot.slane %v21674_v18, %v21599_v35  ;;  %v5427_v52 = vrot.slane %v17325_v55, %v21599_v35 }
 0x346   :  { %v5652_v45 = vsel %vm3042_vm8, %v5375_v14, %v5651_v7  ;;  %v5649_v60 = vsel %vm3050_vm15, %v5359_v36, %v5648_v59  ;;  %v21678_v53 = vrot.slane %v21677_v32, %v21599_v35  ;;  %v17354_v11 = vcombine.high %v21681_v15, %v21681_v15  ;;  %v21686_v7 = vld [vmem:[#allocation121_spill] sm:$0xff] }
 0x347   :  { %v5653_v26 = vsel %vm3044_vm9, %v5379_v17, %v5652_v45  ;;  %v5650_v61 = vsel %vm3052_vm3, %v5363_v2, %v5649_v60  ;;  %v21680_v2 = vrot.slane %v21679_v34, %v21599_v35  ;;  %v21682_v17 = vld [vmem:[#allocation126_spill] sm:$0xff]  ;;  %v5443_v56 = vrot.slane %v21683_v42, %v21599_v35  ;;  %v21688_v59 = vld [vmem:[#allocation129_spill] sm:$0xff] }
 0x348   :  { %v5654_v28 = vsel %vm3046_vm2, %v5383_v0, %v5653_v26  ;;  %11447 = vmatprep.mubr.msk.f32.mxu1 %vm21676_vm11, %v5650_v61  ;;  %v5439_v43 = vrot.slane %v21682_v17, %v21599_v35  ;;  %v5451_v12 = vrot.slane %v21685_v3, %v21599_v35  ;;  %v5455_v29 = vrot.slane %v21681_v15, %v21599_v35  ;;  %v21690_v26 = vld [vmem:[#allocation134_spill] sm:$0xff]  ;;  %v21695_v15 = vld [vmem:[#allocation128_spill] sm:$0xff]  ;;  %vm21754_vm11 = vmmov %vm21548_vm0 }
 0x349   :  { %v5655_v36 = vsel %vm3048_vm13, %v5387_v57, %v5654_v28  ;;  %v5658_v6 = vsel %vm3040_vm4, %v21680_v2, %v21678_v53  ;;  %v21684_v57 = vld [vmem:[#allocation127_spill] sm:$0xff]  ;;  %v5459_v49 = vrot.slane %v17354_v11, %v21599_v35  ;;  %v21689_v45 = vrot.slane %v21688_v59, %v21599_v35 }
 0x34a   :  { %v5656_v14 = vsel %vm3050_vm15, %v5391_v16, %v5655_v36  ;;  %v5659_v44 = vsel %vm3042_vm8, %v5407_v8, %v5658_v6  ;;  %v5447_v41 = vrot.slane %v21684_v57, %v21599_v35  ;;  %v17385_v60 = vcombine.high %v16804_v10, %v16804_v10  ;;  %v21692_v28 = vld [vmem:[#allocation135_spill] sm:$0xff] }
 0x34b   :  { %v5657_v0 = vsel %vm3052_vm3, %v5395_v23, %v5656_v14  ;;  %v5660_v62 = vsel %vm3044_vm9, %v5411_v50, %v5659_v44  ;;  %v21687_v23 = vrot.slane %v21686_v7, %v21599_v35  ;;  %v5471_v18 = vrot.slane %v21690_v26, %v21599_v35  ;;  %v21693_v53 = vld [vmem:[#allocation55_spill] sm:$0xff]  ;;  %v21697_v44 = vld [vmem:[#allocation137_spill] sm:$0xff]  ;;  %v21702_v7 = vld [vmem:[#allocation56_spill] sm:$0xff] }
 0x34c   :  { %11448 = vmatmul.mubr.msk.f32.gmra.mrb[0].mxu1 %vm21548_vm0, %v5657_v0  ;;  %v5661_v16 = vsel %vm3046_vm2, %v5415_v5, %v5660_v62  ;;  %v21691_v5 = vld [vmem:[#allocation311_spill] sm:$0xff]  ;;  %v5479_v36 = vrot.slane %v21692_v28, %v21599_v35  ;;  %v5483_v34 = vrot.slane %v21693_v53, %v21599_v35  ;;  %v5487_v2 = vrot.slane %v16804_v10, %v21599_v35  ;;  %v21700_v62 = vld [vmem:[#allocation317_spill] sm:$0xff]  ;;  %v21708_v28 = vld [vmem:[#allocation150_spill] sm:$0xff] }
 0x34d   :  { %v5665_v38 = vsel %vm3040_vm4, %v21689_v45, %v21687_v23  ;;  %v5662_v21 = vsel %vm3048_vm13, %v5419_v39, %v5661_v16  ;;  %v5475_v61 = vrot.slane %v21691_v5, %v21599_v35  ;;  %v5491_v6 = vrot.slane %v17385_v60, %v21599_v35 }
 0x34e   :  { %v5666_v8 = vsel %vm3042_vm8, %v5439_v43, %v5665_v38  ;;  %v5663_v50 = vsel %vm3050_vm15, %v5423_v48, %v5662_v21  ;;  %v21696_v14 = vrot.slane %v21695_v15, %v21599_v35  ;;  %v17414_v43 = vcombine.high %v16855_v24, %v16855_v24  ;;  %v21704_v38 = vld [vmem:[#allocation136_spill] sm:$0xff]  ;;  %v21706_v21 = vld [vmem:[#allocation145_spill] sm:$0xff] }
 0x34f   :  { %v5667_v25 = vsel %vm3044_vm9, %v5443_v56, %v5666_v8  ;;  %v5664_v39 = vsel %vm3052_vm3, %v5427_v52, %v5663_v50  ;;  %v21698_v52 = vrot.slane %v21697_v44, %v21599_v35  ;;  %v21699_v56 = vld [vmem:[#allocation142_spill] sm:$0xff]  ;;  %v5507_v57 = vrot.slane %v21700_v62, %v21599_v35  ;;  %v21712_v44 = vld [vmem:[#allocation144_spill] sm:$0xff] }
 0x350   :  { %v5668_v32 = vsel %vm3046_vm2, %v5447_v41, %v5667_v25  ;;  %11450 = vmatprep.mubr.msk.f32.mxu1 %vm21694_vm5, %v5664_v39  ;;  %v5503_v0 = vrot.slane %v21699_v56, %v21599_v35  ;;  %v5515_v23 = vrot.slane %v21702_v7, %v21599_v35  ;;  %v5519_v59 = vrot.slane %v16855_v24, %v21599_v35  ;;  %v21709_v39 = vld [vmem:[#allocation151_spill] sm:$0xff]  ;;  %vm21769_vm5 = vmmov %vm21548_vm0 }
 0x351   :  { %v5669_v48 = vsel %vm3048_vm13, %v5451_v12, %v5668_v32  ;;  %v5672_v17 = vsel %vm3040_vm4, %v21698_v52, %v21696_v14  ;;  %v21701_v12 = vld [vmem:[#allocation143_spill] sm:$0xff]  ;;  %v5523_v45 = vrot.slane %v17414_v43, %v21599_v35  ;;  %v21707_v8 = vrot.slane %v21706_v21, %v21599_v35 }
 0x352   :  { %v5670_v10 = vsel %vm3050_vm15, %v5455_v29, %v5669_v48  ;;  %v5673_v42 = vsel %vm3042_vm8, %v5471_v18, %v5672_v17  ;;  %v5511_v16 = vrot.slane %v21701_v12, %v21599_v35  ;;  %v17445_v25 = vcombine.high %v16909_v51, %v16909_v51  ;;  %v21710_v48 = vld [vmem:[#allocation58_spill] sm:$0xff]  ;;  %v21714_v17 = vld [vmem:[#allocation153_spill] sm:$0xff]  ;;  %v21722_v21 = vld [vmem:[#allocation7_spill] sm:$0xff] }
 0x353   :  { %v5671_v41 = vsel %vm3052_vm3, %v5459_v49, %v5670_v10  ;;  %v5674_v3 = vsel %vm3044_vm9, %v5475_v61, %v5673_v42  ;;  %v21705_v49 = vrot.slane %v21704_v38, %v21599_v35  ;;  %v5535_v24 = vrot.slane %v21571_v9, %v21599_v35  ;;  %v21716_v12 = vld [vmem:[#allocation158_spill] sm:$0xff] }
 0x354   :  { %11451 = vmatmul.mubr.msk.f32.gmra.mrb[2].mxu1 %vm21703_vm1, %v5671_v41  ;;  %v5675_v29 = vsel %vm3046_vm2, %v5479_v36, %v5674_v3  ;;  %v5539_v36 = vrot.slane %v21708_v28, %v21599_v35  ;;  %v5543_v32 = vrot.slane %v21709_v39, %v21599_v35  ;;  %v5547_v15 = vrot.slane %v21710_v48, %v21599_v35  ;;  %vm21772_vm1 = vmmov %vm21548_vm0 }
 0x355   :  { %v5679_v26 = vsel %vm3040_vm4, %v21707_v8, %v21705_v49  ;;  %v5676_v18 = vsel %vm3048_vm13, %v5483_v34, %v5675_v29  ;;  %v5551_v9 = vrot.slane %v16909_v51, %v21599_v35  ;;  %v5555_v14 = vrot.slane %v17445_v25, %v21599_v35 }
 0x356   :  { %v5680_v50 = vsel %vm3042_vm8, %v5503_v0, %v5679_v26  ;;  %v5677_v5 = vsel %vm3050_vm15, %v5487_v2, %v5676_v18  ;;  %v21713_v52 = vrot.slane %v21712_v44, %v21599_v35  ;;  %v17474_v42 = vcombine.high %v16963_v1, %v16963_v1  ;;  %v21723_v26 = vld [vmem:[#allocation214_spill] sm:$0xff] }
 0x357   :  { %v5681_v61 = vsel %vm3044_vm9, %v5507_v57, %v5680_v50  ;;  %v5678_v53 = vsel %vm3052_vm3, %v5491_v6, %v5677_v5  ;;  %v21715_v6 = vrot.slane %v21714_v17, %v21599_v35  ;;  %v5567_v0 = vrot.slane %v21587_v20, %v21599_v35  ;;  %v21725_v5 = vld [vmem:[#allocation26_spill] sm:$0xff] }
 0x358   :  { %v5682_v34 = vsel %vm3046_vm2, %v5511_v16, %v5681_v61  ;;  %11453 = vmatprep.mubr.msk.f32.mxu1 %vm21711_vm14, %v5678_v53  ;;  %v5571_v62 = vrot.slane %v16957_v54, %v21599_v35  ;;  %v5575_v3 = vrot.slane %v21591_v31, %v21599_v35  ;;  %v5579_v16 = vrot.slane %v21716_v12, %v21599_v35  ;;  %v21727_v53 = vld [vmem:[#allocation216_spill] sm:$0xff]  ;;  %v21731_v44 = vld [vmem:[#allocation218_spill] sm:$0xff]  ;;  %vm21784_vm14 = vmmov %vm21548_vm0 }
 0x359   :  { %v5683_v2 = vsel %vm3048_vm13, %v5515_v23, %v5682_v34  ;;  %v5686_v10 = vsel %vm3040_vm4, %v21715_v6, %v21713_v52  ;;  %v5583_v20 = vrot.slane %v16963_v1, %v21599_v35  ;;  %v5587_v54 = vrot.slane %v17474_v42, %v21599_v35  ;;  %v21718_v23 = vld [vmem:[#allocation152_spill] sm:$0xff]  ;;  %v21724_v1 = vld [vmem:[#allocation215_spill] sm:$0xff]  ;;  %v21728_v34 = vld [vmem:[#allocation217_spill] sm:$0xff]  ;;  %v17529_v52 = vpop.f32.mrb[64].mxu0 }
 0x35a   :  { %v5684_v51 = vsel %vm3050_vm15, %v5519_v59, %v5683_v2  ;;  %v5687_v56 = vsel %vm3042_vm8, %v5535_v24, %v5686_v10  ;;  %v21719_v29 = vrot.slane %v21718_v23, %v21599_v35  ;;  %v21720_v59 = vld [vmem:[#allocation159_spill] sm:$0xff]  ;;  %v5896_v8 = vrot.slane %v17003_v63, %v21722_v21  ;;  %v21732_v6 = vld [vmem:[#allocation265_spill] sm:$0xff]  ;;  %v21736_v12 = vld [vmem:[#allocation266_spill] sm:$0xff] }
 0x35b   :  { %v5685_v57 = vsel %vm3052_vm3, %v5523_v45, %v5684_v51  ;;  %v5688_v41 = vsel %vm3044_vm9, %v5539_v36, %v5687_v56  ;;  %v21721_v45 = vrot.slane %v21720_v59, %v21599_v35  ;;  %v5957_v18 = vsel %vm3040_vm4, %v21724_v1, %v21723_v26  ;;  %v21733_v51 = vld [vmem:[#allocation24_spill] sm:$0xff]  ;;  %v21744_v1 = vld [vmem:[#allocation267_spill] sm:$0xff] }
 0x35c   :  { %11454 = vmatmul.mubr.msk.f32.gmra.mrb[4].mxu1 %vm21717_vm6, %v5685_v57  ;;  %v5689_v7 = vsel %vm3046_vm2, %v5543_v32, %v5688_v41  ;;  %v5958_v61 = vsel %vm3042_vm8, %v21725_v5, %v5957_v18  ;;  %v5900_v28 = vrot.slane %v17041_v58, %v21722_v21  ;;  %v21726_v32 = vld [vmem:[#allocation140_spill] sm:$0xff]  ;;  %v5964_v48 = vsel %vm3040_vm4, %v21728_v34, %v21727_v53  ;;  %v17539_v41 = vpop.f32.mrb[65].mxu0  ;;  %v21750_v53 = vld [vmem:[#allocation225_spill] sm:$0xff]  ;;  %vm21793_vm6 = vmmov %vm21548_vm0 }
 0x35d   :  { %v5693_v31 = vsel %vm3040_vm4, %v21721_v45, %v21719_v29  ;;  %v5690_v38 = vsel %vm3048_vm13, %v5547_v15, %v5689_v7  ;;  %v5959_v63 = vsel %vm3044_vm9, %v21726_v32, %v5958_v61  ;;  %v5965_v58 = vsel %vm3042_vm8, %v21731_v44, %v5964_v48  ;;  %v21740_v59 = vld [vmem:[#allocation12_spill] sm:$0xff]  ;;  %v21753_v44 = vld [vmem:[#allocation79_spill] sm:$0xff] }
 0x35e   :  { %v5694_v49 = vsel %vm3042_vm8, %v5567_v0, %v5693_v31  ;;  %v5691_v50 = vsel %vm3050_vm15, %v5551_v9, %v5690_v38  ;;  %v21730_v9 = vld [vmem:[#allocation264_spill] sm:$0xff]  ;;  %v5966_v56 = vsel %vm3044_vm9, %v21733_v51, %v5965_v58  ;;  %v21741_v31 = vld [vmem:[#allocation67_spill] sm:$0xff]  ;;  %v5912_v5 = vrot.slane %v17135_v30, %v21722_v21  ;;  %v17585_v58 = vld [vmem:[%s19777_s1 + $0xc8] sm:$0xff] }
 0x35f   :  { %v5695_v24 = vsel %vm3044_vm9, %v5571_v62, %v5694_v49  ;;  %v5692_v36 = vsel %vm3052_vm3, %v5555_v14, %v5691_v50  ;;  %v5960_v2 = vsel %vm3046_vm2, %v21730_v9, %v5959_v63  ;;  %v5904_v14 = vrot.slane %v17073_v13, %v21722_v21  ;;  %v21734_v0 = vld [vmem:[#allocation220_spill] sm:$0xff]  ;;  %v21735_v62 = vld [vmem:[#allocation221_spill] sm:$0xff]  ;;  %v21745_v50 = vld [vmem:[#allocation222_spill] sm:$0xff] }
 0x360   :  { %v5696_v39 = vsel %vm3046_vm2, %v5575_v3, %v5695_v24  ;;  %11456 = vmatprep.mubr.msk.f32.mxu1 %vm21729_vm10, %v5692_v36  ;;  %v5961_v10 = vsel %vm3048_vm13, %v21732_v6, %v5960_v2  ;;  %v5971_v57 = vsel %vm3040_vm4, %v21735_v62, %v21734_v0  ;;  %v21743_v49 = vld [vmem:[#allocation49_spill] sm:$0xff]  ;;  %v21746_v24 = vld [vmem:[#allocation223_spill] sm:$0xff]  ;;  %v21747_v36 = vld [vmem:[#allocation268_spill] sm:$0xff] }
 0x361   :  { %v5697_v15 = vsel %vm3048_vm13, %v5579_v16, %v5696_v39  ;;  %v5962_v13 = vsel %vm3050_vm15, %v21736_v12, %v5961_v10  ;;  %v21737_v16 = vld [vmem:[#allocation219_spill] sm:$0xff]  ;;  %v21748_v39 = vld [vmem:[#allocation57_spill] sm:$0xff]  ;;  %v21749_v63 = vld [vmem:[#allocation224_spill] sm:$0xff] }
 0x362   :  { %v5698_v17 = vsel %vm3050_vm15, %v5583_v20, %v5697_v15  ;;  %v5967_v7 = vsel %vm3046_vm2, %v21737_v16, %v5966_v56  ;;  %v21738_v20 = vld [vmem:[#allocation47_spill] sm:$0xff]  ;;  %v5963_v29 = vsel %vm3052_vm3, %v5896_v8, %v5962_v13  ;;  %v5978_v8 = vsel %vm3040_vm4, %v21746_v24, %v21745_v50  ;;  %v21751_v48 = vld [vmem:[#allocation72_spill] sm:$0xff]  ;;  %v21752_v9 = vld [vmem:[#allocation73_spill] sm:$0xff] }
 0x363   :  { %v5699_v3 = vsel %vm3052_vm3, %v5587_v54, %v5698_v17  ;;  %v5972_v23 = vsel %vm3042_vm8, %v21738_v20, %v5971_v57  ;;  %v5968_v45 = vsel %vm3048_vm13, %v21740_v59, %v5967_v7  ;;  %v5908_v54 = vrot.slane %v17106_v37, %v21722_v21  ;;  %v21755_v6 = vld [vmem:[#allocation269_spill] sm:$0xff]  ;;  %v21756_v51 = vld [vmem:[#allocation80_spill] sm:$0xff]  ;;  %v21757_v0 = vld [vmem:[#allocation226_spill] sm:$0xff] }
 0x364   :  { %11457 = vmatmul.mubr.msk.f32.gmra.mrb[6].mxu1 %vm21739_vm7, %v5699_v3  ;;  %v5973_v38 = vsel %vm3044_vm9, %v21741_v31, %v5972_v23  ;;  %v5969_v26 = vsel %vm3050_vm15, %v21743_v49, %v5968_v45  ;;  %v5979_v32 = vsel %vm3042_vm8, %v21748_v39, %v5978_v8  ;;  %v5985_v34 = vsel %vm3040_vm4, %v21750_v53, %v21749_v63  ;;  %v21758_v62 = vld [vmem:[#allocation227_spill] sm:$0xff]  ;;  %v21760_v12 = vld [vmem:[#allocation64_spill] sm:$0xff]  ;;  %v21768_v50 = vld [vmem:[#allocation229_spill] sm:$0xff] }
 0x365   :  { %11461 = vmatprep.mubr.msk.f32.mxu1 %vm21742_vm12, %v5963_v29  ;;  %v5974_v18 = vsel %vm3046_vm2, %v21744_v1, %v5973_v38  ;;  %v5970_v61 = vsel %vm3052_vm3, %v5900_v28, %v5969_v26  ;;  %v5980_v2 = vsel %vm3044_vm9, %v21752_v9, %v5979_v32  ;;  %v5986_v30 = vsel %vm3042_vm8, %v21753_v44, %v5985_v34  ;;  %v21761_v13 = vld [vmem:[#allocation87_spill] sm:$0xff]  ;;  %v21763_v23 = vld [vmem:[#allocation272_spill] sm:$0xff]  ;;  %v21765_v38 = vld [vmem:[#allocation34_spill] sm:$0xff] }
 0x366   :  { %v5975_v37 = vsel %vm3048_vm13, %v21747_v36, %v5974_v18  ;;  %v5916_v28 = vrot.slane %v17173_v19, %v21722_v21  ;;  %v5981_v10 = vsel %vm3046_vm2, %v21755_v6, %v5980_v2  ;;  %v5987_v56 = vsel %vm3044_vm9, %v21756_v51, %v5986_v30  ;;  %v21759_v19 = vld [vmem:[#allocation270_spill] sm:$0xff]  ;;  %v21762_v7 = vld [vmem:[#allocation271_spill] sm:$0xff]  ;;  %v21764_v59 = vld [vmem:[#allocation88_spill] sm:$0xff] }
 0x367   :  { %v5976_v15 = vsel %vm3050_vm15, %v21751_v48, %v5975_v37  ;;  %v5992_v57 = vsel %vm3040_vm4, %v21758_v62, %v21757_v0  ;;  %v5982_v3 = vsel %vm3048_vm13, %v21759_v19, %v5981_v10  ;;  %v5920_v45 = vrot.slane %v17205_v22, %v21722_v21  ;;  %v21766_v26 = vld [vmem:[#allocation273_spill] sm:$0xff]  ;;  %v21767_v18 = vld [vmem:[#allocation228_spill] sm:$0xff]  ;;  %v21771_v36 = vld [vmem:[#allocation275_spill] sm:$0xff] }
 0x368   :  { %11462 = vmatmul.mubr.msk.f32.vlgmr.msra.gmra.mrb[8].mxu1 %vm21754_vm11, %v5970_v61  ;;  %v5977_v17 = vsel %vm3052_vm3, %v5904_v14, %v5976_v15  ;;  %v5988_v14 = vsel %vm3046_vm2, %v21760_v12, %v5987_v56  ;;  %v5993_v16 = vsel %vm3042_vm8, %v21761_v13, %v5992_v57  ;;  %v5983_v20 = vsel %vm3050_vm15, %v21762_v7, %v5982_v3  ;;  %v21770_v61 = vld [vmem:[#allocation274_spill] sm:$0xff]  ;;  %v21773_v39 = vld [vmem:[#allocation15_spill] sm:$0xff]  ;;  %v21774_v63 = vld [vmem:[#allocation276_spill] sm:$0xff] }
 0x369   :  { %11486 = vmatpush3.msra.mxu1 %v17152_v27  ;;  %11464 = vmatprep.mubr.msk.f32.mxu1 %vm21548_vm0, %v5977_v17  ;;  %v5989_v29 = vsel %vm3048_vm13, %v21763_v23, %v5988_v14  ;;  %v5994_v27 = vsel %vm3044_vm9, %v21764_v59, %v5993_v16  ;;  %v5984_v31 = vsel %vm3052_vm3, %v5908_v54, %v5983_v20  ;;  %v21775_v34 = vld [vmem:[#allocation230_spill] sm:$0xff]  ;;  %v21776_v48 = vld [vmem:[#allocation231_spill] sm:$0xff]  ;;  %v21777_v2 = vld [vmem:[#allocation277_spill] sm:$0xff] }
 0x36a   :  { %11511 = vmatprep.subr.mxu1 %v17585_v58  ;;  %v5990_v49 = vsel %vm3050_vm15, %v21765_v38, %v5989_v29  ;;  %v5995_v1 = vsel %vm3046_vm2, %v21766_v26, %v5994_v27  ;;  %v5999_v24 = vsel %vm3040_vm4, %v21768_v50, %v21767_v18  ;;  %v5924_v37 = vrot.slane %v17234_v40, %v21722_v21  ;;  %v21778_v44 = vld [vmem:[#allocation281_spill] sm:$0xff]  ;;  %v21779_v17 = vld [vmem:[#allocation232_spill] sm:$0xff]  ;;  %v21782_v0 = vld [vmem:[#allocation282_spill] sm:$0xff] }
 0x36b   :  { %v5991_v8 = vsel %vm3052_vm3, %v5912_v5, %v5990_v49  ;;  %v5996_v22 = vsel %vm3048_vm13, %v21770_v61, %v5995_v1  ;;  %v6000_v54 = vsel %vm3042_vm8, %v21771_v36, %v5999_v24  ;;  %v6006_v5 = vsel %vm3040_vm4, %v21776_v48, %v21775_v34  ;;  %v21780_v6 = vld [vmem:[#allocation233_spill] sm:$0xff]  ;;  %v21781_v51 = vld [vmem:[#allocation280_spill] sm:$0xff]  ;;  %v21785_v19 = vld [vmem:[#allocation278_spill] sm:$0xff] }
 0x36c   :  { %11465 = vmatmul.mubr.msk.f32.gmra.mrb[10].mxu1 %vm21769_vm5, %v5984_v31  ;;  %v5997_v32 = vsel %vm3050_vm15, %v21773_v39, %v5996_v22  ;;  %v6001_v53 = vsel %vm3044_vm9, %v21774_v63, %v6000_v54  ;;  %v5928_v15 = vrot.slane %v17265_v47, %v21722_v21  ;;  %v6007_v30 = vsel %vm3042_vm8, %v21778_v44, %v6006_v5  ;;  %v21783_v57 = vld [vmem:[#allocation288_spill] sm:$0xff]  ;;  %v21786_v12 = vld [vmem:[#allocation283_spill] sm:$0xff]  ;;  %v21787_v13 = vld [vmem:[#allocation65_spill] sm:$0xff] }
 0x36d   :  { %11467 = vmatprep.mubr.msk.f32.mxu1 %vm21772_vm1, %v5991_v8  ;;  %v5998_v9 = vsel %vm3052_vm3, %v5916_v28, %v5997_v32  ;;  %v6002_v40 = vsel %vm3046_vm2, %v21777_v2, %v6001_v53  ;;  %v6013_v10 = vsel %vm3040_vm4, %v21780_v6, %v21779_v17  ;;  %v6008_v62 = vsel %vm3044_vm9, %v21782_v0, %v6007_v30  ;;  %v21788_v7 = vld [vmem:[#allocation234_spill] sm:$0xff]  ;;  %v21789_v20 = vld [vmem:[#allocation235_spill] sm:$0xff]  ;;  %v21790_v59 = vld [vmem:[#allocation284_spill] sm:$0xff]  ;;  %v17697_v2 = vpop.f32.mrb[66].mxu0 }
 0x36e   :  { %v6003_v56 = vsel %vm3048_vm13, %v21781_v51, %v6002_v40  ;;  %v6014_v47 = vsel %vm3042_vm8, %v21783_v57, %v6013_v10  ;;  %v5932_v28 = vrot.slane %v17294_v4, %v21722_v21  ;;  %v6009_v14 = vsel %vm3046_vm2, %v21786_v12, %v6008_v62  ;;  %v21791_v27 = vld [vmem:[#allocation289_spill] sm:$0xff]  ;;  %v21792_v38 = vld [vmem:[#allocation292_spill] sm:$0xff]  ;;  %v21795_v18 = vld [vmem:[#allocation290_spill] sm:$0xff] }
 0x36f   :  { %v6004_v3 = vsel %vm3050_vm15, %v21785_v19, %v6003_v56  ;;  %v6015_v16 = vsel %vm3044_vm9, %v21787_v13, %v6014_v47  ;;  %v6020_v23 = vsel %vm3040_vm4, %v21789_v20, %v21788_v7  ;;  %v6010_v4 = vsel %vm3048_vm13, %v21790_v59, %v6009_v14  ;;  %v21794_v26 = vld [vmem:[#allocation285_spill] sm:$0xff]  ;;  %v21796_v24 = vld [vmem:[#allocation294_spill] sm:$0xff]  ;;  %v21798_v54 = vld [vmem:[#allocation295_spill] sm:$0xff]  ;;  %v17709_v56 = vpop.f32.mrb[67].mxu0 }
 0x370   :  { %11468 = vmatmul.mubr.msk.f32.gmra.mrb[12].mxu1 %vm21784_vm14, %v5998_v9  ;;  %v6005_v29 = vsel %vm3052_vm3, %v5920_v45, %v6004_v3  ;;  %v6016_v31 = vsel %vm3046_vm2, %v21791_v27, %v6015_v16  ;;  %v6021_v49 = vsel %vm3042_vm8, %v21792_v38, %v6020_v23  ;;  %v6011_v1 = vsel %vm3050_vm15, %v21794_v26, %v6010_v4  ;;  %v21797_v22 = vld [vmem:[#allocation293_spill] sm:$0xff]  ;;  %v21799_v32 = vld [vmem:[#allocation236_spill] sm:$0xff]  ;;  %vm21801_vm10 = vmmov %vm21548_vm0 }
 0x371   :  { %11470 = vmatprep.mubr.msk.f32.mxu1 %vm21793_vm6, %v6005_v29  ;;  %v6017_v50 = vsel %vm3048_vm13, %v21795_v18, %v6016_v31  ;;  %v6022_v45 = vsel %vm3044_vm9, %v21796_v24, %v6021_v49  ;;  %v5936_v8 = vrot.slane %v17325_v55, %v21722_v21  ;;  %v6012_v61 = vsel %vm3052_vm3, %v5924_v37, %v6011_v1  ;;  %v21800_v63 = vld [vmem:[#allocation237_spill] sm:$0xff]  ;;  %v21802_v48 = vld [vmem:[#allocation296_spill] sm:$0xff]  ;;  %v21803_v55 = vld [vmem:[#allocation299_spill] sm:$0xff] }
 0x372   :  { %v6018_v36 = vsel %vm3050_vm15, %v21797_v22, %v6017_v50  ;;  %v6023_v39 = vsel %vm3046_vm2, %v21798_v54, %v6022_v45  ;;  %v6027_v53 = vsel %vm3040_vm4, %v21800_v63, %v21799_v32  ;;  %v5940_v9 = vrot.slane %v17354_v11, %v21722_v21  ;;  %vm21804_vm7 = vmmov %vm21548_vm0  ;;  %v21805_v40 = vld [vmem:[#allocation298_spill] sm:$0xff]  ;;  %v21806_v30 = vld [vmem:[#allocation300_spill] sm:$0xff] }
 0x373   :  { %v6019_v34 = vsel %vm3052_vm3, %v5928_v15, %v6018_v36  ;;  %v6024_v5 = vsel %vm3048_vm13, %v21802_v48, %v6023_v39  ;;  %v6028_v37 = vsel %vm3042_vm8, %v21803_v55, %v6027_v53  ;;  %v21807_v15 = vld [vmem:[#allocation238_spill] sm:$0xff]  ;;  %v21808_v6 = vld [vmem:[#allocation239_spill] sm:$0xff]  ;;  %v5944_v51 = vrot.slane %v17385_v60, %v21722_v21  ;;  %v21809_v0 = vld [vmem:[#allocation301_spill] sm:$0xff] }
 0x374   :  { %11471 = vmatmul.mubr.msk.f32.gmra.mrb[14].mxu1 %vm21801_vm10, %v6012_v61  ;;  %v6025_v44 = vsel %vm3050_vm15, %v21805_v40, %v6024_v5  ;;  %v6029_v17 = vsel %vm3044_vm9, %v21806_v30, %v6028_v37  ;;  %v6034_v10 = vsel %vm3040_vm4, %v21808_v6, %v21807_v15  ;;  %v21810_v57 = vld [vmem:[#allocation306_spill] sm:$0xff]  ;;  %v21811_v19 = vld [vmem:[#allocation240_spill] sm:$0xff]  ;;  %v21812_v3 = vld [vmem:[#allocation241_spill] sm:$0xff]  ;;  %v5952_v63 = vrot.slane %v17445_v25, %v21722_v21 }
 0x375   :  { %11473 = vmatprep.mubr.msk.f32.mxu1 %vm21804_vm7, %v6019_v34  ;;  %v6026_v11 = vsel %vm3052_vm3, %v5932_v28, %v6025_v44  ;;  %v6030_v62 = vsel %vm3046_vm2, %v21809_v0, %v6029_v17  ;;  %v6035_v47 = vsel %vm3042_vm8, %v21810_v57, %v6034_v10  ;;  %v6041_v12 = vsel %vm3040_vm4, %v21812_v3, %v21811_v19  ;;  %v21813_v14 = vld [vmem:[#allocation305_spill] sm:$0xff]  ;;  %v21814_v16 = vld [vmem:[#allocation307_spill] sm:$0xff]  ;;  %v21815_v7 = vld [vmem:[#allocation312_spill] sm:$0xff] }
 0x376   :  { %v6031_v13 = vsel %vm3048_vm13, %v21813_v14, %v6030_v62  ;;  %v6036_v60 = vsel %vm3044_vm9, %v21814_v16, %v6035_v47  ;;  %v6042_v20 = vsel %vm3042_vm8, %v21815_v7, %v6041_v12  ;;  %v5948_v28 = vrot.slane %v17414_v43, %v21722_v21  ;;  %vm21816_vm12 = vmmov %vm21548_vm0  ;;  %v21817_v23 = vld [vmem:[#allocation302_spill] sm:$0xff]  ;;  %v21818_v59 = vld [vmem:[#allocation308_spill] sm:$0xff] }
 0x377   :  { %v6032_v29 = vsel %vm3050_vm15, %v21817_v23, %v6031_v13  ;;  %v6037_v4 = vsel %vm3046_vm2, %v21818_v59, %v6036_v60  ;;  %v21819_v27 = vld [vmem:[#allocation313_spill] sm:$0xff]  ;;  %v21820_v38 = vld [vmem:[#allocation242_spill] sm:$0xff]  ;;  %v21821_v49 = vld [vmem:[#allocation243_spill] sm:$0xff]  ;;  %v5956_v6 = vrot.slane %v17474_v42, %v21722_v21  ;;  %vm21862_vm6 = vcmask 1040384  }
 0x378   :  { %11474 = vmatmul.mubr.msk.f32.gmra.mrb[0].mxu1 %vm21816_vm12, %v6026_v11  ;;  %v6043_v31 = vsel %vm3044_vm9, %v21819_v27, %v6042_v20  ;;  %v6048_v26 = vsel %vm3040_vm4, %v21821_v49, %v21820_v38  ;;  %v6033_v1 = vsel %vm3052_vm3, %v5936_v8, %v6032_v29  ;;  %v21822_v18 = vld [vmem:[#allocation309_spill] sm:$0xff]  ;;  %v21823_v50 = vld [vmem:[#allocation314_spill] sm:$0xff]  ;;  %vm21825_vm11 = vmmov %vm21548_vm0 }
 0x379   :  { %v6038_v43 = vsel %vm3048_vm13, %v21822_v18, %v6037_v4  ;;  %v6044_v24 = vsel %vm3046_vm2, %v21823_v50, %v6043_v31  ;;  %v21824_v45 = vld [vmem:[#allocation318_spill] sm:$0xff]  ;;  %11476 = vmatprep.mubr.msk.f32.mxu1 %vm21825_vm11, %v6033_v1  ;;  %v21827_v54 = vld [vmem:[#allocation315_spill] sm:$0xff]  ;;  %v21829_v34 = vld [vmem:[#allocation316_spill] sm:$0xff] }
 0x37a   :  { %v6049_v61 = vsel %vm3042_vm8, %v21824_v45, %v6048_v26  ;;  %v21826_v22 = vld [vmem:[#allocation310_spill] sm:$0xff]  ;;  %v6045_v39 = vsel %vm3048_vm13, %v21827_v54, %v6044_v24  ;;  %v21828_v32 = vld [vmem:[#allocation319_spill] sm:$0xff]  ;;  %v21830_v5 = vld [vmem:[#allocation320_spill] sm:$0xff] }
 0x37b   :  { %v6039_v36 = vsel %vm3050_vm15, %v21826_v22, %v6038_v43  ;;  %v6050_v8 = vsel %vm3044_vm9, %v21828_v32, %v6049_v61  ;;  %v6046_v48 = vsel %vm3050_vm15, %v21829_v34, %v6045_v39  ;;  %v21831_v37 = vld [vmem:[#allocation244_spill] sm:$0xff]  ;;  %v21832_v40 = vld [vmem:[#allocation245_spill] sm:$0xff]  ;;  %v21834_v25 = vld [vmem:[#allocation323_spill] sm:$0xff] }
 0x37c   :  { %v6040_v53 = vsel %vm3052_vm3, %v5940_v9, %v6039_v36  ;;  %v6051_v55 = vsel %vm3046_vm2, %v21830_v5, %v6050_v8  ;;  %v6055_v44 = vsel %vm3040_vm4, %v21832_v40, %v21831_v37  ;;  %v6047_v30 = vsel %vm3052_vm3, %v5944_v51, %v6046_v48  ;;  %v21833_v17 = vld [vmem:[#allocation321_spill] sm:$0xff]  ;;  %vm21835_vm5 = vmmov %vm21548_vm0  ;;  %v21836_v10 = vld [vmem:[#allocation322_spill] sm:$0xff] }
 0x37d   :  { %11477 = vmatmul.mubr.msk.f32.gmra.mrb[2].mxu1 %vm21548_vm0, %v6040_v53  ;;  %v6052_v15 = vsel %vm3048_vm13, %v21833_v17, %v6051_v55  ;;  %v6056_v9 = vsel %vm3042_vm8, %v21834_v25, %v6055_v44  ;;  %v21837_v0 = vld [vmem:[#allocation324_spill] sm:$0xff]  ;;  %v21838_v57 = vld [vmem:[#allocation246_spill] sm:$0xff]  ;;  %v21839_v47 = vld [vmem:[#allocation247_spill] sm:$0xff] }
 0x37e   :  { %11479 = vmatprep.mubr.msk.f32.mxu1 %vm21835_vm5, %v6047_v30  ;;  %v6053_v11 = vsel %vm3050_vm15, %v21836_v10, %v6052_v15  ;;  %v6057_v62 = vsel %vm3044_vm9, %v21837_v0, %v6056_v9  ;;  %v6062_v51 = vsel %vm3040_vm4, %v21839_v47, %v21838_v57  ;;  %v21840_v19 = vld [vmem:[#allocation161_spill] sm:$0xff]  ;;  %v21841_v3 = vld [vmem:[#allocation162_spill] sm:$0xff]  ;;  %v21843_v16 = vld [vmem:[#allocation59_spill] sm:$0xff] }
 0x37f   :  { %v6318_v12 = vsel %vm3042_vm8, %v21841_v3, %v21840_v19  ;;  %v6054_v14 = vsel %vm3052_vm3, %v5948_v28, %v6053_v11  ;;  %v21842_v13 = vld [vmem:[#allocation325_spill] sm:$0xff]  ;;  %v6063_v60 = vsel %vm3042_vm8, %v21843_v16, %v6062_v51  ;;  %v21844_v7 = vld [vmem:[#allocation163_spill] sm:$0xff]  ;;  %v21845_v23 = vld [vmem:[#allocation326_spill] sm:$0xff] }
 0x380   :  { %v6058_v42 = vsel %vm3046_vm2, %v21842_v13, %v6057_v62  ;;  %v6319_v20 = vsel %vm3044_vm9, %v21844_v7, %v6318_v12  ;;  %v6064_v59 = vsel %vm3044_vm9, %v16980_v33, %v6063_v60  ;;  %v21846_v4 = vld [vmem:[#allocation164_spill] sm:$0xff]  ;;  %v21847_v31 = vld [vmem:[#allocation25_spill] sm:$0xff]  ;;  %v21848_v28 = vld [vmem:[#allocation42_spill] sm:$0xff] }
 0x381   :  { %v6059_v29 = vsel %vm3048_vm13, %v21845_v23, %v6058_v42  ;;  %v6320_v27 = vsel %vm3046_vm2, %v21846_v4, %v6319_v20  ;;  %v6324_v38 = vsel %vm3042_vm8, %v21848_v28, %v21847_v31  ;;  %vm21849_vm1 = vmmov %vm21548_vm0  ;;  %v21850_v49 = vld [vmem:[#allocation327_spill] sm:$0xff]  ;;  %v21851_v1 = vld [vmem:[#allocation157_spill] sm:$0xff] }
 0x382   :  { %11480 = vmatmul.mubr.msk.f32.gmra.mrb[4].mxu1 %vm21849_vm1, %v6054_v14  ;;  %v6060_v26 = vsel %vm3050_vm15, %v21850_v49, %v6059_v29  ;;  %v6065_v18 = vsel %vm3046_vm2, %v21851_v1, %v6064_v59  ;;  %v21852_v43 = vld [vmem:[#allocation20_spill] sm:$0xff]  ;;  %v21853_v24 = vld [vmem:[#allocation14_spill] sm:$0xff]  ;;  %v21854_v22 = vld [vmem:[#allocation165_spill] sm:$0xff] }
 0x383   :  { %v6321_v50 = vsel %vm3048_vm13, %v21852_v43, %v6320_v27  ;;  %v6325_v33 = vsel %vm3044_vm9, %v21853_v24, %v6324_v38  ;;  %v6061_v45 = vsel %vm3052_vm3, %v5952_v63, %v6060_v26  ;;  %v6066_v61 = vsel %vm3048_vm13, %v16996_v46, %v6065_v18  ;;  %v21855_v54 = vld [vmem:[#allocation43_spill] sm:$0xff]  ;;  %vm21856_vm14 = vmmov %vm21548_vm0  ;;  %v21857_v32 = vld [vmem:[#allocation328_spill] sm:$0xff] }
 0x384   :  { %v6322_v36 = vsel %vm3050_vm15, %v21854_v22, %v6321_v50  ;;  %v6326_v39 = vsel %vm3046_vm2, %v21855_v54, %v6325_v33  ;;  %11482 = vmatprep.mubr.msk.f32.mxu1 %vm21856_vm14, %v6061_v45  ;;  %v6067_v8 = vsel %vm3050_vm15, %v21857_v32, %v6066_v61  ;;  %v21858_v53 = vld [vmem:[#allocation141_spill] sm:$0xff]  ;;  %v21859_v48 = vld [vmem:[#allocation166_spill] sm:$0xff]  ;;  %v21860_v5 = vld [vmem:[#allocation167_spill] sm:$0xff]  ;;  %v17877_v32 = vpop.f32.mrb[68].mxu0 }
 0x385   :  { %v6323_v34 = vsel %vm3052_vm3, %v21858_v53, %v6322_v36  ;;  %v6327_v63 = vsel %vm3048_vm13, %v21859_v48, %v6326_v39  ;;  %v21861_v55 = vld [vmem:[#allocation70_spill] sm:$0xff]  ;;  %v6068_v37 = vsel %vm3052_vm3, %v5956_v6, %v6067_v8  ;;  %v21863_v44 = vld [vmem:[#allocation45_spill] sm:$0xff]  ;;  %vm21865_vm10 = vmmov %vm21548_vm0 }
 0x386   :  { %v6330_v46 = vsel %vm3042_vm8, %v21861_v55, %v21860_v5  ;;  %v6430_v40 = vsel %vm21862_vm6, 0.0, %v6323_v34  ;;  %v6328_v30 = vsel %vm3050_vm15, %v21863_v44, %v6327_v63  ;;  %v21864_v17 = vld [vmem:[#allocation61_spill] sm:$0xff]  ;;  %11483 = vmatmul.mubr.msk.f32.gmra.mrb[6].mxu1 %vm21865_vm10, %v6068_v37  ;;  %v21866_v25 = vld [vmem:[#allocation147_spill] sm:$0xff]  ;;  %v21869_v62 = vld [vmem:[#allocation170_spill] sm:$0xff]  ;;  %v17887_v55 = vpop.f32.mrb[69].mxu0 }
 0x387   :  { %v6331_v15 = vsel %vm3044_vm9, %v21864_v17, %v6330_v46  ;;  %v6329_v9 = vsel %vm3052_vm3, %v21866_v25, %v6328_v30  ;;  %v21867_v10 = vld [vmem:[#allocation51_spill] sm:$0xff]  ;;  %v21868_v0 = vld [vmem:[#allocation169_spill] sm:$0xff]  ;;  %v21871_v47 = vld [vmem:[#allocation174_spill] sm:$0xff] }
 0x388   :  { %v6332_v11 = vsel %vm3046_vm2, %v21867_v10, %v6331_v15  ;;  %v6336_v6 = vsel %vm3042_vm8, %v21869_v62, %v21868_v0  ;;  %v21870_v57 = vld [vmem:[#allocation173_spill] sm:$0xff]  ;;  %vm21872_vm7 = vmmov %vm21548_vm0  ;;  %v21874_v3 = vld [vmem:[#allocation168_spill] sm:$0xff] }
 0x389   :  { %v6342_v51 = vsel %vm3042_vm8, %v21871_v47, %v21870_v57  ;;  %11487 = vmatprep.mubr.msk.f32.mxu1 %vm21872_vm7, %v6430_v40  ;;  %vm21873_vm12 = vmmov %vm21862_vm6  ;;  %v6333_v12 = vsel %vm3048_vm13, %v21874_v3, %v6332_v11  ;;  %v21875_v14 = vld [vmem:[#allocation171_spill] sm:$0xff]  ;;  %v21877_v60 = vld [vmem:[#allocation69_spill] sm:$0xff] }
 0x38a   :  { %v6431_v19 = vsel %vm21873_vm12, 0.0, %v6329_v9  ;;  %v6337_v13 = vsel %vm3044_vm9, %v21875_v14, %v6336_v6  ;;  %v21876_v42 = vld [vmem:[#allocation175_spill] sm:$0xff]  ;;  %v6334_v7 = vsel %vm3050_vm15, %v21877_v60, %v6333_v12  ;;  %v21880_v4 = vld [vmem:[#allocation177_spill] sm:$0xff]  ;;  %v21881_v27 = vld [vmem:[#allocation178_spill] sm:$0xff] }
 0x38b   :  { %v6343_v16 = vsel %vm3044_vm9, %v21876_v42, %v6342_v51  ;;  %v21878_v20 = vld [vmem:[#allocation123_spill] sm:$0xff]  ;;  %v6348_v31 = vsel %vm3042_vm8, %v21881_v27, %v21880_v4  ;;  %v21882_v28 = vld [vmem:[#allocation17_spill] sm:$0xff]  ;;  %v21883_v49 = vld [vmem:[#allocation172_spill] sm:$0xff] }
 0x38c   :  { %v6338_v23 = vsel %vm3046_vm2, %v21878_v20, %v6337_v13  ;;  %v21879_v29 = vld [vmem:[#allocation19_spill] sm:$0xff]  ;;  %v6335_v38 = vsel %vm3052_vm3, %v21882_v28, %v6334_v7  ;;  %v21884_v1 = vld [vmem:[#allocation176_spill] sm:$0xff]  ;;  %vm21886_vm11 = vmmov %vm21548_vm0 }
 0x38d   :  { %v6344_v59 = vsel %vm3046_vm2, %v21879_v29, %v6343_v16  ;;  %v6339_v26 = vsel %vm3048_vm13, %v21883_v49, %v6338_v23  ;;  %v21885_v43 = vld [vmem:[#allocation179_spill] sm:$0xff]  ;;  %11488 = vmatmul.mubr.msk.f32.vlgmr.msra.gmra.mrb[8].mxu1 %vm21886_vm11, %v6431_v19  ;;  %vm21887_vm0 = vmmov %vm21862_vm6  ;;  %v21889_v22 = vld [vmem:[#allocation132_spill] sm:$0xff] }
 0x38e   :  { %v6345_v18 = vsel %vm3048_vm13, %v21884_v1, %v6344_v59  ;;  %v6349_v50 = vsel %vm3044_vm9, %v21885_v43, %v6348_v31  ;;  %v17867_v24 = vld [vmem:[%s19777_s1 + $0xd0] sm:$0xff]  ;;  %v6432_v33 = vsel %vm21887_vm0, 0.0, %v6335_v38  ;;  %11512 = vmatpush3.msra.mxu1 %v17585_v58  ;;  %vm21891_vm5 = vmmov %vm21849_vm1  ;;  %v21892_v8 = vld [vmem:[#allocation100_spill] sm:$0xff] }
 0x38f   :  { %v21888_v45 = vld [vmem:[#allocation75_spill] sm:$0xff]  ;;  %v6346_v36 = vsel %vm3050_vm15, %v21889_v22, %v6345_v18  ;;  %v21890_v54 = vld [vmem:[#allocation78_spill] sm:$0xff]  ;;  %11490 = vmatprep.mubr.msk.f32.mxu1 %vm21891_vm5, %v6432_v33  ;;  %v21893_v34 = vld [vmem:[#allocation9_spill] sm:$0xff]  ;;  %11537 = vmatprep.subr.mxu1 %v17867_v24 }
 0x390   :  { %v6340_v61 = vsel %vm3050_vm15, %v21888_v45, %v6339_v26  ;;  %v6350_v39 = vsel %vm3046_vm2, %v21890_v54, %v6349_v50  ;;  %v6347_v48 = vsel %vm3052_vm3, %v21893_v34, %v6346_v36  ;;  %v21894_v63 = vld [vmem:[#allocation180_spill] sm:$0xff]  ;;  %vm21895_vm1 = vmmov %vm21887_vm0  ;;  %v21898_v44 = vld [vmem:[#allocation181_spill] sm:$0xff] }
 0x391   :  { %v6341_v53 = vsel %vm3052_vm3, %v21892_v8, %v6340_v61  ;;  %v6351_v5 = vsel %vm3048_vm13, %v21894_v63, %v6350_v39  ;;  %vm21896_vm14 = vmmov %vm21887_vm0  ;;  %v21897_v40 = vld [vmem:[#allocation84_spill] sm:$0xff]  ;;  %v21899_v30 = vld [vmem:[#allocation182_spill] sm:$0xff] }
 0x392   :  { %v6433_v46 = vsel %vm21895_vm1, 0.0, %v6341_v53  ;;  %v6434_v37 = vsel %vm21896_vm14, 0.0, %v6347_v48  ;;  %v6352_v58 = vsel %vm3050_vm15, %v21897_v40, %v6351_v5  ;;  %v6354_v17 = vsel %vm3042_vm8, %v21899_v30, %v21898_v44  ;;  %v21900_v15 = vld [vmem:[#allocation155_spill] sm:$0xff]  ;;  %v21903_v62 = vld [vmem:[#allocation16_spill] sm:$0xff]  ;;  %vm21906_vm6 = vmmov %vm21891_vm5 }
 0x393   :  { %v6353_v25 = vsel %vm3052_vm3, %v21900_v15, %v6352_v58  ;;  %v21901_v9 = vld [vmem:[#allocation183_spill] sm:$0xff]  ;;  %v21904_v6 = vld [vmem:[#allocation44_spill] sm:$0xff]  ;;  %11491 = vmatmul.mubr.msk.f32.gmra.mrb[10].mxu1 %vm21906_vm6, %v6433_v46  ;;  %vm21907_vm10 = vmmov %vm21887_vm0 }
 0x394   :  { %v6355_v10 = vsel %vm3044_vm9, %v21901_v9, %v6354_v17  ;;  %v21902_v11 = vld [vmem:[#allocation107_spill] sm:$0xff]  ;;  %v21905_v57 = vcombine.high %v21904_v6, %v21904_v6  ;;  %v6435_v51 = vsel %vm21907_vm10, 0.0, %v6353_v25  ;;  %v21909_v12 = vld [vmem:[#allocation109_spill] sm:$0xff]  ;;  %vm21910_vm7 = vmmov %vm21891_vm5 }
 0x395   :  { %v17903_v0 = vcombine.high %v21902_v11, %v21902_v11  ;;  %v21908_v19 = vld [vmem:[#allocation35_spill] sm:$0xff]  ;;  %v17917_v14 = vcombine.high %v21909_v12, %v21909_v12  ;;  %v17921_v13 = vrot.slane %v21902_v11, %v21722_v21  ;;  %11493 = vmatprep.mubr.msk.f32.mxu1 %vm21910_vm7, %v6434_v37  ;;  %v21911_v42 = vld [vmem:[#allocation184_spill] sm:$0xff]  ;;  %v17932_v7 = vrot.slane %v21909_v12, %v21722_v21  ;;  %v21912_v23 = vld [vmem:[#allocation93_spill] sm:$0xff] }
 0x396   :  { %v17909_v47 = vrot.slane %v21905_v57, %v21903_v62  ;;  %v6356_v3 = vsel %vm3046_vm2, %v21908_v19, %v6355_v10  ;;  %v21913_v4 = vld [vmem:[#allocation8_spill] sm:$0xff]  ;;  %v21915_v28 = vld [vmem:[#allocation185_spill] sm:$0xff]  ;;  %v21916_v38 = vld [vmem:[#allocation186_spill] sm:$0xff] }
 0x397   :  { %v6357_v16 = vsel %vm3048_vm13, %v21911_v42, %v6356_v3  ;;  %v17928_v60 = vrot.slane %v17903_v0, %v21722_v21  ;;  %v17942_v59 = vrot.slane %v17917_v14, %v21722_v21  ;;  %v21914_v27 = vld [vmem:[#allocation28_spill] sm:$0xff]  ;;  %v6366_v49 = vsel %vm3042_vm8, %v21916_v38, %v21915_v28  ;;  %v21917_v26 = vld [vmem:[#allocation213_spill] sm:$0xff]  ;;  %v21918_v43 = vld [vmem:[#allocation187_spill] sm:$0xff] }
 0x398   :  { %v17936_v20 = vrot.slane %v17909_v47, %v21722_v21  ;;  %v6358_v29 = vsel %vm3050_vm15, %v21912_v23, %v6357_v16  ;;  %v6360_v31 = vsel %vm3042_vm8, %v21914_v27, %v21913_v4  ;;  %v6367_v50 = vsel %vm3044_vm9, %v21918_v43, %v6366_v49  ;;  %v21919_v33 = vld [vmem:[#allocation189_spill] sm:$0xff]  ;;  %v21920_v45 = vld [vmem:[#allocation190_spill] sm:$0xff]  ;;  %vm21921_vm12 = vmmov %vm21891_vm5 }
 0x399   :  { %v6359_v1 = vsel %vm3052_vm3, %v21917_v26, %v6358_v29  ;;  %v6361_v18 = vsel %vm3044_vm9, %v17921_v13, %v6360_v31  ;;  %v6372_v61 = vsel %vm3042_vm8, %v21920_v45, %v21919_v33  ;;  %11494 = vmatmul.mubr.msk.f32.gmra.mrb[12].mxu1 %vm21921_vm12, %v6435_v51  ;;  %vm21922_vm11 = vmmov %vm21887_vm0  ;;  %v21923_v54 = vld [vmem:[#allocation27_spill] sm:$0xff]  ;;  %v21926_v48 = vld [vmem:[#allocation188_spill] sm:$0xff] }
 0x39a   :  { %v6436_v22 = vsel %vm21922_vm11, 0.0, %v6359_v1  ;;  %v6362_v36 = vsel %vm3046_vm2, %v17928_v60, %v6361_v18  ;;  %v6368_v39 = vsel %vm3046_vm2, %v21923_v54, %v6367_v50  ;;  %v21924_v8 = vld [vmem:[#allocation191_spill] sm:$0xff]  ;;  %vm21925_vm0 = vmmov %vm21891_vm5  ;;  %v21927_v5 = vld [vmem:[#allocation66_spill] sm:$0xff] }
 0x39b   :  { %v6373_v53 = vsel %vm3044_vm9, %v21924_v8, %v6372_v61  ;;  %11496 = vmatprep.mubr.msk.f32.mxu1 %vm21925_vm0, %v6436_v22  ;;  %v6363_v34 = vsel %vm3048_vm13, %v17932_v7, %v6362_v36  ;;  %v6369_v63 = vsel %vm3048_vm13, %v21926_v48, %v6368_v39  ;;  %v21928_v37 = vld [vmem:[#allocation193_spill] sm:$0xff]  ;;  %v21929_v40 = vld [vmem:[#allocation194_spill] sm:$0xff]  ;;  %v21931_v15 = vld [vmem:[#allocation192_spill] sm:$0xff] }
 0x39c   :  { %v6374_v46 = vsel %vm3046_vm2, %v21927_v5, %v6373_v53  ;;  %v6378_v58 = vsel %vm3042_vm8, %v21929_v40, %v21928_v37  ;;  %v6364_v44 = vsel %vm3050_vm15, %v17942_v59, %v6363_v34  ;;  %v21930_v30 = vld [vmem:[#allocation30_spill] sm:$0xff]  ;;  %v21932_v9 = vld [vmem:[#allocation195_spill] sm:$0xff]  ;;  %v21933_v57 = vld [vmem:[#allocation252_spill] sm:$0xff] }
 0x39d   :  { %v6370_v17 = vsel %vm3050_vm15, %v21930_v30, %v6369_v63  ;;  %v6375_v25 = vsel %vm3048_vm13, %v21931_v15, %v6374_v46  ;;  %v6379_v10 = vsel %vm3044_vm9, %v21932_v9, %v6378_v58  ;;  %v6365_v6 = vsel %vm3052_vm3, %v17936_v20, %v6364_v44  ;;  %v21934_v19 = vld [vmem:[#allocation249_spill] sm:$0xff]  ;;  %v21935_v42 = vld [vmem:[#allocation52_spill] sm:$0xff]  ;;  %vm21936_vm5 = vmmov %vm21895_vm1 }
 0x39e   :  { %v6371_v51 = vsel %vm3052_vm3, %v21933_v57, %v6370_v17  ;;  %v6376_v3 = vsel %vm3050_vm15, %v21934_v19, %v6375_v25  ;;  %v6380_v16 = vsel %vm3046_vm2, %v21935_v42, %v6379_v10  ;;  %v6437_v23 = vsel %vm21936_vm5, 0.0, %v6365_v6  ;;  %v21937_v31 = vld [vmem:[#allocation255_spill] sm:$0xff]  ;;  %v21938_v38 = vld [vmem:[#allocation196_spill] sm:$0xff]  ;;  %vm21939_vm14 = vmmov %vm21925_vm0 }
 0x39f   :  { %v6438_v29 = vsel %vm21895_vm1, 0.0, %v6371_v51  ;;  %v6377_v28 = vsel %vm3052_vm3, %v21937_v31, %v6376_v3  ;;  %v6381_v49 = vsel %vm3048_vm13, %v21938_v38, %v6380_v16  ;;  %11497 = vmatmul.mubr.msk.f32.gmra.mrb[14].mxu1 %vm21939_vm14, %v6437_v23  ;;  %vm21940_vm6 = vmmov %vm21895_vm1  ;;  %v21941_v1 = vld [vmem:[#allocation124_spill] sm:$0xff]  ;;  %v21942_v43 = vld [vmem:[#allocation197_spill] sm:$0xff] }
 0x3a0   :  { %v6439_v26 = vsel %vm21940_vm6, 0.0, %v6377_v28  ;;  %v6382_v18 = vsel %vm3050_vm15, %v21941_v1, %v6381_v49  ;;  %v21943_v50 = vld [vmem:[#allocation198_spill] sm:$0xff]  ;;  %v21944_v45 = vld [vmem:[#allocation201_spill] sm:$0xff]  ;;  %vm21946_vm10 = vmmov %vm21925_vm0 }
 0x3a1   :  { %v6384_v33 = vsel %vm3042_vm8, %v21943_v50, %v21942_v43  ;;  %v21945_v61 = vld [vmem:[#allocation202_spill] sm:$0xff]  ;;  %11499 = vmatprep.mubr.msk.f32.mxu1 %vm21946_vm10, %v6438_v29  ;;  %v21947_v36 = vld [vmem:[#allocation256_spill] sm:$0xff]  ;;  %v21948_v39 = vld [vmem:[#allocation199_spill] sm:$0xff] }
 0x3a2   :  { %v6390_v22 = vsel %vm3042_vm8, %v21945_v61, %v21944_v45  ;;  %v6383_v54 = vsel %vm3052_vm3, %v21947_v36, %v6382_v18  ;;  %v6385_v8 = vsel %vm3044_vm9, %v21948_v39, %v6384_v33  ;;  %v21949_v53 = vld [vmem:[#allocation203_spill] sm:$0xff]  ;;  %v21950_v48 = vld [vmem:[#allocation205_spill] sm:$0xff]  ;;  %v21951_v63 = vld [vmem:[#allocation206_spill] sm:$0xff] }
 0x3a3   :  { %v6391_v34 = vsel %vm3044_vm9, %v21949_v53, %v6390_v22  ;;  %v6396_v5 = vsel %vm3042_vm8, %v21951_v63, %v21950_v48  ;;  %vm21952_vm7 = vmmov %vm21895_vm1  ;;  %v21953_v37 = vld [vmem:[#allocation71_spill] sm:$0xff]  ;;  %v21956_v15 = vld [vmem:[#allocation200_spill] sm:$0xff] }
 0x3a4   :  { %v6440_v46 = vsel %vm21952_vm7, 0.0, %v6383_v54  ;;  %v6386_v40 = vsel %vm3046_vm2, %v21953_v37, %v6385_v8  ;;  %v21954_v58 = vld [vmem:[#allocation83_spill] sm:$0xff]  ;;  %v21957_v9 = vld [vmem:[#allocation204_spill] sm:$0xff]  ;;  %v21958_v6 = vld [vmem:[#allocation133_spill] sm:$0xff] }
 0x3a5   :  { %v6392_v44 = vsel %vm3046_vm2, %v21954_v58, %v6391_v34  ;;  %v21955_v30 = vld [vmem:[#allocation207_spill] sm:$0xff]  ;;  %v6387_v25 = vsel %vm3048_vm13, %v21956_v15, %v6386_v40  ;;  %v21959_v51 = vld [vmem:[#allocation209_spill] sm:$0xff]  ;;  %v21960_v19 = vld [vmem:[#allocation210_spill] sm:$0xff] }
 0x3a6   :  { %v6397_v17 = vsel %vm3044_vm9, %v21955_v30, %v6396_v5  ;;  %v6393_v10 = vsel %vm3048_vm13, %v21957_v9, %v6392_v44  ;;  %v6402_v3 = vsel %vm3042_vm8, %v21960_v19, %v21959_v51  ;;  %vm21961_vm12 = vmmov %vm21925_vm0  ;;  %v21962_v42 = vld [vmem:[#allocation76_spill] sm:$0xff]  ;;  %v21963_v23 = vld [vmem:[#allocation31_spill] sm:$0xff]  ;;  %v18067_v44 = vpop.f32.mrb[70].mxu0 }
 0x3a7   :  { %v6398_v57 = vsel %vm3046_vm2, %v21958_v6, %v6397_v17  ;;  %11500 = vmatmul.mubr.msk.f32.gmra.mrb[0].mxu1 %vm21961_vm12, %v6439_v26  ;;  %v6388_v16 = vsel %vm3050_vm15, %v21962_v42, %v6387_v25  ;;  %v6394_v29 = vsel %vm3050_vm15, %v21963_v23, %v6393_v10  ;;  %v21964_v31 = vld [vmem:[#allocation208_spill] sm:$0xff]  ;;  %v21965_v38 = vld [vmem:[#allocation211_spill] sm:$0xff]  ;;  %vm21966_vm11 = vmmov %vm21925_vm0  ;;  %v18080_v51 = vpop.f32.mrb[71].mxu0 }
 0x3a8   :  { %v6399_v28 = vsel %vm3048_vm13, %v21964_v31, %v6398_v57  ;;  %v6403_v49 = vsel %vm3044_vm9, %v21965_v38, %v6402_v3  ;;  %11502 = vmatprep.mubr.msk.f32.mxu1 %vm21966_vm11, %v6440_v46  ;;  %v21967_v1 = vld [vmem:[#allocation259_spill] sm:$0xff]  ;;  %v21968_v43 = vld [vmem:[#allocation260_spill] sm:$0xff]  ;;  %v21970_v45 = vld [vmem:[#allocation146_spill] sm:$0xff] }
 0x3a9   :  { %v6389_v18 = vsel %vm3052_vm3, %v21967_v1, %v6388_v16  ;;  %v6395_v26 = vsel %vm3052_vm3, %v21968_v43, %v6394_v29  ;;  %v21969_v50 = vld [vmem:[#allocation139_spill] sm:$0xff]  ;;  %v6404_v61 = vsel %vm3046_vm2, %v21970_v45, %v6403_v49  ;;  %v21971_v22 = vld [vmem:[#allocation36_spill] sm:$0xff]  ;;  %v21973_v8 = vld [vmem:[#allocation18_spill] sm:$0xff]  ;;  %v6666_v1 = vrot.slane %v21902_v11, %v21599_v35 }
 0x3aa   :  { %v6400_v33 = vsel %vm3050_vm15, %v21969_v50, %v6399_v28  ;;  %v6694_v36 = vrot.slane %v21971_v22, %v21599_v35  ;;  %v21972_v54 = vld [vmem:[#allocation108_spill] sm:$0xff]  ;;  %vm21975_vm0 = vmmov %vm21895_vm1  ;;  %v21977_v46 = vld [vmem:[#allocation6_spill] sm:$0xff]  ;;  %v6670_v50 = vrot.slane %v17903_v0, %v21599_v35 }
 0x3ab   :  { %v6662_v39 = vrot.slane %v21972_v54, %v21599_v35  ;;  %v6401_v53 = vsel %vm3052_vm3, %v21973_v8, %v6400_v33  ;;  %v21974_v34 = vld [vmem:[#allocation212_spill] sm:$0xff]  ;;  %v6441_v63 = vsel %vm21975_vm0, 0.0, %v6389_v18  ;;  %vm21976_vm5 = vmmov %vm21975_vm0  ;;  %v21978_v40 = vld [vmem:[#allocation37_spill] sm:$0xff]  ;;  %v6678_v54 = vrot.slane %v17917_v14, %v21599_v35 }
 0x3ac   :  { %v6405_v48 = vsel %vm3048_vm13, %v21974_v34, %v6404_v61  ;;  %v6442_v5 = vsel %vm21976_vm5, 0.0, %v6395_v26  ;;  %v2574_v58 = vcombine.high %v21978_v40, %v21978_v40  ;;  %vm21979_vm1 = vmmov %vm21946_vm10  ;;  %v21980_v30 = vld [vmem:[#allocation263_spill] sm:$0xff]  ;;  %v21981_v15 = vld [vmem:[#allocation60_spill] sm:$0xff]  ;;  %v6301_v57 = vrot.slane %v21978_v40, %v21722_v21 }
 0x3ad   :  { %v6406_v37 = vsel %vm3050_vm15, %v21977_v46, %v6405_v48  ;;  %11503 = vmatmul.mubr.msk.f32.gmra.mrb[2].mxu1 %vm21979_vm1, %v6441_v63  ;;  %v21982_v25 = vcombine.high %v21981_v15, %v21981_v15  ;;  %v21983_v10 = vld [vmem:[#allocation160_spill] sm:$0xff]  ;;  %v21984_v19 = vld [vmem:[#allocation102_spill] sm:$0xff]  ;;  %vm21985_vm14 = vmmov %vm21979_vm1  ;;  %v2047_v26 = vcombine.high %v17909_v47, %v17909_v47  ;;  %v6674_v61 = vrot.slane %v21909_v12, %v21599_v35 }
 0x3ae   :  { %v6407_v17 = vsel %vm3052_vm3, %v21980_v30, %v6406_v37  ;;  %v2590_v6 = vcombine.high %v21983_v10, %v21983_v10  ;;  %v6658_v3 = vrot.slane %v21984_v19, %v21599_v35  ;;  %11505 = vmatprep.mubr.msk.f32.mxu1 %vm21985_vm14, %v6442_v5  ;;  %vm21986_vm6 = vmmov %vm21975_vm0  ;;  %v6305_v16 = vrot.slane %v2574_v58, %v21722_v21  ;;  %v21987_v23 = vld [vmem:[#allocation38_spill] sm:$0xff]  ;;  %v21988_v29 = vld [vmem:[#allocation39_spill] sm:$0xff] }
 0x3af   :  { %v2589_v9 = vrot.slane %v21982_v25, %v21903_v62  ;;  %v6443_v42 = vsel %vm21986_vm6, 0.0, %v6401_v53  ;;  %v6408_v31 = vsel %vm3042_vm8, %v21988_v29, %v21987_v23  ;;  %vm21989_vm10 = vmmov %vm21975_vm0  ;;  %v6309_v38 = vrot.slane %v21983_v10, %v21722_v21 }
 0x3b0   :  { %v6444_v28 = vsel %vm21989_vm10, 0.0, %v6407_v17  ;;  %v6409_v49 = vsel %vm3044_vm9, %v6301_v57, %v6408_v31  ;;  %v6313_v18 = vrot.slane %v2590_v6, %v21722_v21  ;;  %vm21990_vm7 = vmmov %vm21979_vm1  ;;  %v6719_v11 = vsel %vm3040_vm4, %v6662_v39, %v6658_v3  ;;  %v21996_v17 = vld [vmem:[#allocation46_spill] sm:$0xff] }
 0x3b1   :  { %v6410_v43 = vsel %vm3046_vm2, %v6305_v16, %v6409_v49  ;;  %11506 = vmatmul.mubr.msk.f32.gmra.mrb[4].mxu1 %vm21990_vm7, %v6443_v42  ;;  %v6317_v33 = vrot.slane %v2589_v9, %v21722_v21  ;;  %vm21991_vm12 = vmmov %vm21979_vm1  ;;  %v6720_v0 = vsel %vm3042_vm8, %v6666_v1, %v6719_v11  ;;  %v6698_v8 = vrot.slane %v21978_v40, %v21599_v35  ;;  %v21994_v40 = vld [vmem:[#allocation32_spill] sm:$0xff]  ;;  %v22004_v11 = vld [vmem:[#allocation85_spill] sm:$0xff] }
 0x3b2   :  { %v6411_v45 = vsel %vm3048_vm13, %v6309_v38, %v6410_v43  ;;  %11508 = vmatprep.mubr.msk.f32.mxu1 %vm21991_vm12, %v6444_v28  ;;  %v6682_v34 = vrot.slane %v17909_v47, %v21599_v35  ;;  %v6721_v12 = vsel %vm3044_vm9, %v6670_v50, %v6720_v0  ;;  %v6702_v39 = vrot.slane %v2574_v58, %v21599_v35  ;;  %vm21992_vm11 = vmmov %vm21975_vm0  ;;  %v22018_v0 = vld [vmem:[#allocation138_spill] sm:$0xff] }
 0x3b3   :  { %v6412_v22 = vsel %vm3050_vm15, %v6313_v18, %v6411_v45  ;;  %v6686_v63 = vrot.slane %v2047_v26, %v21599_v35  ;;  %v6722_v14 = vsel %vm3046_vm2, %v6674_v61, %v6721_v12  ;;  %v2591_v5 = vcombine.high %v2589_v9, %v2589_v9  ;;  %vm21993_vm0 = vmmov %vm21979_vm1  ;;  %v22002_v61 = vld [vmem:[#allocation130_spill] sm:$0xff] }
 0x3b4   :  { %v6413_v53 = vsel %vm3052_vm3, %v6317_v33, %v6412_v22  ;;  %v6723_v46 = vsel %vm3048_vm13, %v6678_v54, %v6722_v14  ;;  %v6706_v37 = vrot.slane %v21983_v10, %v21599_v35  ;;  %v6710_v47 = vrot.slane %v2590_v6, %v21599_v35  ;;  %vm21997_vm5 = vmmov %vm21993_vm0  ;;  %v22014_v22 = vld [vmem:[#allocation62_spill] sm:$0xff]  ;;  %v22016_v54 = vld [vmem:[#allocation125_spill] sm:$0xff] }
 0x3b5   :  { %v6445_v48 = vsel %vm21992_vm11, 0.0, %v6413_v53  ;;  %v21995_v30 = vrot.slane %v21994_v40, %v21599_v35  ;;  %v6724_v15 = vsel %vm3050_vm15, %v6682_v34, %v6723_v46  ;;  %v6714_v25 = vrot.slane %v2589_v9, %v21599_v35  ;;  %vm21999_vm1 = vmmov %vm21993_vm0  ;;  %v22022_v53 = vld [vmem:[#allocation101_spill] sm:$0xff]  ;;  %v22025_v34 = vld [vmem:[#allocation94_spill] sm:$0xff] }
 0x3b6   :  { %11509 = vmatmul.mubr.msk.f32.gmra.mrb[6].mxu1 %vm21993_vm0, %v6445_v48  ;;  %v6906_v10 = vsel %vm3040_vm4, %v21914_v27, %v21913_v4  ;;  %v6725_v6 = vsel %vm3052_vm3, %v6686_v63, %v6724_v15  ;;  %v6913_v42 = vsel %vm3040_vm4, %v21988_v29, %v21987_v23  ;;  %v6718_v31 = vrot.slane %v2591_v5, %v21599_v35  ;;  %v21998_v27 = vld [vmem:[#allocation250_spill] sm:$0xff]  ;;  %vm22001_vm14 = vmmov %vm21993_vm0  ;;  %v22030_v48 = vld [vmem:[#allocation156_spill] sm:$0xff] }
 0x3b7   :  { %v6726_v58 = vsel %vm3040_vm4, %v6694_v36, %v21995_v30  ;;  %11513 = vmatprep.mubr.msk.f32.mxu1 %vm21997_vm5, %v21996_v17  ;;  %v6907_v36 = vsel %vm3042_vm8, %v17921_v13, %v6906_v10  ;;  %v6914_v4 = vsel %vm3042_vm8, %v6301_v57, %v6913_v42  ;;  %v6901_v13 = vrot.slane %v2047_v26, %v21722_v21  ;;  %v22000_v29 = vld [vmem:[#allocation118_spill] sm:$0xff]  ;;  %vm22003_vm6 = vmmov %vm21993_vm0  ;;  %v22032_v63 = vld [vmem:[#allocation253_spill] sm:$0xff] }
 0x3b8   :  { %v6727_v19 = vsel %vm3042_vm8, %v6698_v8, %v6726_v58  ;;  %v6908_v28 = vsel %vm3044_vm9, %v17928_v60, %v6907_v36  ;;  %v6915_v23 = vsel %vm3044_vm9, %v6305_v16, %v6914_v4  ;;  %vm22005_vm10 = vmmov %vm21993_vm0  ;;  %v22020_v8 = vld [vmem:[#allocation86_spill] sm:$0xff]  ;;  %v22044_v40 = vld [vmem:[#allocation77_spill] sm:$0xff] }
 0x3b9   :  { %v6728_v3 = vsel %vm3044_vm9, %v6702_v39, %v6727_v19  ;;  %v6909_v1 = vsel %vm3046_vm2, %v17932_v7, %v6908_v28  ;;  %v6916_v43 = vsel %vm3046_vm2, %v6309_v38, %v6915_v23  ;;  %v6905_v7 = vrot.slane %v2591_v5, %v21722_v21  ;;  %v22006_v38 = vld [vmem:[#allocation91_spill] sm:$0xff]  ;;  %vm22007_vm7 = vmmov %vm21993_vm0  ;;  %v22027_v12 = vld [vmem:[#allocation154_spill] sm:$0xff] }
 0x3ba   :  { %v6729_v9 = vsel %vm3046_vm2, %v6706_v37, %v6728_v3  ;;  %11514 = vmatmul.mubr.msk.f32.vlgmr.msra.gmra.mrb[8].mxu1 %vm21999_vm1, %v21998_v27  ;;  %v6910_v57 = vsel %vm3048_vm13, %v17942_v59, %v6909_v1  ;;  %v6917_v16 = vsel %vm3048_vm13, %v6313_v18, %v6916_v43  ;;  %vm22009_vm12 = vmmov %vm21993_vm0  ;;  %v22011_v18 = vld [vmem:[#allocation248_spill] sm:$0xff]  ;;  %v22028_v39 = vld [vmem:[#allocation149_spill] sm:$0xff] }
 0x3bb   :  { %v6730_v49 = vsel %vm3048_vm13, %v6710_v47, %v6729_v9  ;;  %11538 = vmatpush3.msra.mxu1 %v17867_v24  ;;  %11516 = vmatprep.mubr.msk.f32.mxu1 %vm22001_vm14, %v22000_v29  ;;  %v6911_v26 = vsel %vm3050_vm15, %v17936_v20, %v6910_v57  ;;  %v6918_v45 = vsel %vm3050_vm15, %v6317_v33, %v6917_v16  ;;  %v22008_v20 = vld [vmem:[#allocation148_spill] sm:$0xff]  ;;  %vm22010_vm11 = vmmov %vm21993_vm0  ;;  %v22012_v33 = vld [vmem:[#allocation251_spill] sm:$0xff] }
 0x3bc   :  { %v6731_v60 = vsel %vm3050_vm15, %v6714_v25, %v6730_v49  ;;  %v6912_v24 = vsel %vm3052_vm3, %v6901_v13, %v6911_v26  ;;  %v6919_v59 = vsel %vm3052_vm3, %v6905_v7, %v6918_v45  ;;  %vm22013_vm5 = vmmov %vm21993_vm0  ;;  %v22034_v14 = vld [vmem:[#allocation254_spill] sm:$0xff]  ;;  %v22036_v5 = vld [vmem:[#allocation257_spill] sm:$0xff] }
 0x3bd   :  { %v6732_v50 = vsel %vm3052_vm3, %v6718_v31, %v6731_v60  ;;  %vm22015_vm1 = vmmov %vm21993_vm0  ;;  %v22039_v46 = vld [vmem:[#allocation258_spill] sm:$0xff]  ;;  %v22041_v37 = vld [vmem:[#allocation261_spill] sm:$0xff] }
 0x3be   :  { %11517 = vmatmul.mubr.msk.f32.gmra.mrb[10].mxu1 %vm22003_vm6, %v22002_v61  ;;  %vm22017_vm14 = vmmov %vm21993_vm0  ;;  %v22043_v47 = vld [vmem:[#allocation262_spill] sm:$0xff]  ;;  %v22046_v30 = vld [vmem:[#allocation131_spill] sm:$0xff] }
 0x3bf   :  { %11519 = vmatprep.mubr.msk.f32.mxu1 %vm22005_vm10, %v22004_v11  ;;  %vm22019_vm6 = vmmov %vm21993_vm0  ;;  %v22048_v58 = vld [vmem:[#allocation23_spill] sm:$0xff]  ;;  %v22050_v17 = vld [vmem:[#allocation92_spill] sm:$0xff] }
 0x3c0   :  { %vm22021_vm10 = vmmov %vm21993_vm0  ;;  %v33_v15 = vld [vmem:[%s19777_s1 + $0x128] sm:$0xff]  ;;  %v18234_v25 = vld [vmem:[%s19777_s1 + $0x120] sm:$0xff] }
 0x3c1   :  { %11563 = vmatprep.subr.mxu0 %v33_v15 }
 0x3c2   :  { %11520 = vmatmul.mubr.msk.f32.gmra.mrb[12].mxu1 %vm22007_vm7, %v22006_v38  ;;  %vm22023_vm7 = vmmov %vm21993_vm0  ;;  %11564 = vmatpush3.msra.mxu0 %v33_v15 }
 0x3c3   :  { %11522 = vmatprep.mubr.msk.f32.mxu1 %vm22009_vm12, %v22008_v20  ;;  %vm22024_vm12 = vmmov %vm21993_vm0  ;;  %11571 = vmatprep.subr.mxu0 %v18234_v25 }
 0x3c6   :  { %11523 = vmatmul.mubr.msk.f32.gmra.mrb[14].mxu1 %vm22010_vm11, %v6725_v6  ;;  %vm22026_vm11 = vmmov %vm21993_vm0 }
 0x3c7   :  { %11525 = vmatprep.mubr.msk.f32.mxu1 %vm21993_vm0, %v22011_v18 }
 0x3ca   :  { %11526 = vmatmul.mubr.msk.f32.gmra.mrb[0].mxu1 %vm22013_vm5, %v22012_v33  ;;  %vm22029_vm5 = vmmov %vm21993_vm0 }
 0x3cb   :  { %11528 = vmatprep.mubr.msk.f32.mxu1 %vm22015_vm1, %v22014_v22  ;;  %vm22031_vm1 = vmmov %vm21993_vm0 }
 0x3ce   :  { %11529 = vmatmul.mubr.msk.f32.gmra.mrb[2].mxu1 %vm22017_vm14, %v22016_v54  ;;  %vm22033_vm14 = vmmov %vm21993_vm0 }
 0x3cf   :  { %11531 = vmatprep.mubr.msk.f32.mxu1 %vm22019_vm6, %v22018_v0  ;;  %vm22035_vm6 = vmmov %vm21993_vm0 }
 0x3d2   :  { %11532 = vmatmul.mubr.msk.f32.gmra.mrb[4].mxu1 %vm22021_vm10, %v22020_v8  ;;  %vm22037_vm10 = vmmov %vm21993_vm0 }
 0x3d3   :  { %11534 = vmatprep.mubr.msk.f32.mxu1 %vm22023_vm7, %v22022_v53  ;;  %vm22038_vm7 = vmmov %vm21993_vm0 }
 0x3d6   :  { %11535 = vmatmul.mubr.msk.f32.gmra.mrb[6].mxu1 %vm22024_vm12, %v6732_v50  ;;  %vm22040_vm12 = vmmov %vm21993_vm0 }
 0x3d7   :  { %11539 = vmatprep.mubr.msk.f32.mxu1 %vm22026_vm11, %v22025_v34  ;;  %vm22042_vm11 = vmmov %vm21993_vm0 }
 0x3da   :  { %11540 = vmatmul.mubr.msk.f32.vlgmr.msra.gmra.mrb[8].mxu1 %vm21993_vm0, %v22027_v12 }
 0x3db   :  { %11542 = vmatprep.mubr.msk.f32.mxu1 %vm22029_vm5, %v22028_v39  ;;  %vm22045_vm5 = vmmov %vm21993_vm0 }
 0x3de   :  { %11543 = vmatmul.mubr.msk.f32.gmra.mrb[10].mxu1 %vm22031_vm1, %v22030_v48  ;;  %vm22047_vm1 = vmmov %vm21993_vm0 }
 0x3df   :  { %11545 = vmatprep.mubr.msk.f32.mxu1 %vm22033_vm14, %v22032_v63  ;;  %vm22049_vm14 = vmmov %vm21993_vm0 }
 0x3e2   :  { %11546 = vmatmul.mubr.msk.f32.gmra.mrb[12].mxu1 %vm22035_vm6, %v22034_v14  ;;  %vm22051_vm6 = vmmov %vm21993_vm0 }
 0x3e3   :  { %11548 = vmatprep.mubr.msk.f32.mxu1 %vm22037_vm10, %v22036_v5  ;;  %vm22052_vm10 = vmmov %vm21993_vm0 }
 0x3e6   :  { %11549 = vmatmul.mubr.msk.f32.gmra.mrb[14].mxu1 %vm22038_vm7, %v6912_v24  ;;  %vm22053_vm7 = vmmov %vm21993_vm0 }
 0x3e7   :  { %11551 = vmatprep.mubr.msk.f32.mxu1 %vm22040_vm12, %v22039_v46  ;;  %vm22054_vm12 = vmmov %vm21993_vm0 }
 0x3ea   :  { %11552 = vmatmul.mubr.msk.f32.gmra.mrb[0].mxu1 %vm22042_vm11, %v22041_v37  ;;  %vm22055_vm11 = vmmov %vm21993_vm0 }
 0x3eb   :  { %11554 = vmatprep.mubr.msk.f32.mxu1 %vm21993_vm0, %v22043_v47 }
 0x3ee   :  { %11555 = vmatmul.mubr.msk.f32.gmra.mrb[2].mxu1 %vm22045_vm5, %v22044_v40  ;;  %vm22056_vm5 = vmmov %vm21993_vm0 }
 0x3ef   :  { %11557 = vmatprep.mubr.msk.f32.mxu1 %vm22047_vm1, %v22046_v30  ;;  %vm22057_vm1 = vmmov %vm21993_vm0 }
 0x3f2   :  { %11558 = vmatmul.mubr.msk.f32.gmra.mrb[4].mxu1 %vm22049_vm14, %v22048_v58  ;;  %vm22058_vm14 = vmmov %vm21993_vm0 }
 0x3f3   :  { %11560 = vmatprep.mubr.msk.f32.mxu1 %vm22051_vm6, %v22050_v17  ;;  %vm22059_vm6 = vmmov %vm21993_vm0 }
 0x3f6   :  { %11561 = vmatmul.mubr.msk.f32.gmra.mrb[6].mxu1 %vm22052_vm10, %v6919_v59  ;;  %vm22060_vm10 = vmmov %vm21993_vm0 }
 0x4ad   :  { %v11541_v19 = vpop.f32.mrb[8].mxu1 }
 0x4ae   :  { %v18238_v10 = vadd.f32 %v11541_v19, %v17529_v52  ;;  %v6990_v6 = vpop.f32.mrb[9].mxu1 }
 0x4af   :  { %v18241_v3 = vadd.f32 %v6990_v6, %v17539_v41 }
 0x4b0   :  { %v7086_v36 = vsel %vm22053_vm7, %v18238_v10, 0.0  ;;  %v7123_v42 = vmul.f32 %v18238_v10, %v18238_v10  ;;  %vm22062_vm7 = vmmov %vm21993_vm0 }
 0x4b1   :  { %v7085_v31 = vsel %vm22054_vm12, %v18241_v3, 0.0  ;;  %v7122_v9 = vmul.f32 %v18241_v3, %v18241_v3  ;;  %v11544_v28 = vpop.f32.mrb[10].mxu1  ;;  %vm22063_vm12 = vmmov %vm21993_vm0 }
 0x4b2   :  { %v7139_v52 = vsel %vm22055_vm11, %v7123_v42, 0.0  ;;  %v7087_v4 = vadd.f32 %v7086_v36, %v7085_v31  ;;  %v18253_v27 = vadd.f32 %v11544_v28, %v17697_v2  ;;  %v7000_v41 = vpop.f32.mrb[11].mxu1  ;;  %vm22064_vm11 = vmmov %vm21993_vm0 }
 0x4b3   :  { %v7138_v49 = vsel %vm21993_vm0, %v7122_v9, 0.0  ;;  %v18257_v13 = vadd.f32 %v7000_v41, %v17709_v56 }
 0x4b4   :  { %v7140_v1 = vadd.f32 %v7139_v52, %v7138_v49  ;;  %v7125_v23 = vmul.f32 %v18253_v27, %v18253_v27  ;;  %v7090_v56 = vsel %vm22057_vm1, %v18253_v27, 0.0  ;;  %vm22066_vm1 = vmmov %vm21993_vm0 }
 0x4b5   :  { %v7088_v29 = vsel %vm22056_vm5, %v18257_v13, 0.0  ;;  %v7124_v60 = vmul.f32 %v18257_v13, %v18257_v13  ;;  %v11547_v57 = vpop.f32.mrb[12].mxu1  ;;  %vm22065_vm5 = vmmov %vm21993_vm0 }
 0x4b6   :  { %v7089_v43 = vadd.f32 %v7088_v29, %v7087_v4  ;;  %v18266_v2 = vadd.f32 %v11547_v57, %v17877_v32  ;;  %v7010_v50 = vpop.f32.mrb[13].mxu1  ;;  %v7143_v45 = vsel %vm22059_vm6, %v7125_v23, 0.0  ;;  %vm22068_vm6 = vmmov %vm21993_vm0 }
 0x4b7   :  { %v7141_v26 = vsel %vm22058_vm14, %v7124_v60, 0.0  ;;  %v18272_v7 = vadd.f32 %v7010_v50, %v17887_v55  ;;  %vm22067_vm14 = vmmov %vm21993_vm0 }
 0x4b8   :  { %v7142_v16 = vadd.f32 %v7141_v26, %v7140_v1  ;;  %v7091_v24 = vadd.f32 %v7090_v56, %v7089_v43  ;;  %v7127_v61 = vmul.f32 %v18266_v2, %v18266_v2  ;;  %v7094_v33 = vsel %vm22062_vm7, %v18266_v2, 0.0  ;;  %vm22070_vm7 = vmmov %vm21993_vm0 }
 0x4b9   :  { %v7092_v32 = vsel %vm22060_vm10, %v18272_v7, 0.0  ;;  %v7126_v59 = vmul.f32 %v18272_v7, %v18272_v7  ;;  %v11550_v11 = vpop.f32.mrb[14].mxu1  ;;  %vm22069_vm10 = vmmov %vm21993_vm0 }
 0x4ba   :  { %v7093_v38 = vadd.f32 %v7092_v32, %v7091_v24  ;;  %v7144_v20 = vadd.f32 %v7143_v45, %v7142_v16  ;;  %v18282_v18 = vadd.f32 %v11550_v11, %v18067_v44  ;;  %v7020_v55 = vpop.f32.mrb[15].mxu1  ;;  %v7147_v53 = vsel %vm22064_vm11, %v7127_v61, 0.0  ;;  %vm22072_vm11 = vmmov %vm21993_vm0 }
 0x4bb   :  { %v7145_v22 = vsel %vm22063_vm12, %v7126_v59, 0.0  ;;  %v18288_v54 = vadd.f32 %v7020_v55, %v18080_v51  ;;  %vm22071_vm12 = vmmov %vm21993_vm0 }
 0x4bc   :  { %22061 = vst [vmem:[#allocation5_spill] sm:$0xff] %v18282_v18  ;;  %v7146_v0 = vadd.f32 %v7145_v22, %v7144_v20  ;;  %v7095_v8 = vadd.f32 %v7094_v33, %v7093_v38  ;;  %v7129_v34 = vmul.f32 %v18282_v18, %v18282_v18  ;;  %v7098_v51 = vsel %vm22065_vm5, %v18282_v18, 0.0  ;;  %vm22073_vm5 = vmmov %vm21993_vm0 }
 0x4bd   :  { %v7096_v44 = vsel %vm21993_vm0, %v18288_v54, 0.0  ;;  %v7128_v12 = vmul.f32 %v18288_v54, %v18288_v54  ;;  %v18297_v39 = vpop.f32.mrb[0].mxu1 }
 0x4be   :  { %v7097_v48 = vadd.f32 %v7096_v44, %v7095_v8  ;;  %v7148_v63 = vadd.f32 %v7147_v53, %v7146_v0  ;;  %v18299_v14 = vpop.f32.mrb[1].mxu1  ;;  %v7151_v40 = vsel %vm22067_vm14, %v7129_v34, 0.0  ;;  %v7131_v30 = vmul.f32 %v18297_v39, %v18297_v39  ;;  %vm22075_vm14 = vmmov %vm21993_vm0 }
 0x4bf   :  { %v7149_v5 = vsel %vm22066_vm1, %v7128_v12, 0.0  ;;  %v7130_v46 = vmul.f32 %v18299_v14, %v18299_v14  ;;  %v7100_v58 = vsel %vm22068_vm6, %v18299_v14, 0.0  ;;  %v7102_v36 = vsel %vm22069_vm10, %v18297_v39, 0.0  ;;  %vm22074_vm1 = vmmov %vm21993_vm0 }
 0x4c0   :  { %v7150_v37 = vadd.f32 %v7149_v5, %v7148_v63  ;;  %v7099_v47 = vadd.f32 %v7098_v51, %v7097_v48  ;;  %v7155_v52 = vsel %vm22071_vm12, %v7131_v30, 0.0  ;;  %vm22077_vm6 = vmmov %vm21993_vm0 }
 0x4c1   :  { %v18311_v17 = vpop.f32.mrb[2].mxu1  ;;  %v7153_v42 = vsel %vm22070_vm7, %v7130_v46, 0.0  ;;  %vm22078_vm10 = vmmov %vm21993_vm0 }
 0x4c2   :  { %v7101_v15 = vadd.f32 %v7100_v58, %v7099_v47  ;;  %v7152_v19 = vadd.f32 %v7151_v40, %v7150_v37  ;;  %v18313_v6 = vpop.f32.mrb[3].mxu1  ;;  %v7133_v4 = vmul.f32 %v18311_v17, %v18311_v17  ;;  %v7106_v60 = vsel %vm21993_vm0, %v18311_v17, 0.0  ;;  %vm22079_vm7 = vmmov %vm21993_vm0 }
 0x4c3   :  { %v7132_v31 = vmul.f32 %v18313_v6, %v18313_v6  ;;  %v7104_v41 = vsel %vm22072_vm11, %v18313_v6, 0.0  ;;  %vm22080_vm12 = vmmov %vm21993_vm0 }
 0x4c4   :  { %v7154_v9 = vadd.f32 %v7153_v42, %v7152_v19  ;;  %v7103_v28 = vadd.f32 %v7102_v36, %v7101_v15  ;;  %v7159_v26 = vsel %vm22074_vm1, %v7133_v4, 0.0  ;;  %vm22081_vm11 = vmmov %vm21993_vm0 }
 0x4c5   :  { %v18325_v49 = vpop.f32.mrb[4].mxu1  ;;  %v7157_v57 = vsel %vm22073_vm5, %v7132_v31, 0.0  ;;  %vm22082_vm5 = vmmov %vm21993_vm0 }
 0x4c6   :  { %v7105_v1 = vadd.f32 %v7104_v41, %v7103_v28  ;;  %v7156_v23 = vadd.f32 %v7155_v52, %v7154_v9  ;;  %v18327_v29 = vpop.f32.mrb[5].mxu1  ;;  %v7135_v16 = vmul.f32 %v18325_v49, %v18325_v49  ;;  %v7110_v11 = vsel %vm22077_vm6, %v18325_v49, 0.0 }
 0x4c7   :  { %v7134_v43 = vmul.f32 %v18327_v29, %v18327_v29  ;;  %v7108_v24 = vsel %vm22075_vm14, %v18327_v29, 0.0 }
 0x4c8   :  { %v7158_v50 = vadd.f32 %v7157_v57, %v7156_v23  ;;  %v7107_v56 = vadd.f32 %v7106_v60, %v7105_v1  ;;  %v7163_v22 = vsel %vm22079_vm7, %v7135_v16, 0.0 }
 0x4c9   :  { %v18339_v45 = vpop.f32.mrb[6].mxu1  ;;  %v7161_v38 = vsel %vm22078_vm10, %v7134_v43, 0.0 }
 0x4ca   :  { %22076 = vst [vmem:[#allocation21_spill] sm:$0xff] %v18339_v45  ;;  %v7109_v61 = vadd.f32 %v7108_v24, %v7107_v56  ;;  %v7160_v32 = vadd.f32 %v7159_v26, %v7158_v50  ;;  %v7060_v59 = vpop.f32.mrb[7].mxu1  ;;  %v7137_v0 = vmul.f32 %v18339_v45, %v18339_v45  ;;  %v7114_v44 = vsel %vm22081_vm11, %v18339_v45, 0.0  ;;  %vm22094_vm11 = vmmov %vm21993_vm0 }
 0x4cb   :  { %v7136_v20 = vmul.f32 %v7060_v59, %v7060_v59  ;;  %v7112_v8 = vsel %vm22080_vm12, %v7060_v59, 0.0 }
 0x4cc   :  { %v7162_v55 = vadd.f32 %v7161_v38, %v7160_v32  ;;  %v7111_v33 = vadd.f32 %v7110_v11, %v7109_v61  ;;  %v7167_v51 = vsel %vm22082_vm5, %v7137_v0, 0.0  ;;  %v60_v61 = vld [vmem:[%s19778_s2 + $0x2] sm:$0x3] }
 0x4cd   :  { %v7165_v12 = vsel %vm21993_vm0, %v7136_v20, 0.0  ;;  %v18394_v38 = vrot.slane %v60_v61, %v21722_v21 }
 0x4ce   :  { %v7113_v53 = vadd.f32 %v7112_v8, %v7111_v33  ;;  %v7164_v34 = vadd.f32 %v7163_v22, %v7162_v55 }
 0x4cf   :  { %22085 = vst [vmem:[#allocation33_spill] sm:$0xff] %v18394_v38 }
 0x4d0   :  { %v7115_v48 = vadd.f32 %v7114_v44, %v7113_v53  ;;  %v7166_v63 = vadd.f32 %v7165_v12, %v7164_v34 }
 0x4d2   :  { %v7116_v5 = vrot.slane %v7115_v48, 4  ;;  %v7168_v46 = vadd.f32 %v7167_v51, %v7166_v63 }
 0x4d4   :  { %v7117_v37 = vadd.f32 %v7116_v5, %v7115_v48  ;;  %v7169_v47 = vrot.slane %v7168_v46, 4 }
 0x4d6   :  { %v7118_v40 = vrot.slane %v7117_v37, 2  ;;  %v7170_v30 = vadd.f32 %v7169_v47, %v7168_v46 }
 0x4d8   :  { %v7119_v58 = vadd.f32 %v7118_v40, %v7117_v37  ;;  %v7171_v15 = vrot.slane %v7170_v30, 2 }
 0x4da   :  { %v7120_v19 = vrot.slane %v7119_v58, 1  ;;  %v7172_v36 = vadd.f32 %v7171_v15, %v7170_v30 }
 0x4dc   :  { %v7121_v42 = vadd.f32 %v7120_v19, %v7119_v58  ;;  %v7173_v31 = vrot.slane %v7172_v36, 1 }
 0x4de   :  { %v7174_v9 = vadd.f32 %v7173_v31, %v7172_v36  ;;  %v18352_v28 = vmul.f32 0.0078125, %v7121_v42 }
 0x4e0   :  { %22083 = vst [vmem:[#allocation13_spill] sm:$0xff] %v18352_v28  ;;  %v7176_v52 = vmul.f32 0.0078125, %v7174_v9  ;;  %v7177_v4 = vmul.f32 %v18352_v28, %v18352_v28  ;;  %v7194_v41 = vsub.f32 %v7060_v59, %v18352_v28  ;;  %v7181_v1 = vsub.f32 %v18238_v10, %v18352_v28 }
 0x4e1   :  { %v7183_v23 = vsub.f32 %v18253_v27, %v18352_v28  ;;  %v7185_v60 = vsub.f32 %v18266_v2, %v18352_v28  ;;  %v7189_v57 = vsub.f32 %v18297_v39, %v18352_v28  ;;  %v7191_v43 = vsub.f32 %v18311_v17, %v18352_v28 }
 0x4e2   :  { %v7178_v50 = vsub.f32 %v7176_v52, %v7177_v4  ;;  %v7193_v56 = vsub.f32 %v18325_v49, %v18352_v28  ;;  %v7180_v26 = vsub.f32 %v18241_v3, %v18352_v28  ;;  %v7182_v10 = vsub.f32 %v18257_v13, %v18352_v28 }
 0x4e4   :  { %v7179_v16 = vmax.f32 %v7178_v50, 0.0 }
 0x4e6   :  { %v7196_v13 = vadd.f32 1e-05, %v7179_v16 }
 0x4e8   :  { %11957 = vrsqrt.f32 %v7196_v13 }
 0x4f2   :  { %v11958_v32 = vpop.eup %11957 }
 0x4f3   :  { %v7198_v59 = vmul.f32 %v11958_v32, %v60_v61 }
 0x4f5   :  { %v18391_v11 = vrot.slane %v7198_v59, %v21599_v35 }
 0x4f7   :  { %22084 = vst [vmem:[#allocation11_spill] sm:$0xff] %v18391_v11  ;;  %v7217_v20 = vmul.f32 %v18391_v11, %v7194_v41  ;;  %v7204_v55 = vmul.f32 %v18391_v11, %v7181_v1  ;;  %v7206_v33 = vmul.f32 %v18391_v11, %v7183_v23  ;;  %v7208_v22 = vmul.f32 %v18391_v11, %v7185_v60 }
 0x4f8   :  { %v7212_v0 = vmul.f32 %v18391_v11, %v7189_v57  ;;  %v7214_v8 = vmul.f32 %v18391_v11, %v7191_v43  ;;  %v7216_v63 = vmul.f32 %v18391_v11, %v7193_v56  ;;  %v18412_v5 = vmul.f32 %v18391_v11, %v7180_v26 }
 0x4f9   :  { %v7237_v53 = vadd.f32 %v18394_v38, %v7217_v20  ;;  %v7224_v34 = vadd.f32 %v18394_v38, %v7204_v55  ;;  %v7226_v44 = vadd.f32 %v18394_v38, %v7206_v33  ;;  %v7228_v12 = vadd.f32 %v18394_v38, %v7208_v22 }
 0x4fa   :  { %v7232_v48 = vadd.f32 %v18394_v38, %v7212_v0  ;;  %v18409_v51 = vadd.f32 %v18394_v38, %v7214_v8  ;;  %v18421_v4 = vadd.f32 %v18394_v38, %v7216_v63  ;;  %v18424_v41 = vmul.f32 %v18391_v11, %v7182_v10 }
 0x4fb   :  { %vm7253_vm1 = vcmp.gt.f32.partialorder %v7237_v53, 0.0  ;;  %v7269_v46 = vmul.f32 0.01, %v7237_v53  ;;  %vm7240_vm14 = vcmp.gt.f32.partialorder %v7224_v34, 0.0  ;;  %v7256_v37 = vmul.f32 0.01, %v7224_v34 }
 0x4fc   :  { %vm7242_vm6 = vcmp.gt.f32.partialorder %v7226_v44, 0.0  ;;  %vm7244_vm10 = vcmp.gt.f32.partialorder %v7228_v12, 0.0  ;;  %v7258_v47 = vmul.f32 0.01, %v7226_v44  ;;  %v7260_v40 = vmul.f32 0.01, %v7228_v12 }
 0x4fd   :  { %v7285_v30 = vsel %vm7253_vm1, %v7237_v53, %v7269_v46  ;;  %v7272_v58 = vsel %vm7240_vm14, %v7224_v34, %v7256_v37  ;;  %vm7248_vm7 = vcmp.gt.f32.partialorder %v7232_v48, 0.0  ;;  %v7264_v15 = vmul.f32 0.01, %v7232_v48  ;;  %vm22102_vm1 = vmmov %vm22082_vm5 }
 0x4fe   :  { %v7541_v19 = vcombine.high %v7285_v30, %v7285_v30  ;;  %v18415_v36 = vrot.slane %v7285_v30, %v21903_v62  ;;  %v7320_v42 = vcombine.high %v7272_v58, %v7272_v58  ;;  %v18418_v31 = vrot.slane %v7272_v58, %v21903_v62 }
 0x4ff   :  { %v7274_v9 = vsel %vm7242_vm6, %v7226_v44, %v7258_v47  ;;  %v7276_v52 = vsel %vm7244_vm10, %v7228_v12, %v7260_v40  ;;  %v7280_v57 = vsel %vm7248_vm7, %v7232_v48, %v7264_v15  ;;  %vm7250_vm12 = vcmp.gt.f32.partialorder %v18409_v51, 0.0  ;;  %vm22117_vm6 = vmmov %vm22102_vm1 }
 0x500   :  { %v18427_v1 = vrot.slane %v7541_v19, %v21903_v62  ;;  %v18431_v23 = vcombine.high %v18415_v36, %v18415_v36  ;;  %v18434_v60 = vrot.slane %v7320_v42, %v21903_v62  ;;  %v7335_v43 = vcombine.high %v18418_v31, %v18418_v31  ;;  %vm22122_vm10 = vmmov %vm22102_vm1 }
 0x501   :  { %v7710_v50 = vrot.slane %v18418_v31, %v21599_v35  ;;  %v7354_v56 = vcombine.high %v7274_v9, %v7274_v9  ;;  %v18441_v26 = vrot.slane %v7274_v9, %v21903_v62  ;;  %v7388_v13 = vcombine.high %v7276_v52, %v7276_v52 }
 0x502   :  { %v18446_v10 = vcombine.high %v18434_v60, %v18434_v60  ;;  %v7718_v16 = vrot.slane %v18434_v60, %v21599_v35  ;;  %v18451_v61 = vrot.slane %v7276_v52, %v21903_v62  ;;  %v18454_v32 = vrot.slane %v7335_v43, %v21722_v21 }
 0x503   :  { %v7714_v59 = vrot.slane %v7335_v43, %v21599_v35  ;;  %v18458_v20 = vrot.slane %v7354_v56, %v21903_v62  ;;  %v18462_v55 = vcombine.high %v18441_v26, %v18441_v26  ;;  %v18469_v0 = vrot.slane %v7388_v13, %v21903_v62 }
 0x504   :  { %22086 = vst [vmem:[#allocation22_spill] sm:$0xff] %v18454_v32  ;;  %v7722_v22 = vrot.slane %v18446_v10, %v21599_v35  ;;  %v7403_v8 = vcombine.high %v18451_v61, %v18451_v61  ;;  %v18480_v44 = vrot.slane %v18441_v26, %v21599_v35  ;;  %v7742_v30 = vrot.slane %v18451_v61, %v21599_v35 }
 0x505   :  { %v7803_v53 = vsel %vm3040_vm4, %v7714_v59, %v7710_v50  ;;  %v18476_v34 = vcombine.high %v18458_v20, %v18458_v20  ;;  %v18484_v12 = vrot.slane %v18462_v55, %v21599_v35  ;;  %v18489_v63 = vcombine.high %v18469_v0, %v18469_v0 }
 0x506   :  { %22087 = vst [vmem:[#allocation10_spill] sm:$0xff] %v18480_v44  ;;  %v7804_v48 = vsel %vm3042_vm8, %v7718_v16, %v7803_v53  ;;  %v18492_v46 = vrot.slane %v7403_v8, %v21722_v21  ;;  %v18496_v37 = vrot.slane %v18458_v20, %v21599_v35  ;;  %v7746_v58 = vrot.slane %v7403_v8, %v21599_v35 }
 0x507   :  { %22088 = vst [vmem:[#allocation40_spill] sm:$0xff] %v18484_v12  ;;  %v18499_v47 = vsel %vm3044_vm9, %v7722_v22, %v7804_v48  ;;  %v18503_v40 = vrot.slane %v18476_v34, %v21599_v35  ;;  %v22093_v15 = vmov 0.0   ;;  %v7750_v9 = vrot.slane %v18469_v0, %v21599_v35 }
 0x508   :  { %22089 = vst [vmem:[#allocation68_spill] sm:$0xff] %v18492_v46  ;;  %22090 = vst [vmem:[#allocation53_spill] sm:$0xff] %v18496_v37  ;;  %v7821_v19 = vcombine.low %v22093_v15, %v18499_v47  ;;  %v7754_v52 = vrot.slane %v18489_v63, %v21599_v35  ;;  %v7806_v43 = vsel %vm3040_vm4, %v18484_v12, %v18480_v44  ;;  %vm7252_vm0 = vcmp.gt.f32.partialorder %v18421_v4, 0.0 }
 0x509   :  { %22091 = vst [vmem:[#allocation74_spill] sm:$0xff] %v18499_v47  ;;  %22092 = vst [vmem:[#allocation63_spill] sm:$0xff] %v18503_v40  ;;  %v7809_v50 = vsel %vm3040_vm4, %v7746_v58, %v7742_v30  ;;  %v7456_v56 = vcombine.high %v7280_v57, %v7280_v57  ;;  %v18521_v16 = vrot.slane %v7280_v57, %v21903_v62  ;;  %v7266_v22 = vmul.f32 0.01, %v18409_v51 }
 0x50a   :  { %11565 = vmatprep.mubr.msk.f32.mxu0 %vm22094_vm11, %v7821_v19  ;;  %v7807_v13 = vsel %vm3042_vm8, %v18496_v37, %v7806_v43  ;;  %v7810_v59 = vsel %vm3042_vm8, %v7750_v9, %v7809_v50  ;;  %v7268_v19 = vmul.f32 0.01, %v18421_v4  ;;  %v18630_v37 = vrot.slane %v18441_v26, %v21722_v21 }
 0x50b   :  { %v7808_v8 = vsel %vm3044_vm9, %v18503_v40, %v7807_v13  ;;  %v18532_v53 = vsel %vm3044_vm9, %v7754_v52, %v7810_v59  ;;  %v18535_v57 = vrot.slane %v7456_v56, %v21903_v62  ;;  %v7471_v48 = vcombine.high %v18521_v16, %v18521_v16  ;;  %v18559_v13 = vld [vmem:[%s19777_s1 + $0x130] sm:$0xff] }
 0x50c   :  { %22095 = vst [vmem:[#allocation82_spill] sm:$0xff] %v18532_v53  ;;  %v7822_v30 = vcombine.low %v7808_v8, %v18532_v53  ;;  %v7758_v58 = vrot.slane %v18521_v16, %v21599_v35  ;;  %v7282_v9 = vsel %vm7250_vm12, %v18409_v51, %v7266_v22  ;;  %v7284_v51 = vsel %vm7252_vm0, %v18421_v4, %v7268_v19  ;;  %vm22133_vm0 = vmmov %vm22102_vm1 }
 0x50d   :  { %v18548_v52 = vcombine.high %v18535_v57, %v18535_v57  ;;  %v18551_v43 = vrot.slane %v7471_v48, %v21722_v21  ;;  %v7762_v50 = vrot.slane %v7471_v48, %v21599_v35  ;;  %v7766_v56 = vrot.slane %v18535_v57, %v21599_v35  ;;  %22105 = vst [vmem:[#allocation104_spill] sm:$0xff] %v18630_v37 }
 0x50e   :  { %11566 = vmatmul.mubr.msk.f32.vlgmr.msra.gmra.mrb[72].mxu0 %vm22082_vm5, %v7822_v30  ;;  %v7490_v59 = vcombine.high %v7282_v9, %v7282_v9  ;;  %v7497_v22 = vrot.slane %v7282_v9, %v21903_v62  ;;  %v18568_v8 = vrot.slane %v18418_v31, %v21722_v21  ;;  %v7524_v3 = vcombine.high %v7284_v51, %v7284_v51  ;;  %vm22135_vm5 = vmmov %vm22133_vm0 }
 0x50f   :  { %22096 = vst [vmem:[#allocation81_spill] sm:$0xff] %v18551_v43  ;;  %11572 = vmatpush3.msra.mxu0 %v18234_v25  ;;  %v7638_v48 = vrot.slane %v18548_v52, %v21722_v21  ;;  %v7770_v24 = vrot.slane %v18548_v52, %v21599_v35  ;;  %v7812_v30 = vsel %vm3040_vm4, %v7762_v50, %v7758_v58  ;;  %vm22115_vm14 = vcmask 1040384  }
 0x510   :  { %v7813_v4 = vsel %vm3042_vm8, %v7766_v56, %v7812_v30  ;;  %v7504_v19 = vrot.slane %v7490_v59, %v21903_v62  ;;  %v7505_v9 = vcombine.high %v7497_v22, %v7497_v22  ;;  %v7531_v49 = vrot.slane %v7284_v51, %v21903_v62  ;;  %11579 = vmatprep.subr.mxu0 %v18559_v13  ;;  %vm22126_vm7 = vmmov %vm22115_vm14 }
 0x511   :  { %v18581_v25 = vsel %vm3044_vm9, %v7770_v24, %v7813_v4  ;;  %v7538_v31 = vrot.slane %v7524_v3, %v21903_v62  ;;  %v18585_v17 = vrot.slane %v7497_v22, %v21599_v35  ;;  %v18589_v58 = vrot.slane %v18434_v60, %v21722_v21  ;;  %vm22130_vm12 = vmmov %vm22126_vm7 }
 0x512   :  { %22097 = vst [vmem:[#allocation90_spill] sm:$0xff] %v18581_v25  ;;  %v7823_v52 = vcombine.low %v22093_v15, %v18581_v25  ;;  %v7506_v50 = vcombine.high %v7504_v19, %v7504_v19  ;;  %v7539_v56 = vcombine.high %v7531_v49, %v7531_v49  ;;  %v18594_v51 = vrot.slane %v7505_v9, %v21599_v35  ;;  %vm22132_vm11 = vmmov %vm22126_vm7 }
 0x513   :  { %22098 = vst [vmem:[#allocation95_spill] sm:$0xff] %v18585_v17  ;;  %22099 = vst [vmem:[#allocation96_spill] sm:$0xff] %v18589_v58  ;;  %v18596_v59 = vcombine.high %v7538_v31, %v7538_v31  ;;  %v18599_v24 = vrot.slane %v7504_v19, %v21599_v35  ;;  %v7790_v3 = vrot.slane %v7531_v49, %v21599_v35 }
 0x514   :  { %22100 = vst [vmem:[#allocation89_spill] sm:$0xff] %v18594_v51  ;;  %v7798_v30 = vrot.slane %v7538_v31, %v21599_v35  ;;  %11568 = vmatprep.mubr.msk.f32.mxu0 %vm22102_vm1, %v7823_v52  ;;  %v18605_v60 = vrot.slane %v7539_v56, %v21722_v21  ;;  %v18608_v4 = vrot.slane %v7506_v50, %v21599_v35  ;;  %vm22137_vm1 = vmmov %vm22126_vm7 }
 0x515   :  { %22101 = vst [vmem:[#allocation98_spill] sm:$0xff] %v18599_v24  ;;  %v7794_v39 = vrot.slane %v7539_v56, %v21599_v35  ;;  %v7815_v2 = vsel %vm3040_vm4, %v18594_v51, %v18585_v17  ;;  %v7670_v27 = vrot.slane %v18596_v59, %v21722_v21  ;;  %v7802_v42 = vrot.slane %v18596_v59, %v21599_v35 }
 0x516   :  { %22103 = vst [vmem:[#allocation103_spill] sm:$0xff] %v18605_v60  ;;  %22104 = vst [vmem:[#allocation279_spill] sm:$0xff] %v18608_v4  ;;  %v7816_v52 = vsel %vm3042_vm8, %v18599_v24, %v7815_v2  ;;  %v7671_v33 = vsel %vm3040_vm4, %v18454_v32, %v18568_v8  ;;  %v22106_v2 = vrot.slane %v18446_v10, %v21722_v21 }
 0x517   :  { %v7817_v56 = vsel %vm3044_vm9, %v18608_v4, %v7816_v52  ;;  %v7818_v40 = vsel %vm3040_vm4, %v7794_v39, %v7790_v3  ;;  %v7672_v51 = vsel %vm3042_vm8, %v18589_v58, %v7671_v33  ;;  %v18641_v52 = vrot.slane %v18462_v55, %v21722_v21 }
 0x518   :  { %v7819_v59 = vsel %vm3042_vm8, %v7798_v30, %v7818_v40  ;;  %v18637_v24 = vsel %vm3044_vm9, %v22106_v2, %v7672_v51  ;;  %v18645_v39 = vrot.slane %v18458_v20, %v21722_v21  ;;  %v18653_v40 = vrot.slane %v18476_v34, %v21722_v21  ;;  %v22118_v30 = vld [vmem:[#allocation99_spill] sm:$0xff] }
 0x519   :  { %22107 = vst [vmem:[#allocation41_spill] sm:$0xff] %v18637_v24  ;;  %22108 = vst [vmem:[#allocation97_spill] sm:$0xff] %v18641_v52  ;;  %v18648_v33 = vsel %vm3044_vm9, %v7802_v42, %v7819_v59  ;;  %v7689_v26 = vrot.slane %v18637_v24, 7  ;;  %v18657_v10 = vrot.slane %v18451_v61, %v21722_v21  ;;  %v18662_v51 = vrot.slane %v18469_v0, %v21722_v21 }
 0x51a   :  { %22109 = vst [vmem:[#allocation106_spill] sm:$0xff] %v18645_v39  ;;  %22110 = vst [vmem:[#allocation110_spill] sm:$0xff] %v18648_v33  ;;  %v7824_v55 = vcombine.low %v7817_v56, %v18648_v33  ;;  %v7674_v20 = vsel %vm3040_vm4, %v18641_v52, %v18630_v37  ;;  %v18669_v42 = vrot.slane %v18521_v16, %v21722_v21 }
 0x51b   :  { %22111 = vst [vmem:[#allocation286_spill] sm:$0xff] %v18653_v40  ;;  %22112 = vst [vmem:[#allocation111_spill] sm:$0xff] %v18657_v10  ;;  %v7701_v34 = vsel %vm22115_vm14, 0.0, %v7689_v26  ;;  %v7675_v61 = vsel %vm3042_vm8, %v18645_v39, %v7674_v20  ;;  %v7677_v3 = vsel %vm3040_vm4, %v18492_v46, %v18657_v10  ;;  %v18679_v0 = vrot.slane %v18535_v57, %v21722_v21 }
 0x51c   :  { %22113 = vst [vmem:[#allocation287_spill] sm:$0xff] %v18662_v51  ;;  %22114 = vst [vmem:[#allocation105_spill] sm:$0xff] %v18669_v42  ;;  %11569 = vmatmul.mubr.msk.f32.gmra.mrb[74].mxu0 %vm22117_vm6, %v7824_v55  ;;  %v7924_v56 = vcombine.low %v22118_v30, %v7701_v34  ;;  %v18685_v16 = vsel %vm3044_vm9, %v18653_v40, %v7675_v61  ;;  %v7678_v59 = vsel %vm3042_vm8, %v18662_v51, %v7677_v3 }
 0x51d   :  { %22116 = vst [vmem:[#allocation113_spill] sm:$0xff] %v18679_v0  ;;  %v7680_v2 = vsel %vm3040_vm4, %v18551_v43, %v18669_v42  ;;  %v22119_v26 = vrot.slane %v18489_v63, %v21722_v21  ;;  %v7690_v55 = vrot.slane %v18685_v16, 7  ;;  %v18702_v34 = vrot.slane %v7497_v22, %v21722_v21  ;;  %vm22139_vm6 = vmmov %vm22137_vm1 }
 0x51e   :  { %v7681_v20 = vsel %vm3042_vm8, %v18679_v0, %v7680_v2  ;;  %11573 = vmatprep.mubr.msk.f32.mxu0 %vm22122_vm10, %v7924_v56  ;;  %v18710_v63 = vrot.slane %v7505_v9, %v21722_v21  ;;  %v18718_v22 = vrot.slane %v7506_v50, %v21722_v21  ;;  %v18721_v56 = vrot.slane %v7531_v49, %v21722_v21 }
 0x51f   :  { %v18696_v57 = vsel %vm3044_vm9, %v22119_v26, %v7678_v59  ;;  %22121 = vst [vmem:[#allocation291_spill] sm:$0xff] %v18702_v34  ;;  %v18707_v3 = vsel %vm3044_vm9, %v7638_v48, %v7681_v20  ;;  %v18713_v59 = vrot.slane %v7504_v19, %v21722_v21  ;;  %v7702_v26 = vsel %vm22126_vm7, 0.0, %v7690_v55 }
 0x520   :  { %22120 = vst [vmem:[#allocation114_spill] sm:$0xff] %v18696_v57  ;;  %v7691_v61 = vrot.slane %v18696_v57, 7  ;;  %22123 = vst [vmem:[#allocation115_spill] sm:$0xff] %v18707_v3  ;;  %v7692_v2 = vrot.slane %v18707_v3, 7  ;;  %v18725_v48 = vrot.slane %v18415_v36, %v21722_v21  ;;  %v18729_v20 = vrot.slane %v7538_v31, %v21722_v21 }
 0x521   :  { %22124 = vst [vmem:[#allocation48_spill] sm:$0xff] %v18710_v63  ;;  %22125 = vst [vmem:[#allocation112_spill] sm:$0xff] %v18713_v59  ;;  %v7683_v19 = vsel %vm3040_vm4, %v18710_v63, %v18702_v34  ;;  %v7686_v40 = vsel %vm3040_vm4, %v18605_v60, %v18721_v56  ;;  %v22147_v44 = vsub.f32 %v18313_v6, %v18352_v28 }
 0x522   :  { %22127 = vst [vmem:[#allocation117_spill] sm:$0xff] %v18718_v22  ;;  %22128 = vst [vmem:[#allocation50_spill] sm:$0xff] %v18721_v56  ;;  %v7703_v9 = vsel %vm22130_vm12, 0.0, %v7691_v61  ;;  %v7704_v50 = vsel %vm22132_vm11, 0.0, %v7692_v2  ;;  %v7684_v49 = vsel %vm3042_vm8, %v18713_v59, %v7683_v19  ;;  %v7687_v61 = vsel %vm3042_vm8, %v18729_v20, %v7686_v40  ;;  %v35_v2 = vld [vmem:[%s19777_s1 + $0x138] sm:$0xff] }
 0x523   :  { %22129 = vst [vmem:[#allocation119_spill] sm:$0xff] %v18725_v48  ;;  %22131 = vst [vmem:[#allocation297_spill] sm:$0xff] %v18729_v20  ;;  %v7925_v55 = vcombine.low %v7702_v26, %v7703_v9  ;;  %v7926_v4 = vcombine.low %v22118_v30, %v7704_v50  ;;  %v18743_v31 = vsel %vm3044_vm9, %v18718_v22, %v7684_v49 }
 0x524   :  { %v8021_v26 = vcombine.low %v22093_v15, %v18637_v24  ;;  %v18754_v9 = vsel %vm3044_vm9, %v7670_v27, %v7687_v61  ;;  %v7693_v19 = vrot.slane %v18743_v31, 7  ;;  %v8022_v50 = vcombine.low %v18685_v16, %v18696_v57  ;;  %vm22140_vm12 = vmmov %vm22133_vm0 }
 0x525   :  { %11574 = vmatmul.mubr.msk.f32.vlgmr.msra.gmra.mrb[72].mxu0 %vm22133_vm0, %v7925_v55  ;;  %22134 = vst [vmem:[#allocation120_spill] sm:$0xff] %v18754_v9  ;;  %v7223_v40 = vadd.f32 %v18394_v38, %v18412_v5  ;;  %v7694_v49 = vrot.slane %v18754_v9, 7  ;;  %v8023_v55 = vcombine.low %v22093_v15, %v18707_v3  ;;  %v7225_v27 = vadd.f32 %v18394_v38, %v18424_v41 }
 0x526   :  { %11580 = vmatpush3.msra.mxu0 %v18559_v13  ;;  %11576 = vmatprep.mubr.msk.f32.mxu0 %vm22135_vm5, %v7926_v4  ;;  %v22136_v61 = vsub.f32 %v18272_v7, %v18352_v28  ;;  %v7705_v30 = vsel %vm22137_vm1, 0.0, %v7693_v19  ;;  %v22138_v13 = vsub.f32 %v18288_v54, %v18352_v28  ;;  %v8024_v7 = vcombine.low %v18743_v31, %v18754_v9  ;;  %vm22142_vm5 = vmmov %vm22133_vm0 }
 0x527   :  { %11587 = vmatprep.subr.mxu0 %v35_v2  ;;  %vm7239_vm14 = vcmp.gt.f32.partialorder %v7223_v40, 0.0  ;;  %v7255_v5 = vmul.f32 0.01, %v7223_v40  ;;  %v7706_v15 = vsel %vm22139_vm6, 0.0, %v7694_v49  ;;  %vm7241_vm10 = vcmp.gt.f32.partialorder %v7225_v27, 0.0  ;;  %vm22143_vm1 = vmmov %vm22133_vm0 }
 0x528   :  { %v7207_v16 = vmul.f32 %v18391_v11, %v22136_v61  ;;  %v7209_v4 = vmul.f32 %v18391_v11, %v22138_v13  ;;  %v7257_v22 = vmul.f32 0.01, %v7225_v27  ;;  %v7927_v3 = vcombine.low %v7705_v30, %v7706_v15  ;;  %v36_v13 = vld [vmem:[%s19777_s1 + $0x140] sm:$0xff] }
 0x529   :  { %v7271_v61 = vsel %vm7239_vm14, %v7223_v40, %v7255_v5  ;;  %v22141_v40 = vsub.f32 %v18299_v14, %v18352_v28  ;;  %vm22144_vm14 = vmmov %vm22139_vm6  ;;  %v22148_v47 = vsub.f32 %v18327_v29, %v18352_v28  ;;  %v18914_v6 = vrot.slane %v18431_v23, %v21722_v21 }
 0x52a   :  { %v7227_v41 = vadd.f32 %v18394_v38, %v7207_v16  ;;  %v7229_v19 = vadd.f32 %v18394_v38, %v7209_v4  ;;  %v7273_v57 = vsel %vm7241_vm10, %v7225_v27, %v7257_v22  ;;  %v7303_v24 = vcombine.high %v7271_v61, %v7271_v61  ;;  %11577 = vmatmul.mubr.msk.f32.gmra.mrb[74].mxu0 %vm22140_vm12, %v7927_v3  ;;  %vm22145_vm6 = vmmov %vm22133_vm0 }
 0x52b   :  { %v18783_v33 = vrot.slane %v7271_v61, %v21903_v62  ;;  %v7337_v54 = vcombine.high %v7273_v57, %v7273_v57  ;;  %v18787_v49 = vrot.slane %v7273_v57, %v21903_v62  ;;  %11581 = vmatprep.mubr.msk.f32.mxu0 %vm22133_vm0, %v8021_v26  ;;  %v7211_v3 = vmul.f32 %v18391_v11, %v22141_v40  ;;  %vm22146_vm10 = vmmov %vm22144_vm14 }
 0x52c   :  { %vm7243_vm7 = vcmp.gt.f32.partialorder %v7227_v41, 0.0  ;;  %vm7245_vm11 = vcmp.gt.f32.partialorder %v7229_v19, 0.0  ;;  %v7259_v15 = vmul.f32 0.01, %v7227_v41  ;;  %v18791_v30 = vrot.slane %v7303_v24, %v21903_v62  ;;  %22150 = vst [vmem:[#allocation116_spill] sm:$0xff] %v18914_v6  ;;  %vm22152_vm12 = vmmov %vm22146_vm10 }
 0x52d   :  { %v18795_v22 = vcombine.high %v18783_v33, %v18783_v33  ;;  %v7261_v31 = vmul.f32 0.01, %v7229_v19  ;;  %v18802_v57 = vrot.slane %v7337_v54, %v21903_v62  ;;  %v18806_v27 = vcombine.high %v18787_v49, %v18787_v49 }
 0x52e   :  { %v18810_v24 = vrot.slane %v18783_v33, %v21722_v21  ;;  %v7275_v26 = vsel %vm7243_vm7, %v7227_v41, %v7259_v15  ;;  %v18818_v14 = vrot.slane %v18791_v30, %v21722_v21  ;;  %v18822_v5 = vrot.slane %v18787_v49, %v21722_v21  ;;  %11582 = vmatmul.mubr.msk.f32.vlgmr.msra.gmra.mrb[72].mxu0 %vm22142_vm5, %v8022_v50  ;;  %vm22149_vm7 = vmmov %vm22133_vm0 }
 0x52f   :  { %v18814_v16 = vrot.slane %v18795_v22, %v21722_v21  ;;  %v7277_v4 = vsel %vm7245_vm11, %v7229_v19, %v7261_v31  ;;  %v18830_v41 = vrot.slane %v18806_v27, %v21722_v21  ;;  %v18834_v61 = vrot.slane %v18802_v57, %v21722_v21  ;;  %11588 = vmatpush3.msra.mxu0 %v35_v2  ;;  %vm22153_vm0 = vmmov %vm22146_vm10 }
 0x530   :  { %v7371_v54 = vcombine.high %v7275_v26, %v7275_v26  ;;  %v18837_v15 = vrot.slane %v7275_v26, %v21903_v62  ;;  %11584 = vmatprep.mubr.msk.f32.mxu0 %vm22143_vm1, %v8023_v55  ;;  %v7405_v50 = vcombine.high %v7277_v4, %v7277_v4  ;;  %v18844_v31 = vrot.slane %v7277_v4, %v21903_v62 }
 0x531   :  { %v8218_v19 = vsel %vm3042_vm8, %v18814_v16, %v18810_v24  ;;  %v8220_v9 = vsel %vm3042_vm8, %v18830_v41, %v18822_v5  ;;  %11595 = vmatprep.subr.mxu0 %v36_v13  ;;  %v7215_v59 = vmul.f32 %v18391_v11, %v22148_v47  ;;  %v8232_v34 = vsel %vm3042_vm8, %v18914_v6, %v18725_v48 }
 0x532   :  { %v8219_v40 = vsel %vm3044_vm9, %v18818_v14, %v8218_v19  ;;  %v18852_v2 = vrot.slane %v7371_v54, %v21903_v62  ;;  %v18856_v55 = vcombine.high %v18837_v15, %v18837_v15  ;;  %v8221_v26 = vsel %vm3044_vm9, %v18834_v61, %v8220_v9  ;;  %11585 = vmatmul.mubr.msk.f32.gmra.mrb[74].mxu0 %vm22145_vm6, %v8024_v7 }
 0x533   :  { %v8242_v4 = vsel %vm22144_vm14, 0.0, %v8219_v40  ;;  %v18862_v17 = vrot.slane %v7405_v50, %v21903_v62  ;;  %v18866_v19 = vcombine.high %v18844_v31, %v18844_v31  ;;  %v8243_v54 = vsel %vm22146_vm10, 0.0, %v8221_v26  ;;  %vm22154_vm14 = vmmov %vm22145_vm6 }
 0x534   :  { %v18872_v25 = vrot.slane %v18837_v15, %v21722_v21  ;;  %v18876_v9 = vrot.slane %v18856_v55, %v21722_v21  ;;  %v18880_v50 = vrot.slane %v18852_v2, %v21722_v21  ;;  %v8258_v40 = vcombine.low %v8242_v4, %v8243_v54  ;;  %vm22155_vm6 = vmmov %vm22153_vm0 }
 0x535   :  { %v18884_v53 = vrot.slane %v18844_v31, %v21722_v21  ;;  %v18888_v7 = vrot.slane %v18866_v19, %v21722_v21  ;;  %v18892_v26 = vrot.slane %v18862_v17, %v21722_v21  ;;  %v7213_v4 = vmul.f32 %v18391_v11, %v22147_v44  ;;  %vm22157_vm10 = vmmov %vm22153_vm0 }
 0x536   :  { %v8222_v12 = vsel %vm3042_vm8, %v18876_v9, %v18872_v25  ;;  %v7231_v54 = vadd.f32 %v18394_v38, %v7211_v3  ;;  %11589 = vmatprep.mubr.msk.f32.mxu0 %vm22149_vm7, %v8258_v40  ;;  %v18918_v44 = vrot.slane %v18427_v1, %v21722_v21  ;;  %v7235_v63 = vadd.f32 %v18394_v38, %v7215_v59  ;;  %v18936_v59 = vld [vmem:[%s19777_s1 + $0x148] sm:$0xff]  ;;  %vm22158_vm7 = vmmov %vm22153_vm0 }
 0x537   :  { %v8223_v0 = vsel %vm3044_vm9, %v18880_v50, %v8222_v12  ;;  %v8224_v51 = vsel %vm3042_vm8, %v18888_v7, %v18884_v53  ;;  %v7233_v3 = vadd.f32 %v18394_v38, %v7213_v4  ;;  %v8370_v18 = vrot.slane %v18791_v30, %v21599_v35 }
 0x538   :  { %22151 = vst [vmem:[#allocation122_spill] sm:$0xff] %v18918_v44  ;;  %v8225_v29 = vsel %vm3044_vm9, %v18892_v26, %v8224_v51  ;;  %v8244_v47 = vsel %vm22152_vm12, 0.0, %v8223_v0  ;;  %vm7247_vm11 = vcmp.gt.f32.partialorder %v7231_v54, 0.0  ;;  %v7263_v40 = vmul.f32 0.01, %v7231_v54  ;;  %vm22159_vm12 = vmmov %vm22153_vm0 }
 0x539   :  { %v8245_v12 = vsel %vm22153_vm0, 0.0, %v8225_v29  ;;  %vm7249_vm5 = vcmp.gt.f32.partialorder %v7233_v3, 0.0  ;;  %v7265_v42 = vmul.f32 0.01, %v7233_v3  ;;  %v8233_v51 = vsel %vm3044_vm9, %v18918_v44, %v8232_v34 }
 0x53a   :  { %v8259_v43 = vcombine.low %v8244_v47, %v8245_v12  ;;  %v8366_v0 = vrot.slane %v18795_v22, %v21599_v35  ;;  %v7279_v4 = vsel %vm7247_vm11, %v7231_v54, %v7263_v40  ;;  %vm7251_vm1 = vcmp.gt.f32.partialorder %v7235_v63, 0.0  ;;  %vm22160_vm11 = vmmov %vm22154_vm14 }
 0x53b   :  { %v7267_v46 = vmul.f32 0.01, %v7235_v63  ;;  %v7281_v29 = vsel %vm7249_vm5, %v7233_v3, %v7265_v42  ;;  %v7439_v47 = vcombine.high %v7279_v4, %v7279_v4  ;;  %v18940_v12 = vrot.slane %v7279_v4, %v21903_v62  ;;  %vm22161_vm0 = vmmov %vm22160_vm11 }
 0x53c   :  { %11590 = vmatmul.mubr.msk.f32.vlgmr.msra.gmra.mrb[72].mxu0 %vm22154_vm14, %v8259_v43  ;;  %v8249_v34 = vsel %vm22155_vm6, 0.0, %v8233_v51  ;;  %v7473_v10 = vcombine.high %v7281_v29, %v7281_v29  ;;  %v18944_v22 = vrot.slane %v7281_v29, %v21903_v62  ;;  %v18948_v40 = vcombine.high %v18791_v30, %v18791_v30  ;;  %vm22162_vm5 = vmmov %vm22161_vm0 }
 0x53d   :  { %11596 = vmatpush3.msra.mxu0 %v36_v13  ;;  %v7283_v54 = vsel %vm7251_vm1, %v7235_v63, %v7267_v46  ;;  %v18951_v20 = vrot.slane %v7439_v47, %v21903_v62  ;;  %v18955_v43 = vcombine.high %v18940_v12, %v18940_v12  ;;  %v18959_v13 = vcombine.high %v18802_v57, %v18802_v57  ;;  %vm22163_vm1 = vmmov %vm22161_vm0 }
 0x53e   :  { %v7507_v42 = vcombine.high %v7283_v54, %v7283_v54  ;;  %11603 = vmatprep.subr.mxu0 %v18936_v59  ;;  %v18963_v46 = vrot.slane %v7473_v10, %v21903_v62  ;;  %v18967_v63 = vcombine.high %v18944_v22, %v18944_v22  ;;  %v18971_v3 = vrot.slane %v18940_v12, %v21722_v21  ;;  %vm22165_vm14 = vmmov %vm22161_vm0 }
 0x53f   :  { %v18974_v51 = vrot.slane %v7283_v54, %v21903_v62  ;;  %v18978_v4 = vrot.slane %v18955_v43, %v21722_v21  ;;  %v18982_v29 = vrot.slane %v18951_v20, %v21722_v21  ;;  %v18986_v10 = vrot.slane %v18944_v22, %v21722_v21  ;;  %vm22166_vm6 = vmmov %vm22161_vm0 }
 0x540   :  { %v18989_v47 = vrot.slane %v7507_v42, %v21903_v62  ;;  %v18993_v60 = vrot.slane %v18967_v63, %v21722_v21  ;;  %v18997_v54 = vrot.slane %v18963_v46, %v21722_v21  ;;  %v8430_v56 = vrot.slane %v18955_v43, %v21599_v35 }
 0x541   :  { %v19003_v45 = vcombine.high %v18974_v51, %v18974_v51  ;;  %v8226_v42 = vsel %vm3042_vm8, %v18978_v4, %v18971_v3  ;;  %v19010_v62 = vrot.slane %v18974_v51, %v21722_v21  ;;  %v8362_v44 = vrot.slane %v18783_v33, %v21599_v35 }
 0x542   :  { %22156 = vst [vmem:[#allocation54_spill] sm:$0xff] %v18997_v54  ;;  %v19014_v38 = vrot.slane %v18989_v47, %v21722_v21  ;;  %v8227_v43 = vsel %vm3044_vm9, %v18982_v29, %v8226_v42  ;;  %v8228_v11 = vsel %vm3042_vm8, %v18993_v60, %v18986_v10  ;;  %v8374_v42 = vrot.slane %v18948_v40, %v21599_v35 }
 0x543   :  { %v19025_v28 = vrot.slane %v19003_v45, %v21722_v21  ;;  %v8229_v6 = vsel %vm3044_vm9, %v18997_v54, %v8228_v11  ;;  %v8246_v48 = vsel %vm22157_vm10, 0.0, %v8227_v43  ;;  %v8378_v30 = vrot.slane %v18787_v49, %v21599_v35  ;;  %vm22167_vm10 = vmmov %vm22161_vm0 }
 0x544   :  { %v8247_v39 = vsel %vm22158_vm7, 0.0, %v8229_v6  ;;  %v8382_v11 = vrot.slane %v18806_v27, %v21599_v35  ;;  %v8386_v33 = vrot.slane %v18802_v57, %v21599_v35  ;;  %v8487_v52 = vsel %vm3040_vm4, %v8366_v0, %v8362_v44  ;;  %vm22174_vm7 = vmmov %vm22161_vm0 }
 0x545   :  { %v8230_v58 = vsel %vm3042_vm8, %v19025_v28, %v19010_v62  ;;  %v8260_v54 = vcombine.low %v8246_v48, %v8247_v39  ;;  %v8390_v37 = vrot.slane %v18959_v13, %v21599_v35  ;;  %v8488_v32 = vsel %vm3042_vm8, %v8370_v18, %v8487_v52 }
 0x546   :  { %v8231_v43 = vsel %vm3044_vm9, %v19014_v38, %v8230_v58  ;;  %v19055_v49 = vcombine.high %v18852_v2, %v18852_v2  ;;  %v8489_v58 = vsel %vm3044_vm9, %v8374_v42, %v8488_v32  ;;  %v19061_v48 = vcombine.high %v18862_v17, %v18862_v17 }
 0x547   :  { %v8248_v6 = vsel %vm22159_vm12, 0.0, %v8231_v43  ;;  %11592 = vmatprep.mubr.msk.f32.mxu0 %vm22160_vm11, %v8260_v54  ;;  %v8398_v57 = vrot.slane %v18856_v55, %v21599_v35  ;;  %v8490_v27 = vsel %vm3046_vm2, %v8378_v30, %v8489_v58  ;;  %v8394_v18 = vrot.slane %v18837_v15, %v21599_v35  ;;  %vm22176_vm11 = vmmov %vm22159_vm12 }
 0x548   :  { %v8261_v39 = vcombine.low %v8248_v6, %v8249_v34  ;;  %v8402_v52 = vrot.slane %v18852_v2, %v21599_v35  ;;  %v8406_v44 = vrot.slane %v19055_v49, %v21599_v35  ;;  %v8491_v32 = vsel %vm3048_vm13, %v8382_v11, %v8490_v27 }
 0x549   :  { %v8410_v0 = vrot.slane %v18844_v31, %v21599_v35  ;;  %v8414_v55 = vrot.slane %v18866_v19, %v21599_v35  ;;  %v8418_v34 = vrot.slane %v18862_v17, %v21599_v35  ;;  %v8492_v15 = vsel %vm3050_vm15, %v8386_v33, %v8491_v32 }
 0x54a   :  { %11593 = vmatmul.mubr.msk.f32.gmra.mrb[74].mxu0 %vm22161_vm0, %v8261_v39  ;;  %v8494_v2 = vsel %vm3040_vm4, %v8398_v57, %v8394_v18  ;;  %v19084_v54 = vcombine.high %v18951_v20, %v18951_v20  ;;  %v19088_v42 = vcombine.high %v18963_v46, %v18963_v46  ;;  %v8493_v31 = vsel %vm3052_vm3, %v8390_v37, %v8492_v15 }
 0x54b   :  { %v8495_v30 = vsel %vm3042_vm8, %v8402_v52, %v8494_v2  ;;  %v8426_v19 = vrot.slane %v18940_v12, %v21599_v35  ;;  %v8434_v17 = vrot.slane %v18951_v20, %v21599_v35  ;;  %11597 = vmatprep.mubr.msk.f32.mxu0 %vm22162_vm5, %v8493_v31  ;;  %v8422_v33 = vrot.slane %v19061_v48, %v21599_v35  ;;  %vm22184_vm5 = vmmov %vm22161_vm0 }
 0x54c   :  { %v8496_v11 = vsel %vm3044_vm9, %v8406_v44, %v8495_v30  ;;  %v8438_v43 = vrot.slane %v19084_v54, %v21599_v35  ;;  %v8442_v37 = vrot.slane %v18944_v22, %v21599_v35  ;;  %v8446_v12 = vrot.slane %v18967_v63, %v21599_v35 }
 0x54d   :  { %v8497_v6 = vsel %vm3046_vm2, %v8410_v0, %v8496_v11  ;;  %v8450_v20 = vrot.slane %v18963_v46, %v21599_v35  ;;  %v8501_v39 = vsel %vm3040_vm4, %v8430_v56, %v8426_v19  ;;  %v19114_v27 = vcombine.high %v18989_v47, %v18989_v47 }
 0x54e   :  { %v8498_v58 = vsel %vm3048_vm13, %v8414_v55, %v8497_v6  ;;  %v8502_v57 = vsel %vm3042_vm8, %v8434_v17, %v8501_v39  ;;  %v19118_v22 = vcombine.high %v18427_v1, %v18427_v1  ;;  %v8454_v63 = vrot.slane %v19088_v42, %v21599_v35  ;;  %v38_v55 = vld [vmem:[%s19777_s1 + $0x150] sm:$0xff] }
 0x54f   :  { %v8499_v18 = vsel %vm3050_vm15, %v8418_v34, %v8498_v58  ;;  %v8503_v46 = vsel %vm3044_vm9, %v8438_v43, %v8502_v57  ;;  %v8466_v56 = vrot.slane %v18989_v47, %v21599_v35  ;;  %v8458_v32 = vrot.slane %v18974_v51, %v21599_v35  ;;  %v22168_v57 = vld [vmem:[#allocation22_spill] sm:$0xff] }
 0x550   :  { %v8500_v52 = vsel %vm3052_vm3, %v8422_v33, %v8499_v18  ;;  %v8504_v44 = vsel %vm3046_vm2, %v8442_v37, %v8503_v46  ;;  %v8470_v0 = vrot.slane %v19114_v27, %v21599_v35  ;;  %v8474_v47 = vrot.slane %v18415_v36, %v21599_v35  ;;  %v22169_v18 = vld [vmem:[#allocation104_spill] sm:$0xff]  ;;  %v22171_v46 = vld [vmem:[#allocation54_spill] sm:$0xff] }
 0x551   :  { %11598 = vmatmul.mubr.msk.f32.vlgmr.msra.gmra.mrb[72].mxu0 %vm22163_vm1, %v8500_v52  ;;  %v8505_v34 = vsel %vm3048_vm13, %v8446_v12, %v8504_v44  ;;  %v8478_v15 = vrot.slane %v18431_v23, %v21599_v35  ;;  %v8482_v51 = vrot.slane %v18427_v1, %v21599_v35  ;;  %v8486_v31 = vrot.slane %v19118_v22, %v21599_v35  ;;  %v22175_v44 = vld [vmem:[#allocation119_spill] sm:$0xff]  ;;  %vm22187_vm1 = vmmov %vm22161_vm0 }
 0x552   :  { %11604 = vmatpush3.msra.mxu0 %v18936_v59  ;;  %v8506_v2 = vsel %vm3050_vm15, %v8450_v20, %v8505_v34  ;;  %v22164_v30 = vrot.slane %v19003_v45, %v21599_v35  ;;  %v8615_v36 = vrot.slane %v18948_v40, %v21722_v21  ;;  %v8644_v1 = vsel %vm3040_vm4, %v18814_v16, %v18810_v24 }
 0x553   :  { %v8507_v23 = vsel %vm3052_vm3, %v8454_v63, %v8506_v2  ;;  %11611 = vmatprep.subr.mxu0 %v38_v55  ;;  %v8623_v59 = vrot.slane %v19055_v49, %v21722_v21  ;;  %v8619_v33 = vrot.slane %v18959_v13, %v21722_v21  ;;  %v8645_v40 = vsel %vm3042_vm8, %v18818_v14, %v8644_v1  ;;  %v22170_v63 = vld [vmem:[#allocation97_spill] sm:$0xff] }
 0x554   :  { %v8508_v19 = vsel %vm3040_vm4, %v22164_v30, %v8458_v32  ;;  %11600 = vmatprep.mubr.msk.f32.mxu0 %vm22165_vm14, %v8507_v23  ;;  %v8651_v11 = vsel %vm3040_vm4, %v18876_v9, %v18872_v25  ;;  %v8646_v16 = vsel %vm3044_vm9, %v8615_v36, %v8645_v40  ;;  %v8631_v43 = vrot.slane %v19084_v54, %v21722_v21  ;;  %v22178_v2 = vld [vmem:[#allocation5_spill] sm:$0xff]  ;;  %v22182_v23 = vld [vmem:[#allocation122_spill] sm:$0xff] }
 0x555   :  { %v8509_v17 = vsel %vm3042_vm8, %v8466_v56, %v8508_v19  ;;  %v8652_v49 = vsel %vm3042_vm8, %v18880_v50, %v8651_v11  ;;  %v8647_v13 = vsel %vm3046_vm2, %v18822_v5, %v8646_v16  ;;  %v8627_v14 = vrot.slane %v19061_v48, %v21722_v21  ;;  %v22181_v19 = vld [vmem:[#allocation11_spill] sm:$0xff] }
 0x556   :  { %v8510_v45 = vsel %vm3044_vm9, %v8470_v0, %v8509_v17  ;;  %v8653_v25 = vsel %vm3044_vm9, %v8623_v59, %v8652_v49  ;;  %v8648_v6 = vsel %vm3048_vm13, %v18830_v41, %v8647_v13  ;;  %v8658_v54 = vsel %vm3040_vm4, %v18978_v4, %v18971_v3  ;;  %v22183_v59 = vld [vmem:[#allocation33_spill] sm:$0xff]  ;;  %v22189_v16 = vld [vmem:[#allocation103_spill] sm:$0xff] }
 0x557   :  { %v8511_v24 = vsel %vm3046_vm2, %v8474_v47, %v8510_v45  ;;  %v8654_v50 = vsel %vm3046_vm2, %v18884_v53, %v8653_v25  ;;  %v8649_v5 = vsel %vm3050_vm15, %v18834_v61, %v8648_v6  ;;  %v8659_v20 = vsel %vm3042_vm8, %v18982_v29, %v8658_v54  ;;  %v22191_v25 = vld [vmem:[#allocation111_spill] sm:$0xff]  ;;  %v22194_v54 = vld [vmem:[#allocation81_spill] sm:$0xff] }
 0x558   :  { %v8512_v37 = vsel %vm3048_vm13, %v8478_v15, %v8511_v24  ;;  %v8655_v48 = vsel %vm3048_vm13, %v18888_v7, %v8654_v50  ;;  %v8650_v41 = vsel %vm3052_vm3, %v8619_v33, %v8649_v5  ;;  %v8660_v3 = vsel %vm3044_vm9, %v8631_v43, %v8659_v20  ;;  %v22177_v15 = vld [vmem:[#allocation116_spill] sm:$0xff]  ;;  %v22188_v24 = vld [vmem:[#allocation50_spill] sm:$0xff]  ;;  %v22193_v50 = vld [vmem:[#allocation105_spill] sm:$0xff] }
 0x559   :  { %v8513_v9 = vsel %vm3050_vm15, %v8482_v51, %v8512_v37  ;;  %v8656_v53 = vsel %vm3050_vm15, %v18892_v26, %v8655_v48  ;;  %v8639_v4 = vrot.slane %v19114_v27, %v21722_v21  ;;  %v8635_v7 = vrot.slane %v19088_v42, %v21722_v21  ;;  %v22190_v37 = vld [vmem:[#allocation297_spill] sm:$0xff]  ;;  %v22195_v5 = vld [vmem:[#allocation291_spill] sm:$0xff]  ;;  %v22196_v48 = vld [vmem:[#allocation48_spill] sm:$0xff] }
 0x55a   :  { %v8514_v12 = vsel %vm3052_vm3, %v8486_v31, %v8513_v9  ;;  %v8657_v61 = vsel %vm3052_vm3, %v8627_v14, %v8656_v53  ;;  %v8661_v29 = vsel %vm3046_vm2, %v18986_v10, %v8660_v3  ;;  %v8665_v39 = vsel %vm3040_vm4, %v19025_v28, %v19010_v62  ;;  %v22172_v62 = vld [vmem:[#allocation96_spill] sm:$0xff]  ;;  %v22179_v31 = vld [vmem:[#allocation13_spill] sm:$0xff] }
 0x55b   :  { %11601 = vmatmul.mubr.msk.f32.gmra.mrb[74].mxu0 %vm22166_vm6, %v8514_v12  ;;  %v8662_v26 = vsel %vm3048_vm13, %v18993_v60, %v8661_v29  ;;  %v8666_v58 = vsel %vm3042_vm8, %v19014_v38, %v8665_v39  ;;  %v8793_v27 = vsel %vm3042_vm8, %v22168_v57, %v18568_v8  ;;  %v8795_v42 = vsel %vm3042_vm8, %v22170_v63, %v22169_v18  ;;  %v22173_v60 = vld [vmem:[#allocation106_spill] sm:$0xff]  ;;  %v19232_v38 = vld [vmem:[%s19777_s1 + $0x158] sm:$0xff] }
 0x55c   :  { %11605 = vmatprep.mubr.msk.f32.mxu0 %vm22167_vm10, %v8650_v41  ;;  %v8663_v10 = vsel %vm3050_vm15, %v22171_v46, %v8662_v26  ;;  %v8667_v56 = vsel %vm3044_vm9, %v8639_v4, %v8666_v58  ;;  %v8794_v28 = vsel %vm3044_vm9, %v22172_v62, %v8793_v27  ;;  %v8796_v52 = vsel %vm3044_vm9, %v22173_v60, %v8795_v42  ;;  %v22192_v9 = vld [vmem:[#allocation68_spill] sm:$0xff]  ;;  %v22198_v29 = vld [vmem:[#allocation287_spill] sm:$0xff]  ;;  %v22199_v58 = vld [vmem:[#allocation113_spill] sm:$0xff] }
 0x55d   :  { %v8664_v8 = vsel %vm3052_vm3, %v8635_v7, %v8663_v10  ;;  %v8668_v32 = vsel %vm3046_vm2, %v22175_v44, %v8667_v56  ;;  %v8817_v0 = vsel %vm22159_vm12, 0.0, %v8794_v28  ;;  %v8818_v34 = vsel %vm22176_vm11, 0.0, %v8796_v52  ;;  %v22197_v53 = vld [vmem:[#allocation16_spill] sm:$0xff]  ;;  %vm22201_vm10 = vmmov %vm22176_vm11 }
 0x55e   :  { %v8643_v47 = vrot.slane %v19118_v22, %v21722_v21  ;;  %v8669_v51 = vsel %vm3048_vm13, %v22177_v15, %v8668_v32  ;;  %v22180_v30 = vsub.f32 %v22178_v2, %v22179_v31  ;;  %v8833_v1 = vcombine.low %v8817_v0, %v8818_v34  ;;  %v22185_v22 = vld [vmem:[#allocation21_spill] sm:$0xff]  ;;  %v22200_v27 = vld [vmem:[#allocation112_spill] sm:$0xff]  ;;  %v22202_v32 = vld [vmem:[#allocation74_spill] sm:$0xff] }
 0x55f   :  { %11606 = vmatmul.mubr.msk.f32.vlgmr.msra.gmra.mrb[72].mxu0 %vm22174_vm7, %v8657_v61  ;;  %v8670_v17 = vsel %vm3050_vm15, %v22182_v23, %v8669_v51  ;;  %v22186_v33 = vsub.f32 %v22185_v22, %v22179_v31  ;;  %v8805_v49 = vsel %vm3042_vm8, %v22189_v16, %v22188_v24  ;;  %v8797_v6 = vsel %vm3042_vm8, %v22192_v9, %v22191_v25  ;;  %v22203_v0 = vld [vmem:[#allocation10_spill] sm:$0xff]  ;;  %vm22204_vm7 = vmmov %vm22201_vm10  ;;  %v40_v24 = vld [vmem:[%s19777_s1 + $0x160] sm:$0xff] }
 0x560   :  { %11612 = vmatpush3.msra.mxu0 %v38_v55  ;;  %11608 = vmatprep.mubr.msk.f32.mxu0 %vm22161_vm0, %v8664_v8  ;;  %v7210_v36 = vmul.f32 %v22181_v19, %v22180_v30  ;;  %v8671_v55 = vsel %vm3052_vm3, %v8643_v47, %v8670_v17  ;;  %v8806_v13 = vsel %vm3044_vm9, %v22190_v37, %v8805_v49  ;;  %vm22205_vm12 = vmmov %vm22204_vm7  ;;  %v22207_v17 = vld [vmem:[#allocation40_spill] sm:$0xff]  ;;  %v22209_v22 = vld [vmem:[#allocation82_spill] sm:$0xff] }
 0x561   :  { %11619 = vmatprep.subr.mxu0 %v19232_v38  ;;  %v7218_v40 = vmul.f32 %v22181_v19, %v22186_v33  ;;  %v8801_v12 = vsel %vm3042_vm8, %v22194_v54, %v22193_v50  ;;  %v8803_v20 = vsel %vm3042_vm8, %v22196_v48, %v22195_v5  ;;  %v8798_v39 = vsel %vm3044_vm9, %v22198_v29, %v8797_v6  ;;  %vm22206_vm11 = vmmov %vm22204_vm7  ;;  %v22210_v49 = vld [vmem:[#allocation90_spill] sm:$0xff]  ;;  %v22218_v29 = vld [vmem:[#allocation41_spill] sm:$0xff] }
 0x562   :  { %v7230_v45 = vadd.f32 %v22183_v59, %v7210_v36  ;;  %v8802_v57 = vsel %vm3044_vm9, %v22199_v58, %v8801_v12  ;;  %v8804_v42 = vsel %vm3044_vm9, %v22200_v27, %v8803_v20  ;;  %v8819_v52 = vsel %vm22201_vm10, 0.0, %v8798_v39  ;;  %vm22208_vm0 = vmmov %vm22204_vm7  ;;  %v22216_v20 = vld [vmem:[#allocation89_spill] sm:$0xff]  ;;  %v22220_v39 = vld [vmem:[#allocation63_spill] sm:$0xff] }
 0x563   :  { %11609 = vmatmul.mubr.msk.f32.gmra.mrb[74].mxu0 %vm22184_vm5, %v8671_v55  ;;  %v7238_v43 = vadd.f32 %v22183_v59, %v7218_v40  ;;  %v8966_v34 = vsel %vm3046_vm2, %v22203_v0, %v22202_v32  ;;  %v8821_v15 = vsel %vm22204_vm7, 0.0, %v8802_v57  ;;  %v8822_v51 = vsel %vm22205_vm12, 0.0, %v8804_v42  ;;  %vm22212_vm5 = vmmov %vm22187_vm1  ;;  %v22222_v57 = vld [vmem:[#allocation98_spill] sm:$0xff] }
 0x564   :  { %11613 = vmatprep.mubr.msk.f32.mxu0 %vm22187_vm1, %v8833_v1  ;;  %vm7246_vm14 = vcmp.gt.f32.partialorder %v7230_v45, 0.0  ;;  %v7262_v11 = vmul.f32 0.01, %v7230_v45  ;;  %v8967_v55 = vsel %vm3048_vm13, %v22207_v17, %v8966_v34  ;;  %v8835_v40 = vcombine.low %v8821_v15, %v8822_v51  ;;  %vm22213_vm1 = vmmov %vm22208_vm0  ;;  %v22224_v34 = vld [vmem:[#allocation115_spill] sm:$0xff] }
 0x565   :  { %vm7254_vm6 = vcmp.gt.f32.partialorder %v7238_v43, 0.0  ;;  %v7270_v4 = vmul.f32 0.01, %v7238_v43  ;;  %vm22221_vm10 = vmmov %vm22212_vm5  ;;  %v22226_v15 = vld [vmem:[#allocation279_spill] sm:$0xff] }
 0x566   :  { %v7278_v14 = vsel %vm7246_vm14, %v7230_v45, %v7262_v11  ;;  %v8823_v45 = vsel %vm22208_vm0, 0.0, %v8806_v13  ;;  %vm22215_vm14 = vmmov %vm22212_vm5 }
 0x567   :  { %v7422_v41 = vcombine.high %v7278_v14, %v7278_v14  ;;  %v7429_v3 = vrot.slane %v7278_v14, %v22197_v53  ;;  %v7286_v26 = vsel %vm7254_vm6, %v7238_v43, %v7270_v4  ;;  %v22211_v43 = vld [vmem:[#allocation95_spill] sm:$0xff]  ;;  %v22214_v14 = vld [vmem:[#allocation53_spill] sm:$0xff]  ;;  %vm22219_vm6 = vmmov %vm22212_vm5 }
 0x568   :  { %v7558_v46 = vcombine.high %v7286_v26, %v7286_v26  ;;  %v7565_v10 = vrot.slane %v7286_v26, %v22197_v53  ;;  %v8974_v37 = vsel %vm3046_vm2, %v22211_v43, %v22210_v49  ;;  %v8968_v25 = vsel %vm3050_vm15, %v22214_v14, %v8967_v55  ;;  %vm22225_vm7 = vmmov %vm22212_vm5  ;;  %v22230_v55 = vld [vmem:[#allocation286_spill] sm:$0xff] }
 0x569   :  { %v7436_v61 = vrot.slane %v7422_v41, %v22197_v53  ;;  %v7437_v7 = vcombine.high %v7429_v3, %v7429_v3  ;;  %v8772_v56 = vrot.slane %v7429_v3, %v21722_v21  ;;  %v8937_v2 = vrot.slane %v7429_v3, %v21599_v35  ;;  %v22217_v3 = vld [vmem:[#allocation110_spill] sm:$0xff]  ;;  %vm22227_vm12 = vmmov %vm22212_vm5 }
 0x56a   :  { %v7572_v8 = vrot.slane %v7558_v46, %v22197_v53  ;;  %v7573_v44 = vcombine.high %v7565_v10, %v7565_v10  ;;  %v8784_v30 = vrot.slane %v7565_v10, %v21722_v21  ;;  %v8953_v9 = vrot.slane %v7565_v10, %v21599_v35  ;;  %vm22231_vm0 = vmmov %vm22212_vm5 }
 0x56b   :  { %v8776_v62 = vrot.slane %v7437_v7, %v21722_v21  ;;  %v19287_v28 = vrot.slane %v7436_v61, %v21722_v21  ;;  %v8970_v33 = vsel %vm3046_vm2, %v8937_v2, %v22209_v22  ;;  %v8941_v16 = vrot.slane %v7437_v7, %v21599_v35 }
 0x56c   :  { %v8788_v19 = vrot.slane %v7573_v44, %v21722_v21  ;;  %v8792_v36 = vrot.slane %v7572_v8, %v21722_v21  ;;  %v7438_v50 = vcombine.high %v7436_v61, %v7436_v61  ;;  %v8945_v12 = vrot.slane %v7436_v61, %v21599_v35 }
 0x56d   :  { %v8799_v47 = vsel %vm3042_vm8, %v8776_v62, %v8772_v56  ;;  %v8971_v54 = vsel %vm3048_vm13, %v8941_v16, %v8970_v33  ;;  %v8975_v41 = vsel %vm3048_vm13, %v22216_v20, %v8974_v37  ;;  %v8978_v4 = vsel %vm3046_vm2, %v8953_v9, %v22217_v3 }
 0x56e   :  { %v8800_v31 = vsel %vm3044_vm9, %v19287_v28, %v8799_v47  ;;  %v8807_v59 = vsel %vm3042_vm8, %v8788_v19, %v8784_v30  ;;  %v8957_v7 = vrot.slane %v7573_v44, %v21599_v35  ;;  %v8969_v26 = vsel %vm3052_vm3, %v22220_v39, %v8968_v25  ;;  %v22223_v44 = vld [vmem:[#allocation114_spill] sm:$0xff] }
 0x56f   :  { %v8820_v23 = vsel %vm22206_vm11, 0.0, %v8800_v31  ;;  %v8808_v11 = vsel %vm3044_vm9, %v8792_v36, %v8807_v59  ;;  %v8972_v58 = vsel %vm3050_vm15, %v8945_v12, %v8971_v54  ;;  %v8949_v61 = vrot.slane %v7438_v50, %v21599_v35  ;;  %v22228_v31 = vld [vmem:[#allocation120_spill] sm:$0xff]  ;;  %vm22229_vm11 = vmmov %vm22212_vm5 }
 0x570   :  { %v8834_v1 = vcombine.low %v8819_v52, %v8820_v23  ;;  %v8824_v13 = vsel %vm22213_vm1, 0.0, %v8808_v11  ;;  %v8976_v42 = vsel %vm3050_vm15, %v22222_v57, %v8975_v41  ;;  %v7574_v46 = vcombine.high %v7572_v8, %v7572_v8  ;;  %vm22234_vm1 = vmmov %vm22231_vm0 }
 0x571   :  { %v8836_v6 = vcombine.low %v8823_v45, %v8824_v13  ;;  %v8979_v10 = vsel %vm3048_vm13, %v8957_v7, %v8978_v4  ;;  %v8961_v52 = vrot.slane %v7572_v8, %v21599_v35  ;;  %v9091_v32 = vsel %vm3046_vm2, %v8772_v56, %v22223_v44  ;;  %v22233_v45 = vld [vmem:[#allocation117_spill] sm:$0xff] }
 0x572   :  { %11614 = vmatmul.mubr.msk.f32.vlgmr.msra.gmra.mrb[72].mxu0 %vm22212_vm5, %v8834_v1  ;;  %v8973_v0 = vsel %vm3052_vm3, %v8949_v61, %v8972_v58  ;;  %v9095_v47 = vsel %vm3046_vm2, %v22195_v5, %v22224_v34  ;;  %v8977_v51 = vsel %vm3052_vm3, %v22226_v15, %v8976_v42  ;;  %v9092_v8 = vsel %vm3048_vm13, %v8776_v62, %v9091_v32  ;;  %vm22232_vm5 = vmmov %vm22231_vm0 }
 0x573   :  { %11620 = vmatpush3.msra.mxu0 %v19232_v38  ;;  %11616 = vmatprep.mubr.msk.f32.mxu0 %vm22215_vm14, %v8835_v40  ;;  %v9087_v38 = vsel %vm3046_vm2, %v22169_v18, %v22218_v29  ;;  %v8980_v2 = vsel %vm3050_vm15, %v8961_v52, %v8979_v10  ;;  %v9096_v5 = vsel %vm3048_vm13, %v22196_v48, %v9095_v47  ;;  %vm22235_vm14 = vmmov %vm22231_vm0  ;;  %v11993_v11 = vmov 0.0|0.0  }
 0x574   :  { %11627 = vmatprep.subr.mxu0 %v40_v24  ;;  %v9088_v18 = vsel %vm3048_vm13, %v22170_v63, %v9087_v38  ;;  %v8965_v63 = vrot.slane %v7574_v46, %v21599_v35  ;;  %v9099_v23 = vsel %vm3046_vm2, %v8784_v30, %v22228_v31  ;;  %v9093_v59 = vsel %vm3050_vm15, %v19287_v28, %v9092_v8 }
 0x575   :  { %v9089_v56 = vsel %vm3050_vm15, %v22173_v60, %v9088_v18  ;;  %v9082_v60 = vrot.slane %v7438_v50, %v21722_v21  ;;  %v9097_v48 = vsel %vm3050_vm15, %v22200_v27, %v9096_v5  ;;  %v9100_v62 = vsel %vm3048_vm13, %v8788_v19, %v9099_v23  ;;  %v43_v27 = vld [vmem:[%s19777_s1 + $0x1c0] sm:$0xff]  ;;  %v44_v19 = vld [vmem:[%s19777_s1 + $0x1c8] sm:$0xff] }
 0x576   :  { %11617 = vmatmul.mubr.msk.f32.gmra.mrb[74].mxu0 %vm22219_vm6, %v8836_v6  ;;  %v8981_v17 = vsel %vm3052_vm3, %v8965_v63, %v8980_v2  ;;  %v9090_v1 = vsel %vm3052_vm3, %v22230_v55, %v9089_v56  ;;  %v9098_v22 = vsel %vm3052_vm3, %v22233_v45, %v9097_v48  ;;  %v9101_v33 = vsel %vm3050_vm15, %v8792_v36, %v9100_v62  ;;  %v61_v55 = vld [vmem:[%s19778_s2 + $0x4] sm:$0x3] }
 0x577   :  { %11621 = vmatprep.mubr.msk.f32.mxu0 %vm22221_vm10, %v8969_v26  ;;  %v9094_v30 = vsel %vm3052_vm3, %v9082_v60, %v9093_v59  ;;  %v9086_v28 = vrot.slane %v7574_v46, %v21722_v21  ;;  %v11733_v36 = vpack.c.bf16 %v44_v19, %v43_v27  ;;  %vm11994_vm6 = vmmov 0   ;;  %v19412_v19 = vld [vmem:[%s19777_s1 + $0x1b0] sm:$0xff] }
 0x578   :  { %vm9200_vm10 = vcmask 130048   ;;  %v9254_v48 = vrot.slane %v61_v55, %v21722_v21 }
 0x579   :  { %v9102_v40 = vsel %vm3052_vm3, %v9086_v28, %v9101_v33 }
 0x57a   :  { %11622 = vmatmul.mubr.msk.f32.vlgmr.msra.gmra.mrb[72].mxu0 %vm22225_vm7, %v8973_v0 }
 0x57b   :  { %11628 = vmatpush3.msra.mxu0 %v40_v24  ;;  %11624 = vmatprep.mubr.msk.f32.mxu0 %vm22227_vm12, %v8977_v51  ;;  %v22236_v24 = vmov 0.0  }
 0x57c   :  { %11732 = vmatprep.subr.bf16.mxu0 %v11993_v11 }
 0x57e   :  { %11625 = vmatmul.mubr.msk.f32.gmra.mrb[74].mxu0 %vm22229_vm11, %v8981_v17 }
 0x57f   :  { %11629 = vmatprep.mubr.msk.f32.mxu0 %vm22231_vm0, %v9090_v1 }
 0x582   :  { %11630 = vmatmul.mubr.msk.f32.vlgmr.msra.gmra.mrb[72].mxu0 %vm22232_vm5, %v9094_v30  ;;  %vm22237_vm5 = vcmask 1040384  }
 0x583   :  { %11632 = vmatprep.mubr.msk.f32.mxu0 %vm22234_vm1, %v9098_v22  ;;  %11734 = vmatpush3.bf16.msra.mxu0 %v11733_v36  ;;  %v19417_v36 = vld [vmem:[%s19777_s1 + $0x1b8] sm:$0xff]  ;;  %vm22238_vm1 = vmmov %vm22237_vm5 }
 0x584   :  { %11735 = vmatprep.subr.bf16.mxu0 %v11993_v11 }
 0x586   :  { %11633 = vmatmul.mubr.msk.f32.gmra.mrb[74].mxu0 %vm22235_vm14, %v9102_v40  ;;  %vm22239_vm14 = vmmov %vm22238_vm1 }
 0x587   :  { %11639 = vmatprep.mubr.msk.f32.mxu0 %vm11994_vm6, %v22236_v24 }
 0x655   :  { %v11631_v16 = vpop.f32.mrb[72].mxu0 }
 0x656   :  { %v9202_v49 = vsel %vm9200_vm10, %v11631_v16, 0.0  ;;  %v9215_v43 = vmul.f32 %v11631_v16, %v11631_v16  ;;  %v9177_v37 = vpop.f32.mrb[73].mxu0 }
 0x657   :  { %v9201_v13 = vsel %vm9200_vm10, %v9177_v37, 0.0  ;;  %v9214_v14 = vmul.f32 %v9177_v37, %v9177_v37 }
 0x658   :  { %v9219_v25 = vsel %vm9200_vm10, %v9215_v43, 0.0  ;;  %v9203_v9 = vadd.f32 %v9202_v49, %v9201_v13  ;;  %v19422_v13 = vld [vmem:[%s19777_s1 + $0x1d0] sm:$0xff] }
 0x659   :  { %v9218_v6 = vsel %vm9200_vm10, %v9214_v14, 0.0  ;;  %v11634_v50 = vpop.f32.mrb[74].mxu0  ;;  %v19427_v14 = vld [vmem:[%s19777_s1 + $0x1d8] sm:$0xff] }
 0x65a   :  { %v9220_v54 = vadd.f32 %v9219_v25, %v9218_v6  ;;  %v9187_v12 = vpop.f32.mrb[75].mxu0  ;;  %v9217_v20 = vmul.f32 %v11634_v50, %v11634_v50  ;;  %v9206_v7 = vsel %vm9200_vm10, %v11634_v50, 0.0  ;;  %v11736_v6 = vpack.c.bf16 %v19417_v36, %v19412_v19 }
 0x65b   :  { %v9204_v41 = vsel %vm9200_vm10, %v9187_v12, 0.0  ;;  %v9216_v3 = vmul.f32 %v9187_v12, %v9187_v12 }
 0x65c   :  { %v9205_v4 = vadd.f32 %v9204_v41, %v9203_v9  ;;  %v9223_v26 = vsel %vm9200_vm10, %v9217_v20, 0.0 }
 0x65d   :  { %v9221_v29 = vsel %vm9200_vm10, %v9216_v3, 0.0  ;;  %v11739_v3 = vpack.c.bf16 %v19427_v14, %v19422_v13  ;;  %v48_v13 = vld [vmem:[%s19777_s1 + $0x1e8] sm:$0xff] }
 0x65e   :  { %v9207_v38 = vadd.f32 %v9206_v7, %v9205_v4  ;;  %v9222_v39 = vadd.f32 %v9221_v29, %v9220_v54 }
 0x660   :  { %v9208_v58 = vrot.slane %v9207_v38, 4  ;;  %v9224_v61 = vadd.f32 %v9223_v26, %v9222_v39 }
 0x662   :  { %v9209_v57 = vadd.f32 %v9208_v58, %v9207_v38  ;;  %v9225_v42 = vrot.slane %v9224_v61, 4 }
 0x664   :  { %v9210_v46 = vrot.slane %v9209_v57, 2  ;;  %v9226_v10 = vadd.f32 %v9225_v42, %v9224_v61 }
 0x666   :  { %v9211_v52 = vadd.f32 %v9210_v46, %v9209_v57  ;;  %v9227_v18 = vrot.slane %v9226_v10, 2 }
 0x668   :  { %v9212_v44 = vrot.slane %v9211_v52, 1  ;;  %v9228_v32 = vadd.f32 %v9227_v18, %v9226_v10 }
 0x66a   :  { %v9213_v0 = vadd.f32 %v9212_v44, %v9211_v52  ;;  %v9229_v34 = vrot.slane %v9228_v32, 1 }
 0x66c   :  { %v9230_v47 = vadd.f32 %v9229_v34, %v9228_v32  ;;  %v9231_v15 = vmul.f32 0.03125, %v9213_v0 }
 0x66e   :  { %v9232_v51 = vmul.f32 0.03125, %v9230_v47  ;;  %v9233_v2 = vmul.f32 %v9231_v15, %v9231_v15  ;;  %v9236_v63 = vsub.f32 %v9177_v37, %v9231_v15  ;;  %v9237_v56 = vsub.f32 %v11631_v16, %v9231_v15 }
 0x66f   :  { %v9238_v8 = vsub.f32 %v9187_v12, %v9231_v15  ;;  %v9239_v5 = vsub.f32 %v11634_v50, %v9231_v15 }
 0x670   :  { %v9234_v31 = vsub.f32 %v9232_v51, %v9233_v2 }
 0x672   :  { %v9235_v23 = vmax.f32 %v9234_v31, 0.0 }
 0x674   :  { %v9240_v17 = vadd.f32 1e-05, %v9235_v23 }
 0x676   :  { %11959 = vrsqrt.f32 %v9240_v17 }
 0x680   :  { %v11960_v1 = vpop.eup %11959 }
 0x681   :  { %v9242_v59 = vmul.f32 %v11960_v1, %v61_v55 }
 0x683   :  { %v9246_v60 = vrot.slane %v9242_v59, %v21599_v35 }
 0x685   :  { %v9247_v62 = vmul.f32 %v9246_v60, %v9236_v63  ;;  %v9248_v30 = vmul.f32 %v9246_v60, %v9237_v56  ;;  %v9249_v45 = vmul.f32 %v9246_v60, %v9238_v8  ;;  %v9250_v22 = vmul.f32 %v9246_v60, %v9239_v5 }
 0x687   :  { %v9255_v33 = vadd.f32 %v9254_v48, %v9247_v62  ;;  %v9256_v28 = vadd.f32 %v9254_v48, %v9248_v30  ;;  %v9257_v40 = vadd.f32 %v9254_v48, %v9249_v45  ;;  %v9258_v27 = vadd.f32 %v9254_v48, %v9250_v22 }
 0x689   :  { %vm9259_vm7 = vcmp.gt.f32.partialorder %v9255_v33, 0.0  ;;  %vm9260_vm12 = vcmp.gt.f32.partialorder %v9256_v28, 0.0  ;;  %vm9261_vm11 = vcmp.gt.f32.partialorder %v9257_v40, 0.0  ;;  %vm9262_vm0 = vcmp.gt.f32.partialorder %v9258_v27, 0.0 }
 0x68a   :  { %v9263_v16 = vmul.f32 0.01, %v9255_v33  ;;  %v9264_v49 = vmul.f32 0.01, %v9256_v28  ;;  %v9265_v43 = vmul.f32 0.01, %v9257_v40 }
 0x68b   :  { %v9266_v37 = vmul.f32 0.01, %v9258_v27 }
 0x68c   :  { %v9267_v25 = vsel %vm9259_vm7, %v9255_v33, %v9263_v16  ;;  %v9269_v9 = vsel %vm9261_vm11, %v9257_v40, %v9265_v43  ;;  %v19431_v50 = vsel %vm9260_vm12, %v9256_v28, %v9264_v49  ;;  %vm22240_vm7 = vmmov %vm22238_vm1  ;;  %v22243_v49 = vld [vmem:[#allocation99_spill] sm:$0xff] }
 0x68d   :  { %v9275_v54 = vcombine.high %v9267_v25, %v9267_v25  ;;  %v9309_v12 = vcombine.high %v9269_v9, %v9269_v9  ;;  %v19434_v20 = vrot.slane %v9269_v9, %v22197_v53  ;;  %v19437_v41 = vsel %vm9262_vm0, %v9258_v27, %v9266_v37  ;;  %vm22241_vm12 = vmmov %vm22238_vm1 }
 0x68e   :  { %v19442_v4 = vrot.slane %v9267_v25, %v22197_v53  ;;  %v19446_v7 = vrot.slane %v19431_v50, %v22197_v53  ;;  %v19450_v29 = vrot.slane %v19437_v41, %v22197_v53  ;;  %v9292_v58 = vcombine.high %v19431_v50, %v19431_v50  ;;  %vm22242_vm11 = vmmov %vm22238_vm1 }
 0x68f   :  { %v19453_v38 = vrot.slane %v9275_v54, %v22197_v53  ;;  %v19456_v39 = vrot.slane %v9309_v12, %v22197_v53  ;;  %v9665_v26 = vsel %vm22237_vm5, 0.0, %v19434_v20  ;;  %v19470_v46 = vcombine.high %v19434_v20, %v19434_v20  ;;  %vm22244_vm0 = vmmov %vm22238_vm1 }
 0x690   :  { %v9663_v61 = vsel %vm22238_vm1, 0.0, %v19442_v4  ;;  %v9664_v57 = vsel %vm22239_vm14, 0.0, %v19446_v7  ;;  %v9666_v42 = vsel %vm22240_vm7, 0.0, %v19450_v29  ;;  %v9290_v5 = vcombine.high %v19442_v4, %v19442_v4  ;;  %vm22245_vm5 = vmmov %vm22244_vm0 }
 0x691   :  { %v9325_v10 = vcombine.high %v19456_v39, %v19456_v39  ;;  %v19476_v52 = vrot.slane %v19456_v39, %v21722_v21  ;;  %v19480_v18 = vrot.slane %v19456_v39, %v21599_v35  ;;  %v9291_v44 = vcombine.high %v19453_v38, %v19453_v38  ;;  %vm22246_vm1 = vmmov %vm22244_vm0 }
 0x692   :  { %v9378_v32 = vrot.slane %v19453_v38, %v21599_v35  ;;  %v9354_v0 = vrot.slane %v19453_v38, %v21722_v21  ;;  %v9671_v34 = vcombine.low %v9663_v61, %v9664_v57  ;;  %v9672_v47 = vcombine.low %v9665_v26, %v9666_v42  ;;  %vm22247_vm14 = vmmov %vm22244_vm0 }
 0x693   :  { %v19489_v15 = vrot.slane %v9325_v10, %v21599_v35  ;;  %v9382_v51 = vrot.slane %v9291_v44, %v21599_v35  ;;  %v9358_v2 = vrot.slane %v9291_v44, %v21722_v21  ;;  %v19494_v63 = vrot.slane %v9325_v10, %v21722_v21 }
 0x694   :  { %v19497_v56 = vrot.slane %v9671_v34, %v22197_v53  ;;  %v19500_v8 = vrot.slane %v9672_v47, %v22197_v53  ;;  %v9307_v31 = vcombine.high %v19446_v7, %v19446_v7  ;;  %v19529_v33 = vcombine.high %v19450_v29, %v19450_v29 }
 0x695   :  { %v19507_v23 = vsel %vm3040_vm4, %v9382_v51, %v9378_v32  ;;  %v9392_v17 = vsel %vm3040_vm4, %v19489_v15, %v19480_v18  ;;  %v19513_v55 = vsel %vm3040_vm4, %v9358_v2, %v9354_v0  ;;  %v9368_v1 = vsel %vm3040_vm4, %v19494_v63, %v19476_v52 }
 0x696   :  { %v9393_v59 = vcombine.low %v22236_v24, %v19507_v23  ;;  %v9394_v60 = vcombine.low %v22236_v24, %v9392_v17  ;;  %v9369_v48 = vrot.slane %v19513_v55, 7  ;;  %v9370_v62 = vrot.slane %v9368_v1, 7 }
 0x697   :  { %v9573_v30 = vcombine.low %v22236_v24, %v19513_v55  ;;  %v9574_v45 = vcombine.low %v22236_v24, %v9368_v1  ;;  %v9687_v22 = vcombine.low %v19497_v56, %v19500_v8  ;;  %v9764_v12 = vrot.slane %v19442_v4, %v21599_v35  ;;  %v53_v56 = vld [vmem:[%s19777_s1 + $0x210] sm:$0xff]  ;;  %v54_v8 = vld [vmem:[%s19777_s1 + $0x218] sm:$0xff] }
 0x698   :  { %v9401_v28 = vrot.slane %v9393_v59, %v22197_v53  ;;  %v9408_v40 = vrot.slane %v9394_v60, %v22197_v53  ;;  %v9373_v27 = vsel %vm22241_vm12, 0.0, %v9369_v48  ;;  %v9374_v16 = vsel %vm22242_vm11, 0.0, %v9370_v62 }
 0x699   :  { %v9484_v43 = vcombine.low %v22243_v49, %v9373_v27  ;;  %v9485_v37 = vcombine.low %v22243_v49, %v9374_v16  ;;  %v9581_v25 = vrot.slane %v9573_v30, %v22197_v53  ;;  %v9588_v9 = vrot.slane %v9574_v45, %v22197_v53 }
 0x69a   :  { %v9409_v54 = vcombine.low %v9401_v28, %v9408_v40  ;;  %v9768_v26 = vrot.slane %v9290_v5, %v21599_v35  ;;  %v9772_v61 = vrot.slane %v19446_v7, %v21599_v35  ;;  %v9776_v44 = vrot.slane %v9307_v31, %v21599_v35 }
 0x69b   :  { %v9492_v57 = vrot.slane %v9484_v43, %v22197_v53  ;;  %v9499_v42 = vrot.slane %v9485_v37, %v22197_v53  ;;  %v19546_v10 = vcombine.low %v9581_v25, %v9588_v9  ;;  %v9780_v32 = vrot.slane %v19434_v20, %v21599_v35 }
 0x69c   :  { %11640 = vmatmul.mubr.msk.f32.vlgmr.msra.gmra.mrb[76].mxu0 %vm9200_vm10, %v9409_v54  ;;  %v9784_v0 = vrot.slane %v19470_v46, %v21599_v35  ;;  %v9788_v34 = vrot.slane %v19450_v29, %v21599_v35  ;;  %v9793_v47 = vsel %vm3040_vm4, %v9768_v26, %v9764_v12  ;;  %v9792_v2 = vrot.slane %v19529_v33, %v21599_v35  ;;  %v47_v54 = vld [vmem:[%s19777_s1 + $0x1e0] sm:$0xff] }
 0x69d   :  { %11737 = vmatpush3.bf16.msra.mxu0 %v11736_v6  ;;  %11646 = vmatprep.mubr.msk.f32.mxu0 %vm11994_vm6, %v22236_v24  ;;  %v9500_v51 = vcombine.low %v9492_v57, %v9499_v42  ;;  %v9794_v17 = vsel %vm3042_vm8, %v9772_v61, %v9793_v47  ;;  %v9876_v59 = vrot.slane %v19442_v4, %v21722_v21  ;;  %v9985_v19 = vsel %vm22244_vm0, 0.0, %v19453_v38 }
 0x69e   :  { %11738 = vmatprep.subr.bf16.mxu0 %v11993_v11  ;;  %v9795_v1 = vsel %vm3044_vm9, %v9776_v44, %v9794_v17  ;;  %v9880_v60 = vrot.slane %v9290_v5, %v21722_v21  ;;  %v9884_v6 = vrot.slane %v19446_v7, %v21722_v21  ;;  %v9888_v48 = vrot.slane %v9307_v31, %v21722_v21 }
 0x69f   :  { %v9796_v36 = vsel %vm3046_vm2, %v9780_v32, %v9795_v1  ;;  %v9892_v62 = vrot.slane %v19434_v20, %v21722_v21  ;;  %v9896_v4 = vrot.slane %v19470_v46, %v21722_v21  ;;  %v9306_v38 = vrot.slane %v9292_v58, %v22197_v53 }
 0x6a0   :  { %v9797_v30 = vsel %vm3048_vm13, %v9784_v0, %v9796_v36  ;;  %v9905_v5 = vsel %vm3040_vm4, %v9880_v60, %v9876_v59  ;;  %v9900_v7 = vrot.slane %v19450_v29, %v21722_v21  ;;  %v9326_v20 = vcombine.high %v19437_v41, %v19437_v41  ;;  %v52_v36 = vld [vmem:[%s19777_s1 + $0x208] sm:$0xff] }
 0x6a1   :  { %v9798_v45 = vsel %vm3050_vm15, %v9788_v34, %v9797_v30  ;;  %v9906_v31 = vsel %vm3042_vm8, %v9884_v6, %v9905_v5  ;;  %v9986_v40 = vsel %vm22245_vm5, 0.0, %v9306_v38  ;;  %v9308_v27 = vcombine.high %v9306_v38, %v9306_v38  ;;  %v58_v5 = vld [vmem:[%s19777_s1 + $0x238] sm:$0xff] }
 0x6a2   :  { %v9799_v28 = vsel %vm3052_vm3, %v9792_v2, %v9798_v45  ;;  %v9907_v46 = vsel %vm3044_vm9, %v9888_v48, %v9906_v31  ;;  %v9340_v58 = vrot.slane %v9326_v20, %v22197_v53  ;;  %v9987_v16 = vsel %vm22246_vm1, 0.0, %v19456_v39  ;;  %v55_v48 = vld [vmem:[%s19777_s1 + $0x220] sm:$0xff]  ;;  %v10314_v45 = vld [vmem:[%s19779_s3 + $0x10] sm:$0xff] }
 0x6a3   :  { %v9908_v50 = vsel %vm3046_vm2, %v9892_v62, %v9907_v46  ;;  %v9993_v29 = vcombine.low %v9985_v19, %v9986_v40  ;;  %v9904_v41 = vrot.slane %v19529_v33, %v21722_v21  ;;  %v10086_v43 = vrot.slane %v9306_v38, %v21599_v35  ;;  %v56_v62 = vld [vmem:[%s19777_s1 + $0x228] sm:$0xff] }
 0x6a4   :  { %11647 = vmatmul.mubr.msk.f32.vlgmr.msra.gmra.mrb[76].mxu0 %vm9200_vm10, %v9500_v51  ;;  %v9909_v49 = vsel %vm3048_vm13, %v9896_v4, %v9908_v50  ;;  %v10090_v37 = vrot.slane %v9308_v27, %v21599_v35  ;;  %v9988_v25 = vsel %vm22247_vm14, 0.0, %v9340_v58  ;;  %v9342_v9 = vcombine.high %v9340_v58, %v9340_v58  ;;  %v57_v4 = vld [vmem:[%s19777_s1 + $0x230] sm:$0xff] }
 0x6a5   :  { %11740 = vmatpush3.bf16.msra.mxu0 %v11739_v3  ;;  %11653 = vmatprep.mubr.msk.f32.mxu0 %vm11994_vm6, %v22236_v24  ;;  %v9910_v39 = vsel %vm3050_vm15, %v9900_v7, %v9909_v49  ;;  %v10181_v33 = vrot.slane %v9306_v38, %v21722_v21  ;;  %v9994_v3 = vcombine.low %v9987_v16, %v9988_v25  ;;  %v10315_v7 = vld [vmem:[%s19779_s3 + $0x18] sm:$0xff] }
 0x6a6   :  { %11741 = vmatprep.subr.bf16.mxu0 %v11993_v11  ;;  %v9911_v14 = vsel %vm3052_vm3, %v9904_v41, %v9910_v39  ;;  %v10001_v12 = vrot.slane %v9993_v29, %v22197_v53  ;;  %v10099_v26 = vsel %vm3042_vm8, %v10086_v43, %v19507_v23  ;;  %v10185_v57 = vrot.slane %v9308_v27, %v21722_v21 }
 0x6a7   :  { %v10100_v61 = vsel %vm3044_vm9, %v10090_v37, %v10099_v26  ;;  %v10008_v42 = vrot.slane %v9994_v3, %v22197_v53  ;;  %v10094_v44 = vrot.slane %v9340_v58, %v21599_v35  ;;  %v10194_v0 = vsel %vm3042_vm8, %v10181_v33, %v19513_v55 }
 0x6a8   :  { %v10101_v32 = vsel %vm3046_vm2, %v19480_v18, %v10100_v61  ;;  %v11742_v34 = vpack.c.bf16 %v48_v13, %v47_v54  ;;  %v10098_v47 = vrot.slane %v9342_v9, %v21599_v35  ;;  %v10195_v51 = vsel %vm3044_vm9, %v10185_v57, %v10194_v0  ;;  %v62_v61 = vld [vmem:[%s19778_s2 + $0x6] sm:$0x3] }
 0x6a9   :  { %v10102_v23 = vsel %vm3048_vm13, %v19489_v15, %v10101_v32  ;;  %v10009_v2 = vcombine.low %v10001_v12, %v10008_v42  ;;  %v10189_v53 = vrot.slane %v9340_v58, %v21722_v21  ;;  %v10196_v1 = vsel %vm3046_vm2, %v19476_v52, %v10195_v51  ;;  %v49_v52 = vld [vmem:[%s19777_s1 + $0x1f0] sm:$0xff] }
 0x6aa   :  { %v10103_v17 = vsel %vm3050_vm15, %v10094_v44, %v10102_v23  ;;  %v10193_v55 = vrot.slane %v9342_v9, %v21722_v21  ;;  %v10197_v59 = vsel %vm3048_vm13, %v19494_v63, %v10196_v1  ;;  %v50_v63 = vld [vmem:[%s19777_s1 + $0x1f8] sm:$0xff]  ;;  %v11754_v30 = vpack.c.bf16 %v56_v62, %v55_v48 }
 0x6ab   :  { %v10104_v18 = vsel %vm3052_vm3, %v10098_v47, %v10103_v17  ;;  %v10198_v15 = vsel %vm3050_vm15, %v10189_v53, %v10197_v59  ;;  %v11745_v19 = vpack.c.bf16 %v50_v63, %v49_v52  ;;  %v11757_v38 = vpack.c.bf16 %v58_v5, %v57_v4  ;;  %v10313_v17 = vld [vmem:[%s19779_s3 + $0x8] sm:$0xff]  ;;  %v10316_v59 = vld [vmem:[%s19779_s3 + $0x20] sm:$0xff] }
 0x6ac   :  { %11654 = vmatmul.mubr.msk.f32.vlgmr.msra.gmra.mrb[76].mxu0 %vm9200_vm10, %v19546_v10  ;;  %v10199_v60 = vsel %vm3052_vm3, %v10193_v55, %v10198_v15  ;;  %v51_v10 = vld [vmem:[%s19777_s1 + $0x200] sm:$0xff]  ;;  %v11760_v31 = vpack.c.bf16 %v10315_v7, %v10314_v45  ;;  %v10305_v0 = vrot.slane %v62_v61, %v21722_v21  ;;  %v10317_v15 = vld [vmem:[%s19779_s3 + $0x28] sm:$0xff] }
 0x6ad   :  { %11743 = vmatpush3.bf16.msra.mxu0 %v11742_v34  ;;  %11660 = vmatprep.mubr.msk.f32.mxu0 %vm11994_vm6, %v22236_v24  ;;  %v11748_v6 = vpack.c.bf16 %v52_v36, %v51_v10  ;;  %v11766_v63 = vpack.c.bf16 %v10317_v15, %v10316_v59  ;;  %v10318_v36 = vld [vmem:[%s19779_s3 + $0x30] sm:$0xff] }
 0x6ae   :  { %11744 = vmatprep.subr.bf16.mxu0 %v11993_v11 }
 0x6b4   :  { %11661 = vmatmul.mubr.msk.f32.vlgmr.msra.gmra.mrb[76].mxu0 %vm9200_vm10, %v9687_v22  ;;  %v11751_v22 = vpack.c.bf16 %v54_v8, %v53_v56 }
 0x6b5   :  { %11746 = vmatpush3.bf16.msra.mxu0 %v11745_v19  ;;  %11667 = vmatprep.mubr.msk.f32.mxu0 %vm11994_vm6, %v22236_v24  ;;  %v22248_v19 = vld [vmem:[#allocation29_spill] sm:$0xff] }
 0x6b6   :  { %11747 = vmatprep.subr.bf16.mxu0 %v11993_v11  ;;  %v10484_v10 = vsub.s32 2, %v22248_v19  ;;  %v10566_v48 = vsub.s32 3, %v22248_v19 }
 0x6bc   :  { %11668 = vmatmul.mubr.msk.f32.vlgmr.msra.gmra.mrb[76].mxu0 %vm9200_vm10, %v9799_v28 }
 0x6bd   :  { %11749 = vmatpush3.bf16.msra.mxu0 %v11748_v6  ;;  %11674 = vmatprep.mubr.msk.f32.mxu0 %vm11994_vm6, %v22236_v24  ;;  %v10319_v6 = vld [vmem:[%s19779_s3 + $0x38] sm:$0xff] }
 0x6be   :  { %11750 = vmatprep.subr.bf16.mxu0 %v11993_v11 }
 0x6c4   :  { %11675 = vmatmul.mubr.msk.f32.vlgmr.msra.gmra.mrb[76].mxu0 %vm9200_vm10, %v9911_v14 }
 0x6c5   :  { %11752 = vmatpush3.bf16.msra.mxu0 %v11751_v22  ;;  %11681 = vmatprep.mubr.msk.f32.mxu0 %vm11994_vm6, %v22236_v24  ;;  %v11769_v22 = vpack.c.bf16 %v10319_v6, %v10318_v36 }
 0x6c6   :  { %11753 = vmatprep.subr.bf16.mxu0 %v11993_v11 }
 0x6cc   :  { %11682 = vmatmul.mubr.msk.f32.vlgmr.msra.gmra.mrb[76].mxu0 %vm9200_vm10, %v10009_v2  ;;  %v10312_v2 = vld [vmem:[%s19779_s3] sm:$0xff] }
 0x6cd   :  { %11755 = vmatpush3.bf16.msra.mxu0 %v11754_v30  ;;  %11688 = vmatprep.mubr.msk.f32.mxu0 %vm11994_vm6, %v22236_v24  ;;  %v11763_v55 = vpack.c.bf16 %v10313_v17, %v10312_v2 }
 0x6ce   :  { %11756 = vmatprep.subr.bf16.mxu0 %v11993_v11 }
 0x6d4   :  { %11689 = vmatmul.mubr.msk.f32.vlgmr.msra.gmra.mrb[76].mxu0 %vm9200_vm10, %v10104_v18 }
 0x6d5   :  { %11758 = vmatpush3.bf16.msra.mxu0 %v11757_v38  ;;  %11695 = vmatprep.mubr.msk.f32.mxu0 %vm11994_vm6, %v22236_v24 }
 0x6d6   :  { %11759 = vmatprep.subr.bf16.mxu0 %v11993_v11 }
 0x6dc   :  { %11696 = vmatmul.mubr.msk.f32.vlgmr.msra.gmra.mrb[76].mxu0 %vm9200_vm10, %v10199_v60 }
 0x6dd   :  { %11702 = vmatprep.mubr.msk.f32.mxu0 %vm11994_vm6, %v22236_v24  ;;  %11761 = vmatpush3.bf16.msra.mxu0 %v11760_v31 }
 0x6de   :  { %11762 = vmatprep.subr.bf16.mxu0 %v11993_v11 }
 0x7af   :  { %v10268_v20 = vpop.f32.mrb[76].mxu0 }
 0x7b0   :  { %v10273_v28 = vsel %vm9200_vm10, %v10268_v20, 0.0  ;;  %v10280_v46 = vmul.f32 %v10268_v20, %v10268_v20  ;;  %v11697_v40 = vpop.f32.mrb[77].mxu0 }
 0x7b1   :  { %v10274_v27 = vrot.slane %v10273_v28, 4 }
 0x7b2   :  { %v10281_v50 = vsel %vm9200_vm10, %v10280_v46, 0.0 }
 0x7b3   :  { %v10275_v58 = vadd.f32 %v10274_v27, %v10273_v28  ;;  %v10282_v16 = vrot.slane %v10281_v50, 4  ;;  %v10925_v27 = vld [vmem:[%s19780_s4] ss:$0 sm:$0xff] }
 0x7b5   :  { %v10276_v29 = vrot.slane %v10275_v58, 2  ;;  %v10283_v41 = vadd.f32 %v10282_v16, %v10281_v50 }
 0x7b7   :  { %v10277_v49 = vadd.f32 %v10276_v29, %v10275_v58  ;;  %v10284_v43 = vrot.slane %v10283_v41, 2 }
 0x7b9   :  { %v10278_v37 = vrot.slane %v10277_v49, 1  ;;  %v10285_v39 = vadd.f32 %v10284_v43, %v10283_v41 }
 0x7bb   :  { %v10279_v25 = vadd.f32 %v10278_v37, %v10277_v49  ;;  %v10286_v9 = vrot.slane %v10285_v39, 1 }
 0x7bd   :  { %v10287_v33 = vadd.f32 %v10286_v9, %v10285_v39  ;;  %v10288_v54 = vmul.f32 0.125, %v10279_v25 }
 0x7bf   :  { %v10289_v13 = vmul.f32 0.125, %v10287_v33  ;;  %v10290_v14 = vmul.f32 %v10288_v54, %v10288_v54  ;;  %v10293_v44 = vsub.f32 %v10268_v20, %v10288_v54 }
 0x7c1   :  { %v10291_v3 = vsub.f32 %v10289_v13, %v10290_v14 }
 0x7c3   :  { %v10292_v12 = vmax.f32 %v10291_v3, 0.0 }
 0x7c5   :  { %v10294_v26 = vadd.f32 1e-05, %v10292_v12 }
 0x7c7   :  { %11961 = vrsqrt.f32 %v10294_v26 }
 0x7d1   :  { %v11962_v57 = vpop.eup %11961 }
 0x7d2   :  { %v10296_v42 = vmul.f32 %v11962_v57, %v62_v61 }
 0x7d4   :  { %v10300_v32 = vrot.slane %v10296_v42, %v21599_v35 }
 0x7d6   :  { %v10301_v34 = vmul.f32 %v10300_v32, %v10293_v44 }
 0x7d8   :  { %v10306_v47 = vadd.f32 %v10305_v0, %v10301_v34 }
 0x7da   :  { %vm10307_vm8 = vcmp.gt.f32.partialorder %v10306_v47, 0.0  ;;  %v10308_v23 = vmul.f32 0.01, %v10306_v47 }
 0x7dc   :  { %v10309_v51 = vsel %vm10307_vm8, %v10306_v47, %v10308_v23 }
 0x7dd   :  { %v10311_v53 = vcombine.high %v10309_v51, %v10309_v51  ;;  %v10323_v1 = vrot.slane %v10309_v51, %v21722_v21  ;;  %v10567_v4 = vrot.slane %v10309_v51, %v10566_v48 }
 0x7df   :  { %v10327_v18 = vrot.slane %v10311_v53, %v21722_v21  ;;  %v10408_v52 = vrot.slane %v10311_v53, %v21599_v35  ;;  %v10404_v21 = vrot.slane %v10309_v51, %v21599_v35  ;;  %v10489_v8 = vrot.slane %v10311_v53, %v10484_v10 }
 0x7e0   :  { %v10485_v35 = vrot.slane %v10309_v51, %v10484_v10  ;;  %v10571_v30 = vrot.slane %v10311_v53, %v10566_v48 }
 0x7e1   :  { %v10328_v60 = vsel %vm3040_vm4, %v10327_v18, %v10323_v1  ;;  %v10409_v56 = vsel %vm3040_vm4, %v10408_v52, %v10404_v21 }
 0x7e2   :  { %11703 = vmatmul.mubr.msk.f32.vlgmr.msra.gmra.mrb[78].mxu0 %vm9200_vm10, %v10328_v60  ;;  %v10490_v62 = vsel %vm3040_vm4, %v10489_v8, %v10485_v35  ;;  %v10572_v5 = vsel %vm3040_vm4, %v10571_v30, %v10567_v4  ;;  %vm10655_vm4 = vcmask 517120  }
 0x7e3   :  { %11764 = vmatpush3.bf16.msra.mxu0 %v11763_v55  ;;  %11709 = vmatprep.mubr.msk.f32.mxu0 %vm11994_vm6, %v22236_v24 }
 0x7e4   :  { %11765 = vmatprep.subr.bf16.mxu0 %v11993_v11 }
 0x7e6   :  { %11710 = vmatmul.mubr.msk.f32.vlgmr.msra.gmra.mrb[80].mxu0 %vm9200_vm10, %v10409_v56 }
 0x7e7   :  { %11767 = vmatpush3.bf16.msra.mxu0 %v11766_v63  ;;  %11716 = vmatprep.mubr.msk.f32.mxu0 %vm11994_vm6, %v22236_v24 }
 0x7e8   :  { %11768 = vmatprep.subr.bf16.mxu0 %v11993_v11 }
 0x7ea   :  { %11717 = vmatmul.mubr.msk.f32.vlgmr.msra.gmra.mrb[82].mxu0 %vm9200_vm10, %v10490_v62 }
 0x7eb   :  { %11770 = vmatpush3.bf16.msra.mxu0 %v11769_v22  ;;  %11723 = vmatprep.mubr.msk.f32.mxu0 %vm11994_vm6, %v22236_v24 }
 0x7ee   :  { %11724 = vmatmul.mubr.msk.f32.vlgmr.msra.gmra.mrb[84].mxu0 %vm9200_vm10, %v10572_v5 }
 0x8b5   :  { %v10397_v38 = vpop.f32.mrb[78].mxu0 }
 0x8b6   :  { %v11704_v45 = vpop.f32.mrb[79].mxu0 }
 0x8b9   :  { %v10478_v7 = vpop.f32.mrb[80].mxu0 }
 0x8ba   :  { %v10479_v31 = vadd.f32 %v10478_v7, %v10397_v38  ;;  %v11711_v20 = vpop.f32.mrb[81].mxu0 }
 0x8bd   :  { %v10559_v11 = vpop.f32.mrb[82].mxu0 }
 0x8be   :  { %v10563_v28 = vadd.f32 %v10559_v11, %v10479_v31  ;;  %v11718_v46 = vpop.f32.mrb[83].mxu0 }
 0x8c1   :  { %v10641_v40 = vpop.f32.mrb[84].mxu0 }
 0x8c2   :  { %v10645_v50 = vadd.f32 %v10641_v40, %v10563_v28  ;;  %v11725_v24 = vpop.f32.mrb[85].mxu0 }
 0x8c4   :  { %v10653_v58 = vadd.f32 %v10925_v27, %v10645_v50 }
 0x8c6   :  { %11963 = vtanh.f32 %v10653_v58 }
 0x8d0   :  { %v11964_v16 = vpop.eup %11963 }
 0x8d1   :  { %10656 = vst.msk [vmem:[#allocation2] sm:$0x3] %vm10655_vm4, %v11964_v16 }
 0x8d2   :  { %11977 = shalt.err (!%p11974_p4)
}
 0x8d3   :  { %s11978_s4 = scalar_lea.hbm %s19781_s5, 32 }
 0x8d4   :  { %p11979_p5 = scmp.ne.s32.totalorder %s19781_s5, %s11978_s4  ;;  %p11982_p6 = scmp.lt.u32.totalorder %s11978_s4, %s19781_s5 }
 0x8d6   :  { %p11984_p7 = pnand %p11982_p6, %p11979_p5 }
 0x8d8   :  { %11987 = shalt.err (!%p11984_p7)
}
 0x8d9   :  { %10666 = dma.vmem_to_hbm [thread:$0]  %s10664_s19, 32, %s19781_s5, [#allocation3]  }
 0x8da   :  { %11988 = dma.done.wait [#allocation3], 32  }
 0x8db   :  { %11989 = vsyncadd [#allocation3], 4294967264 }
 0x8dc   :  { %10670 = vsyncpa [#allocation3], 1 }

</bundles_post_ra>
